<compile_context>
chip_gen: v7x
topology: tpu7x:2x2x1
jax: 0.10.0
libtpu: 0.0.40
codegen_flags: <defaults>
</compile_context>

<pallas_src>
import functools

import jax
import jax.numpy as jnp
import numpy as np
from jax.experimental import pallas as pl
from jax.experimental.pallas import tpu as pltpu

EPS = 1e-5

TM_MAX = 512     # rows of the im2col matrix per tile
TK_MAX = 2048    # contraction tile (every K in this model fits in one block)
TR_MAX = 1024    # row tile for the elementwise BN/activation kernel

_MM_PARAMS = pltpu.CompilerParams(
    dimension_semantics=("parallel", "parallel", "arbitrary"),
    vmem_limit_bytes=32 * 1024 * 1024)
_EW_PARAMS = pltpu.CompilerParams(
    dimension_semantics=("parallel",),
    vmem_limit_bytes=32 * 1024 * 1024)


def _round_up(x, m):
    return ((x + m - 1) // m) * m


def _apply_act(y, act):
    if act == "relu":
        return jnp.maximum(y, 0.0)
    if act == "leaky":
        return jnp.where(y >= 0.0, y, 0.2 * y)
    if act == "tanh":
        return jnp.tanh(y)
    return y


# ----------------------------- Pallas kernels ------------------------------ #

def _make_matmul_kernel(act, with_stats, m_valid, tm, single_k):
    """C[i,j] = act(sum_k A[i,k] @ B[k,j] + bias[j]); optional per-channel
    partial sum / sum-of-squares outputs (for fused BatchNorm statistics)."""
    needs_row_mask = (m_valid % tm) != 0

    def finalize(y, o_ref, sum_ref, sq_ref):
        o_ref[...] = _apply_act(y, act).astype(o_ref.dtype)
        if with_stats:
            if needs_row_mask:
                rows = (jax.lax.broadcasted_iota(jnp.int32, y.shape, 0)
                        + pl.program_id(0) * tm)
                ym = jnp.where(rows < m_valid, y, 0.0)
            else:
                ym = y
            psum = jnp.sum(ym, axis=0, keepdims=True)          # (1, tn)
            psq = jnp.sum(ym * ym, axis=0, keepdims=True)      # (1, tn)
            rid = jax.lax.broadcasted_iota(jnp.int32, (8, y.shape[1]), 0)
            sum_ref[...] = jnp.where(rid == 0, psum, 0.0)[None]
            sq_ref[...] = jnp.where(rid == 0, psq, 0.0)[None]

    if single_k:
        if with_stats:
            def kernel(a_ref, b_ref, c_ref, o_ref, sum_ref, sq_ref):
                y = jnp.dot(a_ref[...], b_ref[...],
                            preferred_element_type=jnp.float32) + c_ref[...]
                finalize(y, o_ref, sum_ref, sq_ref)
        else:
            def kernel(a_ref, b_ref, c_ref, o_ref):
                y = jnp.dot(a_ref[...], b_ref[...],
                            preferred_element_type=jnp.float32) + c_ref[...]
                finalize(y, o_ref, None, None)
        return kernel

    if with_stats:
        def kernel(a_ref, b_ref, c_ref, o_ref, sum_ref, sq_ref, acc_ref):
            k = pl.program_id(2)

            @pl.when(k == 0)
            def _():
                acc_ref[...] = jnp.zeros_like(acc_ref)

            acc_ref[...] += jnp.dot(a_ref[...], b_ref[...],
                                    preferred_element_type=jnp.float32)

            @pl.when(k == pl.num_programs(2) - 1)
            def _():
                finalize(acc_ref[...] + c_ref[...], o_ref, sum_ref, sq_ref)
    else:
        def kernel(a_ref, b_ref, c_ref, o_ref, acc_ref):
            k = pl.program_id(2)

            @pl.when(k == 0)
            def _():
                acc_ref[...] = jnp.zeros_like(acc_ref)

            acc_ref[...] += jnp.dot(a_ref[...], b_ref[...],
                                    preferred_element_type=jnp.float32)

            @pl.when(k == pl.num_programs(2) - 1)
            def _():
                finalize(acc_ref[...] + c_ref[...], o_ref, None, None)
    return kernel


def _make_affine_kernel(act, has_residual):
    # y = act(x * scale + bias [+ residual]) with per-channel scale/bias (BN).
    if has_residual:
        def kernel(x_ref, r_ref, s_ref, c_ref, o_ref):
            y = x_ref[...].astype(jnp.float32) * s_ref[...] + c_ref[...]
            y = y + r_ref[...].astype(jnp.float32)
            o_ref[...] = _apply_act(y, act).astype(o_ref.dtype)
    else:
        def kernel(x_ref, s_ref, c_ref, o_ref):
            y = x_ref[...].astype(jnp.float32) * s_ref[...] + c_ref[...]
            o_ref[...] = _apply_act(y, act).astype(o_ref.dtype)
    return kernel


# ----------------------------- Pallas wrappers ------------------------------ #

def pallas_conv_matmul(a, b, bias, act, out_dtype, with_stats):
    """a: [M, K] bf16 (im2col), b: [K, N] bf16, bias: [N] f32.

    Returns (out [M, N], stats) where stats = (sum_per_channel, sumsq) or None.
    """
    M, K = a.shape
    _, N = b.shape

    # --- M tiling (pad only up to the row tile when needed) ---
    mp8 = _round_up(M, 8)
    tm = min(TM_MAX, mp8)
    Mp = _round_up(mp8, tm)
    if Mp != M:
        a = jnp.pad(a, ((0, Mp - M), (0, 0)))

    # --- K tiling (never padded for this model: K <= TK_MAX) ---
    if K <= TK_MAX:
        tk, Kp = K, K
    else:
        tk = 512
        Kp = _round_up(K, tk)
        a = jnp.pad(a, ((0, 0), (0, Kp - K)))
        b = jnp.pad(b, ((0, Kp - K), (0, 0)))

    # --- N tiling (true channel width; no lane padding / slicing) ---
    if N <= 128 or N % 128 == 0:
        tn = min(128, N)
        Np = N
    else:  # not hit in this model
        tn = 128
        Np = _round_up(N, tn)
        b = jnp.pad(b, ((0, 0), (0, Np - N)))
        bias = jnp.pad(bias, (0, Np - N))

    gm, gn, gk = Mp // tm, Np // tn, Kp // tk
    single_k = gk == 1
    bias2d = bias.reshape(1, Np).astype(jnp.float32)

    in_specs = [
        pl.BlockSpec((tm, tk), lambda i, j, k: (i, k)),
        pl.BlockSpec((tk, tn), lambda i, j, k: (k, j)),
        pl.BlockSpec((1, tn), lambda i, j, k: (0, j)),
    ]
    out_shape = [jax.ShapeDtypeStruct((Mp, Np), out_dtype)]
    out_specs = [pl.BlockSpec((tm, tn), lambda i, j, k: (i, j))]
    if with_stats:
        out_shape += [jax.ShapeDtypeStruct((gm, 8, Np), jnp.float32)] * 2
        out_specs += [pl.BlockSpec((1, 8, tn), lambda i, j, k: (i, 0, j))] * 2

    itemsize_out = np.dtype(out_dtype).itemsize
    cost = pl.CostEstimate(
        flops=2 * Mp * Kp * Np,
        transcendentals=Mp * Np if act == "tanh" else 0,
        bytes_accessed=int(Mp * Kp * 2 + Kp * Np * 2 + Mp * Np * itemsize_out),
    )

    res = pl.pallas_call(
        _make_matmul_kernel(act, with_stats, M, tm, single_k),
        grid=(gm, gn, gk),
        in_specs=in_specs,
        out_specs=tuple(out_specs) if with_stats else out_specs[0],
        out_shape=tuple(out_shape) if with_stats else out_shape[0],
        scratch_shapes=[] if single_k else [pltpu.VMEM((tm, tn), jnp.float32)],
        compiler_params=_MM_PARAMS,
        cost_estimate=cost,
    )(a, b, bias2d)

    if with_stats:
        out, psum, psq = res
        s = psum.reshape(-1, Np).sum(axis=0)[:N]
        sq = psq.reshape(-1, Np).sum(axis=0)[:N]
        stats = (s, sq)
    else:
        out = res
        stats = None

    if Mp != M:
        out = out[:M]
    if Np != N:
        out = out[:, :N]
    return out, stats


def pallas_affine(x, scale, bias, act="none", residual=None,
                  out_dtype=jnp.bfloat16):
    """Row-tiled elementwise kernel: act(x * scale + bias [+ residual])."""
    M, C = x.shape
    mp8 = _round_up(M, 8)
    tr = min(TR_MAX, mp8)
    Mp = _round_up(mp8, tr)
    if Mp != M:
        x = jnp.pad(x, ((0, Mp - M), (0, 0)))
        if residual is not None:
            residual = jnp.pad(residual, ((0, Mp - M), (0, 0)))

    s2d = scale.reshape(1, C).astype(jnp.float32)
    c2d = bias.reshape(1, C).astype(jnp.float32)

    args = [x]
    in_specs = [pl.BlockSpec((tr, C), lambda i: (i, 0))]
    if residual is not None:
        args.append(residual)
        in_specs.append(pl.BlockSpec((tr, C), lambda i: (i, 0)))
    args += [s2d, c2d]
    in_specs += [pl.BlockSpec((1, C), lambda i: (0, 0))] * 2

    out = pl.pallas_call(
        _make_affine_kernel(act, residual is not None),
        grid=(Mp // tr,),
        in_specs=in_specs,
        out_specs=pl.BlockSpec((tr, C), lambda i: (i, 0)),
        out_shape=jax.ShapeDtypeStruct((Mp, C), out_dtype),
        compiler_params=_EW_PARAMS,
    )(*args)

    if Mp != M:
        out = out[:M]
    return out


# ------------------------------ layer helpers ------------------------------- #

def _im2col(x, kh, kw, stride, pad4):
    # x: NHWC (bf16); pad4 = (top, bottom, left, right)
    # TODO(synk): fuse im2col into the matmul kernel (grid over output rows +
    # in-kernel gather) to remove the kh*kw x HBM expansion of activations.
    N, H, W, C = x.shape
    pt, pb, pleft, pright = pad4
    xp = jnp.pad(x, ((0, 0), (pt, pb), (pleft, pright), (0, 0)))
    OH = (H + pt + pb - kh) // stride + 1
    OW = (W + pleft + pright - kw) // stride + 1
    patches = [xp[:, i:i + stride * OH:stride, j:j + stride * OW:stride, :]
               for i in range(kh) for j in range(kw)]
    cols = jnp.stack(patches, axis=3).reshape(N * OH * OW, kh * kw * C)
    return cols, (N, OH, OW)


def conv2d(x, w, b=None, stride=1, pad=0, act="none",
           out_dtype=jnp.bfloat16, with_stats=False):
    # w: PyTorch layout [Cout, Cin, kh, kw];  x: NHWC
    cout, cin, kh, kw = w.shape
    if isinstance(pad, int):
        pad = (pad, pad, pad, pad)
    cols, (N, OH, OW) = _im2col(x.astype(jnp.bfloat16), kh, kw, stride, pad)
    wmat = jnp.transpose(w, (2, 3, 1, 0)).reshape(kh * kw * cin, cout)
    wmat = wmat.astype(jnp.bfloat16)
    bias = (b if b is not None else jnp.zeros((cout,), jnp.float32))
    out, stats = pallas_conv_matmul(cols, wmat, bias.astype(jnp.float32),
                                    act, out_dtype, with_stats)
    out = out.reshape(N, OH, OW, cout)
    return (out, stats) if with_stats else out


def _bn_coeffs(stats, count, gamma, beta):
    # Training-mode BatchNorm2d (batch statistics, biased variance, eps=1e-5).
    # TODO(synk): running-stat (eval mode) BatchNorm with momentum buffers is
    # not modeled; this matches PyTorch's training-mode forward.
    s, sq = stats
    mean = s / count
    var = jnp.maximum(sq / count - mean * mean, 0.0)
    inv = gamma / jnp.sqrt(var + EPS)
    return inv, beta - mean * inv


def conv_bn_act(x, w, b, gamma, beta, stride, pad, act, residual=None):
    y, stats = conv2d(x, w, b, stride=stride, pad=pad, act="none",
                      out_dtype=jnp.bfloat16, with_stats=True)
    N, OH, OW, C = y.shape
    scale, shift = _bn_coeffs(stats, N * OH * OW, gamma, beta)
    rf = residual.reshape(-1, C) if residual is not None else None
    out = pallas_affine(y.reshape(-1, C), scale, shift, act=act,
                        residual=rf, out_dtype=jnp.bfloat16)
    return out.reshape(N, OH, OW, C)


def conv_transpose_bn_relu(x, w, gamma, beta):
    # ConvTranspose2d(k=4, s=2, p=1, bias=False), decomposed by output parity
    # into four stride-1 2x2 convolutions (no zero-dilated input), followed by
    # BatchNorm (stats fused into the matmul epilogues) + ReLU.
    cin, cout, _, _ = w.shape
    N, H, W, _ = x.shape
    sums = jnp.zeros((cout,), jnp.float32)
    sqs = jnp.zeros((cout,), jnp.float32)
    phase = [[None, None], [None, None]]
    for rh in (0, 1):
        for rw in (0, 1):
            wk = w[:, :, [3 - rh, 1 - rh], :][:, :, :, [3 - rw, 1 - rw]]
            wk = jnp.transpose(wk, (1, 0, 2, 3))        # [Cout, Cin, 2, 2]
            pad = (((1, 0) if rh == 0 else (0, 1))
                   + ((1, 0) if rw == 0 else (0, 1)))   # (pt, pb, pl, pr)
            y, (s, sq) = conv2d(x, wk, None, stride=1, pad=pad, act="none",
                                out_dtype=jnp.bfloat16, with_stats=True)
            phase[rh][rw] = y
            sums = sums + s
            sqs = sqs + sq
    # Interleave: out[n, 2i+rh, 2j+rw, c] = phase[rh][rw][n, i, j, c]
    row0 = jnp.stack([phase[0][0], phase[0][1]], axis=3)   # (N,H,W,2,C)
    row1 = jnp.stack([phase[1][0], phase[1][1]], axis=3)
    y = jnp.stack([row0, row1], axis=2)                    # (N,H,2,W,2,C)
    y = y.reshape(N, 2 * H, 2 * W, cout)
    scale, shift = _bn_coeffs((sums, sqs), N * (2 * H) * (2 * W), gamma, beta)
    out = pallas_affine(y.reshape(-1, cout), scale, shift, act="relu",
                        out_dtype=jnp.bfloat16)
    return out.reshape(N, 2 * H, 2 * W, cout)


# --------------------------------- model ------------------------------------ #

def residual_block(x, p):
    h = conv_bn_act(x, p["w1"], p["b1"], p["bn1"]["gamma"], p["bn1"]["beta"],
                    stride=1, pad=1, act="relu")
    h = conv_bn_act(h, p["w2"], p["b2"], p["bn2"]["gamma"], p["bn2"]["beta"],
                    stride=1, pad=1, act="none", residual=x)
    return h


def unet_down(x, p, bn):
    if bn:
        h = conv_bn_act(x, p["w"], None, p["bn"]["gamma"], p["bn"]["beta"],
                        stride=2, pad=1, act="leaky")
    else:
        h = conv2d(x, p["w"], None, stride=2, pad=1, act="leaky",
                   out_dtype=jnp.bfloat16, with_stats=False)
    return residual_block(h, p["res"])


def unet_up(x, skip, p):
    h = conv_transpose_bn_relu(x, p["w"], p["bn"]["gamma"], p["bn"]["beta"])
    return jnp.concatenate([h, skip], axis=-1)   # torch.cat((x, skip), dim=1)


def final_block(x, p):
    # Upsample(x2, nearest) -> ZeroPad2d((1,0,1,0)) -> Conv2d(64, out, 4, pad=1)
    # -> Tanh.  The ZeroPad2d and the conv padding are folded into one
    # asymmetric im2col pad (top/left = 2, bottom/right = 1).
    # TODO(synk): fold the nearest-neighbour upsample into the im2col gather
    # instead of materializing the 2x map (largest tensor in the model).
    h = jnp.repeat(jnp.repeat(x, 2, axis=1), 2, axis=2)   # bf16 nearest upsample
    return conv2d(h, p["w"], p["b"], stride=1, pad=(2, 1, 2, 1), act="tanh",
                  out_dtype=jnp.float32, with_stats=False)


def mula_gan_generator(params, x_nchw):
    x = jnp.transpose(x_nchw, (0, 2, 3, 1)).astype(jnp.bfloat16)  # NCHW -> NHWC
    x1 = unet_down(x, params["down1"], bn=False)
    x2 = unet_down(x1, params["down2"], bn=True)
    x3 = unet_down(x2, params["down3"], bn=True)
    u1 = unet_up(x3, x2, params["up1"])
    u2 = unet_up(u1, x1, params["up2"])
    out = final_block(u2, params["final"])
    return jnp.transpose(out, (0, 3, 1, 2)).astype(jnp.float32)   # NHWC -> NCHW


# ------------------------------ parameters ---------------------------------- #

def init_params(key, in_channels=3, out_channels=3):
    ks = iter(jax.random.split(key, 64))

    def cw(cout, cin, k):
        return 0.05 * jax.random.normal(next(ks), (cout, cin, k, k), jnp.float32)

    def cb(c):
        return 0.05 * jax.random.normal(next(ks), (c,), jnp.float32)

    def bn(c):
        return {"gamma": jnp.ones((c,), jnp.float32),
                "beta": jnp.zeros((c,), jnp.float32)}

    def res(c):
        return {"w1": cw(c, c, 3), "b1": cb(c), "bn1": bn(c),
                "w2": cw(c, c, 3), "b2": cb(c), "bn2": bn(c)}

    return {
        "down1": {"w": cw(32, in_channels, 4), "res": res(32)},
        "down2": {"w": cw(64, 32, 4), "bn": bn(64), "res": res(64)},
        "down3": {"w": cw(128, 64, 4), "bn": bn(128), "res": res(128)},
        "up1": {"w": 0.05 * jax.random.normal(next(ks), (128, 64, 4, 4),
                                              jnp.float32), "bn": bn(64)},
        "up2": {"w": 0.05 * jax.random.normal(next(ks), (128, 32, 4, 4),
                                              jnp.float32), "bn": bn(32)},
        "final": {"w": cw(out_channels, 64, 4), "b": cb(out_channels)},
    }


if __name__ == "__main__":
    key = jax.random.PRNGKey(0)
    pkey, xkey = jax.random.split(key)
    params = init_params(pkey, in_channels=3, out_channels=3)
    x = jax.random.normal(xkey, (2, 3, 16, 16), jnp.float32)  # NCHW, like PyTorch

    fn = jax.jit(functools.partial(mula_gan_generator, params))
    out = fn(x)
    jax.block_until_ready(out)
    assert out.shape == (2, 3, 16, 16), out.shape
    assert bool(jnp.all(jnp.isfinite(out)))
    print("KERNEL_OK")
</pallas_src>

<mosaic_0001>
module attributes {stable_mosaic.version = 11 : i64} {
  func.func @kernel(%arg0: i32, %arg1: i32, %arg2: i32, %arg3: memref<128x48xbf16, #tpu.memory_space<vmem>>, %arg4: memref<48x32xbf16, #tpu.memory_space<vmem>>, %arg5: memref<1x32xf32, #tpu.memory_space<vmem>>, %arg6: memref<128x32xbf16, #tpu.memory_space<vmem>>) attributes {dimension_semantics = [#tpu.dimension_semantics<parallel>, #tpu.dimension_semantics<parallel>, #tpu.dimension_semantics<arbitrary>], iteration_bounds = array<i64: 1, 1, 1>, scalar_prefetch = 0 : i64, scratch_operands = 0 : i64, tpu.core_type = #tpu.core_type<tc>, window_params = [{transform_indices = @transform_0, window_bounds = array<i64: 128, 48>}, {transform_indices = @transform_1, window_bounds = array<i64: 48, 32>}, {transform_indices = @transform_2, window_bounds = array<i64: 1, 32>}, {transform_indices = @transform_3, window_bounds = array<i64: 128, 32>}]} {
    %c0 = arith.constant 0 : index
    %c0_0 = arith.constant 0 : index
    %0 = vector.load %arg3[%c0, %c0_0] : memref<128x48xbf16, #tpu.memory_space<vmem>>, vector<128x48xbf16>
    %c0_1 = arith.constant 0 : index
    %c0_2 = arith.constant 0 : index
    %1 = vector.load %arg4[%c0_1, %c0_2] : memref<48x32xbf16, #tpu.memory_space<vmem>>, vector<48x32xbf16>
    %cst = arith.constant dense<0.000000e+00> : vector<128x32xf32>
    %2 = tpu.matmul %0, %1, %cst {dimension_numbers = #tpu.dot_dimension_numbers<[1], [0], [0], [1], [0, 0, 1, 1], [], []>} : vector<128x48xbf16>, vector<48x32xbf16>, vector<128x32xf32> -> vector<128x32xf32>
    %c0_3 = arith.constant 0 : index
    %c0_4 = arith.constant 0 : index
    %3 = vector.load %arg5[%c0_3, %c0_4] : memref<1x32xf32, #tpu.memory_space<vmem>>, vector<1x32xf32>
    %4 = vector.broadcast %3 : vector<1x32xf32> to vector<128x32xf32>
    %5 = arith.addf %2, %4 : vector<128x32xf32>
    %cst_5 = arith.constant 0.000000e+00 : f32
    %6 = vector.broadcast %cst_5 : f32 to vector<128x32xf32>
    %7 = arith.cmpf oge, %5, %6 : vector<128x32xf32>
    %cst_6 = arith.constant 2.000000e-01 : f32
    %8 = vector.broadcast %cst_6 : f32 to vector<128x32xf32>
    %9 = arith.mulf %8, %5 : vector<128x32xf32>
    %10 = arith.select %7, %5, %9 : vector<128x32xi1>, vector<128x32xf32>
    %11 = arith.truncf %10 : vector<128x32xf32> to vector<128x32xbf16>
    %c0_7 = arith.constant 0 : index
    %c0_8 = arith.constant 0 : index
    %12 = vector.load %arg6[%c0_7, %c0_8] : memref<128x32xbf16, #tpu.memory_space<vmem>>, vector<128x32xbf16>
    tpu.vector_store %arg6[%c0_7, %c0_8], %11 {strides = array<i32>} : memref<128x32xbf16, #tpu.memory_space<vmem>>, vector<128x32xbf16>,
    return
  }
  func.func @transform_0(%arg0: i32, %arg1: i32, %arg2: i32) -> (i32, i32) {
    %c0_i32 = arith.constant 0 : i32
    return %arg0, %arg2 : i32, i32
  }
  func.func @transform_1(%arg0: i32, %arg1: i32, %arg2: i32) -> (i32, i32) {
    %c0_i32 = arith.constant 0 : i32
    return %arg2, %arg1 : i32, i32
  }
  func.func @transform_2(%arg0: i32, %arg1: i32, %arg2: i32) -> (i32, i32) {
    %c0_i32 = arith.constant 0 : i32
    %c0_i32_0 = arith.constant 0 : i32
    return %c0_i32, %arg1 : i32, i32
  }
  func.func @transform_3(%arg0: i32, %arg1: i32, %arg2: i32) -> (i32, i32) {
    %c0_i32 = arith.constant 0 : i32
    return %arg0, %arg1 : i32, i32
  }
}

module attributes {stable_mosaic.version = 11 : i64} {
  func.func @kernel(%arg0: i32, %arg1: i32, %arg2: i32, %arg3: memref<128x288xbf16, #tpu.memory_space<vmem>>, %arg4: memref<288x32xbf16, #tpu.memory_space<vmem>>, %arg5: memref<1x32xf32, #tpu.memory_space<vmem>>, %arg6: memref<128x32xbf16, #tpu.memory_space<vmem>>, %arg7: memref<1x8x32xf32, #tpu.memory_space<vmem>>, %arg8: memref<1x8x32xf32, #tpu.memory_space<vmem>>) attributes {dimension_semantics = [#tpu.dimension_semantics<parallel>, #tpu.dimension_semantics<parallel>, #tpu.dimension_semantics<arbitrary>], iteration_bounds = array<i64: 1, 1, 1>, scalar_prefetch = 0 : i64, scratch_operands = 0 : i64, tpu.core_type = #tpu.core_type<tc>, window_params = [{transform_indices = @transform_0, window_bounds = array<i64: 128, 288>}, {transform_indices = @transform_1, window_bounds = array<i64: 288, 32>}, {transform_indices = @transform_2, window_bounds = array<i64: 1, 32>}, {transform_indices = @transform_3, window_bounds = array<i64: 128, 32>}, {transform_indices = @transform_4, window_bounds = array<i64: 1, 8, 32>}, {transform_indices = @transform_5, window_bounds = array<i64: 1, 8, 32>}]} {
    %c0 = arith.constant 0 : index
    %c0_0 = arith.constant 0 : index
    %0 = vector.load %arg3[%c0, %c0_0] : memref<128x288xbf16, #tpu.memory_space<vmem>>, vector<128x288xbf16>
    %c0_1 = arith.constant 0 : index
    %c0_2 = arith.constant 0 : index
    %1 = vector.load %arg4[%c0_1, %c0_2] : memref<288x32xbf16, #tpu.memory_space<vmem>>, vector<288x32xbf16>
    %cst = arith.constant dense<0.000000e+00> : vector<128x32xf32>
    %2 = tpu.matmul %0, %1, %cst {dimension_numbers = #tpu.dot_dimension_numbers<[1], [0], [0], [1], [0, 0, 1, 1], [], []>} : vector<128x288xbf16>, vector<288x32xbf16>, vector<128x32xf32> -> vector<128x32xf32>
    %c0_3 = arith.constant 0 : index
    %c0_4 = arith.constant 0 : index
    %3 = vector.load %arg5[%c0_3, %c0_4] : memref<1x32xf32, #tpu.memory_space<vmem>>, vector<1x32xf32>
    %4 = vector.broadcast %3 : vector<1x32xf32> to vector<128x32xf32>
    %5 = arith.addf %2, %4 : vector<128x32xf32>
    %6 = arith.truncf %5 : vector<128x32xf32> to vector<128x32xbf16>
    %c0_5 = arith.constant 0 : index
    %c0_6 = arith.constant 0 : index
    %7 = vector.load %arg6[%c0_5, %c0_6] : memref<128x32xbf16, #tpu.memory_space<vmem>>, vector<128x32xbf16>
    tpu.vector_store %arg6[%c0_5, %c0_6], %6 {strides = array<i32>} : memref<128x32xbf16, #tpu.memory_space<vmem>>, vector<128x32xbf16>,
    %cst_7 = arith.constant dense<0.000000e+00> : vector<32xf32>
    %8 = vector.multi_reduction <add>, %5, %cst_7 [0] : vector<128x32xf32> to vector<32xf32>
    %9 = vector.shape_cast %8 : vector<32xf32> to vector<1x32xf32>
    %10 = arith.mulf %5, %5 : vector<128x32xf32>
    %cst_8 = arith.constant dense<0.000000e+00> : vector<32xf32>
    %11 = vector.multi_reduction <add>, %10, %cst_8 [0] : vector<128x32xf32> to vector<32xf32>
    %12 = vector.shape_cast %11 : vector<32xf32> to vector<1x32xf32>
    %13 = tpu.iota {dimensions = array<i32: 0>} : vector<8x32xi32>
    %c0_i32 = arith.constant 0 : i32
    %14 = vector.broadcast %c0_i32 : i32 to vector<8x32xi32>
    %15 = arith.cmpi eq, %13, %14 : vector<8x32xi32>
    %cst_9 = arith.constant 0.000000e+00 : f32
    %16 = vector.shape_cast %9 : vector<1x32xf32> to vector<1x32xf32>
    %17 = vector.broadcast %16 : vector<1x32xf32> to vector<8x32xf32>
    %18 = vector.broadcast %cst_9 : f32 to vector<8x32xf32>
    %19 = arith.select %15, %17, %18 : vector<8x32xi1>, vector<8x32xf32>
    %20 = vector.shape_cast %19 : vector<8x32xf32> to vector<1x8x32xf32>
    %c0_10 = arith.constant 0 : index
    %c0_11 = arith.constant 0 : index
    %c0_12 = arith.constant 0 : index
    %21 = vector.load %arg7[%c0_10, %c0_11, %c0_12] : memref<1x8x32xf32, #tpu.memory_space<vmem>>, vector<1x8x32xf32>
    tpu.vector_store %arg7[%c0_10, %c0_11, %c0_12], %20 {strides = array<i32>} : memref<1x8x32xf32, #tpu.memory_space<vmem>>, vector<1x8x32xf32>,
    %c0_i32_13 = arith.constant 0 : i32
    %22 = vector.broadcast %c0_i32_13 : i32 to vector<8x32xi32>
    %23 = arith.cmpi eq, %13, %22 : vector<8x32xi32>
    %cst_14 = arith.constant 0.000000e+00 : f32
    %24 = vector.shape_cast %12 : vector<1x32xf32> to vector<1x32xf32>
    %25 = vector.broadcast %24 : vector<1x32xf32> to vector<8x32xf32>
    %26 = vector.broadcast %cst_14 : f32 to vector<8x32xf32>
    %27 = arith.select %23, %25, %26 : vector<8x32xi1>, vector<8x32xf32>
    %28 = vector.shape_cast %27 : vector<8x32xf32> to vector<1x8x32xf32>
    %c0_15 = arith.constant 0 : index
    %c0_16 = arith.constant 0 : index
    %c0_17 = arith.constant 0 : index
    %29 = vector.load %arg8[%c0_15, %c0_16, %c0_17] : memref<1x8x32xf32, #tpu.memory_space<vmem>>, vector<1x8x32xf32>
    tpu.vector_store %arg8[%c0_15, %c0_16, %c0_17], %28 {strides = array<i32>} : memref<1x8x32xf32, #tpu.memory_space<vmem>>, vector<1x8x32xf32>,
    return
  }
  func.func @transform_0(%arg0: i32, %arg1: i32, %arg2: i32) -> (i32, i32) {
    %c0_i32 = arith.constant 0 : i32
    return %arg0, %arg2 : i32, i32
  }
  func.func @transform_1(%arg0: i32, %arg1: i32, %arg2: i32) -> (i32, i32) {
    %c0_i32 = arith.constant 0 : i32
    return %arg2, %arg1 : i32, i32
  }
  func.func @transform_2(%arg0: i32, %arg1: i32, %arg2: i32) -> (i32, i32) {
    %c0_i32 = arith.constant 0 : i32
    %c0_i32_0 = arith.constant 0 : i32
    return %c0_i32, %arg1 : i32, i32
  }
  func.func @transform_3(%arg0: i32, %arg1: i32, %arg2: i32) -> (i32, i32) {
    %c0_i32 = arith.constant 0 : i32
    return %arg0, %arg1 : i32, i32
  }
  func.func @transform_4(%arg0: i32, %arg1: i32, %arg2: i32) -> (i32, i32, i32) {
    %c0_i32 = arith.constant 0 : i32
    %c0_i32_0 = arith.constant 0 : i32
    return %arg0, %c0_i32, %arg1 : i32, i32, i32
  }
  func.func @transform_5(%arg0: i32, %arg1: i32, %arg2: i32) -> (i32, i32, i32) {
    %c0_i32 = arith.constant 0 : i32
    %c0_i32_0 = arith.constant 0 : i32
    return %arg0, %c0_i32, %arg1 : i32, i32, i32
  }
}

module attributes {stable_mosaic.version = 11 : i64} {
  func.func @kernel(%arg0: i32, %arg1: memref<128x32xbf16, #tpu.memory_space<vmem>>, %arg2: memref<1x32xf32, #tpu.memory_space<vmem>>, %arg3: memref<1x32xf32, #tpu.memory_space<vmem>>, %arg4: memref<128x32xbf16, #tpu.memory_space<vmem>>) attributes {dimension_semantics = [#tpu.dimension_semantics<parallel>], iteration_bounds = array<i64: 1>, scalar_prefetch = 0 : i64, scratch_operands = 0 : i64, tpu.core_type = #tpu.core_type<tc>, window_params = [{transform_indices = @transform_0, window_bounds = array<i64: 128, 32>}, {pipeline_mode = #tpu.pipeline_mode<synchronous>, transform_indices = @transform_1, window_bounds = array<i64: 1, 32>}, {pipeline_mode = #tpu.pipeline_mode<synchronous>, transform_indices = @transform_2, window_bounds = array<i64: 1, 32>}, {transform_indices = @transform_3, window_bounds = array<i64: 128, 32>}]} {
    %c0 = arith.constant 0 : index
    %c0_0 = arith.constant 0 : index
    %0 = vector.load %arg1[%c0, %c0_0] : memref<128x32xbf16, #tpu.memory_space<vmem>>, vector<128x32xbf16>
    %1 = arith.extf %0 : vector<128x32xbf16> to vector<128x32xf32>
    %c0_1 = arith.constant 0 : index
    %c0_2 = arith.constant 0 : index
    %2 = vector.load %arg2[%c0_1, %c0_2] : memref<1x32xf32, #tpu.memory_space<vmem>>, vector<1x32xf32>
    %3 = vector.broadcast %2 : vector<1x32xf32> to vector<128x32xf32>
    %4 = arith.mulf %1, %3 : vector<128x32xf32>
    %c0_3 = arith.constant 0 : index
    %c0_4 = arith.constant 0 : index
    %5 = vector.load %arg3[%c0_3, %c0_4] : memref<1x32xf32, #tpu.memory_space<vmem>>, vector<1x32xf32>
    %6 = vector.broadcast %5 : vector<1x32xf32> to vector<128x32xf32>
    %7 = arith.addf %4, %6 : vector<128x32xf32>
    %cst = arith.constant 0.000000e+00 : f32
    %8 = vector.broadcast %cst : f32 to vector<128x32xf32>
    %9 = arith.maximumf %7, %8 : vector<128x32xf32>
    %10 = arith.truncf %9 : vector<128x32xf32> to vector<128x32xbf16>
    %c0_5 = arith.constant 0 : index
    %c0_6 = arith.constant 0 : index
    %11 = vector.load %arg4[%c0_5, %c0_6] : memref<128x32xbf16, #tpu.memory_space<vmem>>, vector<128x32xbf16>
    tpu.vector_store %arg4[%c0_5, %c0_6], %10 {strides = array<i32>} : memref<128x32xbf16, #tpu.memory_space<vmem>>, vector<128x32xbf16>,
    return
  }
  func.func @transform_0(%arg0: i32) -> (i32, i32) {
    %c0_i32 = arith.constant 0 : i32
    %c0_i32_0 = arith.constant 0 : i32
    return %arg0, %c0_i32 : i32, i32
  }
  func.func @transform_1(%arg0: i32) -> (i32, i32) {
    %c0_i32 = arith.constant 0 : i32
    %c0_i32_0 = arith.constant 0 : i32
    %c0_i32_1 = arith.constant 0 : i32
    return %c0_i32, %c0_i32_0 : i32, i32
  }
  func.func @transform_2(%arg0: i32) -> (i32, i32) {
    %c0_i32 = arith.constant 0 : i32
    %c0_i32_0 = arith.constant 0 : i32
    %c0_i32_1 = arith.constant 0 : i32
    return %c0_i32, %c0_i32_0 : i32, i32
  }
  func.func @transform_3(%arg0: i32) -> (i32, i32) {
    %c0_i32 = arith.constant 0 : i32
    %c0_i32_0 = arith.constant 0 : i32
    return %arg0, %c0_i32 : i32, i32
  }
}

module attributes {stable_mosaic.version = 11 : i64} {
  func.func @kernel(%arg0: i32, %arg1: memref<128x32xbf16, #tpu.memory_space<vmem>>, %arg2: memref<128x32xbf16, #tpu.memory_space<vmem>>, %arg3: memref<1x32xf32, #tpu.memory_space<vmem>>, %arg4: memref<1x32xf32, #tpu.memory_space<vmem>>, %arg5: memref<128x32xbf16, #tpu.memory_space<vmem>>) attributes {dimension_semantics = [#tpu.dimension_semantics<parallel>], iteration_bounds = array<i64: 1>, scalar_prefetch = 0 : i64, scratch_operands = 0 : i64, tpu.core_type = #tpu.core_type<tc>, window_params = [{transform_indices = @transform_0, window_bounds = array<i64: 128, 32>}, {transform_indices = @transform_1, window_bounds = array<i64: 128, 32>}, {pipeline_mode = #tpu.pipeline_mode<synchronous>, transform_indices = @transform_2, window_bounds = array<i64: 1, 32>}, {pipeline_mode = #tpu.pipeline_mode<synchronous>, transform_indices = @transform_3, window_bounds = array<i64: 1, 32>}, {transform_indices = @transform_4, window_bounds = array<i64: 128, 32>}]} {
    %c0 = arith.constant 0 : index
    %c0_0 = arith.constant 0 : index
    %0 = vector.load %arg1[%c0, %c0_0] : memref<128x32xbf16, #tpu.memory_space<vmem>>, vector<128x32xbf16>
    %1 = arith.extf %0 : vector<128x32xbf16> to vector<128x32xf32>
    %c0_1 = arith.constant 0 : index
    %c0_2 = arith.constant 0 : index
    %2 = vector.load %arg3[%c0_1, %c0_2] : memref<1x32xf32, #tpu.memory_space<vmem>>, vector<1x32xf32>
    %3 = vector.broadcast %2 : vector<1x32xf32> to vector<128x32xf32>
    %4 = arith.mulf %1, %3 : vector<128x32xf32>
    %c0_3 = arith.constant 0 : index
    %c0_4 = arith.constant 0 : index
    %5 = vector.load %arg4[%c0_3, %c0_4] : memref<1x32xf32, #tpu.memory_space<vmem>>, vector<1x32xf32>
    %6 = vector.broadcast %5 : vector<1x32xf32> to vector<128x32xf32>
    %7 = arith.addf %4, %6 : vector<128x32xf32>
    %c0_5 = arith.constant 0 : index
    %c0_6 = arith.constant 0 : index
    %8 = vector.load %arg2[%c0_5, %c0_6] : memref<128x32xbf16, #tpu.memory_space<vmem>>, vector<128x32xbf16>
    %9 = arith.extf %8 : vector<128x32xbf16> to vector<128x32xf32>
    %10 = arith.addf %7, %9 : vector<128x32xf32>
    %11 = arith.truncf %10 : vector<128x32xf32> to vector<128x32xbf16>
    %c0_7 = arith.constant 0 : index
    %c0_8 = arith.constant 0 : index
    %12 = vector.load %arg5[%c0_7, %c0_8] : memref<128x32xbf16, #tpu.memory_space<vmem>>, vector<128x32xbf16>
    tpu.vector_store %arg5[%c0_7, %c0_8], %11 {strides = array<i32>} : memref<128x32xbf16, #tpu.memory_space<vmem>>, vector<128x32xbf16>,
    return
  }
  func.func @transform_0(%arg0: i32) -> (i32, i32) {
    %c0_i32 = arith.constant 0 : i32
    %c0_i32_0 = arith.constant 0 : i32
    return %arg0, %c0_i32 : i32, i32
  }
  func.func @transform_1(%arg0: i32) -> (i32, i32) {
    %c0_i32 = arith.constant 0 : i32
    %c0_i32_0 = arith.constant 0 : i32
    return %arg0, %c0_i32 : i32, i32
  }
  func.func @transform_2(%arg0: i32) -> (i32, i32) {
    %c0_i32 = arith.constant 0 : i32
    %c0_i32_0 = arith.constant 0 : i32
    %c0_i32_1 = arith.constant 0 : i32
    return %c0_i32, %c0_i32_0 : i32, i32
  }
  func.func @transform_3(%arg0: i32) -> (i32, i32) {
    %c0_i32 = arith.constant 0 : i32
    %c0_i32_0 = arith.constant 0 : i32
    %c0_i32_1 = arith.constant 0 : i32
    return %c0_i32, %c0_i32_0 : i32, i32
  }
  func.func @transform_4(%arg0: i32) -> (i32, i32) {
    %c0_i32 = arith.constant 0 : i32
    %c0_i32_0 = arith.constant 0 : i32
    return %arg0, %c0_i32 : i32, i32
  }
}

module attributes {stable_mosaic.version = 11 : i64} {
  func.func @kernel(%arg0: i32, %arg1: memref<32x64xbf16, #tpu.memory_space<vmem>>, %arg2: memref<1x64xf32, #tpu.memory_space<vmem>>, %arg3: memref<1x64xf32, #tpu.memory_space<vmem>>, %arg4: memref<32x64xbf16, #tpu.memory_space<vmem>>) attributes {dimension_semantics = [#tpu.dimension_semantics<parallel>], iteration_bounds = array<i64: 1>, scalar_prefetch = 0 : i64, scratch_operands = 0 : i64, tpu.core_type = #tpu.core_type<tc>, window_params = [{transform_indices = @transform_0, window_bounds = array<i64: 32, 64>}, {pipeline_mode = #tpu.pipeline_mode<synchronous>, transform_indices = @transform_1, window_bounds = array<i64: 1, 64>}, {pipeline_mode = #tpu.pipeline_mode<synchronous>, transform_indices = @transform_2, window_bounds = array<i64: 1, 64>}, {transform_indices = @transform_3, window_bounds = array<i64: 32, 64>}]} {
    %c0 = arith.constant 0 : index
    %c0_0 = arith.constant 0 : index
    %0 = vector.load %arg1[%c0, %c0_0] : memref<32x64xbf16, #tpu.memory_space<vmem>>, vector<32x64xbf16>
    %1 = arith.extf %0 : vector<32x64xbf16> to vector<32x64xf32>
    %c0_1 = arith.constant 0 : index
    %c0_2 = arith.constant 0 : index
    %2 = vector.load %arg2[%c0_1, %c0_2] : memref<1x64xf32, #tpu.memory_space<vmem>>, vector<1x64xf32>
    %3 = vector.broadcast %2 : vector<1x64xf32> to vector<32x64xf32>
    %4 = arith.mulf %1, %3 : vector<32x64xf32>
    %c0_3 = arith.constant 0 : index
    %c0_4 = arith.constant 0 : index
    %5 = vector.load %arg3[%c0_3, %c0_4] : memref<1x64xf32, #tpu.memory_space<vmem>>, vector<1x64xf32>
    %6 = vector.broadcast %5 : vector<1x64xf32> to vector<32x64xf32>
    %7 = arith.addf %4, %6 : vector<32x64xf32>
    %cst = arith.constant 0.000000e+00 : f32
    %8 = vector.broadcast %cst : f32 to vector<32x64xf32>
    %9 = arith.cmpf oge, %7, %8 : vector<32x64xf32>
    %cst_5 = arith.constant 2.000000e-01 : f32
    %10 = vector.broadcast %cst_5 : f32 to vector<32x64xf32>
    %11 = arith.mulf %10, %7 : vector<32x64xf32>
    %12 = arith.select %9, %7, %11 : vector<32x64xi1>, vector<32x64xf32>
    %13 = arith.truncf %12 : vector<32x64xf32> to vector<32x64xbf16>
    %c0_6 = arith.constant 0 : index
    %c0_7 = arith.constant 0 : index
    %14 = vector.load %arg4[%c0_6, %c0_7] : memref<32x64xbf16, #tpu.memory_space<vmem>>, vector<32x64xbf16>
    tpu.vector_store %arg4[%c0_6, %c0_7], %13 {strides = array<i32>} : memref<32x64xbf16, #tpu.memory_space<vmem>>, vector<32x64xbf16>,
    return
  }
  func.func @transform_0(%arg0: i32) -> (i32, i32) {
    %c0_i32 = arith.constant 0 : i32
    %c0_i32_0 = arith.constant 0 : i32
    return %arg0, %c0_i32 : i32, i32
  }
  func.func @transform_1(%arg0: i32) -> (i32, i32) {
    %c0_i32 = arith.constant 0 : i32
    %c0_i32_0 = arith.constant 0 : i32
    %c0_i32_1 = arith.constant 0 : i32
    return %c0_i32, %c0_i32_0 : i32, i32
  }
  func.func @transform_2(%arg0: i32) -> (i32, i32) {
    %c0_i32 = arith.constant 0 : i32
    %c0_i32_0 = arith.constant 0 : i32
    %c0_i32_1 = arith.constant 0 : i32
    return %c0_i32, %c0_i32_0 : i32, i32
  }
  func.func @transform_3(%arg0: i32) -> (i32, i32) {
    %c0_i32 = arith.constant 0 : i32
    %c0_i32_0 = arith.constant 0 : i32
    return %arg0, %c0_i32 : i32, i32
  }
}

module attributes {stable_mosaic.version = 11 : i64} {
  func.func @kernel(%arg0: i32, %arg1: i32, %arg2: i32, %arg3: memref<32x512xbf16, #tpu.memory_space<vmem>>, %arg4: memref<512x64xbf16, #tpu.memory_space<vmem>>, %arg5: memref<1x64xf32, #tpu.memory_space<vmem>>, %arg6: memref<32x64xbf16, #tpu.memory_space<vmem>>, %arg7: memref<1x8x64xf32, #tpu.memory_space<vmem>>, %arg8: memref<1x8x64xf32, #tpu.memory_space<vmem>>) attributes {dimension_semantics = [#tpu.dimension_semantics<parallel>, #tpu.dimension_semantics<parallel>, #tpu.dimension_semantics<arbitrary>], iteration_bounds = array<i64: 1, 1, 1>, scalar_prefetch = 0 : i64, scratch_operands = 0 : i64, tpu.core_type = #tpu.core_type<tc>, window_params = [{transform_indices = @transform_0, window_bounds = array<i64: 32, 512>}, {transform_indices = @transform_1, window_bounds = array<i64: 512, 64>}, {transform_indices = @transform_2, window_bounds = array<i64: 1, 64>}, {transform_indices = @transform_3, window_bounds = array<i64: 32, 64>}, {transform_indices = @transform_4, window_bounds = array<i64: 1, 8, 64>}, {transform_indices = @transform_5, window_bounds = array<i64: 1, 8, 64>}]} {
    %c0 = arith.constant 0 : index
    %c0_0 = arith.constant 0 : index
    %0 = vector.load %arg3[%c0, %c0_0] : memref<32x512xbf16, #tpu.memory_space<vmem>>, vector<32x512xbf16>
    %c0_1 = arith.constant 0 : index
    %c0_2 = arith.constant 0 : index
    %1 = vector.load %arg4[%c0_1, %c0_2] : memref<512x64xbf16, #tpu.memory_space<vmem>>, vector<512x64xbf16>
    %cst = arith.constant dense<0.000000e+00> : vector<32x64xf32>
    %2 = tpu.matmul %0, %1, %cst {dimension_numbers = #tpu.dot_dimension_numbers<[1], [0], [0], [1], [0, 0, 1, 1], [], []>} : vector<32x512xbf16>, vector<512x64xbf16>, vector<32x64xf32> -> vector<32x64xf32>
    %c0_3 = arith.constant 0 : index
    %c0_4 = arith.constant 0 : index
    %3 = vector.load %arg5[%c0_3, %c0_4] : memref<1x64xf32, #tpu.memory_space<vmem>>, vector<1x64xf32>
    %4 = vector.broadcast %3 : vector<1x64xf32> to vector<32x64xf32>
    %5 = arith.addf %2, %4 : vector<32x64xf32>
    %6 = arith.truncf %5 : vector<32x64xf32> to vector<32x64xbf16>
    %c0_5 = arith.constant 0 : index
    %c0_6 = arith.constant 0 : index
    %7 = vector.load %arg6[%c0_5, %c0_6] : memref<32x64xbf16, #tpu.memory_space<vmem>>, vector<32x64xbf16>
    tpu.vector_store %arg6[%c0_5, %c0_6], %6 {strides = array<i32>} : memref<32x64xbf16, #tpu.memory_space<vmem>>, vector<32x64xbf16>,
    %cst_7 = arith.constant dense<0.000000e+00> : vector<64xf32>
    %8 = vector.multi_reduction <add>, %5, %cst_7 [0] : vector<32x64xf32> to vector<64xf32>
    %9 = vector.shape_cast %8 : vector<64xf32> to vector<1x64xf32>
    %10 = arith.mulf %5, %5 : vector<32x64xf32>
    %cst_8 = arith.constant dense<0.000000e+00> : vector<64xf32>
    %11 = vector.multi_reduction <add>, %10, %cst_8 [0] : vector<32x64xf32> to vector<64xf32>
    %12 = vector.shape_cast %11 : vector<64xf32> to vector<1x64xf32>
    %13 = tpu.iota {dimensions = array<i32: 0>} : vector<8x64xi32>
    %c0_i32 = arith.constant 0 : i32
    %14 = vector.broadcast %c0_i32 : i32 to vector<8x64xi32>
    %15 = arith.cmpi eq, %13, %14 : vector<8x64xi32>
    %cst_9 = arith.constant 0.000000e+00 : f32
    %16 = vector.shape_cast %9 : vector<1x64xf32> to vector<1x64xf32>
    %17 = vector.broadcast %16 : vector<1x64xf32> to vector<8x64xf32>
    %18 = vector.broadcast %cst_9 : f32 to vector<8x64xf32>
    %19 = arith.select %15, %17, %18 : vector<8x64xi1>, vector<8x64xf32>
    %20 = vector.shape_cast %19 : vector<8x64xf32> to vector<1x8x64xf32>
    %c0_10 = arith.constant 0 : index
    %c0_11 = arith.constant 0 : index
    %c0_12 = arith.constant 0 : index
    %21 = vector.load %arg7[%c0_10, %c0_11, %c0_12] : memref<1x8x64xf32, #tpu.memory_space<vmem>>, vector<1x8x64xf32>
    tpu.vector_store %arg7[%c0_10, %c0_11, %c0_12], %20 {strides = array<i32>} : memref<1x8x64xf32, #tpu.memory_space<vmem>>, vector<1x8x64xf32>,
    %c0_i32_13 = arith.constant 0 : i32
    %22 = vector.broadcast %c0_i32_13 : i32 to vector<8x64xi32>
    %23 = arith.cmpi eq, %13, %22 : vector<8x64xi32>
    %cst_14 = arith.constant 0.000000e+00 : f32
    %24 = vector.shape_cast %12 : vector<1x64xf32> to vector<1x64xf32>
    %25 = vector.broadcast %24 : vector<1x64xf32> to vector<8x64xf32>
    %26 = vector.broadcast %cst_14 : f32 to vector<8x64xf32>
    %27 = arith.select %23, %25, %26 : vector<8x64xi1>, vector<8x64xf32>
    %28 = vector.shape_cast %27 : vector<8x64xf32> to vector<1x8x64xf32>
    %c0_15 = arith.constant 0 : index
    %c0_16 = arith.constant 0 : index
    %c0_17 = arith.constant 0 : index
    %29 = vector.load %arg8[%c0_15, %c0_16, %c0_17] : memref<1x8x64xf32, #tpu.memory_space<vmem>>, vector<1x8x64xf32>
    tpu.vector_store %arg8[%c0_15, %c0_16, %c0_17], %28 {strides = array<i32>} : memref<1x8x64xf32, #tpu.memory_space<vmem>>, vector<1x8x64xf32>,
    return
  }
  func.func @transform_0(%arg0: i32, %arg1: i32, %arg2: i32) -> (i32, i32) {
    %c0_i32 = arith.constant 0 : i32
    return %arg0, %arg2 : i32, i32
  }
  func.func @transform_1(%arg0: i32, %arg1: i32, %arg2: i32) -> (i32, i32) {
    %c0_i32 = arith.constant 0 : i32
    return %arg2, %arg1 : i32, i32
  }
  func.func @transform_2(%arg0: i32, %arg1: i32, %arg2: i32) -> (i32, i32) {
    %c0_i32 = arith.constant 0 : i32
    %c0_i32_0 = arith.constant 0 : i32
    return %c0_i32, %arg1 : i32, i32
  }
  func.func @transform_3(%arg0: i32, %arg1: i32, %arg2: i32) -> (i32, i32) {
    %c0_i32 = arith.constant 0 : i32
    return %arg0, %arg1 : i32, i32
  }
  func.func @transform_4(%arg0: i32, %arg1: i32, %arg2: i32) -> (i32, i32, i32) {
    %c0_i32 = arith.constant 0 : i32
    %c0_i32_0 = arith.constant 0 : i32
    return %arg0, %c0_i32, %arg1 : i32, i32, i32
  }
  func.func @transform_5(%arg0: i32, %arg1: i32, %arg2: i32) -> (i32, i32, i32) {
    %c0_i32 = arith.constant 0 : i32
    %c0_i32_0 = arith.constant 0 : i32
    return %arg0, %c0_i32, %arg1 : i32, i32, i32
  }
}

module attributes {stable_mosaic.version = 11 : i64} {
  func.func @kernel(%arg0: i32, %arg1: i32, %arg2: i32, %arg3: memref<32x576xbf16, #tpu.memory_space<vmem>>, %arg4: memref<576x64xbf16, #tpu.memory_space<vmem>>, %arg5: memref<1x64xf32, #tpu.memory_space<vmem>>, %arg6: memref<32x64xbf16, #tpu.memory_space<vmem>>, %arg7: memref<1x8x64xf32, #tpu.memory_space<vmem>>, %arg8: memref<1x8x64xf32, #tpu.memory_space<vmem>>) attributes {dimension_semantics = [#tpu.dimension_semantics<parallel>, #tpu.dimension_semantics<parallel>, #tpu.dimension_semantics<arbitrary>], iteration_bounds = array<i64: 1, 1, 1>, scalar_prefetch = 0 : i64, scratch_operands = 0 : i64, tpu.core_type = #tpu.core_type<tc>, window_params = [{transform_indices = @transform_0, window_bounds = array<i64: 32, 576>}, {transform_indices = @transform_1, window_bounds = array<i64: 576, 64>}, {transform_indices = @transform_2, window_bounds = array<i64: 1, 64>}, {transform_indices = @transform_3, window_bounds = array<i64: 32, 64>}, {transform_indices = @transform_4, window_bounds = array<i64: 1, 8, 64>}, {transform_indices = @transform_5, window_bounds = array<i64: 1, 8, 64>}]} {
    %c0 = arith.constant 0 : index
    %c0_0 = arith.constant 0 : index
    %0 = vector.load %arg3[%c0, %c0_0] : memref<32x576xbf16, #tpu.memory_space<vmem>>, vector<32x576xbf16>
    %c0_1 = arith.constant 0 : index
    %c0_2 = arith.constant 0 : index
    %1 = vector.load %arg4[%c0_1, %c0_2] : memref<576x64xbf16, #tpu.memory_space<vmem>>, vector<576x64xbf16>
    %cst = arith.constant dense<0.000000e+00> : vector<32x64xf32>
    %2 = tpu.matmul %0, %1, %cst {dimension_numbers = #tpu.dot_dimension_numbers<[1], [0], [0], [1], [0, 0, 1, 1], [], []>} : vector<32x576xbf16>, vector<576x64xbf16>, vector<32x64xf32> -> vector<32x64xf32>
    %c0_3 = arith.constant 0 : index
    %c0_4 = arith.constant 0 : index
    %3 = vector.load %arg5[%c0_3, %c0_4] : memref<1x64xf32, #tpu.memory_space<vmem>>, vector<1x64xf32>
    %4 = vector.broadcast %3 : vector<1x64xf32> to vector<32x64xf32>
    %5 = arith.addf %2, %4 : vector<32x64xf32>
    %6 = arith.truncf %5 : vector<32x64xf32> to vector<32x64xbf16>
    %c0_5 = arith.constant 0 : index
    %c0_6 = arith.constant 0 : index
    %7 = vector.load %arg6[%c0_5, %c0_6] : memref<32x64xbf16, #tpu.memory_space<vmem>>, vector<32x64xbf16>
    tpu.vector_store %arg6[%c0_5, %c0_6], %6 {strides = array<i32>} : memref<32x64xbf16, #tpu.memory_space<vmem>>, vector<32x64xbf16>,
    %cst_7 = arith.constant dense<0.000000e+00> : vector<64xf32>
    %8 = vector.multi_reduction <add>, %5, %cst_7 [0] : vector<32x64xf32> to vector<64xf32>
    %9 = vector.shape_cast %8 : vector<64xf32> to vector<1x64xf32>
    %10 = arith.mulf %5, %5 : vector<32x64xf32>
    %cst_8 = arith.constant dense<0.000000e+00> : vector<64xf32>
    %11 = vector.multi_reduction <add>, %10, %cst_8 [0] : vector<32x64xf32> to vector<64xf32>
    %12 = vector.shape_cast %11 : vector<64xf32> to vector<1x64xf32>
    %13 = tpu.iota {dimensions = array<i32: 0>} : vector<8x64xi32>
    %c0_i32 = arith.constant 0 : i32
    %14 = vector.broadcast %c0_i32 : i32 to vector<8x64xi32>
    %15 = arith.cmpi eq, %13, %14 : vector<8x64xi32>
    %cst_9 = arith.constant 0.000000e+00 : f32
    %16 = vector.shape_cast %9 : vector<1x64xf32> to vector<1x64xf32>
    %17 = vector.broadcast %16 : vector<1x64xf32> to vector<8x64xf32>
    %18 = vector.broadcast %cst_9 : f32 to vector<8x64xf32>
    %19 = arith.select %15, %17, %18 : vector<8x64xi1>, vector<8x64xf32>
    %20 = vector.shape_cast %19 : vector<8x64xf32> to vector<1x8x64xf32>
    %c0_10 = arith.constant 0 : index
    %c0_11 = arith.constant 0 : index
    %c0_12 = arith.constant 0 : index
    %21 = vector.load %arg7[%c0_10, %c0_11, %c0_12] : memref<1x8x64xf32, #tpu.memory_space<vmem>>, vector<1x8x64xf32>
    tpu.vector_store %arg7[%c0_10, %c0_11, %c0_12], %20 {strides = array<i32>} : memref<1x8x64xf32, #tpu.memory_space<vmem>>, vector<1x8x64xf32>,
    %c0_i32_13 = arith.constant 0 : i32
    %22 = vector.broadcast %c0_i32_13 : i32 to vector<8x64xi32>
    %23 = arith.cmpi eq, %13, %22 : vector<8x64xi32>
    %cst_14 = arith.constant 0.000000e+00 : f32
    %24 = vector.shape_cast %12 : vector<1x64xf32> to vector<1x64xf32>
    %25 = vector.broadcast %24 : vector<1x64xf32> to vector<8x64xf32>
    %26 = vector.broadcast %cst_14 : f32 to vector<8x64xf32>
    %27 = arith.select %23, %25, %26 : vector<8x64xi1>, vector<8x64xf32>
    %28 = vector.shape_cast %27 : vector<8x64xf32> to vector<1x8x64xf32>
    %c0_15 = arith.constant 0 : index
    %c0_16 = arith.constant 0 : index
    %c0_17 = arith.constant 0 : index
    %29 = vector.load %arg8[%c0_15, %c0_16, %c0_17] : memref<1x8x64xf32, #tpu.memory_space<vmem>>, vector<1x8x64xf32>
    tpu.vector_store %arg8[%c0_15, %c0_16, %c0_17], %28 {strides = array<i32>} : memref<1x8x64xf32, #tpu.memory_space<vmem>>, vector<1x8x64xf32>,
    return
  }
  func.func @transform_0(%arg0: i32, %arg1: i32, %arg2: i32) -> (i32, i32) {
    %c0_i32 = arith.constant 0 : i32
    return %arg0, %arg2 : i32, i32
  }
  func.func @transform_1(%arg0: i32, %arg1: i32, %arg2: i32) -> (i32, i32) {
    %c0_i32 = arith.constant 0 : i32
    return %arg2, %arg1 : i32, i32
  }
  func.func @transform_2(%arg0: i32, %arg1: i32, %arg2: i32) -> (i32, i32) {
    %c0_i32 = arith.constant 0 : i32
    %c0_i32_0 = arith.constant 0 : i32
    return %c0_i32, %arg1 : i32, i32
  }
  func.func @transform_3(%arg0: i32, %arg1: i32, %arg2: i32) -> (i32, i32) {
    %c0_i32 = arith.constant 0 : i32
    return %arg0, %arg1 : i32, i32
  }
  func.func @transform_4(%arg0: i32, %arg1: i32, %arg2: i32) -> (i32, i32, i32) {
    %c0_i32 = arith.constant 0 : i32
    %c0_i32_0 = arith.constant 0 : i32
    return %arg0, %c0_i32, %arg1 : i32, i32, i32
  }
  func.func @transform_5(%arg0: i32, %arg1: i32, %arg2: i32) -> (i32, i32, i32) {
    %c0_i32 = arith.constant 0 : i32
    %c0_i32_0 = arith.constant 0 : i32
    return %arg0, %c0_i32, %arg1 : i32, i32, i32
  }
}

module attributes {stable_mosaic.version = 11 : i64} {
  func.func @kernel(%arg0: i32, %arg1: memref<32x64xbf16, #tpu.memory_space<vmem>>, %arg2: memref<32x64xbf16, #tpu.memory_space<vmem>>, %arg3: memref<1x64xf32, #tpu.memory_space<vmem>>, %arg4: memref<1x64xf32, #tpu.memory_space<vmem>>, %arg5: memref<32x64xbf16, #tpu.memory_space<vmem>>) attributes {dimension_semantics = [#tpu.dimension_semantics<parallel>], iteration_bounds = array<i64: 1>, scalar_prefetch = 0 : i64, scratch_operands = 0 : i64, tpu.core_type = #tpu.core_type<tc>, window_params = [{transform_indices = @transform_0, window_bounds = array<i64: 32, 64>}, {transform_indices = @transform_1, window_bounds = array<i64: 32, 64>}, {pipeline_mode = #tpu.pipeline_mode<synchronous>, transform_indices = @transform_2, window_bounds = array<i64: 1, 64>}, {pipeline_mode = #tpu.pipeline_mode<synchronous>, transform_indices = @transform_3, window_bounds = array<i64: 1, 64>}, {transform_indices = @transform_4, window_bounds = array<i64: 32, 64>}]} {
    %c0 = arith.constant 0 : index
    %c0_0 = arith.constant 0 : index
    %0 = vector.load %arg1[%c0, %c0_0] : memref<32x64xbf16, #tpu.memory_space<vmem>>, vector<32x64xbf16>
    %1 = arith.extf %0 : vector<32x64xbf16> to vector<32x64xf32>
    %c0_1 = arith.constant 0 : index
    %c0_2 = arith.constant 0 : index
    %2 = vector.load %arg3[%c0_1, %c0_2] : memref<1x64xf32, #tpu.memory_space<vmem>>, vector<1x64xf32>
    %3 = vector.broadcast %2 : vector<1x64xf32> to vector<32x64xf32>
    %4 = arith.mulf %1, %3 : vector<32x64xf32>
    %c0_3 = arith.constant 0 : index
    %c0_4 = arith.constant 0 : index
    %5 = vector.load %arg4[%c0_3, %c0_4] : memref<1x64xf32, #tpu.memory_space<vmem>>, vector<1x64xf32>
    %6 = vector.broadcast %5 : vector<1x64xf32> to vector<32x64xf32>
    %7 = arith.addf %4, %6 : vector<32x64xf32>
    %c0_5 = arith.constant 0 : index
    %c0_6 = arith.constant 0 : index
    %8 = vector.load %arg2[%c0_5, %c0_6] : memref<32x64xbf16, #tpu.memory_space<vmem>>, vector<32x64xbf16>
    %9 = arith.extf %8 : vector<32x64xbf16> to vector<32x64xf32>
    %10 = arith.addf %7, %9 : vector<32x64xf32>
    %11 = arith.truncf %10 : vector<32x64xf32> to vector<32x64xbf16>
    %c0_7 = arith.constant 0 : index
    %c0_8 = arith.constant 0 : index
    %12 = vector.load %arg5[%c0_7, %c0_8] : memref<32x64xbf16, #tpu.memory_space<vmem>>, vector<32x64xbf16>
    tpu.vector_store %arg5[%c0_7, %c0_8], %11 {strides = array<i32>} : memref<32x64xbf16, #tpu.memory_space<vmem>>, vector<32x64xbf16>,
    return
  }
  func.func @transform_0(%arg0: i32) -> (i32, i32) {
    %c0_i32 = arith.constant 0 : i32
    %c0_i32_0 = arith.constant 0 : i32
    return %arg0, %c0_i32 : i32, i32
  }
  func.func @transform_1(%arg0: i32) -> (i32, i32) {
    %c0_i32 = arith.constant 0 : i32
    %c0_i32_0 = arith.constant 0 : i32
    return %arg0, %c0_i32 : i32, i32
  }
  func.func @transform_2(%arg0: i32) -> (i32, i32) {
    %c0_i32 = arith.constant 0 : i32
    %c0_i32_0 = arith.constant 0 : i32
    %c0_i32_1 = arith.constant 0 : i32
    return %c0_i32, %c0_i32_0 : i32, i32
  }
  func.func @transform_3(%arg0: i32) -> (i32, i32) {
    %c0_i32 = arith.constant 0 : i32
    %c0_i32_0 = arith.constant 0 : i32
    %c0_i32_1 = arith.constant 0 : i32
    return %c0_i32, %c0_i32_0 : i32, i32
  }
  func.func @transform_4(%arg0: i32) -> (i32, i32) {
    %c0_i32 = arith.constant 0 : i32
    %c0_i32_0 = arith.constant 0 : i32
    return %arg0, %c0_i32 : i32, i32
  }
}

module attributes {stable_mosaic.version = 11 : i64} {
  func.func @kernel(%arg0: i32, %arg1: memref<32x64xbf16, #tpu.memory_space<vmem>>, %arg2: memref<1x64xf32, #tpu.memory_space<vmem>>, %arg3: memref<1x64xf32, #tpu.memory_space<vmem>>, %arg4: memref<32x64xbf16, #tpu.memory_space<vmem>>) attributes {dimension_semantics = [#tpu.dimension_semantics<parallel>], iteration_bounds = array<i64: 1>, scalar_prefetch = 0 : i64, scratch_operands = 0 : i64, tpu.core_type = #tpu.core_type<tc>, window_params = [{transform_indices = @transform_0, window_bounds = array<i64: 32, 64>}, {pipeline_mode = #tpu.pipeline_mode<synchronous>, transform_indices = @transform_1, window_bounds = array<i64: 1, 64>}, {pipeline_mode = #tpu.pipeline_mode<synchronous>, transform_indices = @transform_2, window_bounds = array<i64: 1, 64>}, {transform_indices = @transform_3, window_bounds = array<i64: 32, 64>}]} {
    %c0 = arith.constant 0 : index
    %c0_0 = arith.constant 0 : index
    %0 = vector.load %arg1[%c0, %c0_0] : memref<32x64xbf16, #tpu.memory_space<vmem>>, vector<32x64xbf16>
    %1 = arith.extf %0 : vector<32x64xbf16> to vector<32x64xf32>
    %c0_1 = arith.constant 0 : index
    %c0_2 = arith.constant 0 : index
    %2 = vector.load %arg2[%c0_1, %c0_2] : memref<1x64xf32, #tpu.memory_space<vmem>>, vector<1x64xf32>
    %3 = vector.broadcast %2 : vector<1x64xf32> to vector<32x64xf32>
    %4 = arith.mulf %1, %3 : vector<32x64xf32>
    %c0_3 = arith.constant 0 : index
    %c0_4 = arith.constant 0 : index
    %5 = vector.load %arg3[%c0_3, %c0_4] : memref<1x64xf32, #tpu.memory_space<vmem>>, vector<1x64xf32>
    %6 = vector.broadcast %5 : vector<1x64xf32> to vector<32x64xf32>
    %7 = arith.addf %4, %6 : vector<32x64xf32>
    %cst = arith.constant 0.000000e+00 : f32
    %8 = vector.broadcast %cst : f32 to vector<32x64xf32>
    %9 = arith.maximumf %7, %8 : vector<32x64xf32>
    %10 = arith.truncf %9 : vector<32x64xf32> to vector<32x64xbf16>
    %c0_5 = arith.constant 0 : index
    %c0_6 = arith.constant 0 : index
    %11 = vector.load %arg4[%c0_5, %c0_6] : memref<32x64xbf16, #tpu.memory_space<vmem>>, vector<32x64xbf16>
    tpu.vector_store %arg4[%c0_5, %c0_6], %10 {strides = array<i32>} : memref<32x64xbf16, #tpu.memory_space<vmem>>, vector<32x64xbf16>,
    return
  }
  func.func @transform_0(%arg0: i32) -> (i32, i32) {
    %c0_i32 = arith.constant 0 : i32
    %c0_i32_0 = arith.constant 0 : i32
    return %arg0, %c0_i32 : i32, i32
  }
  func.func @transform_1(%arg0: i32) -> (i32, i32) {
    %c0_i32 = arith.constant 0 : i32
    %c0_i32_0 = arith.constant 0 : i32
    %c0_i32_1 = arith.constant 0 : i32
    return %c0_i32, %c0_i32_0 : i32, i32
  }
  func.func @transform_2(%arg0: i32) -> (i32, i32) {
    %c0_i32 = arith.constant 0 : i32
    %c0_i32_0 = arith.constant 0 : i32
    %c0_i32_1 = arith.constant 0 : i32
    return %c0_i32, %c0_i32_0 : i32, i32
  }
  func.func @transform_3(%arg0: i32) -> (i32, i32) {
    %c0_i32 = arith.constant 0 : i32
    %c0_i32_0 = arith.constant 0 : i32
    return %arg0, %c0_i32 : i32, i32
  }
}

module attributes {stable_mosaic.version = 11 : i64} {
  func.func @kernel(%arg0: i32, %arg1: i32, %arg2: i32, %arg3: memref<8x1024xbf16, #tpu.memory_space<vmem>>, %arg4: memref<1024x128xbf16, #tpu.memory_space<vmem>>, %arg5: memref<1x128xf32, #tpu.memory_space<vmem>>, %arg6: memref<8x128xbf16, #tpu.memory_space<vmem>>, %arg7: memref<1x8x128xf32, #tpu.memory_space<vmem>>, %arg8: memref<1x8x128xf32, #tpu.memory_space<vmem>>) attributes {dimension_semantics = [#tpu.dimension_semantics<parallel>, #tpu.dimension_semantics<parallel>, #tpu.dimension_semantics<arbitrary>], iteration_bounds = array<i64: 1, 1, 1>, scalar_prefetch = 0 : i64, scratch_operands = 0 : i64, tpu.core_type = #tpu.core_type<tc>, window_params = [{transform_indices = @transform_0, window_bounds = array<i64: 8, 1024>}, {transform_indices = @transform_1, window_bounds = array<i64: 1024, 128>}, {transform_indices = @transform_2, window_bounds = array<i64: 1, 128>}, {transform_indices = @transform_3, window_bounds = array<i64: 8, 128>}, {transform_indices = @transform_4, window_bounds = array<i64: 1, 8, 128>}, {transform_indices = @transform_5, window_bounds = array<i64: 1, 8, 128>}]} {
    %c0 = arith.constant 0 : index
    %c0_0 = arith.constant 0 : index
    %0 = vector.load %arg3[%c0, %c0_0] : memref<8x1024xbf16, #tpu.memory_space<vmem>>, vector<8x1024xbf16>
    %c0_1 = arith.constant 0 : index
    %c0_2 = arith.constant 0 : index
    %1 = vector.load %arg4[%c0_1, %c0_2] : memref<1024x128xbf16, #tpu.memory_space<vmem>>, vector<1024x128xbf16>
    %cst = arith.constant dense<0.000000e+00> : vector<8x128xf32>
    %2 = tpu.matmul %0, %1, %cst {dimension_numbers = #tpu.dot_dimension_numbers<[1], [0], [0], [1], [0, 0, 1, 1], [], []>} : vector<8x1024xbf16>, vector<1024x128xbf16>, vector<8x128xf32> -> vector<8x128xf32>
    %c0_3 = arith.constant 0 : index
    %c0_4 = arith.constant 0 : index
    %3 = vector.load %arg5[%c0_3, %c0_4] : memref<1x128xf32, #tpu.memory_space<vmem>>, vector<1x128xf32>
    %4 = vector.broadcast %3 : vector<1x128xf32> to vector<8x128xf32>
    %5 = arith.addf %2, %4 : vector<8x128xf32>
    %6 = arith.truncf %5 : vector<8x128xf32> to vector<8x128xbf16>
    %c0_5 = arith.constant 0 : index
    %c0_6 = arith.constant 0 : index
    %7 = vector.load %arg6[%c0_5, %c0_6] : memref<8x128xbf16, #tpu.memory_space<vmem>>, vector<8x128xbf16>
    tpu.vector_store %arg6[%c0_5, %c0_6], %6 {strides = array<i32>} : memref<8x128xbf16, #tpu.memory_space<vmem>>, vector<8x128xbf16>,
    %cst_7 = arith.constant dense<0.000000e+00> : vector<128xf32>
    %8 = vector.multi_reduction <add>, %5, %cst_7 [0] : vector<8x128xf32> to vector<128xf32>
    %9 = vector.shape_cast %8 : vector<128xf32> to vector<1x128xf32>
    %10 = arith.mulf %5, %5 : vector<8x128xf32>
    %cst_8 = arith.constant dense<0.000000e+00> : vector<128xf32>
    %11 = vector.multi_reduction <add>, %10, %cst_8 [0] : vector<8x128xf32> to vector<128xf32>
    %12 = vector.shape_cast %11 : vector<128xf32> to vector<1x128xf32>
    %13 = tpu.iota {dimensions = array<i32: 0>} : vector<8x128xi32>
    %c0_i32 = arith.constant 0 : i32
    %14 = vector.broadcast %c0_i32 : i32 to vector<8x128xi32>
    %15 = arith.cmpi eq, %13, %14 : vector<8x128xi32>
    %cst_9 = arith.constant 0.000000e+00 : f32
    %16 = vector.shape_cast %9 : vector<1x128xf32> to vector<1x128xf32>
    %17 = vector.broadcast %16 : vector<1x128xf32> to vector<8x128xf32>
    %18 = vector.broadcast %cst_9 : f32 to vector<8x128xf32>
    %19 = arith.select %15, %17, %18 : vector<8x128xi1>, vector<8x128xf32>
    %20 = vector.shape_cast %19 : vector<8x128xf32> to vector<1x8x128xf32>
    %c0_10 = arith.constant 0 : index
    %c0_11 = arith.constant 0 : index
    %c0_12 = arith.constant 0 : index
    %21 = vector.load %arg7[%c0_10, %c0_11, %c0_12] : memref<1x8x128xf32, #tpu.memory_space<vmem>>, vector<1x8x128xf32>
    tpu.vector_store %arg7[%c0_10, %c0_11, %c0_12], %20 {strides = array<i32>} : memref<1x8x128xf32, #tpu.memory_space<vmem>>, vector<1x8x128xf32>,
    %c0_i32_13 = arith.constant 0 : i32
    %22 = vector.broadcast %c0_i32_13 : i32 to vector<8x128xi32>
    %23 = arith.cmpi eq, %13, %22 : vector<8x128xi32>
    %cst_14 = arith.constant 0.000000e+00 : f32
    %24 = vector.shape_cast %12 : vector<1x128xf32> to vector<1x128xf32>
    %25 = vector.broadcast %24 : vector<1x128xf32> to vector<8x128xf32>
    %26 = vector.broadcast %cst_14 : f32 to vector<8x128xf32>
    %27 = arith.select %23, %25, %26 : vector<8x128xi1>, vector<8x128xf32>
    %28 = vector.shape_cast %27 : vector<8x128xf32> to vector<1x8x128xf32>
    %c0_15 = arith.constant 0 : index
    %c0_16 = arith.constant 0 : index
    %c0_17 = arith.constant 0 : index
    %29 = vector.load %arg8[%c0_15, %c0_16, %c0_17] : memref<1x8x128xf32, #tpu.memory_space<vmem>>, vector<1x8x128xf32>
    tpu.vector_store %arg8[%c0_15, %c0_16, %c0_17], %28 {strides = array<i32>} : memref<1x8x128xf32, #tpu.memory_space<vmem>>, vector<1x8x128xf32>,
    return
  }
  func.func @transform_0(%arg0: i32, %arg1: i32, %arg2: i32) -> (i32, i32) {
    %c0_i32 = arith.constant 0 : i32
    return %arg0, %arg2 : i32, i32
  }
  func.func @transform_1(%arg0: i32, %arg1: i32, %arg2: i32) -> (i32, i32) {
    %c0_i32 = arith.constant 0 : i32
    return %arg2, %arg1 : i32, i32
  }
  func.func @transform_2(%arg0: i32, %arg1: i32, %arg2: i32) -> (i32, i32) {
    %c0_i32 = arith.constant 0 : i32
    %c0_i32_0 = arith.constant 0 : i32
    return %c0_i32, %arg1 : i32, i32
  }
  func.func @transform_3(%arg0: i32, %arg1: i32, %arg2: i32) -> (i32, i32) {
    %c0_i32 = arith.constant 0 : i32
    return %arg0, %arg1 : i32, i32
  }
  func.func @transform_4(%arg0: i32, %arg1: i32, %arg2: i32) -> (i32, i32, i32) {
    %c0_i32 = arith.constant 0 : i32
    %c0_i32_0 = arith.constant 0 : i32
    return %arg0, %c0_i32, %arg1 : i32, i32, i32
  }
  func.func @transform_5(%arg0: i32, %arg1: i32, %arg2: i32) -> (i32, i32, i32) {
    %c0_i32 = arith.constant 0 : i32
    %c0_i32_0 = arith.constant 0 : i32
    return %arg0, %c0_i32, %arg1 : i32, i32, i32
  }
}

module attributes {stable_mosaic.version = 11 : i64} {
  func.func @kernel(%arg0: i32, %arg1: memref<8x128xbf16, #tpu.memory_space<vmem>>, %arg2: memref<1x128xf32, #tpu.memory_space<vmem>>, %arg3: memref<1x128xf32, #tpu.memory_space<vmem>>, %arg4: memref<8x128xbf16, #tpu.memory_space<vmem>>) attributes {dimension_semantics = [#tpu.dimension_semantics<parallel>], iteration_bounds = array<i64: 1>, scalar_prefetch = 0 : i64, scratch_operands = 0 : i64, tpu.core_type = #tpu.core_type<tc>, window_params = [{transform_indices = @transform_0, window_bounds = array<i64: 8, 128>}, {pipeline_mode = #tpu.pipeline_mode<synchronous>, transform_indices = @transform_1, window_bounds = array<i64: 1, 128>}, {pipeline_mode = #tpu.pipeline_mode<synchronous>, transform_indices = @transform_2, window_bounds = array<i64: 1, 128>}, {transform_indices = @transform_3, window_bounds = array<i64: 8, 128>}]} {
    %c0 = arith.constant 0 : index
    %c0_0 = arith.constant 0 : index
    %0 = vector.load %arg1[%c0, %c0_0] : memref<8x128xbf16, #tpu.memory_space<vmem>>, vector<8x128xbf16>
    %1 = arith.extf %0 : vector<8x128xbf16> to vector<8x128xf32>
    %c0_1 = arith.constant 0 : index
    %c0_2 = arith.constant 0 : index
    %2 = vector.load %arg2[%c0_1, %c0_2] : memref<1x128xf32, #tpu.memory_space<vmem>>, vector<1x128xf32>
    %3 = vector.broadcast %2 : vector<1x128xf32> to vector<8x128xf32>
    %4 = arith.mulf %1, %3 : vector<8x128xf32>
    %c0_3 = arith.constant 0 : index
    %c0_4 = arith.constant 0 : index
    %5 = vector.load %arg3[%c0_3, %c0_4] : memref<1x128xf32, #tpu.memory_space<vmem>>, vector<1x128xf32>
    %6 = vector.broadcast %5 : vector<1x128xf32> to vector<8x128xf32>
    %7 = arith.addf %4, %6 : vector<8x128xf32>
    %cst = arith.constant 0.000000e+00 : f32
    %8 = vector.broadcast %cst : f32 to vector<8x128xf32>
    %9 = arith.cmpf oge, %7, %8 : vector<8x128xf32>
    %cst_5 = arith.constant 2.000000e-01 : f32
    %10 = vector.broadcast %cst_5 : f32 to vector<8x128xf32>
    %11 = arith.mulf %10, %7 : vector<8x128xf32>
    %12 = arith.select %9, %7, %11 : vector<8x128xi1>, vector<8x128xf32>
    %13 = arith.truncf %12 : vector<8x128xf32> to vector<8x128xbf16>
    %c0_6 = arith.constant 0 : index
    %c0_7 = arith.constant 0 : index
    %14 = vector.load %arg4[%c0_6, %c0_7] : memref<8x128xbf16, #tpu.memory_space<vmem>>, vector<8x128xbf16>
    tpu.vector_store %arg4[%c0_6, %c0_7], %13 {strides = array<i32>} : memref<8x128xbf16, #tpu.memory_space<vmem>>, vector<8x128xbf16>,
    return
  }
  func.func @transform_0(%arg0: i32) -> (i32, i32) {
    %c0_i32 = arith.constant 0 : i32
    %c0_i32_0 = arith.constant 0 : i32
    return %arg0, %c0_i32 : i32, i32
  }
  func.func @transform_1(%arg0: i32) -> (i32, i32) {
    %c0_i32 = arith.constant 0 : i32
    %c0_i32_0 = arith.constant 0 : i32
    %c0_i32_1 = arith.constant 0 : i32
    return %c0_i32, %c0_i32_0 : i32, i32
  }
  func.func @transform_2(%arg0: i32) -> (i32, i32) {
    %c0_i32 = arith.constant 0 : i32
    %c0_i32_0 = arith.constant 0 : i32
    %c0_i32_1 = arith.constant 0 : i32
    return %c0_i32, %c0_i32_0 : i32, i32
  }
  func.func @transform_3(%arg0: i32) -> (i32, i32) {
    %c0_i32 = arith.constant 0 : i32
    %c0_i32_0 = arith.constant 0 : i32
    return %arg0, %c0_i32 : i32, i32
  }
}

module attributes {stable_mosaic.version = 11 : i64} {
  func.func @kernel(%arg0: i32, %arg1: i32, %arg2: i32, %arg3: memref<8x1152xbf16, #tpu.memory_space<vmem>>, %arg4: memref<1152x128xbf16, #tpu.memory_space<vmem>>, %arg5: memref<1x128xf32, #tpu.memory_space<vmem>>, %arg6: memref<8x128xbf16, #tpu.memory_space<vmem>>, %arg7: memref<1x8x128xf32, #tpu.memory_space<vmem>>, %arg8: memref<1x8x128xf32, #tpu.memory_space<vmem>>) attributes {dimension_semantics = [#tpu.dimension_semantics<parallel>, #tpu.dimension_semantics<parallel>, #tpu.dimension_semantics<arbitrary>], iteration_bounds = array<i64: 1, 1, 1>, scalar_prefetch = 0 : i64, scratch_operands = 0 : i64, tpu.core_type = #tpu.core_type<tc>, window_params = [{transform_indices = @transform_0, window_bounds = array<i64: 8, 1152>}, {transform_indices = @transform_1, window_bounds = array<i64: 1152, 128>}, {transform_indices = @transform_2, window_bounds = array<i64: 1, 128>}, {transform_indices = @transform_3, window_bounds = array<i64: 8, 128>}, {transform_indices = @transform_4, window_bounds = array<i64: 1, 8, 128>}, {transform_indices = @transform_5, window_bounds = array<i64: 1, 8, 128>}]} {
    %c0 = arith.constant 0 : index
    %c0_0 = arith.constant 0 : index
    %0 = vector.load %arg3[%c0, %c0_0] : memref<8x1152xbf16, #tpu.memory_space<vmem>>, vector<8x1152xbf16>
    %c0_1 = arith.constant 0 : index
    %c0_2 = arith.constant 0 : index
    %1 = vector.load %arg4[%c0_1, %c0_2] : memref<1152x128xbf16, #tpu.memory_space<vmem>>, vector<1152x128xbf16>
    %cst = arith.constant dense<0.000000e+00> : vector<8x128xf32>
    %2 = tpu.matmul %0, %1, %cst {dimension_numbers = #tpu.dot_dimension_numbers<[1], [0], [0], [1], [0, 0, 1, 1], [], []>} : vector<8x1152xbf16>, vector<1152x128xbf16>, vector<8x128xf32> -> vector<8x128xf32>
    %c0_3 = arith.constant 0 : index
    %c0_4 = arith.constant 0 : index
    %3 = vector.load %arg5[%c0_3, %c0_4] : memref<1x128xf32, #tpu.memory_space<vmem>>, vector<1x128xf32>
    %4 = vector.broadcast %3 : vector<1x128xf32> to vector<8x128xf32>
    %5 = arith.addf %2, %4 : vector<8x128xf32>
    %6 = arith.truncf %5 : vector<8x128xf32> to vector<8x128xbf16>
    %c0_5 = arith.constant 0 : index
    %c0_6 = arith.constant 0 : index
    %7 = vector.load %arg6[%c0_5, %c0_6] : memref<8x128xbf16, #tpu.memory_space<vmem>>, vector<8x128xbf16>
    tpu.vector_store %arg6[%c0_5, %c0_6], %6 {strides = array<i32>} : memref<8x128xbf16, #tpu.memory_space<vmem>>, vector<8x128xbf16>,
    %cst_7 = arith.constant dense<0.000000e+00> : vector<128xf32>
    %8 = vector.multi_reduction <add>, %5, %cst_7 [0] : vector<8x128xf32> to vector<128xf32>
    %9 = vector.shape_cast %8 : vector<128xf32> to vector<1x128xf32>
    %10 = arith.mulf %5, %5 : vector<8x128xf32>
    %cst_8 = arith.constant dense<0.000000e+00> : vector<128xf32>
    %11 = vector.multi_reduction <add>, %10, %cst_8 [0] : vector<8x128xf32> to vector<128xf32>
    %12 = vector.shape_cast %11 : vector<128xf32> to vector<1x128xf32>
    %13 = tpu.iota {dimensions = array<i32: 0>} : vector<8x128xi32>
    %c0_i32 = arith.constant 0 : i32
    %14 = vector.broadcast %c0_i32 : i32 to vector<8x128xi32>
    %15 = arith.cmpi eq, %13, %14 : vector<8x128xi32>
    %cst_9 = arith.constant 0.000000e+00 : f32
    %16 = vector.shape_cast %9 : vector<1x128xf32> to vector<1x128xf32>
    %17 = vector.broadcast %16 : vector<1x128xf32> to vector<8x128xf32>
    %18 = vector.broadcast %cst_9 : f32 to vector<8x128xf32>
    %19 = arith.select %15, %17, %18 : vector<8x128xi1>, vector<8x128xf32>
    %20 = vector.shape_cast %19 : vector<8x128xf32> to vector<1x8x128xf32>
    %c0_10 = arith.constant 0 : index
    %c0_11 = arith.constant 0 : index
    %c0_12 = arith.constant 0 : index
    %21 = vector.load %arg7[%c0_10, %c0_11, %c0_12] : memref<1x8x128xf32, #tpu.memory_space<vmem>>, vector<1x8x128xf32>
    tpu.vector_store %arg7[%c0_10, %c0_11, %c0_12], %20 {strides = array<i32>} : memref<1x8x128xf32, #tpu.memory_space<vmem>>, vector<1x8x128xf32>,
    %c0_i32_13 = arith.constant 0 : i32
    %22 = vector.broadcast %c0_i32_13 : i32 to vector<8x128xi32>
    %23 = arith.cmpi eq, %13, %22 : vector<8x128xi32>
    %cst_14 = arith.constant 0.000000e+00 : f32
    %24 = vector.shape_cast %12 : vector<1x128xf32> to vector<1x128xf32>
    %25 = vector.broadcast %24 : vector<1x128xf32> to vector<8x128xf32>
    %26 = vector.broadcast %cst_14 : f32 to vector<8x128xf32>
    %27 = arith.select %23, %25, %26 : vector<8x128xi1>, vector<8x128xf32>
    %28 = vector.shape_cast %27 : vector<8x128xf32> to vector<1x8x128xf32>
    %c0_15 = arith.constant 0 : index
    %c0_16 = arith.constant 0 : index
    %c0_17 = arith.constant 0 : index
    %29 = vector.load %arg8[%c0_15, %c0_16, %c0_17] : memref<1x8x128xf32, #tpu.memory_space<vmem>>, vector<1x8x128xf32>
    tpu.vector_store %arg8[%c0_15, %c0_16, %c0_17], %28 {strides = array<i32>} : memref<1x8x128xf32, #tpu.memory_space<vmem>>, vector<1x8x128xf32>,
    return
  }
  func.func @transform_0(%arg0: i32, %arg1: i32, %arg2: i32) -> (i32, i32) {
    %c0_i32 = arith.constant 0 : i32
    return %arg0, %arg2 : i32, i32
  }
  func.func @transform_1(%arg0: i32, %arg1: i32, %arg2: i32) -> (i32, i32) {
    %c0_i32 = arith.constant 0 : i32
    return %arg2, %arg1 : i32, i32
  }
  func.func @transform_2(%arg0: i32, %arg1: i32, %arg2: i32) -> (i32, i32) {
    %c0_i32 = arith.constant 0 : i32
    %c0_i32_0 = arith.constant 0 : i32
    return %c0_i32, %arg1 : i32, i32
  }
  func.func @transform_3(%arg0: i32, %arg1: i32, %arg2: i32) -> (i32, i32) {
    %c0_i32 = arith.constant 0 : i32
    return %arg0, %arg1 : i32, i32
  }
  func.func @transform_4(%arg0: i32, %arg1: i32, %arg2: i32) -> (i32, i32, i32) {
    %c0_i32 = arith.constant 0 : i32
    %c0_i32_0 = arith.constant 0 : i32
    return %arg0, %c0_i32, %arg1 : i32, i32, i32
  }
  func.func @transform_5(%arg0: i32, %arg1: i32, %arg2: i32) -> (i32, i32, i32) {
    %c0_i32 = arith.constant 0 : i32
    %c0_i32_0 = arith.constant 0 : i32
    return %arg0, %c0_i32, %arg1 : i32, i32, i32
  }
}

module attributes {stable_mosaic.version = 11 : i64} {
  func.func @kernel(%arg0: i32, %arg1: memref<8x128xbf16, #tpu.memory_space<vmem>>, %arg2: memref<1x128xf32, #tpu.memory_space<vmem>>, %arg3: memref<1x128xf32, #tpu.memory_space<vmem>>, %arg4: memref<8x128xbf16, #tpu.memory_space<vmem>>) attributes {dimension_semantics = [#tpu.dimension_semantics<parallel>], iteration_bounds = array<i64: 1>, scalar_prefetch = 0 : i64, scratch_operands = 0 : i64, tpu.core_type = #tpu.core_type<tc>, window_params = [{transform_indices = @transform_0, window_bounds = array<i64: 8, 128>}, {pipeline_mode = #tpu.pipeline_mode<synchronous>, transform_indices = @transform_1, window_bounds = array<i64: 1, 128>}, {pipeline_mode = #tpu.pipeline_mode<synchronous>, transform_indices = @transform_2, window_bounds = array<i64: 1, 128>}, {transform_indices = @transform_3, window_bounds = array<i64: 8, 128>}]} {
    %c0 = arith.constant 0 : index
    %c0_0 = arith.constant 0 : index
    %0 = vector.load %arg1[%c0, %c0_0] : memref<8x128xbf16, #tpu.memory_space<vmem>>, vector<8x128xbf16>
    %1 = arith.extf %0 : vector<8x128xbf16> to vector<8x128xf32>
    %c0_1 = arith.constant 0 : index
    %c0_2 = arith.constant 0 : index
    %2 = vector.load %arg2[%c0_1, %c0_2] : memref<1x128xf32, #tpu.memory_space<vmem>>, vector<1x128xf32>
    %3 = vector.broadcast %2 : vector<1x128xf32> to vector<8x128xf32>
    %4 = arith.mulf %1, %3 : vector<8x128xf32>
    %c0_3 = arith.constant 0 : index
    %c0_4 = arith.constant 0 : index
    %5 = vector.load %arg3[%c0_3, %c0_4] : memref<1x128xf32, #tpu.memory_space<vmem>>, vector<1x128xf32>
    %6 = vector.broadcast %5 : vector<1x128xf32> to vector<8x128xf32>
    %7 = arith.addf %4, %6 : vector<8x128xf32>
    %cst = arith.constant 0.000000e+00 : f32
    %8 = vector.broadcast %cst : f32 to vector<8x128xf32>
    %9 = arith.maximumf %7, %8 : vector<8x128xf32>
    %10 = arith.truncf %9 : vector<8x128xf32> to vector<8x128xbf16>
    %c0_5 = arith.constant 0 : index
    %c0_6 = arith.constant 0 : index
    %11 = vector.load %arg4[%c0_5, %c0_6] : memref<8x128xbf16, #tpu.memory_space<vmem>>, vector<8x128xbf16>
    tpu.vector_store %arg4[%c0_5, %c0_6], %10 {strides = array<i32>} : memref<8x128xbf16, #tpu.memory_space<vmem>>, vector<8x128xbf16>,
    return
  }
  func.func @transform_0(%arg0: i32) -> (i32, i32) {
    %c0_i32 = arith.constant 0 : i32
    %c0_i32_0 = arith.constant 0 : i32
    return %arg0, %c0_i32 : i32, i32
  }
  func.func @transform_1(%arg0: i32) -> (i32, i32) {
    %c0_i32 = arith.constant 0 : i32
    %c0_i32_0 = arith.constant 0 : i32
    %c0_i32_1 = arith.constant 0 : i32
    return %c0_i32, %c0_i32_0 : i32, i32
  }
  func.func @transform_2(%arg0: i32) -> (i32, i32) {
    %c0_i32 = arith.constant 0 : i32
    %c0_i32_0 = arith.constant 0 : i32
    %c0_i32_1 = arith.constant 0 : i32
    return %c0_i32, %c0_i32_0 : i32, i32
  }
  func.func @transform_3(%arg0: i32) -> (i32, i32) {
    %c0_i32 = arith.constant 0 : i32
    %c0_i32_0 = arith.constant 0 : i32
    return %arg0, %c0_i32 : i32, i32
  }
}

module attributes {stable_mosaic.version = 11 : i64} {
  func.func @kernel(%arg0: i32, %arg1: memref<8x128xbf16, #tpu.memory_space<vmem>>, %arg2: memref<8x128xbf16, #tpu.memory_space<vmem>>, %arg3: memref<1x128xf32, #tpu.memory_space<vmem>>, %arg4: memref<1x128xf32, #tpu.memory_space<vmem>>, %arg5: memref<8x128xbf16, #tpu.memory_space<vmem>>) attributes {dimension_semantics = [#tpu.dimension_semantics<parallel>], iteration_bounds = array<i64: 1>, scalar_prefetch = 0 : i64, scratch_operands = 0 : i64, tpu.core_type = #tpu.core_type<tc>, window_params = [{transform_indices = @transform_0, window_bounds = array<i64: 8, 128>}, {transform_indices = @transform_1, window_bounds = array<i64: 8, 128>}, {pipeline_mode = #tpu.pipeline_mode<synchronous>, transform_indices = @transform_2, window_bounds = array<i64: 1, 128>}, {pipeline_mode = #tpu.pipeline_mode<synchronous>, transform_indices = @transform_3, window_bounds = array<i64: 1, 128>}, {transform_indices = @transform_4, window_bounds = array<i64: 8, 128>}]} {
    %c0 = arith.constant 0 : index
    %c0_0 = arith.constant 0 : index
    %0 = vector.load %arg1[%c0, %c0_0] : memref<8x128xbf16, #tpu.memory_space<vmem>>, vector<8x128xbf16>
    %1 = arith.extf %0 : vector<8x128xbf16> to vector<8x128xf32>
    %c0_1 = arith.constant 0 : index
    %c0_2 = arith.constant 0 : index
    %2 = vector.load %arg3[%c0_1, %c0_2] : memref<1x128xf32, #tpu.memory_space<vmem>>, vector<1x128xf32>
    %3 = vector.broadcast %2 : vector<1x128xf32> to vector<8x128xf32>
    %4 = arith.mulf %1, %3 : vector<8x128xf32>
    %c0_3 = arith.constant 0 : index
    %c0_4 = arith.constant 0 : index
    %5 = vector.load %arg4[%c0_3, %c0_4] : memref<1x128xf32, #tpu.memory_space<vmem>>, vector<1x128xf32>
    %6 = vector.broadcast %5 : vector<1x128xf32> to vector<8x128xf32>
    %7 = arith.addf %4, %6 : vector<8x128xf32>
    %c0_5 = arith.constant 0 : index
    %c0_6 = arith.constant 0 : index
    %8 = vector.load %arg2[%c0_5, %c0_6] : memref<8x128xbf16, #tpu.memory_space<vmem>>, vector<8x128xbf16>
    %9 = arith.extf %8 : vector<8x128xbf16> to vector<8x128xf32>
    %10 = arith.addf %7, %9 : vector<8x128xf32>
    %11 = arith.truncf %10 : vector<8x128xf32> to vector<8x128xbf16>
    %c0_7 = arith.constant 0 : index
    %c0_8 = arith.constant 0 : index
    %12 = vector.load %arg5[%c0_7, %c0_8] : memref<8x128xbf16, #tpu.memory_space<vmem>>, vector<8x128xbf16>
    tpu.vector_store %arg5[%c0_7, %c0_8], %11 {strides = array<i32>} : memref<8x128xbf16, #tpu.memory_space<vmem>>, vector<8x128xbf16>,
    return
  }
  func.func @transform_0(%arg0: i32) -> (i32, i32) {
    %c0_i32 = arith.constant 0 : i32
    %c0_i32_0 = arith.constant 0 : i32
    return %arg0, %c0_i32 : i32, i32
  }
  func.func @transform_1(%arg0: i32) -> (i32, i32) {
    %c0_i32 = arith.constant 0 : i32
    %c0_i32_0 = arith.constant 0 : i32
    return %arg0, %c0_i32 : i32, i32
  }
  func.func @transform_2(%arg0: i32) -> (i32, i32) {
    %c0_i32 = arith.constant 0 : i32
    %c0_i32_0 = arith.constant 0 : i32
    %c0_i32_1 = arith.constant 0 : i32
    return %c0_i32, %c0_i32_0 : i32, i32
  }
  func.func @transform_3(%arg0: i32) -> (i32, i32) {
    %c0_i32 = arith.constant 0 : i32
    %c0_i32_0 = arith.constant 0 : i32
    %c0_i32_1 = arith.constant 0 : i32
    return %c0_i32, %c0_i32_0 : i32, i32
  }
  func.func @transform_4(%arg0: i32) -> (i32, i32) {
    %c0_i32 = arith.constant 0 : i32
    %c0_i32_0 = arith.constant 0 : i32
    return %arg0, %c0_i32 : i32, i32
  }
}

module attributes {stable_mosaic.version = 11 : i64} {
  func.func @kernel(%arg0: i32, %arg1: i32, %arg2: i32, %arg3: memref<8x512xbf16, #tpu.memory_space<vmem>>, %arg4: memref<512x64xbf16, #tpu.memory_space<vmem>>, %arg5: memref<1x64xf32, #tpu.memory_space<vmem>>, %arg6: memref<8x64xbf16, #tpu.memory_space<vmem>>, %arg7: memref<1x8x64xf32, #tpu.memory_space<vmem>>, %arg8: memref<1x8x64xf32, #tpu.memory_space<vmem>>) attributes {dimension_semantics = [#tpu.dimension_semantics<parallel>, #tpu.dimension_semantics<parallel>, #tpu.dimension_semantics<arbitrary>], iteration_bounds = array<i64: 1, 1, 1>, scalar_prefetch = 0 : i64, scratch_operands = 0 : i64, tpu.core_type = #tpu.core_type<tc>, window_params = [{transform_indices = @transform_0, window_bounds = array<i64: 8, 512>}, {transform_indices = @transform_1, window_bounds = array<i64: 512, 64>}, {transform_indices = @transform_2, window_bounds = array<i64: 1, 64>}, {transform_indices = @transform_3, window_bounds = array<i64: 8, 64>}, {transform_indices = @transform_4, window_bounds = array<i64: 1, 8, 64>}, {transform_indices = @transform_5, window_bounds = array<i64: 1, 8, 64>}]} {
    %c0 = arith.constant 0 : index
    %c0_0 = arith.constant 0 : index
    %0 = vector.load %arg3[%c0, %c0_0] : memref<8x512xbf16, #tpu.memory_space<vmem>>, vector<8x512xbf16>
    %c0_1 = arith.constant 0 : index
    %c0_2 = arith.constant 0 : index
    %1 = vector.load %arg4[%c0_1, %c0_2] : memref<512x64xbf16, #tpu.memory_space<vmem>>, vector<512x64xbf16>
    %cst = arith.constant dense<0.000000e+00> : vector<8x64xf32>
    %2 = tpu.matmul %0, %1, %cst {dimension_numbers = #tpu.dot_dimension_numbers<[1], [0], [0], [1], [0, 0, 1, 1], [], []>} : vector<8x512xbf16>, vector<512x64xbf16>, vector<8x64xf32> -> vector<8x64xf32>
    %c0_3 = arith.constant 0 : index
    %c0_4 = arith.constant 0 : index
    %3 = vector.load %arg5[%c0_3, %c0_4] : memref<1x64xf32, #tpu.memory_space<vmem>>, vector<1x64xf32>
    %4 = vector.broadcast %3 : vector<1x64xf32> to vector<8x64xf32>
    %5 = arith.addf %2, %4 : vector<8x64xf32>
    %6 = arith.truncf %5 : vector<8x64xf32> to vector<8x64xbf16>
    %c0_5 = arith.constant 0 : index
    %c0_6 = arith.constant 0 : index
    %7 = vector.load %arg6[%c0_5, %c0_6] : memref<8x64xbf16, #tpu.memory_space<vmem>>, vector<8x64xbf16>
    tpu.vector_store %arg6[%c0_5, %c0_6], %6 {strides = array<i32>} : memref<8x64xbf16, #tpu.memory_space<vmem>>, vector<8x64xbf16>,
    %cst_7 = arith.constant dense<0.000000e+00> : vector<64xf32>
    %8 = vector.multi_reduction <add>, %5, %cst_7 [0] : vector<8x64xf32> to vector<64xf32>
    %9 = vector.shape_cast %8 : vector<64xf32> to vector<1x64xf32>
    %10 = arith.mulf %5, %5 : vector<8x64xf32>
    %cst_8 = arith.constant dense<0.000000e+00> : vector<64xf32>
    %11 = vector.multi_reduction <add>, %10, %cst_8 [0] : vector<8x64xf32> to vector<64xf32>
    %12 = vector.shape_cast %11 : vector<64xf32> to vector<1x64xf32>
    %13 = tpu.iota {dimensions = array<i32: 0>} : vector<8x64xi32>
    %c0_i32 = arith.constant 0 : i32
    %14 = vector.broadcast %c0_i32 : i32 to vector<8x64xi32>
    %15 = arith.cmpi eq, %13, %14 : vector<8x64xi32>
    %cst_9 = arith.constant 0.000000e+00 : f32
    %16 = vector.shape_cast %9 : vector<1x64xf32> to vector<1x64xf32>
    %17 = vector.broadcast %16 : vector<1x64xf32> to vector<8x64xf32>
    %18 = vector.broadcast %cst_9 : f32 to vector<8x64xf32>
    %19 = arith.select %15, %17, %18 : vector<8x64xi1>, vector<8x64xf32>
    %20 = vector.shape_cast %19 : vector<8x64xf32> to vector<1x8x64xf32>
    %c0_10 = arith.constant 0 : index
    %c0_11 = arith.constant 0 : index
    %c0_12 = arith.constant 0 : index
    %21 = vector.load %arg7[%c0_10, %c0_11, %c0_12] : memref<1x8x64xf32, #tpu.memory_space<vmem>>, vector<1x8x64xf32>
    tpu.vector_store %arg7[%c0_10, %c0_11, %c0_12], %20 {strides = array<i32>} : memref<1x8x64xf32, #tpu.memory_space<vmem>>, vector<1x8x64xf32>,
    %c0_i32_13 = arith.constant 0 : i32
    %22 = vector.broadcast %c0_i32_13 : i32 to vector<8x64xi32>
    %23 = arith.cmpi eq, %13, %22 : vector<8x64xi32>
    %cst_14 = arith.constant 0.000000e+00 : f32
    %24 = vector.shape_cast %12 : vector<1x64xf32> to vector<1x64xf32>
    %25 = vector.broadcast %24 : vector<1x64xf32> to vector<8x64xf32>
    %26 = vector.broadcast %cst_14 : f32 to vector<8x64xf32>
    %27 = arith.select %23, %25, %26 : vector<8x64xi1>, vector<8x64xf32>
    %28 = vector.shape_cast %27 : vector<8x64xf32> to vector<1x8x64xf32>
    %c0_15 = arith.constant 0 : index
    %c0_16 = arith.constant 0 : index
    %c0_17 = arith.constant 0 : index
    %29 = vector.load %arg8[%c0_15, %c0_16, %c0_17] : memref<1x8x64xf32, #tpu.memory_space<vmem>>, vector<1x8x64xf32>
    tpu.vector_store %arg8[%c0_15, %c0_16, %c0_17], %28 {strides = array<i32>} : memref<1x8x64xf32, #tpu.memory_space<vmem>>, vector<1x8x64xf32>,
    return
  }
  func.func @transform_0(%arg0: i32, %arg1: i32, %arg2: i32) -> (i32, i32) {
    %c0_i32 = arith.constant 0 : i32
    return %arg0, %arg2 : i32, i32
  }
  func.func @transform_1(%arg0: i32, %arg1: i32, %arg2: i32) -> (i32, i32) {
    %c0_i32 = arith.constant 0 : i32
    return %arg2, %arg1 : i32, i32
  }
  func.func @transform_2(%arg0: i32, %arg1: i32, %arg2: i32) -> (i32, i32) {
    %c0_i32 = arith.constant 0 : i32
    %c0_i32_0 = arith.constant 0 : i32
    return %c0_i32, %arg1 : i32, i32
  }
  func.func @transform_3(%arg0: i32, %arg1: i32, %arg2: i32) -> (i32, i32) {
    %c0_i32 = arith.constant 0 : i32
    return %arg0, %arg1 : i32, i32
  }
  func.func @transform_4(%arg0: i32, %arg1: i32, %arg2: i32) -> (i32, i32, i32) {
    %c0_i32 = arith.constant 0 : i32
    %c0_i32_0 = arith.constant 0 : i32
    return %arg0, %c0_i32, %arg1 : i32, i32, i32
  }
  func.func @transform_5(%arg0: i32, %arg1: i32, %arg2: i32) -> (i32, i32, i32) {
    %c0_i32 = arith.constant 0 : i32
    %c0_i32_0 = arith.constant 0 : i32
    return %arg0, %c0_i32, %arg1 : i32, i32, i32
  }
}

module attributes {stable_mosaic.version = 11 : i64} {
  func.func @kernel(%arg0: i32, %arg1: i32, %arg2: i32, %arg3: memref<32x512xbf16, #tpu.memory_space<vmem>>, %arg4: memref<512x32xbf16, #tpu.memory_space<vmem>>, %arg5: memref<1x32xf32, #tpu.memory_space<vmem>>, %arg6: memref<32x32xbf16, #tpu.memory_space<vmem>>, %arg7: memref<1x8x32xf32, #tpu.memory_space<vmem>>, %arg8: memref<1x8x32xf32, #tpu.memory_space<vmem>>) attributes {dimension_semantics = [#tpu.dimension_semantics<parallel>, #tpu.dimension_semantics<parallel>, #tpu.dimension_semantics<arbitrary>], iteration_bounds = array<i64: 1, 1, 1>, scalar_prefetch = 0 : i64, scratch_operands = 0 : i64, tpu.core_type = #tpu.core_type<tc>, window_params = [{transform_indices = @transform_0, window_bounds = array<i64: 32, 512>}, {transform_indices = @transform_1, window_bounds = array<i64: 512, 32>}, {transform_indices = @transform_2, window_bounds = array<i64: 1, 32>}, {transform_indices = @transform_3, window_bounds = array<i64: 32, 32>}, {transform_indices = @transform_4, window_bounds = array<i64: 1, 8, 32>}, {transform_indices = @transform_5, window_bounds = array<i64: 1, 8, 32>}]} {
    %c0 = arith.constant 0 : index
    %c0_0 = arith.constant 0 : index
    %0 = vector.load %arg3[%c0, %c0_0] : memref<32x512xbf16, #tpu.memory_space<vmem>>, vector<32x512xbf16>
    %c0_1 = arith.constant 0 : index
    %c0_2 = arith.constant 0 : index
    %1 = vector.load %arg4[%c0_1, %c0_2] : memref<512x32xbf16, #tpu.memory_space<vmem>>, vector<512x32xbf16>
    %cst = arith.constant dense<0.000000e+00> : vector<32x32xf32>
    %2 = tpu.matmul %0, %1, %cst {dimension_numbers = #tpu.dot_dimension_numbers<[1], [0], [0], [1], [0, 0, 1, 1], [], []>} : vector<32x512xbf16>, vector<512x32xbf16>, vector<32x32xf32> -> vector<32x32xf32>
    %c0_3 = arith.constant 0 : index
    %c0_4 = arith.constant 0 : index
    %3 = vector.load %arg5[%c0_3, %c0_4] : memref<1x32xf32, #tpu.memory_space<vmem>>, vector<1x32xf32>
    %4 = vector.broadcast %3 : vector<1x32xf32> to vector<32x32xf32>
    %5 = arith.addf %2, %4 : vector<32x32xf32>
    %6 = arith.truncf %5 : vector<32x32xf32> to vector<32x32xbf16>
    %c0_5 = arith.constant 0 : index
    %c0_6 = arith.constant 0 : index
    %7 = vector.load %arg6[%c0_5, %c0_6] : memref<32x32xbf16, #tpu.memory_space<vmem>>, vector<32x32xbf16>
    tpu.vector_store %arg6[%c0_5, %c0_6], %6 {strides = array<i32>} : memref<32x32xbf16, #tpu.memory_space<vmem>>, vector<32x32xbf16>,
    %cst_7 = arith.constant dense<0.000000e+00> : vector<32xf32>
    %8 = vector.multi_reduction <add>, %5, %cst_7 [0] : vector<32x32xf32> to vector<32xf32>
    %9 = vector.shape_cast %8 : vector<32xf32> to vector<1x32xf32>
    %10 = arith.mulf %5, %5 : vector<32x32xf32>
    %cst_8 = arith.constant dense<0.000000e+00> : vector<32xf32>
    %11 = vector.multi_reduction <add>, %10, %cst_8 [0] : vector<32x32xf32> to vector<32xf32>
    %12 = vector.shape_cast %11 : vector<32xf32> to vector<1x32xf32>
    %13 = tpu.iota {dimensions = array<i32: 0>} : vector<8x32xi32>
    %c0_i32 = arith.constant 0 : i32
    %14 = vector.broadcast %c0_i32 : i32 to vector<8x32xi32>
    %15 = arith.cmpi eq, %13, %14 : vector<8x32xi32>
    %cst_9 = arith.constant 0.000000e+00 : f32
    %16 = vector.shape_cast %9 : vector<1x32xf32> to vector<1x32xf32>
    %17 = vector.broadcast %16 : vector<1x32xf32> to vector<8x32xf32>
    %18 = vector.broadcast %cst_9 : f32 to vector<8x32xf32>
    %19 = arith.select %15, %17, %18 : vector<8x32xi1>, vector<8x32xf32>
    %20 = vector.shape_cast %19 : vector<8x32xf32> to vector<1x8x32xf32>
    %c0_10 = arith.constant 0 : index
    %c0_11 = arith.constant 0 : index
    %c0_12 = arith.constant 0 : index
    %21 = vector.load %arg7[%c0_10, %c0_11, %c0_12] : memref<1x8x32xf32, #tpu.memory_space<vmem>>, vector<1x8x32xf32>
    tpu.vector_store %arg7[%c0_10, %c0_11, %c0_12], %20 {strides = array<i32>} : memref<1x8x32xf32, #tpu.memory_space<vmem>>, vector<1x8x32xf32>,
    %c0_i32_13 = arith.constant 0 : i32
    %22 = vector.broadcast %c0_i32_13 : i32 to vector<8x32xi32>
    %23 = arith.cmpi eq, %13, %22 : vector<8x32xi32>
    %cst_14 = arith.constant 0.000000e+00 : f32
    %24 = vector.shape_cast %12 : vector<1x32xf32> to vector<1x32xf32>
    %25 = vector.broadcast %24 : vector<1x32xf32> to vector<8x32xf32>
    %26 = vector.broadcast %cst_14 : f32 to vector<8x32xf32>
    %27 = arith.select %23, %25, %26 : vector<8x32xi1>, vector<8x32xf32>
    %28 = vector.shape_cast %27 : vector<8x32xf32> to vector<1x8x32xf32>
    %c0_15 = arith.constant 0 : index
    %c0_16 = arith.constant 0 : index
    %c0_17 = arith.constant 0 : index
    %29 = vector.load %arg8[%c0_15, %c0_16, %c0_17] : memref<1x8x32xf32, #tpu.memory_space<vmem>>, vector<1x8x32xf32>
    tpu.vector_store %arg8[%c0_15, %c0_16, %c0_17], %28 {strides = array<i32>} : memref<1x8x32xf32, #tpu.memory_space<vmem>>, vector<1x8x32xf32>,
    return
  }
  func.func @transform_0(%arg0: i32, %arg1: i32, %arg2: i32) -> (i32, i32) {
    %c0_i32 = arith.constant 0 : i32
    return %arg0, %arg2 : i32, i32
  }
  func.func @transform_1(%arg0: i32, %arg1: i32, %arg2: i32) -> (i32, i32) {
    %c0_i32 = arith.constant 0 : i32
    return %arg2, %arg1 : i32, i32
  }
  func.func @transform_2(%arg0: i32, %arg1: i32, %arg2: i32) -> (i32, i32) {
    %c0_i32 = arith.constant 0 : i32
    %c0_i32_0 = arith.constant 0 : i32
    return %c0_i32, %arg1 : i32, i32
  }
  func.func @transform_3(%arg0: i32, %arg1: i32, %arg2: i32) -> (i32, i32) {
    %c0_i32 = arith.constant 0 : i32
    return %arg0, %arg1 : i32, i32
  }
  func.func @transform_4(%arg0: i32, %arg1: i32, %arg2: i32) -> (i32, i32, i32) {
    %c0_i32 = arith.constant 0 : i32
    %c0_i32_0 = arith.constant 0 : i32
    return %arg0, %c0_i32, %arg1 : i32, i32, i32
  }
  func.func @transform_5(%arg0: i32, %arg1: i32, %arg2: i32) -> (i32, i32, i32) {
    %c0_i32 = arith.constant 0 : i32
    %c0_i32_0 = arith.constant 0 : i32
    return %arg0, %c0_i32, %arg1 : i32, i32, i32
  }
}

module attributes {stable_mosaic.version = 11 : i64} {
  func.func @kernel(%arg0: i32, %arg1: i32, %arg2: i32, %arg3: memref<512x1024xbf16, #tpu.memory_space<vmem>>, %arg4: memref<1024x3xbf16, #tpu.memory_space<vmem>>, %arg5: memref<1x3xf32, #tpu.memory_space<vmem>>, %arg6: memref<512x3xf32, #tpu.memory_space<vmem>>) attributes {dimension_semantics = [#tpu.dimension_semantics<parallel>, #tpu.dimension_semantics<parallel>, #tpu.dimension_semantics<arbitrary>], iteration_bounds = array<i64: 1, 1, 1>, scalar_prefetch = 0 : i64, scratch_operands = 0 : i64, tpu.core_type = #tpu.core_type<tc>, window_params = [{transform_indices = @transform_0, window_bounds = array<i64: 512, 1024>}, {transform_indices = @transform_1, window_bounds = array<i64: 1024, 3>}, {transform_indices = @transform_2, window_bounds = array<i64: 1, 3>}, {transform_indices = @transform_3, window_bounds = array<i64: 512, 3>}]} {
    %c0 = arith.constant 0 : index
    %c0_0 = arith.constant 0 : index
    %0 = vector.load %arg3[%c0, %c0_0] : memref<512x1024xbf16, #tpu.memory_space<vmem>>, vector<512x1024xbf16>
    %c0_1 = arith.constant 0 : index
    %c0_2 = arith.constant 0 : index
    %1 = vector.load %arg4[%c0_1, %c0_2] : memref<1024x3xbf16, #tpu.memory_space<vmem>>, vector<1024x3xbf16>
    %cst = arith.constant dense<0.000000e+00> : vector<512x3xf32>
    %2 = tpu.matmul %0, %1, %cst {dimension_numbers = #tpu.dot_dimension_numbers<[1], [0], [0], [1], [0, 0, 1, 1], [], []>} : vector<512x1024xbf16>, vector<1024x3xbf16>, vector<512x3xf32> -> vector<512x3xf32>
    %c0_3 = arith.constant 0 : index
    %c0_4 = arith.constant 0 : index
    %3 = vector.load %arg5[%c0_3, %c0_4] : memref<1x3xf32, #tpu.memory_space<vmem>>, vector<1x3xf32>
    %4 = vector.broadcast %3 : vector<1x3xf32> to vector<512x3xf32>
    %5 = arith.addf %2, %4 : vector<512x3xf32>
    %6 = math.tanh %5 : vector<512x3xf32>
    %c0_5 = arith.constant 0 : index
    %c0_6 = arith.constant 0 : index
    %7 = vector.load %arg6[%c0_5, %c0_6] : memref<512x3xf32, #tpu.memory_space<vmem>>, vector<512x3xf32>
    tpu.vector_store %arg6[%c0_5, %c0_6], %6 {strides = array<i32>} : memref<512x3xf32, #tpu.memory_space<vmem>>, vector<512x3xf32>,
    return
  }
  func.func @transform_0(%arg0: i32, %arg1: i32, %arg2: i32) -> (i32, i32) {
    %c0_i32 = arith.constant 0 : i32
    return %arg0, %arg2 : i32, i32
  }
  func.func @transform_1(%arg0: i32, %arg1: i32, %arg2: i32) -> (i32, i32) {
    %c0_i32 = arith.constant 0 : i32
    return %arg2, %arg1 : i32, i32
  }
  func.func @transform_2(%arg0: i32, %arg1: i32, %arg2: i32) -> (i32, i32) {
    %c0_i32 = arith.constant 0 : i32
    %c0_i32_0 = arith.constant 0 : i32
    return %c0_i32, %arg1 : i32, i32
  }
  func.func @transform_3(%arg0: i32, %arg1: i32, %arg2: i32) -> (i32, i32) {
    %c0_i32 = arith.constant 0 : i32
    return %arg0, %arg1 : i32, i32
  }
}

</mosaic_0001>

<bundles_post_ra>
// kernel: mula_gan_generator.28
= control target key start
LH: loop header
LB: loop body
LE: loop exit
PB: predicated region body
PF: predicated region fallthrough
CT: control target
= control target key end

     0   :  { %8 = vsyncpa [#allocation3], 0  ;;  %s501_s12 = smov [#allocation2]   ;;  %s653_s0 = inlined_call_operand.vmem [shape: bf16[128,48], index: 0, kind: input, shape index: {}]   ;;  %s654_s1 = inlined_call_operand.hbm [shape: bf16[48,32], index: 1, kind: input, shape index: {}]   ;;  %s655_s2 = inlined_call_operand.vmem [shape: f32[1,32], index: 2, kind: input, shape index: {}]   ;;  %s656_s3 = inlined_call_operand.vmem [shape: bf16[128,32], index: 3, kind: output, shape index: {}]  }
   0x1   :  { %s16_s13 = sshll.u32 %s501_s12, 4  ;;  %s477_s16 = scalar_lea.hbm %s654_s1, 384  ;;  %s17_s13 = int_to_ptr.vmem [resolvable:$true] %s16_s13 }
   0x2   :  { %p478_p0 = scmp.ne.s32.totalorder %s654_s1, %s477_s16  ;;  %p481_p1 = scmp.lt.u32.totalorder %s477_s16, %s654_s1 }
   0x4   :  { %p483_p2 = pnand %p481_p1, %p478_p0 }
   0x6   :  { %486 = shalt.err (!%p483_p2)
}
   0x7   :  { %s487_s21 = scalar_lea.vmem %s17_s13, 384  ;;  %p492_p4 = scmp.lt.s32.totalorder %s17_s13, %s17_s13 }
   0x8   :  { %p488_p3 = scmp.ne.s32.totalorder %s17_s13, %s487_s21  ;;  %p493_p5 = scmp.lt.s32.totalorder %s487_s21, %s487_s21 }
   0xa   :  { %p494_p6 = por %p493_p5, %p492_p4 }
   0xc   :  { %p495_p7 = pnand %p494_p6, %p488_p3 }
   0xe   :  { %498 = shalt.err (!%p495_p7)
}
   0xf   :  { %s502_s22 = smov 64   ;;  %s503_s23 = smov 4  }
  0x10   :  { %22 = dma.hbm_to_vmem [thread:$0]  %s654_s1, 384, %s17_s13, [#allocation3], %s502_s22, %s502_s22, %s503_s23  }
  0x11   :  { %499 = dma.done.wait [#allocation3], 384  }
  0x12   :  { %500 = vsyncadd [#allocation3], 4294966912  ;;  %v466_v0 = vld [vmem:[#allocation2] sm:$0xff]   ;;  %v467_v1 = vld [vmem:[#allocation2 + $0x8] sm:$0xff]   ;;  %vm116_vm0 = vcmask 392192   ;;  %vm350_vm1 = vcmask 257024  }
  0x13   :  { %435 = vmatprep.subr.bf16.mxu0 %v466_v0  ;;  %457 = vmatprep.subr.bf16.mxu1 %v466_v0  ;;  %v468_v2 = vld [vmem:[#allocation2 + $0x10] sm:$0xff]   ;;  %v469_v3 = vld [vmem:[%s653_s0] sm:$0xff]   ;;  %v471_v5 = vld [vmem:[%s653_s0 + $0x8] sm:$0xff]  }
  0x14   :  { %436 = vmatpush3.bf16.msra.mxu0 %v466_v0  ;;  %460 = vmatpush3.bf16.msra.mxu1 %v466_v0  ;;  %v470_v4 = vld [vmem:[%s653_s0 + $0x20] sm:$0xff]   ;;  %v472_v6 = vld [vmem:[%s653_s0 + $0x28] sm:$0xff]   ;;  %v473_v7 = vld [vmem:[%s653_s0 + $0x10] sm:$0xff]  }
  0x15   :  { %437 = vmatprep.subr.bf16.mxu0 %v467_v1  ;;  %458 = vmatprep.subr.bf16.mxu1 %v467_v1  ;;  %v474_v8 = vld [vmem:[%s653_s0 + $0x30] sm:$0xff]   ;;  %v475_v9 = vld [vmem:[%s653_s0 + $0x18] sm:$0xff]   ;;  %v571_v11 = vld [vmem:[%s655_s2] ss:$0 sm:$0xff] }
  0x16   :  { %441 = vmatprep.mubr.msk.bf16.mxu0 %vm116_vm0, %v469_v3  ;;  %449 = vmatprep.mubr.msk.bf16.mxu1 %vm116_vm0, %v470_v4  ;;  %v476_v10 = vld [vmem:[%s653_s0 + $0x38] sm:$0xff]  }
  0x18   :  { %438 = vmatpush3.bf16.msra.mxu0 %v467_v1  ;;  %461 = vmatpush3.bf16.msra.mxu1 %v467_v1 }
  0x19   :  { %439 = vmatprep.subr.bf16.mxu0 %v468_v2  ;;  %459 = vmatprep.subr.bf16.mxu1 %v468_v2 }
  0x1c   :  { %440 = vmatpush3.bf16.msra.mxu0 %v468_v2  ;;  %462 = vmatpush3.bf16.msra.mxu1 %v468_v2 }
  0x1f   :  { %442 = vmatmul.mubr.msk.bf16.vlgmr.msra.gmra.mrb[0].mxu0 %vm116_vm0, %v471_v5  ;;  %450 = vmatmul.mubr.msk.bf16.vlgmr.msra.gmra.mrb[0].mxu1 %vm116_vm0, %v472_v6 }
  0x20   :  { %445 = vmatprep.mubr.msk.bf16.mxu0 %vm116_vm0, %v473_v7  ;;  %453 = vmatprep.mubr.msk.bf16.mxu1 %vm116_vm0, %v474_v8 }
  0x27   :  { %446 = vmatmul.mubr.msk.bf16.gmra.mrb[4].mxu0 %vm116_vm0, %v475_v9  ;;  %454 = vmatmul.mubr.msk.bf16.gmra.mrb[4].mxu1 %vm116_vm0, %v476_v10 }
  0xf2   :  { %v443_v12 = vpop.f32.mrb[0].mxu0  ;;  %v451_v13 = vpop.f32.mrb[0].mxu1 }
  0xf3   :  { %v184_v14 = vadd.f32 %v443_v12, %v571_v11  ;;  %v216_v15 = vadd.f32 %v451_v13, %v571_v11  ;;  %v175_v16 = vpop.f32.mrb[1].mxu0  ;;  %v207_v17 = vpop.f32.mrb[1].mxu1 }
  0xf4   :  { %v176_v18 = vadd.f32 %v571_v11, %v175_v16  ;;  %v208_v19 = vadd.f32 %v571_v11, %v207_v17  ;;  %v444_v20 = vpop.f32.mrb[2].mxu0  ;;  %v452_v21 = vpop.f32.mrb[2].mxu1 }
  0xf5   :  { %vm240_vm2 = vcmp.ge.f32.partialorder %v184_v14, 0.0  ;;  %v256_v22 = vmul.f32 0.2, %v184_v14  ;;  %vm248_vm3 = vcmp.ge.f32.partialorder %v216_v15, 0.0  ;;  %v264_v23 = vmul.f32 0.2, %v216_v15 }
  0xf6   :  { %vm238_vm4 = vcmp.ge.f32.partialorder %v176_v18, 0.0  ;;  %v254_v24 = vmul.f32 0.2, %v176_v18  ;;  %vm246_vm5 = vcmp.ge.f32.partialorder %v208_v19, 0.0  ;;  %v262_v25 = vmul.f32 0.2, %v208_v19 }
  0xf7   :  { %v272_v26 = vsel %vm240_vm2, %v184_v14, %v256_v22  ;;  %v280_v27 = vsel %vm248_vm3, %v216_v15, %v264_v23  ;;  %v187_v28 = vadd.f32 %v444_v20, %v571_v11  ;;  %v219_v29 = vadd.f32 %v452_v21, %v571_v11  ;;  %v178_v30 = vpop.f32.mrb[3].mxu0  ;;  %v210_v31 = vpop.f32.mrb[3].mxu1 }
  0xf8   :  { %v410_v32 = vpack.c.bf16 %v272_v26, %v272_v26  ;;  %v418_v33 = vpack.c.bf16 %v280_v27, %v280_v27  ;;  %v270_v34 = vsel %vm238_vm4, %v176_v18, %v254_v24  ;;  %v278_v35 = vsel %vm246_vm5, %v208_v19, %v262_v25 }
  0xf9   :  { %v408_v36 = vpack.c.bf16 %v270_v34, %v270_v34  ;;  %v416_v37 = vpack.c.bf16 %v278_v35, %v278_v35  ;;  %vm241_vm6 = vcmp.ge.f32.partialorder %v187_v28, 0.0  ;;  %v257_v38 = vmul.f32 0.2, %v187_v28 }
  0xfa   :  { %353 = vst.msk [vmem:[%s656_s3 + $0x8] sm:$0xf] %vm350_vm1, %v410_v32  ;;  %361 = vst.msk [vmem:[%s656_s3 + $0x28] sm:$0xf] %vm350_vm1, %v418_v33  ;;  %vm249_vm7 = vcmp.ge.f32.partialorder %v219_v29, 0.0  ;;  %v179_v40 = vadd.f32 %v571_v11, %v178_v30  ;;  %v211_v41 = vadd.f32 %v571_v11, %v210_v31  ;;  %v447_v42 = vpop.f32.mrb[4].mxu0 }
  0xfb   :  { %v265_v39 = vmul.f32 0.2, %v219_v29  ;;  %v455_v43 = vpop.f32.mrb[4].mxu1  ;;  %351 = vst.msk [vmem:[%s656_s3] sm:$0xf] %vm350_vm1, %v408_v36  ;;  %v273_v44 = vsel %vm241_vm6, %v187_v28, %v257_v38  ;;  %v200_v45 = vadd.f32 %v447_v42, %v571_v11  ;;  %v191_v47 = vpop.f32.mrb[5].mxu0 }
  0xfc   :  { %359 = vst.msk [vmem:[%s656_s3 + $0x20] sm:$0xf] %vm350_vm1, %v416_v37  ;;  %v232_v46 = vadd.f32 %v455_v43, %v571_v11  ;;  %v223_v48 = vpop.f32.mrb[5].mxu1  ;;  %v411_v49 = vpack.c.bf16 %v273_v44, %v273_v44  ;;  %vm239_vm8 = vcmp.ge.f32.partialorder %v179_v40, 0.0  ;;  %v255_v51 = vmul.f32 0.2, %v179_v40 }
  0xfd   :  { %v281_v50 = vsel %vm249_vm7, %v219_v29, %v265_v39  ;;  %v448_v52 = vpop.f32.mrb[6].mxu0  ;;  %v456_v53 = vpop.f32.mrb[6].mxu1  ;;  %vm247_vm9 = vcmp.ge.f32.partialorder %v211_v41, 0.0  ;;  %v263_v55 = vmul.f32 0.2, %v211_v41  ;;  %vm244_vm10 = vcmp.ge.f32.partialorder %v200_v45, 0.0 }
  0xfe   :  { %v419_v54 = vpack.c.bf16 %v281_v50, %v281_v50  ;;  %v194_v56 = vpop.f32.mrb[7].mxu0  ;;  %v226_v57 = vpop.f32.mrb[7].mxu1  ;;  %354 = vst.msk [vmem:[%s656_s3 + $0xc] sm:$0xf] %vm350_vm1, %v411_v49  ;;  %v271_v58 = vsel %vm239_vm8, %v179_v40, %v255_v51  ;;  %v260_v59 = vmul.f32 0.2, %v200_v45  ;;  %v192_v63 = vadd.f32 %v571_v11, %v191_v47 }
  0xff   :  { %vm252_vm11 = vcmp.ge.f32.partialorder %v232_v46, 0.0  ;;  %v268_v60 = vmul.f32 0.2, %v232_v46  ;;  %v409_v61 = vpack.c.bf16 %v271_v58, %v271_v58  ;;  %v279_v62 = vsel %vm247_vm9, %v211_v41, %v263_v55 }
 0x100   :  { %362 = vst.msk [vmem:[%s656_s3 + $0x2c] sm:$0xf] %vm350_vm1, %v419_v54  ;;  %v224_v0 = vadd.f32 %v571_v11, %v223_v48  ;;  %v417_v1 = vpack.c.bf16 %v279_v62, %v279_v62  ;;  %v276_v2 = vsel %vm244_vm10, %v200_v45, %v260_v59  ;;  %v203_v4 = vadd.f32 %v448_v52, %v571_v11 }
 0x101   :  { %v284_v3 = vsel %vm252_vm11, %v232_v46, %v268_v60  ;;  %352 = vst.msk [vmem:[%s656_s3 + $0x4] sm:$0xf] %vm350_vm1, %v409_v61  ;;  %v414_v5 = vpack.c.bf16 %v276_v2, %v276_v2  ;;  %vm242_vm12 = vcmp.ge.f32.partialorder %v192_v63, 0.0  ;;  %v258_v7 = vmul.f32 0.2, %v192_v63 }
 0x102   :  { %v422_v6 = vpack.c.bf16 %v284_v3, %v284_v3  ;;  %360 = vst.msk [vmem:[%s656_s3 + $0x24] sm:$0xf] %vm350_vm1, %v417_v1  ;;  %vm250_vm13 = vcmp.ge.f32.partialorder %v224_v0, 0.0  ;;  %v266_v8 = vmul.f32 0.2, %v224_v0  ;;  %vm245_vm14 = vcmp.ge.f32.partialorder %v203_v4, 0.0 }
 0x103   :  { %v261_v9 = vmul.f32 0.2, %v203_v4  ;;  %357 = vst.msk [vmem:[%s656_s3 + $0x18] sm:$0xf] %vm350_vm1, %v414_v5  ;;  %v274_v10 = vsel %vm242_vm12, %v192_v63, %v258_v7  ;;  %v235_v12 = vadd.f32 %v456_v53, %v571_v11  ;;  %v195_v13 = vadd.f32 %v571_v11, %v194_v56 }
 0x104   :  { %365 = vst.msk [vmem:[%s656_s3 + $0x38] sm:$0xf] %vm350_vm1, %v422_v6  ;;  %v227_v14 = vadd.f32 %v571_v11, %v226_v57  ;;  %v412_v15 = vpack.c.bf16 %v274_v10, %v274_v10  ;;  %v282_v16 = vsel %vm250_vm13, %v224_v0, %v266_v8 }
 0x105   :  { %v277_v17 = vsel %vm245_vm14, %v203_v4, %v261_v9  ;;  %v420_v18 = vpack.c.bf16 %v282_v16, %v282_v16  ;;  %vm253_vm15 = vcmp.ge.f32.partialorder %v235_v12, 0.0  ;;  %v269_v20 = vmul.f32 0.2, %v235_v12 }
 0x106   :  { %v415_v19 = vpack.c.bf16 %v277_v17, %v277_v17  ;;  %355 = vst.msk [vmem:[%s656_s3 + $0x10] sm:$0xf] %vm350_vm1, %v412_v15  ;;  %vm243_vm0 = vcmp.ge.f32.partialorder %v195_v13, 0.0  ;;  %v259_v21 = vmul.f32 0.2, %v195_v13  ;;  %vm251_vm2 = vcmp.ge.f32.partialorder %v227_v14, 0.0 }
 0x107   :  { %v267_v22 = vmul.f32 0.2, %v227_v14  ;;  %363 = vst.msk [vmem:[%s656_s3 + $0x30] sm:$0xf] %vm350_vm1, %v420_v18  ;;  %v285_v11 = vsel %vm253_vm15, %v235_v12, %v269_v20 }
 0x108   :  { %358 = vst.msk [vmem:[%s656_s3 + $0x1c] sm:$0xf] %vm350_vm1, %v415_v19  ;;  %v423_v23 = vpack.c.bf16 %v285_v11, %v285_v11  ;;  %v275_v24 = vsel %vm243_vm0, %v195_v13, %v259_v21 }
 0x109   :  { %v283_v25 = vsel %vm251_vm2, %v227_v14, %v267_v22  ;;  %v413_v26 = vpack.c.bf16 %v275_v24, %v275_v24 }
 0x10a   :  { %v421_v27 = vpack.c.bf16 %v283_v25, %v283_v25  ;;  %366 = vst.msk [vmem:[%s656_s3 + $0x3c] sm:$0xf] %vm350_vm1, %v423_v23 }
 0x10b   :  { %356 = vst.msk [vmem:[%s656_s3 + $0x14] sm:$0xf] %vm350_vm1, %v413_v26 }
 0x10c   :  { %364 = vst.msk [vmem:[%s656_s3 + $0x34] sm:$0xf] %vm350_vm1, %v421_v27 }
 0x10d   :  { %371 = vsyncpa [#allocation3], 1 }

// kernel: mula_gan_generator.30
= control target key start
LH: loop header
LB: loop body
LE: loop exit
PB: predicated region body
PF: predicated region fallthrough
CT: control target
= control target key end

     0   :  { %vm172_vm0 = vcmask 257024   ;;  %s416_s0 = inlined_call_operand.vmem [shape: bf16[128,32], index: 0, kind: input, shape index: {}]   ;;  %s417_s1 = inlined_call_operand.vmem [shape: f32[1,32], index: 1, kind: input, shape index: {}]   ;;  %s418_s2 = inlined_call_operand.vmem [shape: f32[1,32], index: 2, kind: input, shape index: {}]   ;;  %s419_s3 = inlined_call_operand.vmem [shape: bf16[128,32], index: 3, kind: output, shape index: {}]  }
   0x1   :  { %v228_v0 = vld [vmem:[%s416_s0] sm:$0xff]   ;;  %v259_v4 = vld [vmem:[%s416_s0 + $0x8] sm:$0xff]   ;;  %v260_v5 = vld [vmem:[%s416_s0 + $0x10] sm:$0xff]  }
   0x2   :  { %v292_v1 = vld [vmem:[%s417_s1] ss:$0 sm:$0xff]  ;;  %v229_v2 = vunpack.c.l.bf16 %v228_v0  ;;  %v230_v3 = vunpack.c.h.bf16 %v228_v0  ;;  %v261_v6 = vld [vmem:[%s416_s0 + $0x18] sm:$0xff]   ;;  %v233_v8 = vunpack.c.l.bf16 %v259_v4  ;;  %v234_v9 = vunpack.c.h.bf16 %v259_v4  ;;  %v263_v41 = vld [vmem:[%s416_s0 + $0x28] sm:$0xff]  }
   0x3   :  { %v306_v7 = vld [vmem:[%s418_s2] ss:$0 sm:$0xff]  ;;  %v237_v10 = vunpack.c.l.bf16 %v260_v5  ;;  %v238_v11 = vunpack.c.h.bf16 %v260_v5  ;;  %v241_v14 = vunpack.c.l.bf16 %v261_v6  ;;  %v242_v15 = vunpack.c.h.bf16 %v261_v6  ;;  %v264_v42 = vld [vmem:[%s416_s0 + $0x30] sm:$0xff]   ;;  %v265_v47 = vld [vmem:[%s416_s0 + $0x38] sm:$0xff]  }
   0x4   :  { %v53_v12 = vmul.f32 %v229_v2, %v292_v1  ;;  %v54_v13 = vmul.f32 %v230_v3, %v292_v1  ;;  %v55_v16 = vmul.f32 %v233_v8, %v292_v1  ;;  %v56_v17 = vmul.f32 %v234_v9, %v292_v1  ;;  %v262_v36 = vld [vmem:[%s416_s0 + $0x20] sm:$0xff]  }
   0x5   :  { %v57_v18 = vmul.f32 %v237_v10, %v292_v1  ;;  %v58_v19 = vmul.f32 %v238_v11, %v292_v1  ;;  %v59_v22 = vmul.f32 %v241_v14, %v292_v1  ;;  %v60_v23 = vmul.f32 %v242_v15, %v292_v1 }
   0x6   :  { %v76_v20 = vadd.f32 %v306_v7, %v53_v12  ;;  %v77_v21 = vadd.f32 %v306_v7, %v54_v13  ;;  %v78_v24 = vadd.f32 %v306_v7, %v55_v16  ;;  %v79_v25 = vadd.f32 %v306_v7, %v56_v17 }
   0x7   :  { %v80_v26 = vadd.f32 %v306_v7, %v57_v18  ;;  %v81_v27 = vadd.f32 %v306_v7, %v58_v19  ;;  %v82_v30 = vadd.f32 %v306_v7, %v59_v22  ;;  %v83_v31 = vadd.f32 %v306_v7, %v60_v23 }
   0x8   :  { %v92_v28 = vmax.f32 %v76_v20, 0.0  ;;  %v93_v29 = vmax.f32 %v77_v21, 0.0  ;;  %v94_v32 = vmax.f32 %v78_v24, 0.0  ;;  %v95_v33 = vmax.f32 %v79_v25, 0.0 }
   0x9   :  { %v96_v34 = vmax.f32 %v80_v26, 0.0  ;;  %v97_v35 = vmax.f32 %v81_v27, 0.0  ;;  %v98_v39 = vmax.f32 %v82_v30, 0.0  ;;  %v99_v40 = vmax.f32 %v83_v31, 0.0 }
   0xa   :  { %v211_v37 = vpack.c.bf16 %v92_v28, %v92_v28  ;;  %v212_v38 = vpack.c.bf16 %v93_v29, %v93_v29  ;;  %v213_v43 = vpack.c.bf16 %v94_v32, %v94_v32  ;;  %v214_v44 = vpack.c.bf16 %v95_v33, %v95_v33 }
   0xb   :  { %v215_v45 = vpack.c.bf16 %v96_v34, %v96_v34  ;;  %v216_v46 = vpack.c.bf16 %v97_v35, %v97_v35  ;;  %v217_v48 = vpack.c.bf16 %v98_v39, %v98_v39  ;;  %v218_v49 = vpack.c.bf16 %v99_v40, %v99_v40 }
   0xc   :  { %173 = vst.msk [vmem:[%s419_s3] sm:$0xf] %vm172_vm0, %v211_v37  ;;  %174 = vst.msk [vmem:[%s419_s3 + $0x4] sm:$0xf] %vm172_vm0, %v212_v38  ;;  %v245_v50 = vunpack.c.l.bf16 %v262_v36  ;;  %v246_v51 = vunpack.c.h.bf16 %v262_v36  ;;  %v249_v52 = vunpack.c.l.bf16 %v263_v41  ;;  %v250_v53 = vunpack.c.h.bf16 %v263_v41 }
   0xd   :  { %175 = vst.msk [vmem:[%s419_s3 + $0x8] sm:$0xf] %vm172_vm0, %v213_v43  ;;  %176 = vst.msk [vmem:[%s419_s3 + $0xc] sm:$0xf] %vm172_vm0, %v214_v44  ;;  %v253_v54 = vunpack.c.l.bf16 %v264_v42  ;;  %v254_v55 = vunpack.c.h.bf16 %v264_v42  ;;  %v257_v58 = vunpack.c.l.bf16 %v265_v47  ;;  %v258_v59 = vunpack.c.h.bf16 %v265_v47 }
   0xe   :  { %177 = vst.msk [vmem:[%s419_s3 + $0x10] sm:$0xf] %vm172_vm0, %v215_v45  ;;  %178 = vst.msk [vmem:[%s419_s3 + $0x14] sm:$0xf] %vm172_vm0, %v216_v46  ;;  %v61_v56 = vmul.f32 %v245_v50, %v292_v1  ;;  %v62_v57 = vmul.f32 %v246_v51, %v292_v1  ;;  %v63_v60 = vmul.f32 %v249_v52, %v292_v1 }
   0xf   :  { %179 = vst.msk [vmem:[%s419_s3 + $0x18] sm:$0xf] %vm172_vm0, %v217_v48  ;;  %180 = vst.msk [vmem:[%s419_s3 + $0x1c] sm:$0xf] %vm172_vm0, %v218_v49  ;;  %v64_v61 = vmul.f32 %v250_v53, %v292_v1  ;;  %v65_v62 = vmul.f32 %v253_v54, %v292_v1  ;;  %v66_v63 = vmul.f32 %v254_v55, %v292_v1 }
  0x10   :  { %v84_v0 = vadd.f32 %v306_v7, %v61_v56  ;;  %v85_v2 = vadd.f32 %v306_v7, %v62_v57  ;;  %v67_v3 = vmul.f32 %v257_v58, %v292_v1  ;;  %v68_v4 = vmul.f32 %v258_v59, %v292_v1 }
  0x11   :  { %v86_v5 = vadd.f32 %v306_v7, %v63_v60  ;;  %v87_v6 = vadd.f32 %v306_v7, %v64_v61  ;;  %v88_v8 = vadd.f32 %v306_v7, %v65_v62  ;;  %v89_v9 = vadd.f32 %v306_v7, %v66_v63 }
  0x12   :  { %v100_v10 = vmax.f32 %v84_v0, 0.0  ;;  %v101_v11 = vmax.f32 %v85_v2, 0.0  ;;  %v90_v12 = vadd.f32 %v306_v7, %v67_v3  ;;  %v91_v13 = vadd.f32 %v306_v7, %v68_v4 }
  0x13   :  { %v102_v14 = vmax.f32 %v86_v5, 0.0  ;;  %v103_v15 = vmax.f32 %v87_v6, 0.0  ;;  %v104_v16 = vmax.f32 %v88_v8, 0.0  ;;  %v105_v17 = vmax.f32 %v89_v9, 0.0 }
  0x14   :  { %v219_v18 = vpack.c.bf16 %v100_v10, %v100_v10  ;;  %v220_v1 = vpack.c.bf16 %v101_v11, %v101_v11  ;;  %v106_v19 = vmax.f32 %v90_v12, 0.0  ;;  %v107_v20 = vmax.f32 %v91_v13, 0.0 }
  0x15   :  { %v221_v21 = vpack.c.bf16 %v102_v14, %v102_v14  ;;  %v222_v22 = vpack.c.bf16 %v103_v15, %v103_v15  ;;  %v223_v23 = vpack.c.bf16 %v104_v16, %v104_v16  ;;  %v224_v24 = vpack.c.bf16 %v105_v17, %v105_v17 }
  0x16   :  { %181 = vst.msk [vmem:[%s419_s3 + $0x20] sm:$0xf] %vm172_vm0, %v219_v18  ;;  %182 = vst.msk [vmem:[%s419_s3 + $0x24] sm:$0xf] %vm172_vm0, %v220_v1  ;;  %v225_v7 = vpack.c.bf16 %v106_v19, %v106_v19  ;;  %v226_v25 = vpack.c.bf16 %v107_v20, %v107_v20 }
  0x17   :  { %183 = vst.msk [vmem:[%s419_s3 + $0x28] sm:$0xf] %vm172_vm0, %v221_v21  ;;  %184 = vst.msk [vmem:[%s419_s3 + $0x2c] sm:$0xf] %vm172_vm0, %v222_v22 }
  0x18   :  { %185 = vst.msk [vmem:[%s419_s3 + $0x30] sm:$0xf] %vm172_vm0, %v223_v23  ;;  %186 = vst.msk [vmem:[%s419_s3 + $0x34] sm:$0xf] %vm172_vm0, %v224_v24 }
  0x19   :  { %187 = vst.msk [vmem:[%s419_s3 + $0x38] sm:$0xf] %vm172_vm0, %v225_v7  ;;  %188 = vst.msk [vmem:[%s419_s3 + $0x3c] sm:$0xf] %vm172_vm0, %v226_v25 }

// kernel: mula_gan_generator.29
= control target key start
LH: loop header
LB: loop body
LE: loop exit
PB: predicated region body
PF: predicated region fallthrough
CT: control target
= control target key end

     0   :  { %vm321_vm0 = vcmask 261120   ;;  %vm604_vm1 = vcmask 257024   ;;  %s1280_s1 = inlined_call_operand.vmem [shape: bf16[288,32], index: 1, kind: input, shape index: {}]   ;;  %s1281_s0 = inlined_call_operand.vmem [shape: bf16[128,288], index: 0, kind: input, shape index: {}]   ;;  %s1282_s2 = inlined_call_operand.vmem [shape: f32[1,32], index: 2, kind: input, shape index: {}]   ;;  %s1283_s3 = inlined_call_operand.vmem [shape: bf16[128,32], index: 3, kind: output, shape index: {0}]   ;;  %s1284_s4 = inlined_call_operand.vmem [shape: f32[1,8,32], index: 4, kind: output, shape index: {1}]   ;;  %s1285_s5 = inlined_call_operand.vmem [shape: f32[1,8,32], index: 5, kind: output, shape index: {2}]  }
   0x1   :  { %v923_v0 = vld [vmem:[%s1280_s1 + $0x40] sm:$0xff]   ;;  %v925_v2 = vld [vmem:[%s1280_s1 + $0x48] sm:$0xff]   ;;  %v927_v4 = vld [vmem:[%s1280_s1 + $0x50] sm:$0xff]  }
   0x2   :  { %v924_v1 = vld [vmem:[%s1280_s1] sm:$0xff]   ;;  %813 = vmatprep.subr.bf16.mxu0 %v923_v0  ;;  %907 = vmatprep.subr.bf16.mxu1 %v923_v0  ;;  %v926_v3 = vld [vmem:[%s1280_s1 + $0x8] sm:$0xff]   ;;  %v928_v5 = vld [vmem:[%s1280_s1 + $0x10] sm:$0xff]  }
   0x3   :  { %814 = vmatpush3.bf16.msra.mxu0 %v924_v1  ;;  %915 = vmatpush3.bf16.msra.mxu1 %v924_v1  ;;  %v929_v6 = vld [vmem:[%s1280_s1 + $0x58] sm:$0xff]   ;;  %v931_v8 = vld [vmem:[%s1280_s1 + $0x60] sm:$0xff]   ;;  %v933_v10 = vld [vmem:[%s1280_s1 + $0x68] sm:$0xff]  }
   0x4   :  { %815 = vmatprep.subr.bf16.mxu0 %v925_v2  ;;  %908 = vmatprep.subr.bf16.mxu1 %v925_v2  ;;  %v930_v7 = vld [vmem:[%s1280_s1 + $0x18] sm:$0xff]   ;;  %v932_v9 = vld [vmem:[%s1280_s1 + $0x20] sm:$0xff]   ;;  %v934_v13 = vld [vmem:[%s1280_s1 + $0x28] sm:$0xff]  }
   0x5   :  { %v941_v11 = vld [vmem:[%s1281_s0 + $0x4] ss:$12 sps:$4 sm:$0xff]   ;;  %v944_v12 = vld [vmem:[%s1281_s0 + $0x94] ss:$12 sps:$4 sm:$0xff]   ;;  %v937_v16 = vld [vmem:[%s1280_s1 + $0x78] sm:$0xff]  }
   0x6   :  { %v935_v14 = vld [vmem:[%s1280_s1 + $0x70] sm:$0xff]   ;;  %378 = vmatprep.mubr.bf16.mxu0 %v941_v11  ;;  %426 = vmatprep.mubr.bf16.mxu1 %v944_v12  ;;  %v938_v17 = vld [vmem:[%s1280_s1 + $0x38] sm:$0xff]   ;;  %v939_v18 = vld [vmem:[%s1281_s0] ss:$12 sps:$4 sm:$0xff]  }
   0x7   :  { %816 = vmatpush3.bf16.msra.mxu0 %v926_v3  ;;  %916 = vmatpush3.bf16.msra.mxu1 %v926_v3  ;;  %v936_v15 = vld [vmem:[%s1280_s1 + $0x30] sm:$0xff]   ;;  %v949_v19 = vld [vmem:[%s1280_s1 + $0x80] sm:$0xff]   ;;  %v945_v21 = vld [vmem:[%s1281_s0 + $0x1c] ss:$12 sps:$4 sm:$0xff]  }
   0x8   :  { %817 = vmatprep.subr.bf16.mxu0 %v927_v4  ;;  %909 = vmatprep.subr.bf16.mxu1 %v927_v4  ;;  %v942_v20 = vld [vmem:[%s1281_s0 + $0x90] ss:$12 sps:$4 sm:$0xff]   ;;  %v947_v22 = vld [vmem:[%s1281_s0 + $0xac] ss:$12 sps:$4 sm:$0xff]   ;;  %v951_v25 = vld [vmem:[%s1281_s0 + $0xa8] ss:$12 sps:$4 sm:$0xff]  }
   0x9   :  { %v952_v23 = vld [vmem:[%s1280_s1 + $0x88] sm:$0xff]   ;;  %v950_v24 = vld [vmem:[%s1281_s0 + $0x18] ss:$12 sps:$4 sm:$0xff]   ;;  %v953_v26 = vld [vmem:[%s1281_s0 + $0x34] ss:$12 sps:$4 sm:$0xff]  }
   0xa   :  { %v955_v27 = vld [vmem:[%s1281_s0 + $0x8] ss:$12 sps:$4 sm:$0xff]   ;;  %v956_v28 = vld [vmem:[%s1281_s0 + $0x30] ss:$12 sps:$4 sm:$0xff]   ;;  %v957_v29 = vld [vmem:[%s1281_s0 + $0x20] ss:$12 sps:$4 sm:$0xff]  }
   0xb   :  { %818 = vmatpush3.bf16.msra.mxu0 %v928_v5  ;;  %917 = vmatpush3.bf16.msra.mxu1 %v928_v5  ;;  %v958_v30 = vld [vmem:[%s1281_s0 + $0x4c] ss:$12 sps:$4 sm:$0xff]   ;;  %v961_v32 = vld [vmem:[%s1281_s0 + $0x48] ss:$12 sps:$4 sm:$0xff]   ;;  %v962_v33 = vld [vmem:[%s1281_s0 + $0x50] ss:$12 sps:$4 sm:$0xff]  }
   0xc   :  { %819 = vmatprep.subr.bf16.mxu0 %v929_v6  ;;  %910 = vmatprep.subr.bf16.mxu1 %v929_v6  ;;  %v960_v31 = vld [vmem:[%s1281_s0 + $0x38] ss:$12 sps:$4 sm:$0xff]   ;;  %v965_v35 = vld [vmem:[%s1281_s0 + $0x68] ss:$12 sps:$4 sm:$0xff]   ;;  %v966_v36 = vld [vmem:[%s1281_s0 + $0x60] ss:$12 sps:$4 sm:$0xff]  }
   0xd   :  { %v963_v34 = vld [vmem:[%s1281_s0 + $0x64] ss:$12 sps:$4 sm:$0xff]   ;;  %v967_v37 = vld [vmem:[%s1281_s0 + $0x80] ss:$12 sps:$4 sm:$0xff]   ;;  %v968_v38 = vld [vmem:[%s1281_s0 + $0x7c] ss:$12 sps:$4 sm:$0xff]  }
   0xe   :  { %v970_v39 = vld [vmem:[%s1281_s0 + $0x98] ss:$12 sps:$4 sm:$0xff]   ;;  %v972_v41 = vld [vmem:[%s1281_s0 + $0xb0] ss:$12 sps:$4 sm:$0xff]   ;;  %v1148_v2 = vld [vmem:[%s1282_s2] ss:$0 sm:$0xff] }
   0xf   :  { %820 = vmatpush3.bf16.msra.mxu0 %v930_v7  ;;  %918 = vmatpush3.bf16.msra.mxu1 %v930_v7  ;;  %v971_v40 = vld [vmem:[%s1281_s0 + $0x78] ss:$12 sps:$4 sm:$0xff]  }
  0x10   :  { %821 = vmatprep.subr.bf16.mxu0 %v931_v8  ;;  %911 = vmatprep.subr.bf16.mxu1 %v931_v8 }
  0x13   :  { %822 = vmatpush3.bf16.msra.mxu0 %v932_v9  ;;  %919 = vmatpush3.bf16.msra.mxu1 %v932_v9 }
  0x14   :  { %823 = vmatprep.subr.bf16.mxu0 %v933_v10  ;;  %912 = vmatprep.subr.bf16.mxu1 %v933_v10 }
  0x17   :  { %824 = vmatpush3.bf16.msra.mxu0 %v934_v13  ;;  %920 = vmatpush3.bf16.msra.mxu1 %v934_v13 }
  0x18   :  { %825 = vmatprep.subr.bf16.mxu0 %v935_v14  ;;  %913 = vmatprep.subr.bf16.mxu1 %v935_v14 }
  0x1b   :  { %826 = vmatpush3.bf16.msra.mxu0 %v936_v15  ;;  %921 = vmatpush3.bf16.msra.mxu1 %v936_v15 }
  0x1c   :  { %827 = vmatprep.subr.bf16.mxu0 %v937_v16  ;;  %914 = vmatprep.subr.bf16.mxu1 %v937_v16 }
  0x1f   :  { %828 = vmatpush3.bf16.msra.mxu0 %v938_v17  ;;  %922 = vmatpush3.bf16.msra.mxu1 %v938_v17 }
  0x20   :  { %887 = vmatprep.subr.bf16.mxu1 %v949_v19 }
  0x22   :  { %379 = vmatmul.mubr.bf16.vlgmr.msra.gmra.mrb[0].mxu0 %v939_v18  ;;  %427 = vmatmul.mubr.bf16.vlgmr.msra.gmra.mrb[0].mxu1 %v942_v20 }
  0x23   :  { %386 = vmatprep.mubr.bf16.mxu0 %v945_v21  ;;  %434 = vmatprep.mubr.bf16.mxu1 %v947_v22 }
  0x24   :  { %888 = vmatpush3.bf16.msra.mxu1 %v949_v19 }
  0x25   :  { %889 = vmatprep.subr.bf16.mxu1 %v952_v23 }
  0x28   :  { %890 = vmatpush3.bf16.msra.mxu1 %v952_v23 }
  0x2a   :  { %387 = vmatmul.mubr.bf16.gmra.mrb[4].mxu0 %v950_v24  ;;  %435 = vmatmul.mubr.bf16.gmra.mrb[4].mxu1 %v951_v25 }
  0x2b   :  { %394 = vmatprep.mubr.bf16.mxu0 %v953_v26  ;;  %891 = vmatprep.mubr.msk.bf16.mxu1 %vm321_vm0, %v955_v27 }
  0x32   :  { %395 = vmatmul.mubr.bf16.gmra.mrb[8].mxu0 %v956_v28  ;;  %892 = vmatmul.mubr.msk.bf16.vlgmr.msra.gmra.mrb[8].mxu1 %vm321_vm0, %v957_v29 }
  0x33   :  { %402 = vmatprep.mubr.bf16.mxu0 %v958_v30  ;;  %895 = vmatprep.mubr.msk.bf16.mxu1 %vm321_vm0, %v960_v31 }
  0x3a   :  { %403 = vmatmul.mubr.bf16.gmra.mrb[12].mxu0 %v961_v32  ;;  %896 = vmatmul.mubr.msk.bf16.gmra.mrb[12].mxu1 %vm321_vm0, %v962_v33 }
  0x3b   :  { %410 = vmatprep.mubr.bf16.mxu0 %v963_v34  ;;  %899 = vmatprep.mubr.msk.bf16.mxu1 %vm321_vm0, %v965_v35 }
  0x42   :  { %411 = vmatmul.mubr.bf16.gmra.mrb[16].mxu0 %v966_v36  ;;  %900 = vmatmul.mubr.msk.bf16.gmra.mrb[16].mxu1 %vm321_vm0, %v967_v37 }
  0x43   :  { %418 = vmatprep.mubr.bf16.mxu0 %v968_v38  ;;  %903 = vmatprep.mubr.msk.bf16.mxu1 %vm321_vm0, %v970_v39 }
  0x4a   :  { %419 = vmatmul.mubr.bf16.gmra.mrb[20].mxu0 %v971_v40  ;;  %904 = vmatmul.mubr.msk.bf16.gmra.mrb[20].mxu1 %vm321_vm0, %v972_v41 }
  0xf5   :  { %v829_v42 = vpop.f32.mrb[0].mxu0  ;;  %v865_v43 = vpop.f32.mrb[0].mxu1 }
  0xf6   :  { %v830_v44 = vpop.f32.mrb[1].mxu0  ;;  %v866_v45 = vpop.f32.mrb[1].mxu1 }
  0xf7   :  { %v831_v46 = vadd.f32 %v830_v44, %v829_v42  ;;  %v832_v47 = vpop.f32.mrb[2].mxu0  ;;  %v1137_v48 = vadd.f32 %v866_v45, %v865_v43  ;;  %v868_v49 = vpop.f32.mrb[2].mxu1 }
  0xf8   :  { %v833_v50 = vpop.f32.mrb[3].mxu0  ;;  %v869_v51 = vpop.f32.mrb[3].mxu1 }
  0xf9   :  { %v834_v52 = vadd.f32 %v833_v50, %v832_v47  ;;  %v1139_v53 = vadd.f32 %v869_v51, %v868_v49  ;;  %v381_v6 = vadd.f32 %v831_v46, %v1148_v2 }
  0xfb   :  { %v384_v21 = vadd.f32 %v834_v52, %v1148_v2 }
  0xfd   :  { %v835_v54 = vpop.f32.mrb[4].mxu0  ;;  %v871_v55 = vpop.f32.mrb[4].mxu1 }
  0xfe   :  { %v836_v56 = vpop.f32.mrb[5].mxu0  ;;  %v872_v57 = vpop.f32.mrb[5].mxu1 }
  0xff   :  { %v837_v58 = vadd.f32 %v836_v56, %v835_v54  ;;  %v838_v59 = vpop.f32.mrb[6].mxu0  ;;  %v1141_v60 = vadd.f32 %v872_v57, %v871_v55  ;;  %v874_v61 = vpop.f32.mrb[6].mxu1 }
 0x100   :  { %v839_v62 = vpop.f32.mrb[7].mxu0  ;;  %v875_v63 = vpop.f32.mrb[7].mxu1 }
 0x101   :  { %v840_v0 = vadd.f32 %v839_v62, %v838_v59  ;;  %v1143_v1 = vadd.f32 %v875_v63, %v874_v61  ;;  %v389_v3 = vadd.f32 %v837_v58, %v1148_v2 }
 0x103   :  { %v392_v10 = vadd.f32 %v840_v0, %v1148_v2 }
 0x105   :  { %v841_v4 = vpop.f32.mrb[8].mxu0  ;;  %v893_v5 = vpop.f32.mrb[8].mxu1 }
 0x106   :  { %v486_v7 = vadd.f32 %v893_v5, %v389_v3  ;;  %v842_v8 = vpop.f32.mrb[9].mxu0  ;;  %v477_v9 = vpop.f32.mrb[9].mxu1 }
 0x107   :  { %v843_v11 = vadd.f32 %v842_v8, %v841_v4  ;;  %v478_v12 = vadd.f32 %v477_v9, %v381_v6  ;;  %v844_v13 = vpop.f32.mrb[10].mxu0  ;;  %v894_v14 = vpop.f32.mrb[10].mxu1 }
 0x108   :  { %v799_v15 = vpack.c.bf16 %v486_v7, %v486_v7  ;;  %v489_v16 = vadd.f32 %v894_v14, %v392_v10  ;;  %v845_v17 = vpop.f32.mrb[11].mxu0  ;;  %v480_v18 = vpop.f32.mrb[11].mxu1  ;;  %v660_v22 = vmul.f32 %v486_v7, %v486_v7  ;;  %v624_v33 = vsel %vm321_vm0, %v486_v7, 0.0 }
 0x109   :  { %v797_v19 = vpack.c.bf16 %v478_v12, %v478_v12  ;;  %v846_v20 = vadd.f32 %v845_v17, %v844_v13  ;;  %v658_v24 = vmul.f32 %v478_v12, %v478_v12  ;;  %v481_v25 = vadd.f32 %v480_v18, %v384_v21 }
 0x10a   :  { %607 = vst.msk [vmem:[%s1283_s3 + $0x8] sm:$0xf] %vm604_vm1, %v799_v15  ;;  %v800_v23 = vpack.c.bf16 %v489_v16, %v489_v16  ;;  %v621_v26 = vsel %vm321_vm0, %v478_v12, 0.0  ;;  %v397_v32 = vadd.f32 %v843_v11, %v1148_v2  ;;  %v677_v34 = vsel %vm321_vm0, %v660_v22, 0.0 }
 0x10b   :  { %605 = vst.msk [vmem:[%s1283_s3] sm:$0xf] %vm604_vm1, %v797_v19  ;;  %v798_v27 = vpack.c.bf16 %v481_v25, %v481_v25  ;;  %v622_v28 = vsel %vm321_vm0, %v481_v25, 0.0  ;;  %v659_v29 = vmul.f32 %v481_v25, %v481_v25  ;;  %v661_v35 = vmul.f32 %v489_v16, %v489_v16 }
 0x10c   :  { %608 = vst.msk [vmem:[%s1283_s3 + $0xc] sm:$0xf] %vm604_vm1, %v800_v23  ;;  %v623_v36 = vadd.f32 %v622_v28, %v621_v26  ;;  %v674_v39 = vsel %vm321_vm0, %v658_v24, 0.0  ;;  %v626_v45 = vsel %vm321_vm0, %v489_v16, 0.0  ;;  %v400_v50 = vadd.f32 %v846_v20, %v1148_v2 }
 0x10d   :  { %v847_v30 = vpop.f32.mrb[12].mxu0  ;;  %v897_v31 = vpop.f32.mrb[12].mxu1  ;;  %606 = vst.msk [vmem:[%s1283_s3 + $0x4] sm:$0xf] %vm604_vm1, %v798_v27  ;;  %v675_v40 = vsel %vm321_vm0, %v659_v29, 0.0  ;;  %v679_v62 = vsel %vm321_vm0, %v661_v35, 0.0 }
 0x10e   :  { %v848_v37 = vpop.f32.mrb[13].mxu0  ;;  %v493_v38 = vpop.f32.mrb[13].mxu1  ;;  %v625_v46 = vadd.f32 %v624_v33, %v623_v36  ;;  %v676_v47 = vadd.f32 %v675_v40, %v674_v39  ;;  %v429_v39 = vadd.f32 %v1137_v48, %v1148_v2 }
 0x10f   :  { %v849_v41 = vadd.f32 %v848_v37, %v847_v30  ;;  %v494_v42 = vadd.f32 %v493_v38, %v397_v32  ;;  %v850_v43 = vpop.f32.mrb[14].mxu0  ;;  %v898_v44 = vpop.f32.mrb[14].mxu1  ;;  %v437_v38 = vadd.f32 %v1141_v60, %v1148_v2 }
 0x110   :  { %v851_v49 = vpop.f32.mrb[15].mxu0  ;;  %v496_v51 = vpop.f32.mrb[15].mxu1  ;;  %v678_v57 = vadd.f32 %v677_v34, %v676_v47  ;;  %v627_v58 = vadd.f32 %v626_v45, %v625_v46 }
 0x111   :  { %v405_v52 = vadd.f32 %v849_v41, %v1148_v2  ;;  %v801_v54 = vpack.c.bf16 %v494_v42, %v494_v42  ;;  %v628_v55 = vsel %vm321_vm0, %v494_v42, 0.0  ;;  %v662_v56 = vmul.f32 %v494_v42, %v494_v42 }
 0x112   :  { %v852_v59 = vadd.f32 %v851_v49, %v850_v43  ;;  %v497_v61 = vadd.f32 %v496_v51, %v400_v50  ;;  %v629_v3 = vadd.f32 %v628_v55, %v627_v58  ;;  %v680_v4 = vadd.f32 %v679_v62, %v678_v57 }
 0x113   :  { %v502_v63 = vadd.f32 %v897_v31, %v405_v52  ;;  %609 = vst.msk [vmem:[%s1283_s3 + $0x10] sm:$0xf] %vm604_vm1, %v801_v54  ;;  %v681_v0 = vsel %vm321_vm0, %v662_v56, 0.0 }
 0x114   :  { %v408_v5 = vadd.f32 %v852_v59, %v1148_v2  ;;  %v802_v6 = vpack.c.bf16 %v497_v61, %v497_v61  ;;  %v630_v9 = vsel %vm321_vm0, %v497_v61, 0.0  ;;  %v682_v13 = vadd.f32 %v681_v0, %v680_v4 }
 0x115   :  { %v803_v7 = vpack.c.bf16 %v502_v63, %v502_v63  ;;  %v664_v8 = vmul.f32 %v502_v63, %v502_v63  ;;  %v632_v10 = vsel %vm321_vm0, %v502_v63, 0.0  ;;  %v853_v11 = vpop.f32.mrb[16].mxu0  ;;  %v1190_v12 = vpop.f32.mrb[16].mxu1  ;;  %v631_v15 = vadd.f32 %v630_v9, %v629_v3 }
 0x116   :  { %v505_v14 = vadd.f32 %v898_v44, %v408_v5  ;;  %610 = vst.msk [vmem:[%s1283_s3 + $0x14] sm:$0xf] %vm604_vm1, %v802_v6  ;;  %v663_v16 = vmul.f32 %v497_v61, %v497_v61  ;;  %v854_v17 = vpop.f32.mrb[17].mxu0  ;;  %v509_v18 = vpop.f32.mrb[17].mxu1  ;;  %v440_v3 = vadd.f32 %v1143_v1, %v1148_v2 }
 0x117   :  { %611 = vst.msk [vmem:[%s1283_s3 + $0x18] sm:$0xf] %vm604_vm1, %v803_v7  ;;  %v685_v19 = vsel %vm321_vm0, %v664_v8, 0.0  ;;  %v855_v20 = vadd.f32 %v854_v17, %v853_v11  ;;  %v856_v21 = vpop.f32.mrb[18].mxu0  ;;  %v1201_v22 = vpop.f32.mrb[18].mxu1  ;;  %v633_v25 = vadd.f32 %v632_v10, %v631_v15  ;;  %v432_v7 = vadd.f32 %v1139_v53, %v1148_v2 }
 0x118   :  { %v804_v23 = vpack.c.bf16 %v505_v14, %v505_v14  ;;  %v665_v24 = vmul.f32 %v505_v14, %v505_v14  ;;  %v683_v26 = vsel %vm321_vm0, %v663_v16, 0.0  ;;  %v857_v27 = vpop.f32.mrb[19].mxu0  ;;  %v512_v28 = vpop.f32.mrb[19].mxu1  ;;  %v634_v32 = vsel %vm321_vm0, %v505_v14, 0.0 }
 0x119   :  { %v684_v29 = vadd.f32 %v683_v26, %v682_v13  ;;  %v858_v30 = vadd.f32 %v857_v27, %v856_v21  ;;  %v413_v31 = vadd.f32 %v855_v20, %v1148_v2  ;;  %v635_v33 = vadd.f32 %v634_v32, %v633_v25 }
 0x11a   :  { %612 = vst.msk [vmem:[%s1283_s3 + $0x1c] sm:$0xf] %vm604_vm1, %v804_v23  ;;  %v687_v34 = vsel %vm321_vm0, %v665_v24, 0.0 }
 0x11b   :  { %v686_v35 = vadd.f32 %v685_v19, %v684_v29  ;;  %v510_v36 = vadd.f32 %v509_v18, %v413_v31  ;;  %v416_v37 = vadd.f32 %v858_v30, %v1148_v2 }
 0x11d   :  { %v805_v40 = vpack.c.bf16 %v510_v36, %v510_v36  ;;  %v636_v41 = vsel %vm321_vm0, %v510_v36, 0.0  ;;  %v666_v42 = vmul.f32 %v510_v36, %v510_v36  ;;  %v688_v43 = vadd.f32 %v687_v34, %v686_v35  ;;  %v859_v44 = vpop.f32.mrb[20].mxu0  ;;  %v905_v45 = vpop.f32.mrb[20].mxu1 }
 0x11e   :  { %v637_v46 = vadd.f32 %v636_v41, %v635_v33  ;;  %v513_v47 = vadd.f32 %v512_v28, %v416_v37  ;;  %v534_v49 = vadd.f32 %v905_v45, %v437_v38  ;;  %v860_v50 = vpop.f32.mrb[21].mxu0  ;;  %v525_v51 = vpop.f32.mrb[21].mxu1 }
 0x11f   :  { %613 = vst.msk [vmem:[%s1283_s3 + $0x20] sm:$0xf] %vm604_vm1, %v805_v40  ;;  %v689_v60 = vsel %vm321_vm0, %v666_v42, 0.0  ;;  %v861_v48 = vadd.f32 %v860_v50, %v859_v44  ;;  %v526_v52 = vadd.f32 %v525_v51, %v429_v39  ;;  %v862_v54 = vpop.f32.mrb[22].mxu0  ;;  %v906_v55 = vpop.f32.mrb[22].mxu1 }
 0x120   :  { %v690_v56 = vadd.f32 %v689_v60, %v688_v43  ;;  %v806_v57 = vpack.c.bf16 %v513_v47, %v513_v47  ;;  %v638_v58 = vsel %vm321_vm0, %v513_v47, 0.0  ;;  %v667_v59 = vmul.f32 %v513_v47, %v513_v47  ;;  %v863_v61 = vpop.f32.mrb[23].mxu0  ;;  %v528_v62 = vpop.f32.mrb[23].mxu1 }
 0x121   :  { %v639_v63 = vadd.f32 %v638_v58, %v637_v46  ;;  %v811_v0 = vpack.c.bf16 %v534_v49, %v534_v49  ;;  %v421_v5 = vadd.f32 %v861_v48, %v1148_v2  ;;  %v809_v6 = vpack.c.bf16 %v526_v52, %v526_v52 }
 0x122   :  { %614 = vst.msk [vmem:[%s1283_s3 + $0x24] sm:$0xf] %vm604_vm1, %v806_v57  ;;  %v691_v4 = vsel %vm321_vm0, %v667_v59, 0.0  ;;  %v537_v1 = vadd.f32 %v906_v55, %v440_v3  ;;  %v864_v10 = vadd.f32 %v863_v61, %v862_v54  ;;  %v529_v11 = vadd.f32 %v528_v62, %v432_v7 }
 0x123   :  { %v692_v8 = vadd.f32 %v691_v4, %v690_v56  ;;  %619 = vst.msk [vmem:[%s1283_s3 + $0x38] sm:$0xf] %vm604_vm1, %v811_v0  ;;  %v518_v9 = vadd.f32 %v1190_v12, %v421_v5  ;;  %617 = vst.msk [vmem:[%s1283_s3 + $0x30] sm:$0xf] %vm604_vm1, %v809_v6  ;;  %v644_v26 = vsel %vm321_vm0, %v526_v52, 0.0  ;;  %v672_v30 = vmul.f32 %v534_v49, %v534_v49 }
 0x124   :  { %v812_v13 = vpack.c.bf16 %v537_v1, %v537_v1  ;;  %v424_v16 = vadd.f32 %v864_v10, %v1148_v2  ;;  %v810_v12 = vpack.c.bf16 %v529_v11, %v529_v11  ;;  %v670_v2 = vmul.f32 %v526_v52, %v526_v52 }
 0x125   :  { %v807_v14 = vpack.c.bf16 %v518_v9, %v518_v9  ;;  %v640_v53 = vsel %vm321_vm0, %v518_v9, 0.0  ;;  %v668_v15 = vmul.f32 %v518_v9, %v518_v9  ;;  %v671_v27 = vmul.f32 %v529_v11, %v529_v11 }
 0x126   :  { %v641_v17 = vadd.f32 %v640_v53, %v639_v63  ;;  %620 = vst.msk [vmem:[%s1283_s3 + $0x3c] sm:$0xf] %vm604_vm1, %v812_v13  ;;  %v521_v19 = vadd.f32 %v1201_v22, %v424_v16  ;;  %618 = vst.msk [vmem:[%s1283_s3 + $0x34] sm:$0xf] %vm604_vm1, %v810_v12  ;;  %v697_v31 = vsel %vm321_vm0, %v670_v2, 0.0  ;;  %v646_v32 = vsel %vm321_vm0, %v529_v11, 0.0 }
 0x127   :  { %615 = vst.msk [vmem:[%s1283_s3 + $0x28] sm:$0xf] %vm604_vm1, %v807_v14  ;;  %v693_v18 = vsel %vm321_vm0, %v668_v15, 0.0  ;;  %v648_v35 = vsel %vm321_vm0, %v534_v49, 0.0  ;;  %v673_v36 = vmul.f32 %v537_v1, %v537_v1  ;;  %v699_v37 = vsel %vm321_vm0, %v671_v27, 0.0 }
 0x128   :  { %v694_v20 = vadd.f32 %v693_v18, %v692_v8  ;;  %v808_v21 = vpack.c.bf16 %v521_v19, %v521_v19  ;;  %v642_v23 = vsel %vm321_vm0, %v521_v19, 0.0  ;;  %v669_v24 = vmul.f32 %v521_v19, %v521_v19 }
 0x129   :  { %v643_v25 = vadd.f32 %v642_v23, %v641_v17  ;;  %v701_v40 = vsel %vm321_vm0, %v672_v30, 0.0  ;;  %v650_v41 = vsel %vm321_vm0, %v537_v1, 0.0  ;;  %v703_v44 = vsel %vm321_vm0, %v673_v36, 0.0 }
 0x12a   :  { %616 = vst.msk [vmem:[%s1283_s3 + $0x2c] sm:$0xf] %vm604_vm1, %v808_v21  ;;  %v695_v22 = vsel %vm321_vm0, %v669_v24, 0.0  ;;  %v711_v47 = vlaneseq }
 0x12b   :  { %v645_v28 = vadd.f32 %v644_v26, %v643_v25  ;;  %v696_v29 = vadd.f32 %v695_v22, %v694_v20 }
 0x12c   :  { %v712_v48 = vshrl.u32 %v711_v47, 7 }
 0x12d   :  { %v647_v33 = vadd.f32 %v646_v32, %v645_v28  ;;  %v698_v34 = vadd.f32 %v697_v31, %v696_v29 }
 0x12e   :  { %vm713_vm2 = vcmp.eq.s32.totalorder %v712_v48, 0 }
 0x12f   :  { %v649_v38 = vadd.f32 %v648_v35, %v647_v33  ;;  %v700_v39 = vadd.f32 %v699_v37, %v698_v34 }
 0x131   :  { %v651_v42 = vadd.f32 %v650_v41, %v649_v38  ;;  %v702_v43 = vadd.f32 %v701_v40, %v700_v39 }
 0x133   :  { %v652_v45 = vrot.slane %v651_v42, 4  ;;  %v704_v46 = vadd.f32 %v703_v44, %v702_v43 }
 0x135   :  { %v653_v50 = vadd.f32 %v652_v45, %v651_v42  ;;  %v705_v51 = vrot.slane %v704_v46, 4 }
 0x137   :  { %v654_v60 = vrot.slane %v653_v50, 2  ;;  %v706_v49 = vadd.f32 %v705_v51, %v704_v46 }
 0x139   :  { %v655_v52 = vadd.f32 %v654_v60, %v653_v50  ;;  %v707_v54 = vrot.slane %v706_v49, 2 }
 0x13b   :  { %v656_v55 = vrot.slane %v655_v52, 1  ;;  %v708_v56 = vadd.f32 %v707_v54, %v706_v49 }
 0x13d   :  { %v657_v57 = vadd.f32 %v656_v55, %v655_v52  ;;  %v709_v58 = vrot.slane %v708_v56, 1 }
 0x13f   :  { %v710_v59 = vadd.f32 %v709_v58, %v708_v56  ;;  %v714_v61 = vsel %vm713_vm2, %v657_v57, 0.0 }
 0x140   :  { %715 = vst.msk [vmem:[%s1284_s4] sm:$0xff] %vm321_vm0, %v714_v61 }
 0x141   :  { %v716_v62 = vsel %vm713_vm2, %v710_v59, 0.0 }
 0x142   :  { %717 = vst.msk [vmem:[%s1285_s5] sm:$0xff] %vm321_vm0, %v716_v62 }

// kernel: mula_gan_generator.32
= control target key start
LH: loop header
LB: loop body
LE: loop exit
PB: predicated region body
PF: predicated region fallthrough
CT: control target
= control target key end

     0   :  { %vm207_vm0 = vcmask 257024   ;;  %s519_s0 = inlined_call_operand.vmem [shape: bf16[128,32], index: 0, kind: input, shape index: {}]   ;;  %s520_s1 = inlined_call_operand.vmem [shape: bf16[128,32], index: 1, kind: input, shape index: {}]   ;;  %s521_s2 = inlined_call_operand.vmem [shape: f32[1,32], index: 2, kind: input, shape index: {}]   ;;  %s522_s3 = inlined_call_operand.vmem [shape: f32[1,32], index: 3, kind: input, shape index: {}]   ;;  %s523_s4 = inlined_call_operand.vmem [shape: bf16[128,32], index: 4, kind: output, shape index: {}]  }
   0x1   :  { %v263_v0 = vld [vmem:[%s519_s0] sm:$0xff]   ;;  %v326_v5 = vld [vmem:[%s519_s0 + $0x8] sm:$0xff]   ;;  %v327_v12 = vld [vmem:[%s519_s0 + $0x10] sm:$0xff]  }
   0x2   :  { %v371_v1 = vld [vmem:[%s521_s2] ss:$0 sm:$0xff]  ;;  %v264_v2 = vunpack.c.l.bf16 %v263_v0  ;;  %v265_v4 = vunpack.c.h.bf16 %v263_v0  ;;  %v333_v6 = vld [vmem:[%s520_s1 + $0x8] sm:$0xff]   ;;  %v268_v10 = vunpack.c.l.bf16 %v326_v5  ;;  %v334_v13 = vld [vmem:[%s520_s1 + $0x10] sm:$0xff]   ;;  %v269_v16 = vunpack.c.h.bf16 %v326_v5 }
   0x3   :  { %v295_v3 = vld [vmem:[%s520_s1] sm:$0xff]   ;;  %v300_v11 = vunpack.c.l.bf16 %v333_v6  ;;  %v301_v17 = vunpack.c.h.bf16 %v333_v6  ;;  %v328_v18 = vld [vmem:[%s519_s0 + $0x18] sm:$0xff]   ;;  %v272_v20 = vunpack.c.l.bf16 %v327_v12  ;;  %v304_v21 = vunpack.c.l.bf16 %v334_v13  ;;  %v330_v54 = vld [vmem:[%s519_s0 + $0x28] sm:$0xff]  }
   0x4   :  { %v385_v7 = vld [vmem:[%s522_s3] ss:$0 sm:$0xff]  ;;  %v296_v8 = vunpack.c.l.bf16 %v295_v3  ;;  %v297_v9 = vunpack.c.h.bf16 %v295_v3  ;;  %v56_v14 = vmul.f32 %v264_v2, %v371_v1  ;;  %v57_v15 = vmul.f32 %v265_v4, %v371_v1  ;;  %v335_v23 = vld [vmem:[%s520_s1 + $0x18] sm:$0xff]   ;;  %v337_v55 = vld [vmem:[%s520_s1 + $0x28] sm:$0xff]  }
   0x5   :  { %v58_v19 = vmul.f32 %v268_v10, %v371_v1  ;;  %v273_v22 = vunpack.c.h.bf16 %v327_v12  ;;  %v59_v26 = vmul.f32 %v269_v16, %v371_v1  ;;  %v305_v27 = vunpack.c.h.bf16 %v334_v13  ;;  %v329_v40 = vld [vmem:[%s519_s0 + $0x20] sm:$0xff]   ;;  %v331_v0 = vld [vmem:[%s519_s0 + $0x30] sm:$0xff]   ;;  %v332_v16 = vld [vmem:[%s519_s0 + $0x38] sm:$0xff]  }
   0x6   :  { %v79_v24 = vadd.f32 %v385_v7, %v56_v14  ;;  %v80_v25 = vadd.f32 %v385_v7, %v57_v15  ;;  %v60_v29 = vmul.f32 %v272_v20, %v371_v1  ;;  %v276_v31 = vunpack.c.l.bf16 %v328_v18  ;;  %v336_v45 = vld [vmem:[%s520_s1 + $0x20] sm:$0xff]   ;;  %v338_v2 = vld [vmem:[%s520_s1 + $0x30] sm:$0xff]  }
   0x7   :  { %v81_v28 = vadd.f32 %v385_v7, %v58_v19  ;;  %v61_v30 = vmul.f32 %v273_v22, %v371_v1  ;;  %v82_v34 = vadd.f32 %v385_v7, %v59_v26  ;;  %v308_v35 = vunpack.c.l.bf16 %v335_v23 }
   0x8   :  { %v127_v32 = vadd.f32 %v296_v8, %v79_v24  ;;  %v128_v33 = vadd.f32 %v297_v9, %v80_v25  ;;  %v83_v37 = vadd.f32 %v385_v7, %v60_v29  ;;  %v62_v39 = vmul.f32 %v276_v31, %v371_v1 }
   0x9   :  { %v129_v36 = vadd.f32 %v300_v11, %v81_v28  ;;  %v84_v38 = vadd.f32 %v385_v7, %v61_v30  ;;  %v130_v43 = vadd.f32 %v301_v17, %v82_v34  ;;  %v277_v44 = vunpack.c.h.bf16 %v328_v18 }
   0xa   :  { %v246_v41 = vpack.c.bf16 %v127_v32, %v127_v32  ;;  %v247_v42 = vpack.c.bf16 %v128_v33, %v128_v33  ;;  %v131_v47 = vadd.f32 %v304_v21, %v83_v37  ;;  %v85_v49 = vadd.f32 %v385_v7, %v62_v39  ;;  %v339_v21 = vld [vmem:[%s520_s1 + $0x38] sm:$0xff]  }
   0xb   :  { %v248_v46 = vpack.c.bf16 %v129_v36, %v129_v36  ;;  %v132_v48 = vadd.f32 %v305_v27, %v84_v38  ;;  %v249_v50 = vpack.c.bf16 %v130_v43, %v130_v43  ;;  %v63_v51 = vmul.f32 %v277_v44, %v371_v1 }
   0xc   :  { %208 = vst.msk [vmem:[%s523_s4] sm:$0xf] %vm207_vm0, %v246_v41  ;;  %209 = vst.msk [vmem:[%s523_s4 + $0x4] sm:$0xf] %vm207_vm0, %v247_v42  ;;  %v309_v52 = vunpack.c.h.bf16 %v335_v23  ;;  %v280_v53 = vunpack.c.l.bf16 %v329_v40  ;;  %v250_v56 = vpack.c.bf16 %v131_v47, %v131_v47  ;;  %v133_v58 = vadd.f32 %v308_v35, %v85_v49 }
   0xd   :  { %210 = vst.msk [vmem:[%s523_s4 + $0x8] sm:$0xf] %vm207_vm0, %v248_v46  ;;  %v251_v57 = vpack.c.bf16 %v132_v48, %v132_v48  ;;  %v312_v59 = vunpack.c.l.bf16 %v336_v45  ;;  %211 = vst.msk [vmem:[%s523_s4 + $0xc] sm:$0xf] %vm207_vm0, %v249_v50  ;;  %v86_v60 = vadd.f32 %v385_v7, %v63_v51  ;;  %v281_v62 = vunpack.c.h.bf16 %v329_v40 }
   0xe   :  { %v64_v61 = vmul.f32 %v280_v53, %v371_v1  ;;  %v313_v63 = vunpack.c.h.bf16 %v336_v45  ;;  %212 = vst.msk [vmem:[%s523_s4 + $0x10] sm:$0xf] %vm207_vm0, %v250_v56  ;;  %v252_v3 = vpack.c.bf16 %v133_v58, %v133_v58  ;;  %v284_v4 = vunpack.c.l.bf16 %v330_v54 }
   0xf   :  { %213 = vst.msk [vmem:[%s523_s4 + $0x14] sm:$0xf] %vm207_vm0, %v251_v57  ;;  %v316_v5 = vunpack.c.l.bf16 %v337_v55  ;;  %v285_v6 = vunpack.c.h.bf16 %v330_v54  ;;  %v134_v8 = vadd.f32 %v309_v52, %v86_v60  ;;  %v65_v10 = vmul.f32 %v281_v62, %v371_v1 }
  0x10   :  { %v87_v9 = vadd.f32 %v385_v7, %v64_v61  ;;  %v317_v11 = vunpack.c.h.bf16 %v337_v55  ;;  %214 = vst.msk [vmem:[%s523_s4 + $0x18] sm:$0xf] %vm207_vm0, %v252_v3  ;;  %v66_v12 = vmul.f32 %v284_v4, %v371_v1  ;;  %v288_v14 = vunpack.c.l.bf16 %v331_v0 }
  0x11   :  { %v67_v13 = vmul.f32 %v285_v6, %v371_v1  ;;  %v320_v15 = vunpack.c.l.bf16 %v338_v2  ;;  %v253_v17 = vpack.c.bf16 %v134_v8, %v134_v8  ;;  %v88_v19 = vadd.f32 %v385_v7, %v65_v10 }
  0x12   :  { %v135_v18 = vadd.f32 %v312_v59, %v87_v9  ;;  %v289_v20 = vunpack.c.h.bf16 %v331_v0  ;;  %v89_v22 = vadd.f32 %v385_v7, %v66_v12  ;;  %v68_v24 = vmul.f32 %v288_v14, %v371_v1 }
  0x13   :  { %v90_v23 = vadd.f32 %v385_v7, %v67_v13  ;;  %v321_v25 = vunpack.c.h.bf16 %v338_v2  ;;  %215 = vst.msk [vmem:[%s523_s4 + $0x1c] sm:$0xf] %vm207_vm0, %v253_v17  ;;  %v136_v27 = vadd.f32 %v313_v63, %v88_v19  ;;  %v292_v29 = vunpack.c.l.bf16 %v332_v16 }
  0x14   :  { %v254_v26 = vpack.c.bf16 %v135_v18, %v135_v18  ;;  %v69_v28 = vmul.f32 %v289_v20, %v371_v1  ;;  %v137_v30 = vadd.f32 %v316_v5, %v89_v22  ;;  %v91_v32 = vadd.f32 %v385_v7, %v68_v24 }
  0x15   :  { %v138_v31 = vadd.f32 %v317_v11, %v90_v23  ;;  %v324_v33 = vunpack.c.l.bf16 %v339_v21  ;;  %v255_v34 = vpack.c.bf16 %v136_v27, %v136_v27  ;;  %v70_v36 = vmul.f32 %v292_v29, %v371_v1 }
  0x16   :  { %216 = vst.msk [vmem:[%s523_s4 + $0x20] sm:$0xf] %vm207_vm0, %v254_v26  ;;  %v92_v35 = vadd.f32 %v385_v7, %v69_v28  ;;  %v293_v37 = vunpack.c.h.bf16 %v332_v16  ;;  %v256_v38 = vpack.c.bf16 %v137_v30, %v137_v30  ;;  %v139_v40 = vadd.f32 %v320_v15, %v91_v32 }
  0x17   :  { %v257_v39 = vpack.c.bf16 %v138_v31, %v138_v31  ;;  %217 = vst.msk [vmem:[%s523_s4 + $0x24] sm:$0xf] %vm207_vm0, %v255_v34  ;;  %v93_v42 = vadd.f32 %v385_v7, %v70_v36  ;;  %v325_v44 = vunpack.c.h.bf16 %v339_v21 }
  0x18   :  { %v140_v41 = vadd.f32 %v321_v25, %v92_v35  ;;  %v71_v43 = vmul.f32 %v293_v37, %v371_v1  ;;  %218 = vst.msk [vmem:[%s523_s4 + $0x28] sm:$0xf] %vm207_vm0, %v256_v38  ;;  %v258_v45 = vpack.c.bf16 %v139_v40, %v139_v40 }
  0x19   :  { %219 = vst.msk [vmem:[%s523_s4 + $0x2c] sm:$0xf] %vm207_vm0, %v257_v39  ;;  %v141_v47 = vadd.f32 %v324_v33, %v93_v42 }
  0x1a   :  { %v259_v46 = vpack.c.bf16 %v140_v41, %v140_v41  ;;  %v94_v48 = vadd.f32 %v385_v7, %v71_v43  ;;  %220 = vst.msk [vmem:[%s523_s4 + $0x30] sm:$0xf] %vm207_vm0, %v258_v45 }
  0x1b   :  { %v260_v1 = vpack.c.bf16 %v141_v47, %v141_v47 }
  0x1c   :  { %221 = vst.msk [vmem:[%s523_s4 + $0x34] sm:$0xf] %vm207_vm0, %v259_v46  ;;  %v142_v49 = vadd.f32 %v325_v44, %v94_v48 }
  0x1d   :  { %222 = vst.msk [vmem:[%s523_s4 + $0x38] sm:$0xf] %vm207_vm0, %v260_v1 }
  0x1e   :  { %v261_v50 = vpack.c.bf16 %v142_v49, %v142_v49 }
  0x20   :  { %223 = vst.msk [vmem:[%s523_s4 + $0x3c] sm:$0xf] %vm207_vm0, %v261_v50 }

// kernel: mula_gan_generator.34
= control target key start
LH: loop header
LB: loop body
LE: loop exit
PB: predicated region body
PF: predicated region fallthrough
CT: control target
= control target key end

     0   :  { %vm72_vm4 = vcmask 519168   ;;  %s144_s0 = inlined_call_operand.vmem [shape: bf16[32,64], index: 0, kind: input, shape index: {}]   ;;  %s145_s1 = inlined_call_operand.vmem [shape: f32[1,64], index: 1, kind: input, shape index: {}]   ;;  %s146_s2 = inlined_call_operand.vmem [shape: f32[1,64], index: 2, kind: input, shape index: {}]   ;;  %s147_s3 = inlined_call_operand.vmem [shape: bf16[32,64], index: 3, kind: output, shape index: {}]  }
   0x1   :  { %v92_v0 = vld [vmem:[%s144_s0] sm:$0xff]   ;;  %v99_v4 = vld [vmem:[%s144_s0 + $0x8] sm:$0xff]  }
   0x2   :  { %v81_v1 = vld [vmem:[%s145_s1] ss:$0 sm:$0xff]  ;;  %v93_v2 = vunpack.c.l.bf16 %v92_v0  ;;  %v94_v3 = vunpack.c.h.bf16 %v92_v0  ;;  %v97_v6 = vunpack.c.l.bf16 %v99_v4  ;;  %v98_v7 = vunpack.c.h.bf16 %v99_v4 }
   0x3   :  { %v82_v5 = vld [vmem:[%s146_s2] ss:$0 sm:$0xff] }
   0x4   :  { %v29_v8 = vmul.f32 %v93_v2, %v81_v1  ;;  %v30_v9 = vmul.f32 %v94_v3, %v81_v1  ;;  %v31_v10 = vmul.f32 %v97_v6, %v81_v1  ;;  %v32_v11 = vmul.f32 %v98_v7, %v81_v1 }
   0x6   :  { %v40_v12 = vadd.f32 %v82_v5, %v29_v8  ;;  %v41_v13 = vadd.f32 %v82_v5, %v30_v9  ;;  %v42_v14 = vadd.f32 %v82_v5, %v31_v10  ;;  %v43_v15 = vadd.f32 %v82_v5, %v32_v11 }
   0x8   :  { %vm44_vm0 = vcmp.ge.f32.partialorder %v40_v12, 0.0  ;;  %v48_v16 = vmul.f32 0.2, %v40_v12  ;;  %vm45_vm1 = vcmp.ge.f32.partialorder %v41_v13, 0.0  ;;  %v49_v17 = vmul.f32 0.2, %v41_v13 }
   0x9   :  { %vm46_vm2 = vcmp.ge.f32.partialorder %v42_v14, 0.0  ;;  %v50_v18 = vmul.f32 0.2, %v42_v14  ;;  %vm47_vm3 = vcmp.ge.f32.partialorder %v43_v15, 0.0  ;;  %v51_v19 = vmul.f32 0.2, %v43_v15 }
   0xa   :  { %v52_v20 = vsel %vm44_vm0, %v40_v12, %v48_v16  ;;  %v53_v21 = vsel %vm45_vm1, %v41_v13, %v49_v17 }
   0xb   :  { %v87_v22 = vpack.c.bf16 %v52_v20, %v52_v20  ;;  %v88_v23 = vpack.c.bf16 %v53_v21, %v53_v21  ;;  %v54_v24 = vsel %vm46_vm2, %v42_v14, %v50_v18  ;;  %v55_v25 = vsel %vm47_vm3, %v43_v15, %v51_v19 }
   0xc   :  { %v89_v26 = vpack.c.bf16 %v54_v24, %v54_v24  ;;  %v90_v27 = vpack.c.bf16 %v55_v25, %v55_v25 }
   0xd   :  { %73 = vst.msk [vmem:[%s147_s3] sm:$0xf] %vm72_vm4, %v87_v22  ;;  %74 = vst.msk [vmem:[%s147_s3 + $0x4] sm:$0xf] %vm72_vm4, %v88_v23 }
   0xe   :  { %75 = vst.msk [vmem:[%s147_s3 + $0x8] sm:$0xf] %vm72_vm4, %v89_v26  ;;  %76 = vst.msk [vmem:[%s147_s3 + $0xc] sm:$0xf] %vm72_vm4, %v90_v27 }

// kernel: mula_gan_generator.33
= control target key start
LH: loop header
LB: loop body
LE: loop exit
PB: predicated region body
PF: predicated region fallthrough
CT: control target
= control target key end

     0   :  { %vm443_vm0 = vcmask 519168   ;;  %vm448_vm1 = vcmask 523264   ;;  %s832_s1 = inlined_call_operand.vmem [shape: bf16[512,64], index: 1, kind: input, shape index: {}]   ;;  %s833_s0 = inlined_call_operand.vmem [shape: bf16[32,512], index: 0, kind: input, shape index: {}]   ;;  %s834_s2 = inlined_call_operand.vmem [shape: f32[1,64], index: 2, kind: input, shape index: {}]   ;;  %s835_s3 = inlined_call_operand.vmem [shape: bf16[32,64], index: 3, kind: output, shape index: {0}]   ;;  %s836_s4 = inlined_call_operand.vmem [shape: f32[1,8,64], index: 4, kind: output, shape index: {1}]   ;;  %s837_s5 = inlined_call_operand.vmem [shape: f32[1,8,64], index: 5, kind: output, shape index: {2}]  }
   0x1   :  { %v603_v0 = vld [vmem:[%s832_s1 + $0x40] sm:$0xff]   ;;  %v607_v4 = vld [vmem:[%s832_s1 + $0x48] sm:$0xff]   ;;  %v611_v8 = vld [vmem:[%s832_s1 + $0x50] sm:$0xff]  }
   0x2   :  { %v604_v1 = vld [vmem:[%s832_s1 + $0xc0] sm:$0xff]   ;;  %547 = vmatprep.subr.bf16.mxu0 %v603_v0  ;;  %v608_v5 = vld [vmem:[%s832_s1 + $0xc8] sm:$0xff]   ;;  %v612_v9 = vld [vmem:[%s832_s1 + $0xd0] sm:$0xff]  }
   0x3   :  { %v605_v2 = vld [vmem:[%s832_s1] sm:$0xff]   ;;  %575 = vmatprep.subr.bf16.mxu1 %v604_v1  ;;  %v609_v6 = vld [vmem:[%s832_s1 + $0x8] sm:$0xff]   ;;  %v613_v10 = vld [vmem:[%s832_s1 + $0x10] sm:$0xff]  }
   0x4   :  { %v606_v3 = vld [vmem:[%s832_s1 + $0x80] sm:$0xff]   ;;  %548 = vmatpush3.bf16.msra.mxu0 %v605_v2  ;;  %v610_v7 = vld [vmem:[%s832_s1 + $0x88] sm:$0xff]   ;;  %v614_v11 = vld [vmem:[%s832_s1 + $0x90] sm:$0xff]  }
   0x5   :  { %576 = vmatpush3.bf16.msra.mxu1 %v606_v3  ;;  %549 = vmatprep.subr.bf16.mxu0 %v607_v4  ;;  %v615_v12 = vld [vmem:[%s832_s1 + $0x58] sm:$0xff]   ;;  %v619_v16 = vld [vmem:[%s832_s1 + $0x60] sm:$0xff]   ;;  %v623_v20 = vld [vmem:[%s832_s1 + $0x68] sm:$0xff]  }
   0x6   :  { %577 = vmatprep.subr.bf16.mxu1 %v608_v5  ;;  %v616_v13 = vld [vmem:[%s832_s1 + $0xd8] sm:$0xff]   ;;  %v620_v17 = vld [vmem:[%s832_s1 + $0xe0] sm:$0xff]   ;;  %v624_v21 = vld [vmem:[%s832_s1 + $0xe8] sm:$0xff]  }
   0x7   :  { %v617_v14 = vld [vmem:[%s832_s1 + $0x18] sm:$0xff]   ;;  %v621_v18 = vld [vmem:[%s832_s1 + $0x20] sm:$0xff]   ;;  %v625_v22 = vld [vmem:[%s832_s1 + $0x28] sm:$0xff]  }
   0x8   :  { %550 = vmatpush3.bf16.msra.mxu0 %v609_v6  ;;  %v618_v15 = vld [vmem:[%s832_s1 + $0x98] sm:$0xff]   ;;  %v622_v19 = vld [vmem:[%s832_s1 + $0xa0] sm:$0xff]   ;;  %v626_v23 = vld [vmem:[%s832_s1 + $0xa8] sm:$0xff]  }
   0x9   :  { %578 = vmatpush3.bf16.msra.mxu1 %v610_v7  ;;  %551 = vmatprep.subr.bf16.mxu0 %v611_v8  ;;  %v627_v24 = vld [vmem:[%s832_s1 + $0x70] sm:$0xff]   ;;  %v631_v28 = vld [vmem:[%s832_s1 + $0x78] sm:$0xff]   ;;  %v498_v42 = vld [vmem:[%s834_s2] ss:$0 sm:$0xff] }
   0xa   :  { %579 = vmatprep.subr.bf16.mxu1 %v612_v9  ;;  %v628_v25 = vld [vmem:[%s832_s1 + $0xf0] sm:$0xff]   ;;  %v632_v29 = vld [vmem:[%s832_s1 + $0xf8] sm:$0xff]  }
   0xb   :  { %v629_v26 = vld [vmem:[%s832_s1 + $0x30] sm:$0xff]   ;;  %v633_v30 = vld [vmem:[%s832_s1 + $0x38] sm:$0xff]  }
   0xc   :  { %552 = vmatpush3.bf16.msra.mxu0 %v613_v10  ;;  %v630_v27 = vld [vmem:[%s832_s1 + $0xb0] sm:$0xff]   ;;  %v634_v31 = vld [vmem:[%s832_s1 + $0xb8] sm:$0xff]  }
   0xd   :  { %580 = vmatpush3.bf16.msra.mxu1 %v614_v11  ;;  %553 = vmatprep.subr.bf16.mxu0 %v615_v12  ;;  %v635_v32 = vld [vmem:[%s833_s0] ss:$16 sps:$4 sm:$0xff]   ;;  %v637_v33 = vld [vmem:[%s833_s0 + $0x4] ss:$16 sps:$4 sm:$0xff]   ;;  %v638_v34 = vld [vmem:[%s833_s0 + $0x8] ss:$16 sps:$4 sm:$0xff]  }
   0xe   :  { %581 = vmatprep.subr.bf16.mxu1 %v616_v13  ;;  %v640_v35 = vld [vmem:[%s833_s0 + $0xc] ss:$16 sps:$4 sm:$0xff]   ;;  %361 = vmatprep.mubr.bf16.mxu0 %v637_v33  ;;  %v641_v36 = vld [vmem:[%s833_s0 + $0x24] ss:$16 sps:$4 sm:$0xff]   ;;  %v645_v38 = vld [vmem:[%s833_s0 + $0x20] ss:$16 sps:$4 sm:$0xff]  }
   0xf   :  { %410 = vmatprep.mubr.bf16.mxu1 %v640_v35  ;;  %v643_v37 = vld [vmem:[%s833_s0 + $0x2c] ss:$16 sps:$4 sm:$0xff]   ;;  %v646_v39 = vld [vmem:[%s833_s0 + $0x28] ss:$16 sps:$4 sm:$0xff]  }
  0x10   :  { %554 = vmatpush3.bf16.msra.mxu0 %v617_v14 }
  0x11   :  { %582 = vmatpush3.bf16.msra.mxu1 %v618_v15  ;;  %555 = vmatprep.subr.bf16.mxu0 %v619_v16 }
  0x12   :  { %583 = vmatprep.subr.bf16.mxu1 %v620_v17 }
  0x14   :  { %556 = vmatpush3.bf16.msra.mxu0 %v621_v18 }
  0x15   :  { %584 = vmatpush3.bf16.msra.mxu1 %v622_v19  ;;  %557 = vmatprep.subr.bf16.mxu0 %v623_v20 }
  0x16   :  { %585 = vmatprep.subr.bf16.mxu1 %v624_v21 }
  0x18   :  { %558 = vmatpush3.bf16.msra.mxu0 %v625_v22 }
  0x19   :  { %586 = vmatpush3.bf16.msra.mxu1 %v626_v23  ;;  %559 = vmatprep.subr.bf16.mxu0 %v627_v24 }
  0x1a   :  { %587 = vmatprep.subr.bf16.mxu1 %v628_v25 }
  0x1c   :  { %560 = vmatpush3.bf16.msra.mxu0 %v629_v26 }
  0x1d   :  { %588 = vmatpush3.bf16.msra.mxu1 %v630_v27  ;;  %561 = vmatprep.subr.bf16.mxu0 %v631_v28 }
  0x1e   :  { %589 = vmatprep.subr.bf16.mxu1 %v632_v29 }
  0x20   :  { %562 = vmatpush3.bf16.msra.mxu0 %v633_v30 }
  0x21   :  { %590 = vmatpush3.bf16.msra.mxu1 %v634_v31 }
  0x23   :  { %362 = vmatmul.mubr.bf16.vlgmr.msra.gmra.mrb[0].mxu0 %v635_v32  ;;  %v479_v32 = vlaneseq }
  0x24   :  { %411 = vmatmul.mubr.bf16.vlgmr.msra.gmra.mrb[0].mxu1 %v638_v34  ;;  %369 = vmatprep.mubr.bf16.mxu0 %v641_v36 }
  0x25   :  { %418 = vmatprep.mubr.bf16.mxu1 %v643_v37  ;;  %v480_v37 = vshrl.u32 %v479_v32, 7 }
  0x27   :  { %vm481_vm2 = vcmp.eq.s32.totalorder %v480_v37, 0 }
  0x2b   :  { %370 = vmatmul.mubr.bf16.gmra.mrb[4].mxu0 %v645_v38 }
  0x2c   :  { %419 = vmatmul.mubr.bf16.gmra.mrb[4].mxu1 %v646_v39 }
  0xf6   :  { %v563_v40 = vpop.f32.mrb[0].mxu0 }
  0xf7   :  { %v591_v41 = vpop.f32.mrb[0].mxu1  ;;  %v564_v43 = vpop.f32.mrb[1].mxu0 }
  0xf8   :  { %v565_v44 = vadd.f32 %v564_v43, %v563_v40  ;;  %v592_v45 = vpop.f32.mrb[1].mxu1  ;;  %v566_v46 = vpop.f32.mrb[2].mxu0 }
  0xf9   :  { %v593_v47 = vadd.f32 %v592_v45, %v591_v41  ;;  %v594_v48 = vpop.f32.mrb[2].mxu1  ;;  %v567_v49 = vpop.f32.mrb[3].mxu0 }
  0xfa   :  { %v364_v50 = vadd.f32 %v565_v44, %v498_v42  ;;  %v568_v51 = vadd.f32 %v567_v49, %v566_v46  ;;  %v595_v52 = vpop.f32.mrb[3].mxu1 }
  0xfb   :  { %v596_v53 = vadd.f32 %v595_v52, %v594_v48 }
  0xfc   :  { %v413_v54 = vadd.f32 %v593_v47, %v364_v50  ;;  %v367_v55 = vadd.f32 %v568_v51, %v498_v42 }
  0xfe   :  { %v543_v56 = vpack.c.bf16 %v413_v54, %v413_v54  ;;  %v462_v57 = vmul.f32 %v413_v54, %v413_v54  ;;  %v416_v58 = vadd.f32 %v596_v53, %v367_v55  ;;  %v569_v59 = vpop.f32.mrb[4].mxu0  ;;  %v449_v62 = vsel %vm448_vm1, %v413_v54, 0.0 }
  0xff   :  { %v597_v60 = vpop.f32.mrb[4].mxu1  ;;  %v570_v61 = vpop.f32.mrb[5].mxu0 }
 0x100   :  { %444 = vst.msk [vmem:[%s835_s3] sm:$0xf] %vm443_vm0, %v543_v56  ;;  %v544_v63 = vpack.c.bf16 %v416_v58, %v416_v58  ;;  %v450_v0 = vsel %vm448_vm1, %v416_v58, 0.0  ;;  %v463_v1 = vmul.f32 %v416_v58, %v416_v58  ;;  %v598_v2 = vpop.f32.mrb[5].mxu1  ;;  %v572_v3 = vpop.f32.mrb[6].mxu0  ;;  %v571_v5 = vadd.f32 %v570_v61, %v569_v59 }
 0x101   :  { %v451_v4 = vadd.f32 %v450_v0, %v449_v62  ;;  %v599_v6 = vadd.f32 %v598_v2, %v597_v60  ;;  %v600_v7 = vpop.f32.mrb[6].mxu1  ;;  %v573_v8 = vpop.f32.mrb[7].mxu0  ;;  %v466_v9 = vsel %vm448_vm1, %v462_v57, 0.0 }
 0x102   :  { %445 = vst.msk [vmem:[%s835_s3 + $0x4] sm:$0xf] %vm443_vm0, %v544_v63  ;;  %v467_v10 = vsel %vm448_vm1, %v463_v1, 0.0  ;;  %v574_v11 = vadd.f32 %v573_v8, %v572_v3  ;;  %v601_v12 = vpop.f32.mrb[7].mxu1  ;;  %v372_v14 = vadd.f32 %v571_v5, %v498_v42 }
 0x103   :  { %v468_v13 = vadd.f32 %v467_v10, %v466_v9  ;;  %v602_v15 = vadd.f32 %v601_v12, %v600_v7 }
 0x104   :  { %v375_v16 = vadd.f32 %v574_v11, %v498_v42  ;;  %v421_v17 = vadd.f32 %v599_v6, %v372_v14 }
 0x106   :  { %v424_v18 = vadd.f32 %v602_v15, %v375_v16  ;;  %v545_v19 = vpack.c.bf16 %v421_v17, %v421_v17  ;;  %v452_v20 = vsel %vm448_vm1, %v421_v17, 0.0  ;;  %v464_v21 = vmul.f32 %v421_v17, %v421_v17 }
 0x107   :  { %v453_v22 = vadd.f32 %v452_v20, %v451_v4 }
 0x108   :  { %v546_v23 = vpack.c.bf16 %v424_v18, %v424_v18  ;;  %v454_v24 = vsel %vm448_vm1, %v424_v18, 0.0  ;;  %v465_v25 = vmul.f32 %v424_v18, %v424_v18  ;;  %446 = vst.msk [vmem:[%s835_s3 + $0x8] sm:$0xf] %vm443_vm0, %v545_v19  ;;  %v469_v26 = vsel %vm448_vm1, %v464_v21, 0.0 }
 0x109   :  { %v470_v27 = vadd.f32 %v469_v26, %v468_v13  ;;  %v455_v28 = vadd.f32 %v454_v24, %v453_v22 }
 0x10a   :  { %447 = vst.msk [vmem:[%s835_s3 + $0xc] sm:$0xf] %vm443_vm0, %v546_v23  ;;  %v471_v29 = vsel %vm448_vm1, %v465_v25, 0.0 }
 0x10b   :  { %v456_v30 = vrot.slane %v455_v28, 4  ;;  %v472_v31 = vadd.f32 %v471_v29, %v470_v27 }
 0x10d   :  { %v457_v33 = vadd.f32 %v456_v30, %v455_v28  ;;  %v473_v34 = vrot.slane %v472_v31, 4 }
 0x10f   :  { %v458_v35 = vrot.slane %v457_v33, 2  ;;  %v474_v36 = vadd.f32 %v473_v34, %v472_v31 }
 0x111   :  { %v459_v38 = vadd.f32 %v458_v35, %v457_v33  ;;  %v475_v39 = vrot.slane %v474_v36, 2 }
 0x113   :  { %v460_v40 = vrot.slane %v459_v38, 1  ;;  %v476_v41 = vadd.f32 %v475_v39, %v474_v36 }
 0x115   :  { %v461_v42 = vadd.f32 %v460_v40, %v459_v38  ;;  %v477_v43 = vrot.slane %v476_v41, 1 }
 0x117   :  { %v478_v44 = vadd.f32 %v477_v43, %v476_v41  ;;  %v482_v45 = vsel %vm481_vm2, %v461_v42, 0.0 }
 0x118   :  { %483 = vst.msk [vmem:[%s836_s4] sm:$0xff] %vm448_vm1, %v482_v45 }
 0x119   :  { %v484_v46 = vsel %vm481_vm2, %v478_v44, 0.0 }
 0x11a   :  { %485 = vst.msk [vmem:[%s837_s5] sm:$0xff] %vm448_vm1, %v484_v46 }

// kernel: mula_gan_generator.36
= control target key start
LH: loop header
LB: loop body
LE: loop exit
PB: predicated region body
PF: predicated region fallthrough
CT: control target
= control target key end

     0   :  { %vm64_vm0 = vcmask 519168   ;;  %s136_s0 = inlined_call_operand.vmem [shape: bf16[32,64], index: 0, kind: input, shape index: {}]   ;;  %s137_s1 = inlined_call_operand.vmem [shape: f32[1,64], index: 1, kind: input, shape index: {}]   ;;  %s138_s2 = inlined_call_operand.vmem [shape: f32[1,64], index: 2, kind: input, shape index: {}]   ;;  %s139_s3 = inlined_call_operand.vmem [shape: bf16[32,64], index: 3, kind: output, shape index: {}]  }
   0x1   :  { %v84_v0 = vld [vmem:[%s136_s0] sm:$0xff]   ;;  %v91_v4 = vld [vmem:[%s136_s0 + $0x8] sm:$0xff]  }
   0x2   :  { %v73_v1 = vld [vmem:[%s137_s1] ss:$0 sm:$0xff]  ;;  %v85_v2 = vunpack.c.l.bf16 %v84_v0  ;;  %v86_v3 = vunpack.c.h.bf16 %v84_v0  ;;  %v89_v6 = vunpack.c.l.bf16 %v91_v4  ;;  %v90_v7 = vunpack.c.h.bf16 %v91_v4 }
   0x3   :  { %v74_v5 = vld [vmem:[%s138_s2] ss:$0 sm:$0xff] }
   0x4   :  { %v29_v8 = vmul.f32 %v85_v2, %v73_v1  ;;  %v30_v9 = vmul.f32 %v86_v3, %v73_v1  ;;  %v31_v10 = vmul.f32 %v89_v6, %v73_v1  ;;  %v32_v11 = vmul.f32 %v90_v7, %v73_v1 }
   0x6   :  { %v40_v12 = vadd.f32 %v74_v5, %v29_v8  ;;  %v41_v13 = vadd.f32 %v74_v5, %v30_v9  ;;  %v42_v14 = vadd.f32 %v74_v5, %v31_v10  ;;  %v43_v15 = vadd.f32 %v74_v5, %v32_v11 }
   0x8   :  { %v44_v16 = vmax.f32 %v40_v12, 0.0  ;;  %v45_v17 = vmax.f32 %v41_v13, 0.0  ;;  %v46_v18 = vmax.f32 %v42_v14, 0.0  ;;  %v47_v19 = vmax.f32 %v43_v15, 0.0 }
   0xa   :  { %v79_v20 = vpack.c.bf16 %v44_v16, %v44_v16  ;;  %v80_v21 = vpack.c.bf16 %v45_v17, %v45_v17  ;;  %v81_v22 = vpack.c.bf16 %v46_v18, %v46_v18  ;;  %v82_v23 = vpack.c.bf16 %v47_v19, %v47_v19 }
   0xc   :  { %65 = vst.msk [vmem:[%s139_s3] sm:$0xf] %vm64_vm0, %v79_v20  ;;  %66 = vst.msk [vmem:[%s139_s3 + $0x4] sm:$0xf] %vm64_vm0, %v80_v21 }
   0xd   :  { %67 = vst.msk [vmem:[%s139_s3 + $0x8] sm:$0xf] %vm64_vm0, %v81_v22  ;;  %68 = vst.msk [vmem:[%s139_s3 + $0xc] sm:$0xf] %vm64_vm0, %v82_v23 }

// kernel: mula_gan_generator.38
= control target key start
LH: loop header
LB: loop body
LE: loop exit
PB: predicated region body
PF: predicated region fallthrough
CT: control target
= control target key end

     0   :  { %vm75_vm0 = vcmask 519168   ;;  %s167_s0 = inlined_call_operand.vmem [shape: bf16[32,64], index: 0, kind: input, shape index: {}]   ;;  %s168_s1 = inlined_call_operand.vmem [shape: bf16[32,64], index: 1, kind: input, shape index: {}]   ;;  %s169_s2 = inlined_call_operand.vmem [shape: f32[1,64], index: 2, kind: input, shape index: {}]   ;;  %s170_s3 = inlined_call_operand.vmem [shape: f32[1,64], index: 3, kind: input, shape index: {}]   ;;  %s171_s4 = inlined_call_operand.vmem [shape: bf16[32,64], index: 4, kind: output, shape index: {}]  }
   0x1   :  { %v95_v0 = vld [vmem:[%s167_s0] sm:$0xff]   ;;  %v110_v5 = vld [vmem:[%s167_s0 + $0x8] sm:$0xff]  }
   0x2   :  { %v84_v1 = vld [vmem:[%s169_s2] ss:$0 sm:$0xff]  ;;  %v96_v2 = vunpack.c.l.bf16 %v95_v0  ;;  %v97_v4 = vunpack.c.h.bf16 %v95_v0  ;;  %v111_v6 = vld [vmem:[%s168_s1 + $0x8] sm:$0xff]   ;;  %v100_v9 = vunpack.c.l.bf16 %v110_v5  ;;  %v101_v13 = vunpack.c.h.bf16 %v110_v5 }
   0x3   :  { %v103_v3 = vld [vmem:[%s168_s1] sm:$0xff]   ;;  %v108_v15 = vunpack.c.l.bf16 %v111_v6  ;;  %v109_v19 = vunpack.c.h.bf16 %v111_v6 }
   0x4   :  { %v85_v7 = vld [vmem:[%s170_s3] ss:$0 sm:$0xff]  ;;  %v104_v8 = vunpack.c.l.bf16 %v103_v3  ;;  %v32_v10 = vmul.f32 %v96_v2, %v84_v1  ;;  %v33_v11 = vmul.f32 %v97_v4, %v84_v1  ;;  %v105_v12 = vunpack.c.h.bf16 %v103_v3 }
   0x5   :  { %v34_v14 = vmul.f32 %v100_v9, %v84_v1  ;;  %v35_v18 = vmul.f32 %v101_v13, %v84_v1 }
   0x6   :  { %v43_v16 = vadd.f32 %v85_v7, %v32_v10  ;;  %v44_v17 = vadd.f32 %v85_v7, %v33_v11 }
   0x7   :  { %v45_v20 = vadd.f32 %v85_v7, %v34_v14  ;;  %v46_v23 = vadd.f32 %v85_v7, %v35_v18 }
   0x8   :  { %v55_v21 = vadd.f32 %v104_v8, %v43_v16  ;;  %v56_v22 = vadd.f32 %v105_v12, %v44_v17 }
   0x9   :  { %v57_v24 = vadd.f32 %v108_v15, %v45_v20  ;;  %v58_v27 = vadd.f32 %v109_v19, %v46_v23 }
   0xa   :  { %v90_v25 = vpack.c.bf16 %v55_v21, %v55_v21  ;;  %v91_v26 = vpack.c.bf16 %v56_v22, %v56_v22 }
   0xb   :  { %v92_v28 = vpack.c.bf16 %v57_v24, %v57_v24  ;;  %v93_v29 = vpack.c.bf16 %v58_v27, %v58_v27 }
   0xc   :  { %76 = vst.msk [vmem:[%s171_s4] sm:$0xf] %vm75_vm0, %v90_v25  ;;  %77 = vst.msk [vmem:[%s171_s4 + $0x4] sm:$0xf] %vm75_vm0, %v91_v26 }
   0xd   :  { %78 = vst.msk [vmem:[%s171_s4 + $0x8] sm:$0xf] %vm75_vm0, %v92_v28  ;;  %79 = vst.msk [vmem:[%s171_s4 + $0xc] sm:$0xf] %vm75_vm0, %v93_v29 }

// kernel: mula_gan_generator.35
= control target key start
LH: loop header
LB: loop body
LE: loop exit
PB: predicated region body
PF: predicated region fallthrough
CT: control target
= control target key end

     0   :  { %vm375_vm0 = vcmask 523264   ;;  %vm545_vm1 = vcmask 519168   ;;  %s985_s1 = inlined_call_operand.vmem [shape: bf16[576,64], index: 1, kind: input, shape index: {}]   ;;  %s986_s0 = inlined_call_operand.vmem [shape: bf16[32,576], index: 0, kind: input, shape index: {}]   ;;  %s987_s2 = inlined_call_operand.vmem [shape: f32[1,64], index: 2, kind: input, shape index: {}]   ;;  %s988_s3 = inlined_call_operand.vmem [shape: bf16[32,64], index: 3, kind: output, shape index: {0}]   ;;  %s989_s4 = inlined_call_operand.vmem [shape: f32[1,8,64], index: 4, kind: output, shape index: {1}]   ;;  %s990_s5 = inlined_call_operand.vmem [shape: f32[1,8,64], index: 5, kind: output, shape index: {2}]  }
   0x1   :  { %v730_v0 = vld [vmem:[%s985_s1 + $0x40] sm:$0xff]   ;;  %v734_v4 = vld [vmem:[%s985_s1 + $0x48] sm:$0xff]   ;;  %v738_v8 = vld [vmem:[%s985_s1 + $0x50] sm:$0xff]  }
   0x2   :  { %v731_v1 = vld [vmem:[%s985_s1] sm:$0xff]   ;;  %656 = vmatprep.subr.bf16.mxu0 %v730_v0  ;;  %v735_v5 = vld [vmem:[%s985_s1 + $0x8] sm:$0xff]   ;;  %v739_v9 = vld [vmem:[%s985_s1 + $0x10] sm:$0xff]  }
   0x3   :  { %v732_v2 = vld [vmem:[%s985_s1 + $0xc0] sm:$0xff]   ;;  %657 = vmatpush3.bf16.msra.mxu0 %v731_v1  ;;  %v736_v6 = vld [vmem:[%s985_s1 + $0xc8] sm:$0xff]   ;;  %v740_v10 = vld [vmem:[%s985_s1 + $0xd0] sm:$0xff]  }
   0x4   :  { %v733_v3 = vld [vmem:[%s985_s1 + $0x80] sm:$0xff]   ;;  %684 = vmatprep.subr.bf16.mxu1 %v732_v2  ;;  %658 = vmatprep.subr.bf16.mxu0 %v734_v4  ;;  %v737_v7 = vld [vmem:[%s985_s1 + $0x88] sm:$0xff]   ;;  %v741_v11 = vld [vmem:[%s985_s1 + $0x90] sm:$0xff]  }
   0x5   :  { %685 = vmatpush3.bf16.msra.mxu1 %v733_v3  ;;  %v742_v12 = vld [vmem:[%s985_s1 + $0x58] sm:$0xff]   ;;  %v746_v16 = vld [vmem:[%s985_s1 + $0x60] sm:$0xff]   ;;  %v750_v20 = vld [vmem:[%s985_s1 + $0x68] sm:$0xff]  }
   0x6   :  { %686 = vmatprep.subr.bf16.mxu1 %v736_v6  ;;  %v743_v13 = vld [vmem:[%s985_s1 + $0x18] sm:$0xff]   ;;  %v747_v17 = vld [vmem:[%s985_s1 + $0x20] sm:$0xff]   ;;  %v751_v21 = vld [vmem:[%s985_s1 + $0x28] sm:$0xff]  }
   0x7   :  { %659 = vmatpush3.bf16.msra.mxu0 %v735_v5  ;;  %v744_v14 = vld [vmem:[%s985_s1 + $0xd8] sm:$0xff]   ;;  %v748_v18 = vld [vmem:[%s985_s1 + $0xe0] sm:$0xff]   ;;  %v752_v22 = vld [vmem:[%s985_s1 + $0xe8] sm:$0xff]  }
   0x8   :  { %660 = vmatprep.subr.bf16.mxu0 %v738_v8  ;;  %v745_v15 = vld [vmem:[%s985_s1 + $0x98] sm:$0xff]   ;;  %v749_v19 = vld [vmem:[%s985_s1 + $0xa0] sm:$0xff]   ;;  %v753_v23 = vld [vmem:[%s985_s1 + $0xa8] sm:$0xff]  }
   0x9   :  { %687 = vmatpush3.bf16.msra.mxu1 %v737_v7  ;;  %v754_v24 = vld [vmem:[%s985_s1 + $0x70] sm:$0xff]   ;;  %v758_v28 = vld [vmem:[%s985_s1 + $0x78] sm:$0xff]   ;;  %v765_v34 = vld [vmem:[%s985_s1 + $0x100] sm:$0xff]  }
   0xa   :  { %688 = vmatprep.subr.bf16.mxu1 %v740_v10  ;;  %v755_v25 = vld [vmem:[%s985_s1 + $0x30] sm:$0xff]   ;;  %v759_v29 = vld [vmem:[%s985_s1 + $0x38] sm:$0xff]   ;;  %v768_v36 = vld [vmem:[%s986_s0 + $0xc] ss:$20 sps:$4 sm:$0xff]  }
   0xb   :  { %661 = vmatpush3.bf16.msra.mxu0 %v739_v9  ;;  %v756_v26 = vld [vmem:[%s985_s1 + $0xf0] sm:$0xff]   ;;  %v760_v30 = vld [vmem:[%s985_s1 + $0xf8] sm:$0xff]   ;;  %v769_v37 = vld [vmem:[%s985_s1 + $0x108] sm:$0xff]   ;;  %463 = vmatprep.mubr.bf16.mxu1 %v768_v36 }
   0xc   :  { %662 = vmatprep.subr.bf16.mxu0 %v742_v12  ;;  %v757_v27 = vld [vmem:[%s985_s1 + $0xb0] sm:$0xff]   ;;  %v763_v32 = vld [vmem:[%s986_s0 + $0x4] ss:$20 sps:$4 sm:$0xff]   ;;  %v766_v35 = vld [vmem:[%s986_s0 + $0x8] ss:$20 sps:$4 sm:$0xff]  }
   0xd   :  { %689 = vmatpush3.bf16.msra.mxu1 %v741_v11  ;;  %v761_v31 = vld [vmem:[%s986_s0] ss:$20 sps:$4 sm:$0xff]   ;;  %v764_v33 = vld [vmem:[%s985_s1 + $0xb8] sm:$0xff]   ;;  %414 = vmatprep.mubr.bf16.mxu0 %v763_v32  ;;  %v776_v42 = vld [vmem:[%s986_s0 + $0x30] ss:$20 sps:$4 sm:$0xff]  }
   0xe   :  { %690 = vmatprep.subr.bf16.mxu1 %v744_v14  ;;  %v770_v38 = vld [vmem:[%s986_s0 + $0x2c] ss:$20 sps:$4 sm:$0xff]   ;;  %v772_v39 = vld [vmem:[%s986_s0 + $0x28] ss:$20 sps:$4 sm:$0xff]   ;;  %v773_v40 = vld [vmem:[%s985_s1 + $0x110] sm:$0xff]  }
   0xf   :  { %663 = vmatpush3.bf16.msra.mxu0 %v743_v13  ;;  %v774_v41 = vld [vmem:[%s986_s0 + $0x34] ss:$20 sps:$4 sm:$0xff]   ;;  %v777_v43 = vld [vmem:[%s985_s1 + $0x118] sm:$0xff]   ;;  %v778_v44 = vld [vmem:[%s986_s0 + $0x10] ss:$20 sps:$4 sm:$0xff]  }
  0x10   :  { %664 = vmatprep.subr.bf16.mxu0 %v746_v16  ;;  %v779_v45 = vld [vmem:[%s986_s0 + $0x38] ss:$20 sps:$4 sm:$0xff]   ;;  %v599_v47 = vld [vmem:[%s987_s2] ss:$0 sm:$0xff] }
  0x11   :  { %691 = vmatpush3.bf16.msra.mxu1 %v745_v15 }
  0x12   :  { %692 = vmatprep.subr.bf16.mxu1 %v748_v18 }
  0x13   :  { %665 = vmatpush3.bf16.msra.mxu0 %v747_v17 }
  0x14   :  { %666 = vmatprep.subr.bf16.mxu0 %v750_v20 }
  0x15   :  { %693 = vmatpush3.bf16.msra.mxu1 %v749_v19 }
  0x16   :  { %694 = vmatprep.subr.bf16.mxu1 %v752_v22 }
  0x17   :  { %667 = vmatpush3.bf16.msra.mxu0 %v751_v21 }
  0x18   :  { %668 = vmatprep.subr.bf16.mxu0 %v754_v24 }
  0x19   :  { %695 = vmatpush3.bf16.msra.mxu1 %v753_v23 }
  0x1a   :  { %696 = vmatprep.subr.bf16.mxu1 %v756_v26 }
  0x1b   :  { %669 = vmatpush3.bf16.msra.mxu0 %v755_v25 }
  0x1c   :  { %670 = vmatprep.subr.bf16.mxu0 %v758_v28 }
  0x1d   :  { %697 = vmatpush3.bf16.msra.mxu1 %v757_v27 }
  0x1e   :  { %698 = vmatprep.subr.bf16.mxu1 %v760_v30 }
  0x1f   :  { %671 = vmatpush3.bf16.msra.mxu0 %v759_v29 }
  0x20   :  { %718 = vmatprep.subr.bf16.mxu0 %v765_v34 }
  0x21   :  { %699 = vmatpush3.bf16.msra.mxu1 %v764_v33 }
  0x22   :  { %415 = vmatmul.mubr.bf16.vlgmr.msra.gmra.mrb[0].mxu0 %v761_v31 }
  0x23   :  { %719 = vmatpush3.bf16.msra.mxu0 %v765_v34  ;;  %422 = vmatprep.mubr.bf16.mxu0 %v770_v38 }
  0x24   :  { %464 = vmatmul.mubr.bf16.vlgmr.msra.gmra.mrb[0].mxu1 %v766_v35  ;;  %720 = vmatprep.subr.bf16.mxu0 %v769_v37 }
  0x25   :  { %471 = vmatprep.mubr.bf16.mxu1 %v774_v41 }
  0x27   :  { %721 = vmatpush3.bf16.msra.mxu0 %v769_v37 }
  0x28   :  { %722 = vmatprep.subr.bf16.mxu0 %v773_v40 }
  0x2a   :  { %423 = vmatmul.mubr.bf16.gmra.mrb[4].mxu0 %v772_v39 }
  0x2b   :  { %726 = vmatprep.mubr.msk.bf16.mxu0 %vm375_vm0, %v778_v44  ;;  %723 = vmatpush3.bf16.msra.mxu0 %v773_v40 }
  0x2c   :  { %472 = vmatmul.mubr.bf16.gmra.mrb[4].mxu1 %v776_v42  ;;  %724 = vmatprep.subr.bf16.mxu0 %v777_v43 }
  0x2f   :  { %725 = vmatpush3.bf16.msra.mxu0 %v777_v43 }
  0x32   :  { %727 = vmatmul.mubr.msk.bf16.vlgmr.msra.gmra.mrb[8].mxu0 %vm375_vm0, %v779_v45 }
  0xf5   :  { %v672_v46 = vpop.f32.mrb[0].mxu0 }
  0xf6   :  { %v673_v48 = vpop.f32.mrb[1].mxu0 }
  0xf7   :  { %v674_v49 = vadd.f32 %v673_v48, %v672_v46  ;;  %v675_v50 = vpop.f32.mrb[2].mxu0  ;;  %v700_v51 = vpop.f32.mrb[0].mxu1  ;;  %v580_v46 = vlaneseq }
  0xf8   :  { %v676_v52 = vpop.f32.mrb[3].mxu0  ;;  %v701_v55 = vpop.f32.mrb[1].mxu1 }
  0xf9   :  { %v417_v53 = vadd.f32 %v674_v49, %v599_v47  ;;  %v677_v54 = vadd.f32 %v676_v52, %v675_v50  ;;  %v702_v56 = vadd.f32 %v701_v55, %v700_v51  ;;  %v703_v57 = vpop.f32.mrb[2].mxu1  ;;  %v581_v51 = vshrl.u32 %v580_v46, 7 }
  0xfa   :  { %v704_v59 = vpop.f32.mrb[3].mxu1 }
  0xfb   :  { %v420_v58 = vadd.f32 %v677_v54, %v599_v47  ;;  %v705_v60 = vadd.f32 %v704_v59, %v703_v57  ;;  %v466_v61 = vadd.f32 %v702_v56, %v417_v53  ;;  %vm582_vm2 = vcmp.eq.s32.totalorder %v581_v51, 0 }
  0xfd   :  { %v678_v62 = vpop.f32.mrb[4].mxu0  ;;  %v469_v0 = vadd.f32 %v705_v60, %v420_v58 }
  0xfe   :  { %v679_v63 = vpop.f32.mrb[5].mxu0 }
  0xff   :  { %v680_v1 = vadd.f32 %v679_v63, %v678_v62  ;;  %v681_v2 = vpop.f32.mrb[6].mxu0  ;;  %v706_v3 = vpop.f32.mrb[4].mxu1 }
 0x100   :  { %v682_v4 = vpop.f32.mrb[7].mxu0  ;;  %v707_v7 = vpop.f32.mrb[5].mxu1 }
 0x101   :  { %v425_v5 = vadd.f32 %v680_v1, %v599_v47  ;;  %v683_v6 = vadd.f32 %v682_v4, %v681_v2  ;;  %v708_v8 = vadd.f32 %v707_v7, %v706_v3  ;;  %v709_v9 = vpop.f32.mrb[6].mxu1 }
 0x102   :  { %v710_v11 = vpop.f32.mrb[7].mxu1 }
 0x103   :  { %v428_v10 = vadd.f32 %v683_v6, %v599_v47  ;;  %v711_v12 = vadd.f32 %v710_v11, %v709_v9  ;;  %v474_v13 = vadd.f32 %v708_v8, %v425_v5 }
 0x105   :  { %v728_v14 = vpop.f32.mrb[8].mxu0  ;;  %v477_v15 = vadd.f32 %v711_v12, %v428_v10 }
 0x106   :  { %v523_v16 = vadd.f32 %v728_v14, %v474_v13  ;;  %v514_v17 = vpop.f32.mrb[9].mxu0 }
 0x107   :  { %v515_v18 = vadd.f32 %v514_v17, %v466_v61  ;;  %v729_v19 = vpop.f32.mrb[10].mxu0 }
 0x108   :  { %v654_v20 = vpack.c.bf16 %v523_v16, %v523_v16  ;;  %v526_v21 = vadd.f32 %v729_v19, %v477_v15  ;;  %v517_v22 = vpop.f32.mrb[11].mxu0  ;;  %v565_v26 = vmul.f32 %v523_v16, %v523_v16  ;;  %v553_v33 = vsel %vm375_vm0, %v523_v16, 0.0 }
 0x109   :  { %v652_v23 = vpack.c.bf16 %v515_v18, %v515_v18  ;;  %v563_v24 = vmul.f32 %v515_v18, %v515_v18  ;;  %v518_v25 = vadd.f32 %v517_v22, %v469_v0  ;;  %v550_v28 = vsel %vm375_vm0, %v515_v18, 0.0 }
 0x10a   :  { %548 = vst.msk [vmem:[%s988_s3 + $0x8] sm:$0xf] %vm545_vm1, %v654_v20  ;;  %v655_v27 = vpack.c.bf16 %v526_v21, %v526_v21  ;;  %v566_v35 = vmul.f32 %v526_v21, %v526_v21  ;;  %v570_v39 = vsel %vm375_vm0, %v565_v26, 0.0  ;;  %v555_v40 = vsel %vm375_vm0, %v526_v21, 0.0 }
 0x10b   :  { %546 = vst.msk [vmem:[%s988_s3] sm:$0xf] %vm545_vm1, %v652_v23  ;;  %v653_v29 = vpack.c.bf16 %v518_v25, %v518_v25  ;;  %v551_v30 = vsel %vm375_vm0, %v518_v25, 0.0  ;;  %v564_v31 = vmul.f32 %v518_v25, %v518_v25  ;;  %v567_v34 = vsel %vm375_vm0, %v563_v24, 0.0 }
 0x10c   :  { %549 = vst.msk [vmem:[%s988_s3 + $0xc] sm:$0xf] %vm545_vm1, %v655_v27  ;;  %v552_v32 = vadd.f32 %v551_v30, %v550_v28  ;;  %v572_v43 = vsel %vm375_vm0, %v566_v35, 0.0 }
 0x10d   :  { %547 = vst.msk [vmem:[%s988_s3 + $0x4] sm:$0xf] %vm545_vm1, %v653_v29  ;;  %v568_v36 = vsel %vm375_vm0, %v564_v31, 0.0 }
 0x10e   :  { %v554_v37 = vadd.f32 %v553_v33, %v552_v32  ;;  %v569_v38 = vadd.f32 %v568_v36, %v567_v34 }
 0x110   :  { %v556_v41 = vadd.f32 %v555_v40, %v554_v37  ;;  %v571_v42 = vadd.f32 %v570_v39, %v569_v38 }
 0x112   :  { %v557_v44 = vrot.slane %v556_v41, 4  ;;  %v573_v45 = vadd.f32 %v572_v43, %v571_v42 }
 0x114   :  { %v558_v47 = vadd.f32 %v557_v44, %v556_v41  ;;  %v574_v48 = vrot.slane %v573_v45, 4 }
 0x116   :  { %v559_v49 = vrot.slane %v558_v47, 2  ;;  %v575_v50 = vadd.f32 %v574_v48, %v573_v45 }
 0x118   :  { %v560_v52 = vadd.f32 %v559_v49, %v558_v47  ;;  %v576_v53 = vrot.slane %v575_v50, 2 }
 0x11a   :  { %v561_v54 = vrot.slane %v560_v52, 1  ;;  %v577_v55 = vadd.f32 %v576_v53, %v575_v50 }
 0x11c   :  { %v562_v56 = vadd.f32 %v561_v54, %v560_v52  ;;  %v578_v57 = vrot.slane %v577_v55, 1 }
 0x11e   :  { %v579_v58 = vadd.f32 %v578_v57, %v577_v55  ;;  %v583_v59 = vsel %vm582_vm2, %v562_v56, 0.0 }
 0x11f   :  { %584 = vst.msk [vmem:[%s989_s4] sm:$0xff] %vm375_vm0, %v583_v59 }
 0x120   :  { %v585_v60 = vsel %vm582_vm2, %v579_v58, 0.0 }
 0x121   :  { %586 = vst.msk [vmem:[%s990_s5] sm:$0xff] %vm375_vm0, %v585_v60 }

// kernel: mula_gan_generator.40
= control target key start
LH: loop header
LB: loop body
LE: loop exit
PB: predicated region body
PF: predicated region fallthrough
CT: control target
= control target key end

     0   :  { %s75_s0 = inlined_call_operand.vmem [shape: bf16[8,128], index: 0, kind: input, shape index: {}]   ;;  %s76_s1 = inlined_call_operand.vmem [shape: f32[1,128], index: 1, kind: input, shape index: {}]   ;;  %s77_s2 = inlined_call_operand.vmem [shape: f32[1,128], index: 2, kind: input, shape index: {}]   ;;  %s78_s3 = inlined_call_operand.vmem [shape: bf16[8,128], index: 3, kind: output, shape index: {}]  }
   0x1   :  { %v14_v0 = vld [vmem:[%s75_s0] sm:$0xf] }
   0x2   :  { %v41_v1 = vld [vmem:[%s76_s1] ss:$0 sm:$0xff]  ;;  %v15_v2 = vunpack.c.l.bf16 %v14_v0 }
   0x3   :  { %v42_v3 = vld [vmem:[%s77_s2] ss:$0 sm:$0xff] }
   0x4   :  { %v23_v4 = vmul.f32 %v41_v1, %v15_v2 }
   0x6   :  { %v31_v5 = vadd.f32 %v42_v3, %v23_v4 }
   0x8   :  { %vm32_vm0 = vcmp.ge.f32.partialorder %v31_v5, 0.0  ;;  %v33_v6 = vmul.f32 0.2, %v31_v5 }
   0xa   :  { %v34_v7 = vsel %vm32_vm0, %v31_v5, %v33_v6 }
   0xb   :  { %v35_v8 = vpack.c.bf16 %v34_v7, %v34_v7 }
   0xd   :  { %36 = vst [vmem:[%s78_s3] sm:$0xf] %v35_v8 }

// kernel: mula_gan_generator.39
= control target key start
LH: loop header
LB: loop body
LE: loop exit
PB: predicated region body
PF: predicated region fallthrough
CT: control target
= control target key end

     0   :  { %s1242_s1 = inlined_call_operand.vmem [shape: bf16[1024,128], index: 1, kind: input, shape index: {}]   ;;  %s1243_s0 = inlined_call_operand.vmem [shape: bf16[8,1024], index: 0, kind: input, shape index: {}]   ;;  %s1244_s2 = inlined_call_operand.vmem [shape: f32[1,128], index: 2, kind: input, shape index: {}]   ;;  %s1245_s3 = inlined_call_operand.vmem [shape: bf16[8,128], index: 3, kind: output, shape index: {0}]   ;;  %s1246_s4 = inlined_call_operand.vmem [shape: f32[1,8,128], index: 4, kind: output, shape index: {1}]   ;;  %s1247_s5 = inlined_call_operand.vmem [shape: f32[1,8,128], index: 5, kind: output, shape index: {2}]  }
   0x1   :  { %v924_v0 = vld [vmem:[%s1242_s1 + $0x40] sm:$0xff]   ;;  %v928_v4 = vld [vmem:[%s1242_s1 + $0x48] sm:$0xff]   ;;  %v932_v8 = vld [vmem:[%s1242_s1 + $0x50] sm:$0xff]  }
   0x2   :  { %v925_v1 = vld [vmem:[%s1242_s1 + $0xc0] sm:$0xff]   ;;  %836 = vmatprep.subr.bf16.mxu0 %v924_v0  ;;  %v929_v5 = vld [vmem:[%s1242_s1 + $0xc8] sm:$0xff]   ;;  %v933_v9 = vld [vmem:[%s1242_s1 + $0xd0] sm:$0xff]  }
   0x3   :  { %v926_v2 = vld [vmem:[%s1242_s1] sm:$0xff]   ;;  %858 = vmatprep.subr.bf16.mxu1 %v925_v1  ;;  %v930_v6 = vld [vmem:[%s1242_s1 + $0x8] sm:$0xff]   ;;  %v934_v10 = vld [vmem:[%s1242_s1 + $0x10] sm:$0xff]  }
   0x4   :  { %v927_v3 = vld [vmem:[%s1242_s1 + $0x80] sm:$0xff]   ;;  %837 = vmatpush3.bf16.msra.mxu0 %v926_v2  ;;  %v931_v7 = vld [vmem:[%s1242_s1 + $0x88] sm:$0xff]   ;;  %v935_v11 = vld [vmem:[%s1242_s1 + $0x90] sm:$0xff]  }
   0x5   :  { %859 = vmatpush3.bf16.msra.mxu1 %v927_v3  ;;  %838 = vmatprep.subr.bf16.mxu0 %v928_v4  ;;  %v936_v12 = vld [vmem:[%s1242_s1 + $0x58] sm:$0xff]   ;;  %v940_v16 = vld [vmem:[%s1242_s1 + $0x60] sm:$0xff]   ;;  %v944_v20 = vld [vmem:[%s1242_s1 + $0x68] sm:$0xff]  }
   0x6   :  { %860 = vmatprep.subr.bf16.mxu1 %v929_v5  ;;  %v937_v13 = vld [vmem:[%s1242_s1 + $0xd8] sm:$0xff]   ;;  %v941_v17 = vld [vmem:[%s1242_s1 + $0xe0] sm:$0xff]   ;;  %v945_v21 = vld [vmem:[%s1242_s1 + $0xe8] sm:$0xff]  }
   0x7   :  { %v938_v14 = vld [vmem:[%s1242_s1 + $0x18] sm:$0xff]   ;;  %v942_v18 = vld [vmem:[%s1242_s1 + $0x20] sm:$0xff]   ;;  %v946_v22 = vld [vmem:[%s1242_s1 + $0x28] sm:$0xff]  }
   0x8   :  { %839 = vmatpush3.bf16.msra.mxu0 %v930_v6  ;;  %v939_v15 = vld [vmem:[%s1242_s1 + $0x98] sm:$0xff]   ;;  %v943_v19 = vld [vmem:[%s1242_s1 + $0xa0] sm:$0xff]   ;;  %v947_v23 = vld [vmem:[%s1242_s1 + $0xa8] sm:$0xff]  }
   0x9   :  { %861 = vmatpush3.bf16.msra.mxu1 %v931_v7  ;;  %840 = vmatprep.subr.bf16.mxu0 %v932_v8  ;;  %v948_v24 = vld [vmem:[%s1242_s1 + $0x70] sm:$0xff]   ;;  %v952_v28 = vld [vmem:[%s1242_s1 + $0x78] sm:$0xff]   ;;  %v18_v32 = vld [vmem:[%s1243_s0] sm:$0xff] }
   0xa   :  { %862 = vmatprep.subr.bf16.mxu1 %v933_v9  ;;  %v949_v25 = vld [vmem:[%s1242_s1 + $0xf0] sm:$0xff]   ;;  %v953_v29 = vld [vmem:[%s1242_s1 + $0xf8] sm:$0xff]   ;;  %v19_v33 = vld [vmem:[%s1243_s0 + $0x8] sm:$0xff]  ;;  %v764_v34 = vcombine.low %v18_v32, %v18_v32  ;;  %v765_v35 = vcombine.high %v18_v32, %v18_v32 }
   0xb   :  { %v950_v26 = vld [vmem:[%s1242_s1 + $0x30] sm:$0xff]   ;;  %v954_v30 = vld [vmem:[%s1242_s1 + $0x38] sm:$0xff]   ;;  %v766_v36 = vcombine.low %v19_v33, %v19_v33  ;;  %v767_v37 = vcombine.high %v19_v33, %v19_v33  ;;  %v960_v38 = vld [vmem:[%s1242_s1 + $0x140] sm:$0xff]  }
   0xc   :  { %841 = vmatpush3.bf16.msra.mxu0 %v934_v10  ;;  %v951_v27 = vld [vmem:[%s1242_s1 + $0xb0] sm:$0xff]   ;;  %v955_v31 = vld [vmem:[%s1242_s1 + $0xb8] sm:$0xff]   ;;  %v961_v39 = vld [vmem:[%s1242_s1 + $0x1c0] sm:$0xff]   ;;  %601 = vmatprep.mubr.bf16.mxu0 %v765_v35 }
   0xd   :  { %863 = vmatpush3.bf16.msra.mxu1 %v935_v11  ;;  %842 = vmatprep.subr.bf16.mxu0 %v936_v12  ;;  %v962_v40 = vld [vmem:[%s1242_s1 + $0x100] sm:$0xff]   ;;  %v964_v42 = vld [vmem:[%s1242_s1 + $0x148] sm:$0xff]   ;;  %v968_v46 = vld [vmem:[%s1242_s1 + $0x150] sm:$0xff]  }
   0xe   :  { %864 = vmatprep.subr.bf16.mxu1 %v937_v13  ;;  %641 = vmatprep.mubr.bf16.mxu1 %v767_v37  ;;  %v963_v41 = vld [vmem:[%s1242_s1 + $0x180] sm:$0xff]   ;;  %v965_v43 = vld [vmem:[%s1242_s1 + $0x1c8] sm:$0xff]   ;;  %v969_v47 = vld [vmem:[%s1242_s1 + $0x1d0] sm:$0xff]  }
   0xf   :  { %v966_v44 = vld [vmem:[%s1242_s1 + $0x108] sm:$0xff]   ;;  %v970_v48 = vld [vmem:[%s1242_s1 + $0x110] sm:$0xff]   ;;  %v972_v50 = vld [vmem:[%s1242_s1 + $0x158] sm:$0xff]  }
  0x10   :  { %843 = vmatpush3.bf16.msra.mxu0 %v938_v14  ;;  %v967_v45 = vld [vmem:[%s1242_s1 + $0x188] sm:$0xff]   ;;  %v971_v49 = vld [vmem:[%s1242_s1 + $0x190] sm:$0xff]   ;;  %v973_v51 = vld [vmem:[%s1242_s1 + $0x1d8] sm:$0xff]  }
  0x11   :  { %865 = vmatpush3.bf16.msra.mxu1 %v939_v15  ;;  %844 = vmatprep.subr.bf16.mxu0 %v940_v16  ;;  %v974_v52 = vld [vmem:[%s1242_s1 + $0x118] sm:$0xff]   ;;  %v976_v54 = vld [vmem:[%s1242_s1 + $0x160] sm:$0xff]   ;;  %v980_v58 = vld [vmem:[%s1242_s1 + $0x168] sm:$0xff]  }
  0x12   :  { %866 = vmatprep.subr.bf16.mxu1 %v941_v17  ;;  %v975_v53 = vld [vmem:[%s1242_s1 + $0x198] sm:$0xff]   ;;  %v977_v55 = vld [vmem:[%s1242_s1 + $0x1e0] sm:$0xff]   ;;  %v981_v59 = vld [vmem:[%s1242_s1 + $0x1e8] sm:$0xff]  }
  0x13   :  { %v978_v56 = vld [vmem:[%s1242_s1 + $0x120] sm:$0xff]   ;;  %v982_v60 = vld [vmem:[%s1242_s1 + $0x128] sm:$0xff]   ;;  %v984_v62 = vld [vmem:[%s1242_s1 + $0x170] sm:$0xff]  }
  0x14   :  { %845 = vmatpush3.bf16.msra.mxu0 %v942_v18  ;;  %v979_v57 = vld [vmem:[%s1242_s1 + $0x1a0] sm:$0xff]   ;;  %v983_v61 = vld [vmem:[%s1242_s1 + $0x1a8] sm:$0xff]   ;;  %v985_v63 = vld [vmem:[%s1242_s1 + $0x1f0] sm:$0xff]  }
  0x15   :  { %867 = vmatpush3.bf16.msra.mxu1 %v943_v19  ;;  %846 = vmatprep.subr.bf16.mxu0 %v944_v20  ;;  %v986_v0 = vld [vmem:[%s1242_s1 + $0x130] sm:$0xff]   ;;  %v988_v2 = vld [vmem:[%s1242_s1 + $0x178] sm:$0xff]   ;;  %v763_v14 = vld [vmem:[%s1244_s2] ss:$0 sm:$0xff] }
  0x16   :  { %868 = vmatprep.subr.bf16.mxu1 %v945_v21  ;;  %v987_v1 = vld [vmem:[%s1242_s1 + $0x1b0] sm:$0xff]   ;;  %v989_v3 = vld [vmem:[%s1242_s1 + $0x1f8] sm:$0xff]  }
  0x17   :  { %v990_v4 = vld [vmem:[%s1242_s1 + $0x138] sm:$0xff]   ;;  %v20_v6 = vld [vmem:[%s1243_s0 + $0x10] sm:$0xff] }
  0x18   :  { %847 = vmatpush3.bf16.msra.mxu0 %v946_v22  ;;  %v991_v5 = vld [vmem:[%s1242_s1 + $0x1b8] sm:$0xff]   ;;  %v768_v7 = vcombine.low %v20_v6, %v20_v6  ;;  %v769_v8 = vcombine.high %v20_v6, %v20_v6 }
  0x19   :  { %869 = vmatpush3.bf16.msra.mxu1 %v947_v23  ;;  %848 = vmatprep.subr.bf16.mxu0 %v948_v24  ;;  %v21_v9 = vld [vmem:[%s1243_s0 + $0x18] sm:$0xff] }
  0x1a   :  { %870 = vmatprep.subr.bf16.mxu1 %v949_v25  ;;  %v770_v10 = vcombine.low %v21_v9, %v21_v9  ;;  %v771_v11 = vcombine.high %v21_v9, %v21_v9 }
  0x1c   :  { %849 = vmatpush3.bf16.msra.mxu0 %v950_v26 }
  0x1d   :  { %871 = vmatpush3.bf16.msra.mxu1 %v951_v27  ;;  %850 = vmatprep.subr.bf16.mxu0 %v952_v28 }
  0x1e   :  { %872 = vmatprep.subr.bf16.mxu1 %v953_v29 }
  0x20   :  { %851 = vmatpush3.bf16.msra.mxu0 %v954_v30 }
  0x21   :  { %873 = vmatpush3.bf16.msra.mxu1 %v955_v31  ;;  %880 = vmatprep.subr.bf16.mxu0 %v960_v38 }
  0x22   :  { %902 = vmatprep.subr.bf16.mxu1 %v961_v39 }
  0x23   :  { %602 = vmatmul.mubr.bf16.vlgmr.msra.gmra.mrb[0].mxu0 %v764_v34 }
  0x24   :  { %642 = vmatmul.mubr.bf16.vlgmr.msra.gmra.mrb[0].mxu1 %v766_v36  ;;  %881 = vmatpush3.bf16.msra.mxu0 %v962_v40  ;;  %v744_v40 = vlaneseq }
  0x25   :  { %903 = vmatpush3.bf16.msra.mxu1 %v963_v41  ;;  %882 = vmatprep.subr.bf16.mxu0 %v964_v42 }
  0x26   :  { %904 = vmatprep.subr.bf16.mxu1 %v965_v43  ;;  %681 = vmatprep.mubr.bf16.mxu0 %v769_v8 }
  0x27   :  { %721 = vmatprep.mubr.bf16.mxu1 %v771_v11 }
  0x28   :  { %883 = vmatpush3.bf16.msra.mxu0 %v966_v44 }
  0x29   :  { %905 = vmatpush3.bf16.msra.mxu1 %v967_v45  ;;  %884 = vmatprep.subr.bf16.mxu0 %v968_v46  ;;  %v745_v45 = vshrl.u32 %v744_v40, 7 }
  0x2a   :  { %906 = vmatprep.subr.bf16.mxu1 %v969_v47 }
  0x2b   :  { %vm746_vm0 = vcmp.eq.s32.totalorder %v745_v45, 0 }
  0x2c   :  { %885 = vmatpush3.bf16.msra.mxu0 %v970_v48 }
  0x2d   :  { %907 = vmatpush3.bf16.msra.mxu1 %v971_v49  ;;  %886 = vmatprep.subr.bf16.mxu0 %v972_v50 }
  0x2e   :  { %908 = vmatprep.subr.bf16.mxu1 %v973_v51 }
  0x30   :  { %887 = vmatpush3.bf16.msra.mxu0 %v974_v52 }
  0x31   :  { %909 = vmatpush3.bf16.msra.mxu1 %v975_v53  ;;  %888 = vmatprep.subr.bf16.mxu0 %v976_v54 }
  0x32   :  { %910 = vmatprep.subr.bf16.mxu1 %v977_v55 }
  0x34   :  { %889 = vmatpush3.bf16.msra.mxu0 %v978_v56 }
  0x35   :  { %911 = vmatpush3.bf16.msra.mxu1 %v979_v57  ;;  %890 = vmatprep.subr.bf16.mxu0 %v980_v58 }
  0x36   :  { %912 = vmatprep.subr.bf16.mxu1 %v981_v59 }
  0x38   :  { %891 = vmatpush3.bf16.msra.mxu0 %v982_v60 }
  0x39   :  { %913 = vmatpush3.bf16.msra.mxu1 %v983_v61  ;;  %892 = vmatprep.subr.bf16.mxu0 %v984_v62 }
  0x3a   :  { %914 = vmatprep.subr.bf16.mxu1 %v985_v63 }
  0x3c   :  { %893 = vmatpush3.bf16.msra.mxu0 %v986_v0 }
  0x3d   :  { %915 = vmatpush3.bf16.msra.mxu1 %v987_v1  ;;  %894 = vmatprep.subr.bf16.mxu0 %v988_v2 }
  0x3e   :  { %916 = vmatprep.subr.bf16.mxu1 %v989_v3 }
  0x40   :  { %895 = vmatpush3.bf16.msra.mxu0 %v990_v4 }
  0x41   :  { %917 = vmatpush3.bf16.msra.mxu1 %v991_v5 }
  0x43   :  { %682 = vmatmul.mubr.bf16.vlgmr.msra.gmra.mrb[4].mxu0 %v768_v7 }
  0x44   :  { %722 = vmatmul.mubr.bf16.vlgmr.msra.gmra.mrb[4].mxu1 %v770_v10 }
  0xf6   :  { %v852_v12 = vpop.f32.mrb[0].mxu0 }
  0xf7   :  { %v874_v13 = vpop.f32.mrb[0].mxu1  ;;  %v853_v15 = vpop.f32.mrb[1].mxu0 }
  0xf8   :  { %v875_v16 = vpop.f32.mrb[1].mxu1  ;;  %v854_v17 = vadd.f32 %v853_v15, %v852_v12  ;;  %v855_v19 = vpop.f32.mrb[2].mxu0 }
  0xf9   :  { %v876_v18 = vadd.f32 %v875_v16, %v874_v13  ;;  %v877_v20 = vpop.f32.mrb[2].mxu1  ;;  %v856_v21 = vpop.f32.mrb[3].mxu0 }
  0xfa   :  { %v878_v22 = vpop.f32.mrb[3].mxu1  ;;  %v604_v23 = vadd.f32 %v854_v17, %v763_v14 }
  0xfc   :  { %v644_v24 = vadd.f32 %v876_v18, %v604_v23 }
 0x116   :  { %v896_v25 = vpop.f32.mrb[4].mxu0 }
 0x117   :  { %v918_v26 = vpop.f32.mrb[4].mxu1  ;;  %v897_v27 = vpop.f32.mrb[5].mxu0 }
 0x118   :  { %v919_v28 = vpop.f32.mrb[5].mxu1  ;;  %v898_v29 = vadd.f32 %v897_v27, %v896_v25  ;;  %v899_v31 = vpop.f32.mrb[6].mxu0 }
 0x119   :  { %v920_v30 = vadd.f32 %v919_v28, %v918_v26  ;;  %v921_v32 = vpop.f32.mrb[6].mxu1  ;;  %v900_v33 = vpop.f32.mrb[7].mxu0 }
 0x11a   :  { %v922_v34 = vpop.f32.mrb[7].mxu1  ;;  %v684_v35 = vadd.f32 %v898_v29, %v644_v24 }
 0x11c   :  { %v724_v36 = vadd.f32 %v920_v30, %v684_v35 }
 0x11e   :  { %v729_v37 = vpack.c.bf16 %v724_v36, %v724_v36  ;;  %v731_v38 = vrot.slane %v724_v36, 4  ;;  %v737_v39 = vmul.f32 %v724_v36, %v724_v36 }
 0x120   :  { %730 = vst [vmem:[%s1245_s3] sm:$0xf] %v729_v37  ;;  %v732_v41 = vadd.f32 %v731_v38, %v724_v36  ;;  %v738_v42 = vrot.slane %v737_v39, 4 }
 0x122   :  { %v733_v43 = vrot.slane %v732_v41, 2  ;;  %v739_v44 = vadd.f32 %v738_v42, %v737_v39 }
 0x124   :  { %v734_v46 = vadd.f32 %v733_v43, %v732_v41  ;;  %v740_v47 = vrot.slane %v739_v44, 2 }
 0x126   :  { %v735_v48 = vrot.slane %v734_v46, 1  ;;  %v741_v49 = vadd.f32 %v740_v47, %v739_v44 }
 0x128   :  { %v736_v50 = vadd.f32 %v735_v48, %v734_v46  ;;  %v742_v51 = vrot.slane %v741_v49, 1 }
 0x12a   :  { %v743_v52 = vadd.f32 %v742_v51, %v741_v49  ;;  %v747_v53 = vsel %vm746_vm0, %v736_v50, 0.0 }
 0x12b   :  { %748 = vst [vmem:[%s1246_s4] sm:$0xff] %v747_v53 }
 0x12c   :  { %v749_v54 = vsel %vm746_vm0, %v743_v52, 0.0 }
 0x12d   :  { %750 = vst [vmem:[%s1247_s5] sm:$0xff] %v749_v54 }

// kernel: mula_gan_generator.42
= control target key start
LH: loop header
LB: loop body
LE: loop exit
PB: predicated region body
PF: predicated region fallthrough
CT: control target
= control target key end

     0   :  { %s73_s0 = inlined_call_operand.vmem [shape: bf16[8,128], index: 0, kind: input, shape index: {}]   ;;  %s74_s1 = inlined_call_operand.vmem [shape: f32[1,128], index: 1, kind: input, shape index: {}]   ;;  %s75_s2 = inlined_call_operand.vmem [shape: f32[1,128], index: 2, kind: input, shape index: {}]   ;;  %s76_s3 = inlined_call_operand.vmem [shape: bf16[8,128], index: 3, kind: output, shape index: {}]  }
   0x1   :  { %v14_v0 = vld [vmem:[%s73_s0] sm:$0xf] }
   0x2   :  { %v39_v1 = vld [vmem:[%s74_s1] ss:$0 sm:$0xff]  ;;  %v15_v2 = vunpack.c.l.bf16 %v14_v0 }
   0x3   :  { %v40_v3 = vld [vmem:[%s75_s2] ss:$0 sm:$0xff] }
   0x4   :  { %v23_v4 = vmul.f32 %v39_v1, %v15_v2 }
   0x6   :  { %v31_v5 = vadd.f32 %v40_v3, %v23_v4 }
   0x8   :  { %v32_v6 = vmax.f32 %v31_v5, 0.0 }
   0xa   :  { %v33_v7 = vpack.c.bf16 %v32_v6, %v32_v6 }
   0xc   :  { %34 = vst [vmem:[%s76_s3] sm:$0xf] %v33_v7 }

// kernel: mula_gan_generator.44
= control target key start
LH: loop header
LB: loop body
LE: loop exit
PB: predicated region body
PF: predicated region fallthrough
CT: control target
= control target key end

     0   :  { %s86_s0 = inlined_call_operand.vmem [shape: bf16[8,128], index: 0, kind: input, shape index: {}]   ;;  %s87_s1 = inlined_call_operand.vmem [shape: bf16[8,128], index: 1, kind: input, shape index: {}]   ;;  %s88_s2 = inlined_call_operand.vmem [shape: f32[1,128], index: 2, kind: input, shape index: {}]   ;;  %s89_s3 = inlined_call_operand.vmem [shape: f32[1,128], index: 3, kind: input, shape index: {}]   ;;  %s90_s4 = inlined_call_operand.vmem [shape: bf16[8,128], index: 4, kind: output, shape index: {}]  }
   0x1   :  { %v17_v0 = vld [vmem:[%s86_s0] sm:$0xf] }
   0x2   :  { %v44_v1 = vld [vmem:[%s88_s2] ss:$0 sm:$0xff]  ;;  %v18_v2 = vunpack.c.l.bf16 %v17_v0 }
   0x3   :  { %v35_v3 = vld [vmem:[%s87_s1] sm:$0xf] }
   0x4   :  { %v45_v4 = vld [vmem:[%s89_s3] ss:$0 sm:$0xff]  ;;  %v26_v5 = vmul.f32 %v44_v1, %v18_v2  ;;  %v36_v6 = vunpack.c.l.bf16 %v35_v3 }
   0x6   :  { %v34_v7 = vadd.f32 %v45_v4, %v26_v5 }
   0x8   :  { %v37_v8 = vadd.f32 %v36_v6, %v34_v7 }
   0xa   :  { %v38_v9 = vpack.c.bf16 %v37_v8, %v37_v8 }
   0xc   :  { %39 = vst [vmem:[%s90_s4] sm:$0xf] %v38_v9 }

// kernel: mula_gan_generator.41
= control target key start
LH: loop header
LB: loop body
LE: loop exit
PB: predicated region body
PF: predicated region fallthrough
CT: control target
= control target key end

     0   :  { %vm1155_vm0 = vmmov 0   ;;  %s1429_s1 = inlined_call_operand.vmem [shape: bf16[1152,128], index: 1, kind: input, shape index: {}]   ;;  %s1430_s0 = inlined_call_operand.vmem [shape: bf16[8,1152], index: 0, kind: input, shape index: {}]   ;;  %s1431_s2 = inlined_call_operand.vmem [shape: f32[1,128], index: 2, kind: input, shape index: {}]   ;;  %s1432_s3 = inlined_call_operand.vmem [shape: bf16[8,128], index: 3, kind: output, shape index: {0}]   ;;  %s1433_s4 = inlined_call_operand.vmem [shape: f32[1,8,128], index: 4, kind: output, shape index: {1}]   ;;  %s1434_s5 = inlined_call_operand.vmem [shape: f32[1,8,128], index: 5, kind: output, shape index: {2}]  }
   0x1   :  { %v1073_v0 = vld [vmem:[%s1429_s1 + $0x40] sm:$0xff]   ;;  %v1077_v4 = vld [vmem:[%s1429_s1 + $0x48] sm:$0xff]   ;;  %v1081_v8 = vld [vmem:[%s1429_s1 + $0x50] sm:$0xff]  }
   0x2   :  { %v1074_v1 = vld [vmem:[%s1429_s1] sm:$0xff]   ;;  %954 = vmatprep.subr.bf16.mxu0 %v1073_v0  ;;  %v1078_v5 = vld [vmem:[%s1429_s1 + $0x8] sm:$0xff]   ;;  %v1082_v9 = vld [vmem:[%s1429_s1 + $0x10] sm:$0xff]  }
   0x3   :  { %v1075_v2 = vld [vmem:[%s1429_s1 + $0xc0] sm:$0xff]   ;;  %955 = vmatpush3.bf16.msra.mxu0 %v1074_v1  ;;  %v1079_v6 = vld [vmem:[%s1429_s1 + $0xc8] sm:$0xff]   ;;  %v1083_v10 = vld [vmem:[%s1429_s1 + $0xd0] sm:$0xff]  }
   0x4   :  { %v1076_v3 = vld [vmem:[%s1429_s1 + $0x80] sm:$0xff]   ;;  %976 = vmatprep.subr.bf16.mxu1 %v1075_v2  ;;  %956 = vmatprep.subr.bf16.mxu0 %v1077_v4  ;;  %v1080_v7 = vld [vmem:[%s1429_s1 + $0x88] sm:$0xff]   ;;  %v1084_v11 = vld [vmem:[%s1429_s1 + $0x90] sm:$0xff]  }
   0x5   :  { %977 = vmatpush3.bf16.msra.mxu1 %v1076_v3  ;;  %v1085_v12 = vld [vmem:[%s1429_s1 + $0x58] sm:$0xff]   ;;  %v1089_v16 = vld [vmem:[%s1429_s1 + $0x60] sm:$0xff]   ;;  %v1093_v20 = vld [vmem:[%s1429_s1 + $0x68] sm:$0xff]  }
   0x6   :  { %978 = vmatprep.subr.bf16.mxu1 %v1079_v6  ;;  %v1086_v13 = vld [vmem:[%s1429_s1 + $0x18] sm:$0xff]   ;;  %v1090_v17 = vld [vmem:[%s1429_s1 + $0x20] sm:$0xff]   ;;  %v1094_v21 = vld [vmem:[%s1429_s1 + $0x28] sm:$0xff]  }
   0x7   :  { %957 = vmatpush3.bf16.msra.mxu0 %v1078_v5  ;;  %v1087_v14 = vld [vmem:[%s1429_s1 + $0xd8] sm:$0xff]   ;;  %v1091_v18 = vld [vmem:[%s1429_s1 + $0xe0] sm:$0xff]   ;;  %v1095_v22 = vld [vmem:[%s1429_s1 + $0xe8] sm:$0xff]  }
   0x8   :  { %958 = vmatprep.subr.bf16.mxu0 %v1081_v8  ;;  %v1088_v15 = vld [vmem:[%s1429_s1 + $0x98] sm:$0xff]   ;;  %v1092_v19 = vld [vmem:[%s1429_s1 + $0xa0] sm:$0xff]   ;;  %v1096_v23 = vld [vmem:[%s1429_s1 + $0xa8] sm:$0xff]  }
   0x9   :  { %979 = vmatpush3.bf16.msra.mxu1 %v1080_v7  ;;  %v1097_v24 = vld [vmem:[%s1429_s1 + $0x70] sm:$0xff]   ;;  %v1101_v28 = vld [vmem:[%s1429_s1 + $0x78] sm:$0xff]   ;;  %v18_v31 = vld [vmem:[%s1430_s0] sm:$0xff] }
   0xa   :  { %980 = vmatprep.subr.bf16.mxu1 %v1083_v10  ;;  %v1098_v25 = vld [vmem:[%s1429_s1 + $0x30] sm:$0xff]   ;;  %v1102_v29 = vld [vmem:[%s1429_s1 + $0x38] sm:$0xff]   ;;  %v873_v32 = vcombine.low %v18_v31, %v18_v31  ;;  %v874_v33 = vcombine.high %v18_v31, %v18_v31  ;;  %v1107_v35 = vld [vmem:[%s1429_s1 + $0x140] sm:$0xff]  }
   0xb   :  { %959 = vmatpush3.bf16.msra.mxu0 %v1082_v9  ;;  %v1099_v26 = vld [vmem:[%s1429_s1 + $0xf0] sm:$0xff]   ;;  %v1103_v30 = vld [vmem:[%s1429_s1 + $0xf8] sm:$0xff]   ;;  %v19_v36 = vld [vmem:[%s1430_s0 + $0x8] sm:$0xff]  ;;  %v1154_v9 = vmov 0.0  }
   0xc   :  { %960 = vmatprep.subr.bf16.mxu0 %v1085_v12  ;;  %v1100_v27 = vld [vmem:[%s1429_s1 + $0xb0] sm:$0xff]   ;;  %v1106_v34 = vld [vmem:[%s1429_s1 + $0xb8] sm:$0xff]   ;;  %670 = vmatprep.mubr.bf16.mxu0 %v874_v33  ;;  %v875_v37 = vcombine.low %v19_v36, %v19_v36  ;;  %v876_v38 = vcombine.high %v19_v36, %v19_v36  ;;  %v1110_v39 = vld [vmem:[%s1429_s1 + $0x100] sm:$0xff]  }
   0xd   :  { %981 = vmatpush3.bf16.msra.mxu1 %v1084_v11  ;;  %v1111_v40 = vld [vmem:[%s1429_s1 + $0x1c0] sm:$0xff]   ;;  %v1113_v42 = vld [vmem:[%s1429_s1 + $0x148] sm:$0xff]   ;;  %v1117_v46 = vld [vmem:[%s1429_s1 + $0x150] sm:$0xff]  }
   0xe   :  { %982 = vmatprep.subr.bf16.mxu1 %v1087_v14  ;;  %710 = vmatprep.mubr.bf16.mxu1 %v876_v38  ;;  %v1112_v41 = vld [vmem:[%s1429_s1 + $0x180] sm:$0xff]   ;;  %v1114_v43 = vld [vmem:[%s1429_s1 + $0x108] sm:$0xff]   ;;  %v1118_v47 = vld [vmem:[%s1429_s1 + $0x110] sm:$0xff]  }
   0xf   :  { %961 = vmatpush3.bf16.msra.mxu0 %v1086_v13  ;;  %v1115_v44 = vld [vmem:[%s1429_s1 + $0x1c8] sm:$0xff]   ;;  %v1119_v48 = vld [vmem:[%s1429_s1 + $0x1d0] sm:$0xff]   ;;  %v1121_v50 = vld [vmem:[%s1429_s1 + $0x158] sm:$0xff]  }
  0x10   :  { %962 = vmatprep.subr.bf16.mxu0 %v1089_v16  ;;  %v1116_v45 = vld [vmem:[%s1429_s1 + $0x188] sm:$0xff]   ;;  %v1120_v49 = vld [vmem:[%s1429_s1 + $0x190] sm:$0xff]   ;;  %v1122_v51 = vld [vmem:[%s1429_s1 + $0x118] sm:$0xff]  }
  0x11   :  { %983 = vmatpush3.bf16.msra.mxu1 %v1088_v15  ;;  %v1123_v52 = vld [vmem:[%s1429_s1 + $0x1d8] sm:$0xff]   ;;  %v1125_v54 = vld [vmem:[%s1429_s1 + $0x160] sm:$0xff]   ;;  %v1129_v58 = vld [vmem:[%s1429_s1 + $0x168] sm:$0xff]  }
  0x12   :  { %984 = vmatprep.subr.bf16.mxu1 %v1091_v18  ;;  %v1124_v53 = vld [vmem:[%s1429_s1 + $0x198] sm:$0xff]   ;;  %v1126_v55 = vld [vmem:[%s1429_s1 + $0x120] sm:$0xff]   ;;  %v1130_v59 = vld [vmem:[%s1429_s1 + $0x128] sm:$0xff]  }
  0x13   :  { %963 = vmatpush3.bf16.msra.mxu0 %v1090_v17  ;;  %v1127_v56 = vld [vmem:[%s1429_s1 + $0x1e0] sm:$0xff]   ;;  %v1131_v60 = vld [vmem:[%s1429_s1 + $0x1e8] sm:$0xff]   ;;  %v1133_v62 = vld [vmem:[%s1429_s1 + $0x170] sm:$0xff]  }
  0x14   :  { %964 = vmatprep.subr.bf16.mxu0 %v1093_v20  ;;  %v1128_v57 = vld [vmem:[%s1429_s1 + $0x1a0] sm:$0xff]   ;;  %v1132_v61 = vld [vmem:[%s1429_s1 + $0x1a8] sm:$0xff]   ;;  %v1134_v63 = vld [vmem:[%s1429_s1 + $0x130] sm:$0xff]  }
  0x15   :  { %985 = vmatpush3.bf16.msra.mxu1 %v1092_v19  ;;  %v1135_v0 = vld [vmem:[%s1429_s1 + $0x1f0] sm:$0xff]   ;;  %v1137_v2 = vld [vmem:[%s1429_s1 + $0x178] sm:$0xff]   ;;  %v1145_v13 = vld [vmem:[%s1429_s1 + $0x200] sm:$0xff]  }
  0x16   :  { %986 = vmatprep.subr.bf16.mxu1 %v1095_v22  ;;  %v1136_v1 = vld [vmem:[%s1429_s1 + $0x1b0] sm:$0xff]   ;;  %v1138_v3 = vld [vmem:[%s1429_s1 + $0x138] sm:$0xff]   ;;  %v1146_v14 = vld [vmem:[%s1429_s1 + $0x208] sm:$0xff]  }
  0x17   :  { %965 = vmatpush3.bf16.msra.mxu0 %v1094_v21  ;;  %v1139_v4 = vld [vmem:[%s1429_s1 + $0x1f8] sm:$0xff]   ;;  %v20_v5 = vld [vmem:[%s1430_s0 + $0x10] sm:$0xff]  ;;  %v1149_v17 = vld [vmem:[%s1429_s1 + $0x220] sm:$0xff]  }
  0x18   :  { %966 = vmatprep.subr.bf16.mxu0 %v1097_v24  ;;  %v877_v6 = vcombine.low %v20_v5, %v20_v5  ;;  %v878_v7 = vcombine.high %v20_v5, %v20_v5  ;;  %v1142_v8 = vld [vmem:[%s1429_s1 + $0x1b8] sm:$0xff]   ;;  %v1147_v15 = vld [vmem:[%s1429_s1 + $0x210] sm:$0xff]   ;;  %v1150_v18 = vld [vmem:[%s1429_s1 + $0x228] sm:$0xff]  }
  0x19   :  { %987 = vmatpush3.bf16.msra.mxu1 %v1096_v23  ;;  %v21_v10 = vld [vmem:[%s1430_s0 + $0x18] sm:$0xff]  ;;  %v1151_v19 = vld [vmem:[%s1429_s1 + $0x230] sm:$0xff]   ;;  %v1153_v21 = vld [vmem:[%s1430_s0 + $0x20] ss:$0 sps:$4 sm:$0xff]  }
  0x1a   :  { %988 = vmatprep.subr.bf16.mxu1 %v1099_v26  ;;  %v879_v11 = vcombine.low %v21_v10, %v21_v10  ;;  %v880_v12 = vcombine.high %v21_v10, %v21_v10  ;;  %v1148_v16 = vld [vmem:[%s1429_s1 + $0x218] sm:$0xff]   ;;  %v872_v23 = vld [vmem:[%s1431_s2] ss:$0 sm:$0xff] }
  0x1b   :  { %967 = vmatpush3.bf16.msra.mxu0 %v1098_v25  ;;  %v1152_v20 = vld [vmem:[%s1429_s1 + $0x238] sm:$0xff]  }
  0x1c   :  { %968 = vmatprep.subr.bf16.mxu0 %v1101_v28 }
  0x1d   :  { %989 = vmatpush3.bf16.msra.mxu1 %v1100_v27 }
  0x1e   :  { %990 = vmatprep.subr.bf16.mxu1 %v1103_v30 }
  0x1f   :  { %969 = vmatpush3.bf16.msra.mxu0 %v1102_v29 }
  0x20   :  { %998 = vmatprep.subr.bf16.mxu0 %v1107_v35 }
  0x21   :  { %991 = vmatpush3.bf16.msra.mxu1 %v1106_v34 }
  0x22   :  { %671 = vmatmul.mubr.bf16.vlgmr.msra.gmra.mrb[0].mxu0 %v873_v32  ;;  %1020 = vmatprep.subr.bf16.mxu1 %v1111_v40 }
  0x23   :  { %999 = vmatpush3.bf16.msra.mxu0 %v1110_v39  ;;  %750 = vmatprep.mubr.bf16.mxu0 %v878_v7 }
  0x24   :  { %711 = vmatmul.mubr.bf16.vlgmr.msra.gmra.mrb[0].mxu1 %v875_v37  ;;  %1000 = vmatprep.subr.bf16.mxu0 %v1113_v42 }
  0x25   :  { %1021 = vmatpush3.bf16.msra.mxu1 %v1112_v41  ;;  %790 = vmatprep.mubr.bf16.mxu1 %v880_v12 }
  0x26   :  { %1022 = vmatprep.subr.bf16.mxu1 %v1115_v44 }
  0x27   :  { %1001 = vmatpush3.bf16.msra.mxu0 %v1114_v43 }
  0x28   :  { %1002 = vmatprep.subr.bf16.mxu0 %v1117_v46 }
  0x29   :  { %1023 = vmatpush3.bf16.msra.mxu1 %v1116_v45 }
  0x2a   :  { %1024 = vmatprep.subr.bf16.mxu1 %v1119_v48 }
  0x2b   :  { %1003 = vmatpush3.bf16.msra.mxu0 %v1118_v47 }
  0x2c   :  { %1004 = vmatprep.subr.bf16.mxu0 %v1121_v50 }
  0x2d   :  { %1025 = vmatpush3.bf16.msra.mxu1 %v1120_v49 }
  0x2e   :  { %1026 = vmatprep.subr.bf16.mxu1 %v1123_v52 }
  0x2f   :  { %1005 = vmatpush3.bf16.msra.mxu0 %v1122_v51 }
  0x30   :  { %1006 = vmatprep.subr.bf16.mxu0 %v1125_v54 }
  0x31   :  { %1027 = vmatpush3.bf16.msra.mxu1 %v1124_v53 }
  0x32   :  { %1028 = vmatprep.subr.bf16.mxu1 %v1127_v56 }
  0x33   :  { %1007 = vmatpush3.bf16.msra.mxu0 %v1126_v55  ;;  %v853_v55 = vlaneseq }
  0x34   :  { %1008 = vmatprep.subr.bf16.mxu0 %v1129_v58 }
  0x35   :  { %1029 = vmatpush3.bf16.msra.mxu1 %v1128_v57 }
  0x36   :  { %1030 = vmatprep.subr.bf16.mxu1 %v1131_v60  ;;  %v854_v60 = vshrl.u32 %v853_v55, 7 }
  0x37   :  { %1009 = vmatpush3.bf16.msra.mxu0 %v1130_v59 }
  0x38   :  { %1010 = vmatprep.subr.bf16.mxu0 %v1133_v62  ;;  %vm855_vm1 = vcmp.eq.s32.totalorder %v854_v60, 0 }
  0x39   :  { %1031 = vmatpush3.bf16.msra.mxu1 %v1132_v61 }
  0x3a   :  { %1032 = vmatprep.subr.bf16.mxu1 %v1135_v0 }
  0x3b   :  { %1011 = vmatpush3.bf16.msra.mxu0 %v1134_v63 }
  0x3c   :  { %1012 = vmatprep.subr.bf16.mxu0 %v1137_v2 }
  0x3d   :  { %1033 = vmatpush3.bf16.msra.mxu1 %v1136_v1 }
  0x3e   :  { %1034 = vmatprep.subr.bf16.mxu1 %v1139_v4 }
  0x3f   :  { %1013 = vmatpush3.bf16.msra.mxu0 %v1138_v3 }
  0x40   :  { %1051 = vmatprep.subr.bf16.mxu0 %v1154_v9 }
  0x41   :  { %1035 = vmatpush3.bf16.msra.mxu1 %v1142_v8 }
  0x42   :  { %751 = vmatmul.mubr.bf16.vlgmr.msra.gmra.mrb[4].mxu0 %v877_v6 }
  0x43   :  { %1052 = vmatpush3.bf16.msra.mxu0 %v1145_v13  ;;  %1067 = vmatprep.mubr.msk.bf16.mxu0 %vm1155_vm0, %v1154_v9 }
  0x44   :  { %791 = vmatmul.mubr.bf16.vlgmr.msra.gmra.mrb[4].mxu1 %v879_v11  ;;  %1053 = vmatprep.subr.bf16.mxu0 %v1154_v9 }
  0x47   :  { %1054 = vmatpush3.bf16.msra.mxu0 %v1146_v14 }
  0x48   :  { %1055 = vmatprep.subr.bf16.mxu0 %v1154_v9 }
  0x4b   :  { %1056 = vmatpush3.bf16.msra.mxu0 %v1147_v15 }
  0x4c   :  { %1057 = vmatprep.subr.bf16.mxu0 %v1154_v9 }
  0x4f   :  { %1058 = vmatpush3.bf16.msra.mxu0 %v1148_v16 }
  0x50   :  { %1059 = vmatprep.subr.bf16.mxu0 %v1154_v9 }
  0x53   :  { %1060 = vmatpush3.bf16.msra.mxu0 %v1149_v17 }
  0x54   :  { %1061 = vmatprep.subr.bf16.mxu0 %v1154_v9 }
  0x57   :  { %1062 = vmatpush3.bf16.msra.mxu0 %v1150_v18 }
  0x58   :  { %1063 = vmatprep.subr.bf16.mxu0 %v1154_v9 }
  0x5b   :  { %1064 = vmatpush3.bf16.msra.mxu0 %v1151_v19 }
  0x5c   :  { %1065 = vmatprep.subr.bf16.mxu0 %v1154_v9 }
  0x5f   :  { %1066 = vmatpush3.bf16.msra.mxu0 %v1152_v20 }
  0x62   :  { %1068 = vmatmul.mubr.bf16.vlgmr.msra.gmra.mrb[8].mxu0 %v1153_v21 }
  0xf5   :  { %v970_v22 = vpop.f32.mrb[0].mxu0 }
  0xf6   :  { %v971_v24 = vpop.f32.mrb[1].mxu0 }
  0xf7   :  { %v972_v25 = vadd.f32 %v971_v24, %v970_v22  ;;  %v973_v26 = vpop.f32.mrb[2].mxu0  ;;  %v992_v27 = vpop.f32.mrb[0].mxu1 }
  0xf8   :  { %v974_v28 = vpop.f32.mrb[3].mxu0  ;;  %v993_v29 = vpop.f32.mrb[1].mxu1 }
  0xf9   :  { %v673_v30 = vadd.f32 %v972_v25, %v872_v23  ;;  %v994_v31 = vadd.f32 %v993_v29, %v992_v27  ;;  %v995_v32 = vpop.f32.mrb[2].mxu1 }
  0xfa   :  { %v996_v33 = vpop.f32.mrb[3].mxu1 }
  0xfb   :  { %v713_v34 = vadd.f32 %v994_v31, %v673_v30 }
 0x115   :  { %v1014_v35 = vpop.f32.mrb[4].mxu0 }
 0x116   :  { %v1015_v36 = vpop.f32.mrb[5].mxu0 }
 0x117   :  { %v1016_v37 = vadd.f32 %v1015_v36, %v1014_v35  ;;  %v1017_v38 = vpop.f32.mrb[6].mxu0  ;;  %v1036_v39 = vpop.f32.mrb[4].mxu1 }
 0x118   :  { %v1018_v40 = vpop.f32.mrb[7].mxu0  ;;  %v1037_v41 = vpop.f32.mrb[5].mxu1 }
 0x119   :  { %v753_v42 = vadd.f32 %v1016_v37, %v713_v34  ;;  %v1038_v43 = vadd.f32 %v1037_v41, %v1036_v39  ;;  %v1039_v44 = vpop.f32.mrb[6].mxu1 }
 0x11a   :  { %v1040_v45 = vpop.f32.mrb[7].mxu1 }
 0x11b   :  { %v793_v46 = vadd.f32 %v1038_v43, %v753_v42 }
 0x135   :  { %v832_v47 = vpop.f32.mrb[8].mxu0 }
 0x136   :  { %v833_v48 = vadd.f32 %v832_v47, %v793_v46  ;;  %v1069_v49 = vpop.f32.mrb[9].mxu0 }
 0x137   :  { %v835_v50 = vpop.f32.mrb[10].mxu0 }
 0x138   :  { %v838_v51 = vpack.c.bf16 %v833_v48, %v833_v48  ;;  %v840_v52 = vrot.slane %v833_v48, 4  ;;  %v846_v53 = vmul.f32 %v833_v48, %v833_v48  ;;  %v1070_v54 = vpop.f32.mrb[11].mxu0 }
 0x13a   :  { %839 = vst [vmem:[%s1432_s3] sm:$0xf] %v838_v51  ;;  %v841_v56 = vadd.f32 %v840_v52, %v833_v48  ;;  %v847_v57 = vrot.slane %v846_v53, 4 }
 0x13c   :  { %v842_v58 = vrot.slane %v841_v56, 2  ;;  %v848_v59 = vadd.f32 %v847_v57, %v846_v53 }
 0x13e   :  { %v843_v61 = vadd.f32 %v842_v58, %v841_v56  ;;  %v849_v62 = vrot.slane %v848_v59, 2 }
 0x140   :  { %v844_v63 = vrot.slane %v843_v61, 1  ;;  %v850_v0 = vadd.f32 %v849_v62, %v848_v59 }
 0x142   :  { %v845_v1 = vadd.f32 %v844_v63, %v843_v61  ;;  %v851_v2 = vrot.slane %v850_v0, 1 }
 0x144   :  { %v852_v3 = vadd.f32 %v851_v2, %v850_v0  ;;  %v856_v4 = vsel %vm855_vm1, %v845_v1, 0.0 }
 0x145   :  { %857 = vst [vmem:[%s1433_s4] sm:$0xff] %v856_v4 }
 0x146   :  { %v858_v5 = vsel %vm855_vm1, %v852_v3, 0.0 }
 0x147   :  { %859 = vst [vmem:[%s1434_s5] sm:$0xff] %v858_v5 }

// kernel: mula_gan_generator.48
= control target key start
LH: loop header
LB: loop body
LE: loop exit
PB: predicated region body
PF: predicated region fallthrough
CT: control target
= control target key end

     0   :  { %vm380_vm0 = vcmask 523264   ;;  %vm378_vm1 = vcmask 519168   ;;  %v396_v56 = vlaneseq  ;;  %s680_s1 = inlined_call_operand.vmem [shape: bf16[512,64], index: 1, kind: input, shape index: {}]   ;;  %s681_s0 = inlined_call_operand.vmem [shape: bf16[8,512], index: 0, kind: input, shape index: {}]   ;;  %s682_s2 = inlined_call_operand.vmem [shape: f32[1,64], index: 2, kind: input, shape index: {}]   ;;  %s683_s3 = inlined_call_operand.vmem [shape: bf16[8,64], index: 3, kind: output, shape index: {0}]   ;;  %s684_s4 = inlined_call_operand.vmem [shape: f32[1,8,64], index: 4, kind: output, shape index: {1}]   ;;  %s685_s5 = inlined_call_operand.vmem [shape: f32[1,8,64], index: 5, kind: output, shape index: {2}]  }
   0x1   :  { %v496_v0 = vld [vmem:[%s680_s1 + $0x40] sm:$0xff]   ;;  %v500_v4 = vld [vmem:[%s680_s1 + $0x48] sm:$0xff]   ;;  %v504_v8 = vld [vmem:[%s680_s1 + $0x50] sm:$0xff]  }
   0x2   :  { %v497_v1 = vld [vmem:[%s680_s1 + $0xc0] sm:$0xff]   ;;  %452 = vmatprep.subr.bf16.mxu0 %v496_v0  ;;  %v501_v5 = vld [vmem:[%s680_s1 + $0xc8] sm:$0xff]   ;;  %v505_v9 = vld [vmem:[%s680_s1 + $0xd0] sm:$0xff]   ;;  %v397_v61 = vshrl.u32 %v396_v56, 7 }
   0x3   :  { %v498_v2 = vld [vmem:[%s680_s1] sm:$0xff]   ;;  %474 = vmatprep.subr.bf16.mxu1 %v497_v1  ;;  %v502_v6 = vld [vmem:[%s680_s1 + $0x8] sm:$0xff]   ;;  %v506_v10 = vld [vmem:[%s680_s1 + $0x10] sm:$0xff]  }
   0x4   :  { %v499_v3 = vld [vmem:[%s680_s1 + $0x80] sm:$0xff]   ;;  %453 = vmatpush3.bf16.msra.mxu0 %v498_v2  ;;  %v503_v7 = vld [vmem:[%s680_s1 + $0x88] sm:$0xff]   ;;  %v507_v11 = vld [vmem:[%s680_s1 + $0x90] sm:$0xff]   ;;  %vm398_vm2 = vcmp.eq.s32.totalorder %v397_v61, 0 }
   0x5   :  { %475 = vmatpush3.bf16.msra.mxu1 %v499_v3  ;;  %454 = vmatprep.subr.bf16.mxu0 %v500_v4  ;;  %v508_v12 = vld [vmem:[%s680_s1 + $0x58] sm:$0xff]   ;;  %v512_v16 = vld [vmem:[%s680_s1 + $0x60] sm:$0xff]   ;;  %v516_v20 = vld [vmem:[%s680_s1 + $0x68] sm:$0xff]  }
   0x6   :  { %476 = vmatprep.subr.bf16.mxu1 %v501_v5  ;;  %v509_v13 = vld [vmem:[%s680_s1 + $0xd8] sm:$0xff]   ;;  %v513_v17 = vld [vmem:[%s680_s1 + $0xe0] sm:$0xff]   ;;  %v517_v21 = vld [vmem:[%s680_s1 + $0xe8] sm:$0xff]  }
   0x7   :  { %v510_v14 = vld [vmem:[%s680_s1 + $0x18] sm:$0xff]   ;;  %v514_v18 = vld [vmem:[%s680_s1 + $0x20] sm:$0xff]   ;;  %v518_v22 = vld [vmem:[%s680_s1 + $0x28] sm:$0xff]  }
   0x8   :  { %455 = vmatpush3.bf16.msra.mxu0 %v502_v6  ;;  %v511_v15 = vld [vmem:[%s680_s1 + $0x98] sm:$0xff]   ;;  %v515_v19 = vld [vmem:[%s680_s1 + $0xa0] sm:$0xff]   ;;  %v519_v23 = vld [vmem:[%s680_s1 + $0xa8] sm:$0xff]  }
   0x9   :  { %477 = vmatpush3.bf16.msra.mxu1 %v503_v7  ;;  %456 = vmatprep.subr.bf16.mxu0 %v504_v8  ;;  %v520_v24 = vld [vmem:[%s680_s1 + $0x70] sm:$0xff]   ;;  %v524_v28 = vld [vmem:[%s680_s1 + $0x78] sm:$0xff]   ;;  %v18_v32 = vld [vmem:[%s681_s0] sm:$0xff] }
   0xa   :  { %478 = vmatprep.subr.bf16.mxu1 %v505_v9  ;;  %v521_v25 = vld [vmem:[%s680_s1 + $0xf0] sm:$0xff]   ;;  %v525_v29 = vld [vmem:[%s680_s1 + $0xf8] sm:$0xff]   ;;  %v19_v33 = vld [vmem:[%s681_s0 + $0x8] sm:$0xff]  ;;  %v416_v34 = vcombine.low %v18_v32, %v18_v32  ;;  %v417_v35 = vcombine.high %v18_v32, %v18_v32 }
   0xb   :  { %v522_v26 = vld [vmem:[%s680_s1 + $0x30] sm:$0xff]   ;;  %v526_v30 = vld [vmem:[%s680_s1 + $0x38] sm:$0xff]   ;;  %v418_v36 = vcombine.low %v19_v33, %v19_v33  ;;  %v419_v37 = vcombine.high %v19_v33, %v19_v33  ;;  %v415_v40 = vld [vmem:[%s682_s2] ss:$0 sm:$0xff] }
   0xc   :  { %457 = vmatpush3.bf16.msra.mxu0 %v506_v10  ;;  %v523_v27 = vld [vmem:[%s680_s1 + $0xb0] sm:$0xff]   ;;  %v527_v31 = vld [vmem:[%s680_s1 + $0xb8] sm:$0xff]   ;;  %329 = vmatprep.mubr.bf16.mxu0 %v417_v35 }
   0xd   :  { %479 = vmatpush3.bf16.msra.mxu1 %v507_v11  ;;  %458 = vmatprep.subr.bf16.mxu0 %v508_v12 }
   0xe   :  { %480 = vmatprep.subr.bf16.mxu1 %v509_v13  ;;  %369 = vmatprep.mubr.bf16.mxu1 %v419_v37 }
  0x10   :  { %459 = vmatpush3.bf16.msra.mxu0 %v510_v14 }
  0x11   :  { %481 = vmatpush3.bf16.msra.mxu1 %v511_v15  ;;  %460 = vmatprep.subr.bf16.mxu0 %v512_v16 }
  0x12   :  { %482 = vmatprep.subr.bf16.mxu1 %v513_v17 }
  0x14   :  { %461 = vmatpush3.bf16.msra.mxu0 %v514_v18 }
  0x15   :  { %483 = vmatpush3.bf16.msra.mxu1 %v515_v19  ;;  %462 = vmatprep.subr.bf16.mxu0 %v516_v20 }
  0x16   :  { %484 = vmatprep.subr.bf16.mxu1 %v517_v21 }
  0x18   :  { %463 = vmatpush3.bf16.msra.mxu0 %v518_v22 }
  0x19   :  { %485 = vmatpush3.bf16.msra.mxu1 %v519_v23  ;;  %464 = vmatprep.subr.bf16.mxu0 %v520_v24 }
  0x1a   :  { %486 = vmatprep.subr.bf16.mxu1 %v521_v25 }
  0x1c   :  { %465 = vmatpush3.bf16.msra.mxu0 %v522_v26 }
  0x1d   :  { %487 = vmatpush3.bf16.msra.mxu1 %v523_v27  ;;  %466 = vmatprep.subr.bf16.mxu0 %v524_v28 }
  0x1e   :  { %488 = vmatprep.subr.bf16.mxu1 %v525_v29 }
  0x20   :  { %467 = vmatpush3.bf16.msra.mxu0 %v526_v30 }
  0x21   :  { %489 = vmatpush3.bf16.msra.mxu1 %v527_v31 }
  0x23   :  { %330 = vmatmul.mubr.bf16.vlgmr.msra.gmra.mrb[0].mxu0 %v416_v34 }
  0x24   :  { %370 = vmatmul.mubr.bf16.vlgmr.msra.gmra.mrb[0].mxu1 %v418_v36 }
  0xf6   :  { %v468_v38 = vpop.f32.mrb[0].mxu0 }
  0xf7   :  { %v490_v39 = vpop.f32.mrb[0].mxu1  ;;  %v469_v41 = vpop.f32.mrb[1].mxu0 }
  0xf8   :  { %v491_v42 = vpop.f32.mrb[1].mxu1  ;;  %v470_v43 = vadd.f32 %v469_v41, %v468_v38  ;;  %v471_v45 = vpop.f32.mrb[2].mxu0 }
  0xf9   :  { %v492_v44 = vadd.f32 %v491_v42, %v490_v39  ;;  %v493_v46 = vpop.f32.mrb[2].mxu1  ;;  %v472_v47 = vpop.f32.mrb[3].mxu0 }
  0xfa   :  { %v494_v48 = vpop.f32.mrb[3].mxu1  ;;  %v332_v49 = vadd.f32 %v470_v43, %v415_v40 }
  0xfc   :  { %v372_v50 = vadd.f32 %v492_v44, %v332_v49 }
  0xfe   :  { %v377_v51 = vpack.c.bf16 %v372_v50, %v372_v50  ;;  %v381_v52 = vsel %vm380_vm0, %v372_v50, 0.0  ;;  %v388_v53 = vmul.f32 %v372_v50, %v372_v50 }
  0xff   :  { %v382_v54 = vrot.slane %v381_v52, 4 }
 0x100   :  { %379 = vst.msk [vmem:[%s683_s3] sm:$0xf] %vm378_vm1, %v377_v51  ;;  %v389_v55 = vsel %vm380_vm0, %v388_v53, 0.0 }
 0x101   :  { %v383_v57 = vadd.f32 %v382_v54, %v381_v52  ;;  %v390_v58 = vrot.slane %v389_v55, 4 }
 0x103   :  { %v384_v59 = vrot.slane %v383_v57, 2  ;;  %v391_v60 = vadd.f32 %v390_v58, %v389_v55 }
 0x105   :  { %v385_v62 = vadd.f32 %v384_v59, %v383_v57  ;;  %v392_v63 = vrot.slane %v391_v60, 2 }
 0x107   :  { %v386_v0 = vrot.slane %v385_v62, 1  ;;  %v393_v1 = vadd.f32 %v392_v63, %v391_v60 }
 0x109   :  { %v387_v2 = vadd.f32 %v386_v0, %v385_v62  ;;  %v394_v3 = vrot.slane %v393_v1, 1 }
 0x10b   :  { %v395_v4 = vadd.f32 %v394_v3, %v393_v1  ;;  %v399_v5 = vsel %vm398_vm2, %v387_v2, 0.0 }
 0x10c   :  { %400 = vst.msk [vmem:[%s684_s4] sm:$0xff] %vm380_vm0, %v399_v5 }
 0x10d   :  { %v401_v6 = vsel %vm398_vm2, %v395_v4, 0.0 }
 0x10e   :  { %402 = vst.msk [vmem:[%s685_s5] sm:$0xff] %vm380_vm0, %v401_v6 }

// kernel: mula_gan_generator.50
= control target key start
LH: loop header
LB: loop body
LE: loop exit
PB: predicated region body
PF: predicated region fallthrough
CT: control target
= control target key end

     0   :  { %vm443_vm0 = vcmask 257024   ;;  %vm448_vm1 = vcmask 261120   ;;  %s832_s1 = inlined_call_operand.vmem [shape: bf16[512,32], index: 1, kind: input, shape index: {}]   ;;  %s833_s0 = inlined_call_operand.vmem [shape: bf16[32,512], index: 0, kind: input, shape index: {}]   ;;  %s834_s2 = inlined_call_operand.vmem [shape: f32[1,32], index: 2, kind: input, shape index: {}]   ;;  %s835_s3 = inlined_call_operand.vmem [shape: bf16[32,32], index: 3, kind: output, shape index: {0}]   ;;  %s836_s4 = inlined_call_operand.vmem [shape: f32[1,8,32], index: 4, kind: output, shape index: {1}]   ;;  %s837_s5 = inlined_call_operand.vmem [shape: f32[1,8,32], index: 5, kind: output, shape index: {2}]  }
   0x1   :  { %v603_v0 = vld [vmem:[%s832_s1 + $0x40] sm:$0xff]   ;;  %v607_v4 = vld [vmem:[%s832_s1 + $0x48] sm:$0xff]   ;;  %v611_v8 = vld [vmem:[%s832_s1 + $0x50] sm:$0xff]  }
   0x2   :  { %v604_v1 = vld [vmem:[%s832_s1 + $0xc0] sm:$0xff]   ;;  %547 = vmatprep.subr.bf16.mxu0 %v603_v0  ;;  %v608_v5 = vld [vmem:[%s832_s1 + $0xc8] sm:$0xff]   ;;  %v612_v9 = vld [vmem:[%s832_s1 + $0xd0] sm:$0xff]  }
   0x3   :  { %v605_v2 = vld [vmem:[%s832_s1] sm:$0xff]   ;;  %575 = vmatprep.subr.bf16.mxu1 %v604_v1  ;;  %v609_v6 = vld [vmem:[%s832_s1 + $0x8] sm:$0xff]   ;;  %v613_v10 = vld [vmem:[%s832_s1 + $0x10] sm:$0xff]  }
   0x4   :  { %v606_v3 = vld [vmem:[%s832_s1 + $0x80] sm:$0xff]   ;;  %548 = vmatpush3.bf16.msra.mxu0 %v605_v2  ;;  %v610_v7 = vld [vmem:[%s832_s1 + $0x88] sm:$0xff]   ;;  %v614_v11 = vld [vmem:[%s832_s1 + $0x90] sm:$0xff]  }
   0x5   :  { %576 = vmatpush3.bf16.msra.mxu1 %v606_v3  ;;  %549 = vmatprep.subr.bf16.mxu0 %v607_v4  ;;  %v615_v12 = vld [vmem:[%s832_s1 + $0x58] sm:$0xff]   ;;  %v619_v16 = vld [vmem:[%s832_s1 + $0x60] sm:$0xff]   ;;  %v623_v20 = vld [vmem:[%s832_s1 + $0x68] sm:$0xff]  }
   0x6   :  { %577 = vmatprep.subr.bf16.mxu1 %v608_v5  ;;  %v616_v13 = vld [vmem:[%s832_s1 + $0xd8] sm:$0xff]   ;;  %v620_v17 = vld [vmem:[%s832_s1 + $0xe0] sm:$0xff]   ;;  %v624_v21 = vld [vmem:[%s832_s1 + $0xe8] sm:$0xff]  }
   0x7   :  { %v617_v14 = vld [vmem:[%s832_s1 + $0x18] sm:$0xff]   ;;  %v621_v18 = vld [vmem:[%s832_s1 + $0x20] sm:$0xff]   ;;  %v625_v22 = vld [vmem:[%s832_s1 + $0x28] sm:$0xff]  }
   0x8   :  { %550 = vmatpush3.bf16.msra.mxu0 %v609_v6  ;;  %v618_v15 = vld [vmem:[%s832_s1 + $0x98] sm:$0xff]   ;;  %v622_v19 = vld [vmem:[%s832_s1 + $0xa0] sm:$0xff]   ;;  %v626_v23 = vld [vmem:[%s832_s1 + $0xa8] sm:$0xff]  }
   0x9   :  { %578 = vmatpush3.bf16.msra.mxu1 %v610_v7  ;;  %551 = vmatprep.subr.bf16.mxu0 %v611_v8  ;;  %v627_v24 = vld [vmem:[%s832_s1 + $0x70] sm:$0xff]   ;;  %v631_v28 = vld [vmem:[%s832_s1 + $0x78] sm:$0xff]   ;;  %v498_v42 = vld [vmem:[%s834_s2] ss:$0 sm:$0xff] }
   0xa   :  { %579 = vmatprep.subr.bf16.mxu1 %v612_v9  ;;  %v628_v25 = vld [vmem:[%s832_s1 + $0xf0] sm:$0xff]   ;;  %v632_v29 = vld [vmem:[%s832_s1 + $0xf8] sm:$0xff]  }
   0xb   :  { %v629_v26 = vld [vmem:[%s832_s1 + $0x30] sm:$0xff]   ;;  %v633_v30 = vld [vmem:[%s832_s1 + $0x38] sm:$0xff]  }
   0xc   :  { %552 = vmatpush3.bf16.msra.mxu0 %v613_v10  ;;  %v630_v27 = vld [vmem:[%s832_s1 + $0xb0] sm:$0xff]   ;;  %v634_v31 = vld [vmem:[%s832_s1 + $0xb8] sm:$0xff]  }
   0xd   :  { %580 = vmatpush3.bf16.msra.mxu1 %v614_v11  ;;  %553 = vmatprep.subr.bf16.mxu0 %v615_v12  ;;  %v635_v32 = vld [vmem:[%s833_s0] ss:$16 sps:$4 sm:$0xff]   ;;  %v637_v33 = vld [vmem:[%s833_s0 + $0x4] ss:$16 sps:$4 sm:$0xff]   ;;  %v638_v34 = vld [vmem:[%s833_s0 + $0x8] ss:$16 sps:$4 sm:$0xff]  }
   0xe   :  { %581 = vmatprep.subr.bf16.mxu1 %v616_v13  ;;  %v640_v35 = vld [vmem:[%s833_s0 + $0xc] ss:$16 sps:$4 sm:$0xff]   ;;  %361 = vmatprep.mubr.bf16.mxu0 %v637_v33  ;;  %v641_v36 = vld [vmem:[%s833_s0 + $0x24] ss:$16 sps:$4 sm:$0xff]   ;;  %v645_v38 = vld [vmem:[%s833_s0 + $0x20] ss:$16 sps:$4 sm:$0xff]  }
   0xf   :  { %410 = vmatprep.mubr.bf16.mxu1 %v640_v35  ;;  %v643_v37 = vld [vmem:[%s833_s0 + $0x2c] ss:$16 sps:$4 sm:$0xff]   ;;  %v646_v39 = vld [vmem:[%s833_s0 + $0x28] ss:$16 sps:$4 sm:$0xff]  }
  0x10   :  { %554 = vmatpush3.bf16.msra.mxu0 %v617_v14 }
  0x11   :  { %582 = vmatpush3.bf16.msra.mxu1 %v618_v15  ;;  %555 = vmatprep.subr.bf16.mxu0 %v619_v16 }
  0x12   :  { %583 = vmatprep.subr.bf16.mxu1 %v620_v17 }
  0x14   :  { %556 = vmatpush3.bf16.msra.mxu0 %v621_v18 }
  0x15   :  { %584 = vmatpush3.bf16.msra.mxu1 %v622_v19  ;;  %557 = vmatprep.subr.bf16.mxu0 %v623_v20 }
  0x16   :  { %585 = vmatprep.subr.bf16.mxu1 %v624_v21 }
  0x18   :  { %558 = vmatpush3.bf16.msra.mxu0 %v625_v22 }
  0x19   :  { %586 = vmatpush3.bf16.msra.mxu1 %v626_v23  ;;  %559 = vmatprep.subr.bf16.mxu0 %v627_v24 }
  0x1a   :  { %587 = vmatprep.subr.bf16.mxu1 %v628_v25 }
  0x1c   :  { %560 = vmatpush3.bf16.msra.mxu0 %v629_v26 }
  0x1d   :  { %588 = vmatpush3.bf16.msra.mxu1 %v630_v27  ;;  %561 = vmatprep.subr.bf16.mxu0 %v631_v28 }
  0x1e   :  { %589 = vmatprep.subr.bf16.mxu1 %v632_v29 }
  0x20   :  { %562 = vmatpush3.bf16.msra.mxu0 %v633_v30 }
  0x21   :  { %590 = vmatpush3.bf16.msra.mxu1 %v634_v31 }
  0x23   :  { %362 = vmatmul.mubr.bf16.vlgmr.msra.gmra.mrb[0].mxu0 %v635_v32  ;;  %v479_v32 = vlaneseq }
  0x24   :  { %411 = vmatmul.mubr.bf16.vlgmr.msra.gmra.mrb[0].mxu1 %v638_v34  ;;  %369 = vmatprep.mubr.bf16.mxu0 %v641_v36 }
  0x25   :  { %418 = vmatprep.mubr.bf16.mxu1 %v643_v37  ;;  %v480_v37 = vshrl.u32 %v479_v32, 7 }
  0x27   :  { %vm481_vm2 = vcmp.eq.s32.totalorder %v480_v37, 0 }
  0x2b   :  { %370 = vmatmul.mubr.bf16.gmra.mrb[4].mxu0 %v645_v38 }
  0x2c   :  { %419 = vmatmul.mubr.bf16.gmra.mrb[4].mxu1 %v646_v39 }
  0xf6   :  { %v563_v40 = vpop.f32.mrb[0].mxu0 }
  0xf7   :  { %v591_v41 = vpop.f32.mrb[0].mxu1  ;;  %v564_v43 = vpop.f32.mrb[1].mxu0 }
  0xf8   :  { %v565_v44 = vadd.f32 %v564_v43, %v563_v40  ;;  %v592_v45 = vpop.f32.mrb[1].mxu1  ;;  %v566_v46 = vpop.f32.mrb[2].mxu0 }
  0xf9   :  { %v593_v47 = vadd.f32 %v592_v45, %v591_v41  ;;  %v594_v48 = vpop.f32.mrb[2].mxu1  ;;  %v567_v49 = vpop.f32.mrb[3].mxu0 }
  0xfa   :  { %v364_v50 = vadd.f32 %v565_v44, %v498_v42  ;;  %v568_v51 = vadd.f32 %v567_v49, %v566_v46  ;;  %v595_v52 = vpop.f32.mrb[3].mxu1 }
  0xfb   :  { %v596_v53 = vadd.f32 %v595_v52, %v594_v48 }
  0xfc   :  { %v413_v54 = vadd.f32 %v593_v47, %v364_v50  ;;  %v367_v55 = vadd.f32 %v568_v51, %v498_v42 }
  0xfe   :  { %v543_v56 = vpack.c.bf16 %v413_v54, %v413_v54  ;;  %v462_v57 = vmul.f32 %v413_v54, %v413_v54  ;;  %v416_v58 = vadd.f32 %v596_v53, %v367_v55  ;;  %v569_v59 = vpop.f32.mrb[4].mxu0  ;;  %v449_v62 = vsel %vm448_vm1, %v413_v54, 0.0 }
  0xff   :  { %v597_v60 = vpop.f32.mrb[4].mxu1  ;;  %v570_v61 = vpop.f32.mrb[5].mxu0 }
 0x100   :  { %444 = vst.msk [vmem:[%s835_s3] sm:$0xf] %vm443_vm0, %v543_v56  ;;  %v544_v63 = vpack.c.bf16 %v416_v58, %v416_v58  ;;  %v450_v0 = vsel %vm448_vm1, %v416_v58, 0.0  ;;  %v463_v1 = vmul.f32 %v416_v58, %v416_v58  ;;  %v598_v2 = vpop.f32.mrb[5].mxu1  ;;  %v572_v3 = vpop.f32.mrb[6].mxu0  ;;  %v571_v5 = vadd.f32 %v570_v61, %v569_v59 }
 0x101   :  { %v451_v4 = vadd.f32 %v450_v0, %v449_v62  ;;  %v599_v6 = vadd.f32 %v598_v2, %v597_v60  ;;  %v600_v7 = vpop.f32.mrb[6].mxu1  ;;  %v573_v8 = vpop.f32.mrb[7].mxu0  ;;  %v466_v9 = vsel %vm448_vm1, %v462_v57, 0.0 }
 0x102   :  { %445 = vst.msk [vmem:[%s835_s3 + $0x4] sm:$0xf] %vm443_vm0, %v544_v63  ;;  %v467_v10 = vsel %vm448_vm1, %v463_v1, 0.0  ;;  %v574_v11 = vadd.f32 %v573_v8, %v572_v3  ;;  %v601_v12 = vpop.f32.mrb[7].mxu1  ;;  %v372_v14 = vadd.f32 %v571_v5, %v498_v42 }
 0x103   :  { %v468_v13 = vadd.f32 %v467_v10, %v466_v9  ;;  %v602_v15 = vadd.f32 %v601_v12, %v600_v7 }
 0x104   :  { %v375_v16 = vadd.f32 %v574_v11, %v498_v42  ;;  %v421_v17 = vadd.f32 %v599_v6, %v372_v14 }
 0x106   :  { %v424_v18 = vadd.f32 %v602_v15, %v375_v16  ;;  %v545_v19 = vpack.c.bf16 %v421_v17, %v421_v17  ;;  %v452_v20 = vsel %vm448_vm1, %v421_v17, 0.0  ;;  %v464_v21 = vmul.f32 %v421_v17, %v421_v17 }
 0x107   :  { %v453_v22 = vadd.f32 %v452_v20, %v451_v4 }
 0x108   :  { %v546_v23 = vpack.c.bf16 %v424_v18, %v424_v18  ;;  %v454_v24 = vsel %vm448_vm1, %v424_v18, 0.0  ;;  %v465_v25 = vmul.f32 %v424_v18, %v424_v18  ;;  %446 = vst.msk [vmem:[%s835_s3 + $0x8] sm:$0xf] %vm443_vm0, %v545_v19  ;;  %v469_v26 = vsel %vm448_vm1, %v464_v21, 0.0 }
 0x109   :  { %v470_v27 = vadd.f32 %v469_v26, %v468_v13  ;;  %v455_v28 = vadd.f32 %v454_v24, %v453_v22 }
 0x10a   :  { %447 = vst.msk [vmem:[%s835_s3 + $0xc] sm:$0xf] %vm443_vm0, %v546_v23  ;;  %v471_v29 = vsel %vm448_vm1, %v465_v25, 0.0 }
 0x10b   :  { %v456_v30 = vrot.slane %v455_v28, 4  ;;  %v472_v31 = vadd.f32 %v471_v29, %v470_v27 }
 0x10d   :  { %v457_v33 = vadd.f32 %v456_v30, %v455_v28  ;;  %v473_v34 = vrot.slane %v472_v31, 4 }
 0x10f   :  { %v458_v35 = vrot.slane %v457_v33, 2  ;;  %v474_v36 = vadd.f32 %v473_v34, %v472_v31 }
 0x111   :  { %v459_v38 = vadd.f32 %v458_v35, %v457_v33  ;;  %v475_v39 = vrot.slane %v474_v36, 2 }
 0x113   :  { %v460_v40 = vrot.slane %v459_v38, 1  ;;  %v476_v41 = vadd.f32 %v475_v39, %v474_v36 }
 0x115   :  { %v461_v42 = vadd.f32 %v460_v40, %v459_v38  ;;  %v477_v43 = vrot.slane %v476_v41, 1 }
 0x117   :  { %v478_v44 = vadd.f32 %v477_v43, %v476_v41  ;;  %v482_v45 = vsel %vm481_vm2, %v461_v42, 0.0 }
 0x118   :  { %483 = vst.msk [vmem:[%s836_s4] sm:$0xff] %vm448_vm1, %v482_v45 }
 0x119   :  { %v484_v46 = vsel %vm481_vm2, %v478_v44, 0.0 }
 0x11a   :  { %485 = vst.msk [vmem:[%s837_s5] sm:$0xff] %vm448_vm1, %v484_v46 }

// kernel: mula_gan_generator.55
= control target key start
LH: loop header
LB: loop body
LE: loop exit
PB: predicated region body
PF: predicated region fallthrough
CT: control target
= control target key end

     0   :  { %v4258_v0 = vmov 0   ;;  %vm3290_vm0 = vcmask 23552   ;;  %s5649_s1 = inlined_call_operand.vmem [shape: bf16[1024,3], index: 1, kind: input, shape index: {}]   ;;  %s5650_s0 = inlined_call_operand.vmem [shape: bf16[512,1024], index: 0, kind: input, shape index: {}]   ;;  %s5651_s2 = inlined_call_operand.vmem [shape: f32[1,3], index: 2, kind: input, shape index: {}]   ;;  %s5652_s3 = inlined_call_operand.vmem [shape: f32[512,3], index: 3, kind: output, shape index: {}]  }
   0x1   :  { %2070 = vmatprep.subr.bf16.mxu1 %v4258_v0  ;;  %2648 = vmatprep.subr.bf16.mxu0 %v4258_v0  ;;  %v4065_v1 = vld [vmem:[%s5649_s1] sm:$0xff]   ;;  %v4067_v3 = vld [vmem:[%s5649_s1 + $0x8] sm:$0xff]   ;;  %v4069_v5 = vld [vmem:[%s5649_s1 + $0x10] sm:$0xff]  }
   0x2   :  { %v4066_v2 = vld [vmem:[%s5649_s1 + $0x100] sm:$0xff]   ;;  %2071 = vmatpush1.bf16.msra.mxu1 %v4065_v1  ;;  %v4068_v4 = vld [vmem:[%s5649_s1 + $0x108] sm:$0xff]   ;;  %v4070_v6 = vld [vmem:[%s5649_s1 + $0x110] sm:$0xff]  }
   0x3   :  { %2649 = vmatpush1.bf16.msra.mxu0 %v4066_v2  ;;  %2072 = vmatprep.subr.bf16.mxu1 %v4258_v0  ;;  %v4071_v7 = vld [vmem:[%s5649_s1 + $0x18] sm:$0xff]   ;;  %v4073_v9 = vld [vmem:[%s5649_s1 + $0x20] sm:$0xff]   ;;  %v4075_v11 = vld [vmem:[%s5649_s1 + $0x28] sm:$0xff]  }
   0x4   :  { %2650 = vmatprep.subr.bf16.mxu0 %v4258_v0  ;;  %v4072_v8 = vld [vmem:[%s5649_s1 + $0x118] sm:$0xff]   ;;  %v4074_v10 = vld [vmem:[%s5649_s1 + $0x120] sm:$0xff]   ;;  %v4076_v12 = vld [vmem:[%s5649_s1 + $0x128] sm:$0xff]  }
   0x5   :  { %v4077_v13 = vld [vmem:[%s5649_s1 + $0x30] sm:$0xff]   ;;  %v4079_v15 = vld [vmem:[%s5649_s1 + $0x38] sm:$0xff]   ;;  %v4081_v17 = vld [vmem:[%s5649_s1 + $0x40] sm:$0xff]  }
   0x6   :  { %2073 = vmatpush1.bf16.msra.mxu1 %v4067_v3  ;;  %v4078_v14 = vld [vmem:[%s5649_s1 + $0x130] sm:$0xff]   ;;  %v4080_v16 = vld [vmem:[%s5649_s1 + $0x138] sm:$0xff]   ;;  %v4082_v18 = vld [vmem:[%s5649_s1 + $0x140] sm:$0xff]  }
   0x7   :  { %2651 = vmatpush1.bf16.msra.mxu0 %v4068_v4  ;;  %2074 = vmatprep.subr.bf16.mxu1 %v4258_v0  ;;  %v4354_v19 = vld [vmem:[%s5650_s0] sm:$0xff]  ;;  %v4364_v21 = vld [vmem:[%s5650_s0 + $0x10] sm:$0xff]  ;;  %v4083_v24 = vld [vmem:[%s5649_s1 + $0x48] sm:$0xff]  }
   0x8   :  { %2652 = vmatprep.subr.bf16.mxu0 %v4258_v0  ;;  %v4359_v20 = vld [vmem:[%s5650_s0 + $0x20] sm:$0xff]  ;;  %v4371_v23 = vld [vmem:[%s5650_s0 + $0x30] sm:$0xff]  ;;  %v4084_v26 = vld [vmem:[%s5649_s1 + $0x148] sm:$0xff]  }
   0x9   :  { %v3361_v22 = vcombine.high %v4354_v19, %v4359_v20  ;;  %v3365_v25 = vcombine.high %v4364_v21, %v4371_v23  ;;  %v4085_v27 = vld [vmem:[%s5649_s1 + $0x50] sm:$0xff]   ;;  %v4087_v29 = vld [vmem:[%s5649_s1 + $0x58] sm:$0xff]   ;;  %v4089_v31 = vld [vmem:[%s5649_s1 + $0x60] sm:$0xff]   ;;  %v3360_v42 = vcombine.low %v4354_v19, %v4359_v20  ;;  %v3364_v44 = vcombine.low %v4364_v21, %v4371_v23 }
   0xa   :  { %2075 = vmatpush1.bf16.msra.mxu1 %v4069_v5  ;;  %v4086_v28 = vld [vmem:[%s5649_s1 + $0x150] sm:$0xff]   ;;  %v4088_v30 = vld [vmem:[%s5649_s1 + $0x158] sm:$0xff]   ;;  %v4090_v32 = vld [vmem:[%s5649_s1 + $0x160] sm:$0xff]  }
   0xb   :  { %2653 = vmatpush1.bf16.msra.mxu0 %v4070_v6  ;;  %2076 = vmatprep.subr.bf16.mxu1 %v4258_v0  ;;  %v4091_v33 = vld [vmem:[%s5649_s1 + $0x68] sm:$0xff]   ;;  %v4093_v35 = vld [vmem:[%s5649_s1 + $0x70] sm:$0xff]   ;;  %v4095_v37 = vld [vmem:[%s5649_s1 + $0x78] sm:$0xff]  }
   0xc   :  { %2654 = vmatprep.subr.bf16.mxu0 %v4258_v0  ;;  %2102 = vmatprep.mubr.bf16.mxu1 %v3361_v22  ;;  %v4092_v34 = vld [vmem:[%s5649_s1 + $0x168] sm:$0xff]   ;;  %v4094_v36 = vld [vmem:[%s5649_s1 + $0x170] sm:$0xff]   ;;  %v4096_v38 = vld [vmem:[%s5649_s1 + $0x178] sm:$0xff]  }
   0xd   :  { %2680 = vmatprep.mubr.bf16.mxu0 %v3365_v25  ;;  %v23_v39 = vld [vmem:[%s5650_s0 + $0x40] sm:$0xff]  ;;  %v25_v41 = vld [vmem:[%s5650_s0 + $0x50] sm:$0xff]  ;;  %v4099_v51 = vld [vmem:[%s5649_s1 + $0x88] sm:$0xff]  }
   0xe   :  { %2077 = vmatpush1.bf16.msra.mxu1 %v4071_v7  ;;  %v27_v40 = vld [vmem:[%s5650_s0 + $0x60] sm:$0xff]  ;;  %v29_v43 = vld [vmem:[%s5650_s0 + $0x70] sm:$0xff]  ;;  %v4100_v52 = vld [vmem:[%s5649_s1 + $0x188] sm:$0xff]  }
   0xf   :  { %2655 = vmatpush1.bf16.msra.mxu0 %v4072_v8  ;;  %2078 = vmatprep.subr.bf16.mxu1 %v4258_v0  ;;  %v4097_v45 = vld [vmem:[%s5649_s1 + $0x80] sm:$0xff]   ;;  %v3369_v47 = vcombine.high %v23_v39, %v27_v40  ;;  %v3373_v48 = vcombine.high %v25_v41, %v29_v43  ;;  %v33_v53 = vld [vmem:[%s5650_s0 + $0x90] sm:$0xff]  ;;  %v3368_v55 = vcombine.low %v23_v39, %v27_v40  ;;  %v4103_v2 = vld [vmem:[%s5649_s1 + $0x98] sm:$0xff]  }
  0x10   :  { %2656 = vmatprep.subr.bf16.mxu0 %v4258_v0  ;;  %v4098_v46 = vld [vmem:[%s5649_s1 + $0x180] sm:$0xff]   ;;  %v37_v54 = vld [vmem:[%s5650_s0 + $0xb0] sm:$0xff]  ;;  %v3372_v56 = vcombine.low %v25_v41, %v29_v43  ;;  %v4104_v3 = vld [vmem:[%s5649_s1 + $0x198] sm:$0xff]  }
  0x11   :  { %v31_v49 = vld [vmem:[%s5650_s0 + $0x80] sm:$0xff]  ;;  %v3381_v58 = vcombine.high %v33_v53, %v37_v54  ;;  %v4101_v59 = vld [vmem:[%s5649_s1 + $0x90] sm:$0xff]   ;;  %v3380_v6 = vcombine.low %v33_v53, %v37_v54  ;;  %v4116_v39 = vld [vmem:[%s5649_s1 + $0x1c8] sm:$0xff]  }
  0x12   :  { %2079 = vmatpush1.bf16.msra.mxu1 %v4073_v9  ;;  %v35_v50 = vld [vmem:[%s5650_s0 + $0xa0] sm:$0xff]  ;;  %v4102_v60 = vld [vmem:[%s5649_s1 + $0x190] sm:$0xff]   ;;  %v4119_v54 = vld [vmem:[%s5649_s1 + $0xd8] sm:$0xff]  }
  0x13   :  { %2657 = vmatpush1.bf16.msra.mxu0 %v4074_v10  ;;  %2080 = vmatprep.subr.bf16.mxu1 %v4258_v0  ;;  %v3377_v57 = vcombine.high %v31_v49, %v35_v50  ;;  %v39_v61 = vld [vmem:[%s5650_s0 + $0xc0] sm:$0xff]  ;;  %v41_v63 = vld [vmem:[%s5650_s0 + $0xd0] sm:$0xff]  ;;  %v3376_v4 = vcombine.low %v31_v49, %v35_v50 }
  0x14   :  { %2658 = vmatprep.subr.bf16.mxu0 %v4258_v0  ;;  %v43_v62 = vld [vmem:[%s5650_s0 + $0xe0] sm:$0xff]  ;;  %v45_v1 = vld [vmem:[%s5650_s0 + $0xf0] sm:$0xff] }
  0x15   :  { %v4105_v5 = vld [vmem:[%s5649_s1 + $0xa0] sm:$0xff]   ;;  %v3385_v7 = vcombine.high %v39_v61, %v43_v62  ;;  %v3389_v9 = vcombine.high %v41_v63, %v45_v1  ;;  %v4109_v20 = vld [vmem:[%s5649_s1 + $0xb0] sm:$0xff]  }
  0x16   :  { %2081 = vmatpush1.bf16.msra.mxu1 %v4075_v11  ;;  %v4106_v8 = vld [vmem:[%s5649_s1 + $0x1a0] sm:$0xff]   ;;  %v4110_v21 = vld [vmem:[%s5649_s1 + $0x1b0] sm:$0xff]  }
  0x17   :  { %2659 = vmatpush1.bf16.msra.mxu0 %v4076_v12  ;;  %2082 = vmatprep.subr.bf16.mxu1 %v4258_v0  ;;  %v47_v10 = vld [vmem:[%s5650_s0 + $0x100] sm:$0xff]  ;;  %v49_v12 = vld [vmem:[%s5650_s0 + $0x110] sm:$0xff] }
  0x18   :  { %2660 = vmatprep.subr.bf16.mxu0 %v4258_v0  ;;  %v51_v11 = vld [vmem:[%s5650_s0 + $0x120] sm:$0xff]  ;;  %v57_v25 = vld [vmem:[%s5650_s0 + $0x150] sm:$0xff] }
  0x19   :  { %v55_v22 = vld [vmem:[%s5650_s0 + $0x140] sm:$0xff]  ;;  %v77_v49 = vld [vmem:[%s5650_s0 + $0x1f0] sm:$0xff] }
  0x1a   :  { %2083 = vmatpush1.bf16.msra.mxu1 %v4077_v13  ;;  %v53_v13 = vld [vmem:[%s5650_s0 + $0x130] sm:$0xff]  ;;  %v59_v23 = vld [vmem:[%s5650_s0 + $0x160] sm:$0xff] }
  0x1b   :  { %2661 = vmatpush1.bf16.msra.mxu0 %v4078_v14  ;;  %2084 = vmatprep.subr.bf16.mxu1 %v4258_v0  ;;  %v4107_v14 = vld [vmem:[%s5649_s1 + $0xa8] sm:$0xff]   ;;  %v3397_v19 = vcombine.high %v49_v12, %v53_v13  ;;  %v3400_v40 = vcombine.low %v55_v22, %v59_v23 }
  0x1c   :  { %2662 = vmatprep.subr.bf16.mxu0 %v4258_v0 }
  0x1e   :  { %2085 = vmatpush1.bf16.msra.mxu1 %v4079_v15  ;;  %v4108_v15 = vld [vmem:[%s5649_s1 + $0x1a8] sm:$0xff]  }
  0x1f   :  { %2663 = vmatpush1.bf16.msra.mxu0 %v4080_v16  ;;  %2086 = vmatprep.subr.bf16.mxu1 %v4258_v0  ;;  %v3384_v16 = vcombine.low %v39_v61, %v43_v62 }
  0x20   :  { %2664 = vmatprep.subr.bf16.mxu0 %v4258_v0 }
  0x22   :  { %2087 = vmatpush1.bf16.msra.mxu1 %v4081_v17  ;;  %v3388_v17 = vcombine.low %v41_v63, %v45_v1  ;;  %v87_v1 = vld [vmem:[%s5650_s0 + $0x240] sm:$0xff] }
  0x23   :  { %2665 = vmatpush1.bf16.msra.mxu0 %v4082_v18  ;;  %2088 = vmatprep.subr.bf16.mxu1 %v4258_v0  ;;  %v3393_v18 = vcombine.high %v47_v10, %v51_v11 }
  0x24   :  { %2666 = vmatprep.subr.bf16.mxu0 %v4258_v0 }
  0x26   :  { %2089 = vmatpush1.bf16.msra.mxu1 %v4083_v24  ;;  %v4111_v24 = vld [vmem:[%s5649_s1 + $0xb8] sm:$0xff]  }
  0x27   :  { %2667 = vmatpush1.bf16.msra.mxu0 %v4084_v26  ;;  %2090 = vmatprep.subr.bf16.mxu1 %v4258_v0  ;;  %v61_v26 = vld [vmem:[%s5650_s0 + $0x170] sm:$0xff] }
  0x28   :  { %2668 = vmatprep.subr.bf16.mxu0 %v4258_v0  ;;  %v3404_v41 = vcombine.low %v57_v25, %v61_v26 }
  0x2a   :  { %2091 = vmatpush1.bf16.msra.mxu1 %v4085_v27  ;;  %v4112_v27 = vld [vmem:[%s5649_s1 + $0x1b8] sm:$0xff]  }
  0x2b   :  { %2669 = vmatpush1.bf16.msra.mxu0 %v4086_v28  ;;  %2092 = vmatprep.subr.bf16.mxu1 %v4258_v0  ;;  %v3392_v28 = vcombine.low %v47_v10, %v51_v11  ;;  %v4122_v10 = vld [vmem:[%s5649_s1 + $0x1e0] sm:$0xff]  }
  0x2c   :  { %2670 = vmatprep.subr.bf16.mxu0 %v4258_v0  ;;  %v95_v11 = vld [vmem:[%s5650_s0 + $0x280] sm:$0xff] }
  0x2e   :  { %2093 = vmatpush1.bf16.msra.mxu1 %v4087_v29  ;;  %v3396_v29 = vcombine.low %v49_v12, %v53_v13  ;;  %v99_v12 = vld [vmem:[%s5650_s0 + $0x2a0] sm:$0xff]  ;;  %v97_v13 = vld [vmem:[%s5650_s0 + $0x290] sm:$0xff] }
  0x2f   :  { %2671 = vmatpush1.bf16.msra.mxu0 %v4088_v30  ;;  %2094 = vmatprep.subr.bf16.mxu1 %v4258_v0  ;;  %v3401_v30 = vcombine.high %v55_v22, %v59_v23  ;;  %v109_v22 = vld [vmem:[%s5650_s0 + $0x2f0] sm:$0xff]  ;;  %v3440_v23 = vcombine.low %v95_v11, %v99_v12 }
  0x30   :  { %2672 = vmatprep.subr.bf16.mxu0 %v4258_v0 }
  0x32   :  { %2095 = vmatpush1.bf16.msra.mxu1 %v4089_v31  ;;  %v3405_v31 = vcombine.high %v57_v25, %v61_v26 }
  0x33   :  { %2673 = vmatpush1.bf16.msra.mxu0 %v4090_v32  ;;  %2096 = vmatprep.subr.bf16.mxu1 %v4258_v0  ;;  %v4113_v32 = vld [vmem:[%s5649_s1 + $0xc0] sm:$0xff]  }
  0x34   :  { %2674 = vmatprep.subr.bf16.mxu0 %v4258_v0 }
  0x36   :  { %2097 = vmatpush1.bf16.msra.mxu1 %v4091_v33  ;;  %v4114_v33 = vld [vmem:[%s5649_s1 + $0x1c0] sm:$0xff]  }
  0x37   :  { %2675 = vmatpush1.bf16.msra.mxu0 %v4092_v34  ;;  %2098 = vmatprep.subr.bf16.mxu1 %v4258_v0  ;;  %v63_v34 = vld [vmem:[%s5650_s0 + $0x180] sm:$0xff] }
  0x38   :  { %2676 = vmatprep.subr.bf16.mxu0 %v4258_v0 }
  0x3a   :  { %2099 = vmatpush1.bf16.msra.mxu1 %v4093_v35  ;;  %v67_v35 = vld [vmem:[%s5650_s0 + $0x1a0] sm:$0xff] }
  0x3b   :  { %2677 = vmatpush1.bf16.msra.mxu0 %v4094_v36  ;;  %2100 = vmatprep.subr.bf16.mxu1 %v4258_v0  ;;  %v4115_v36 = vld [vmem:[%s5649_s1 + $0xc8] sm:$0xff]   ;;  %v3408_v50 = vcombine.low %v63_v34, %v67_v35 }
  0x3c   :  { %2678 = vmatprep.subr.bf16.mxu0 %v4258_v0 }
  0x3e   :  { %2101 = vmatpush1.bf16.msra.mxu1 %v4095_v37  ;;  %v65_v37 = vld [vmem:[%s5650_s0 + $0x190] sm:$0xff] }
  0x3f   :  { %2679 = vmatpush1.bf16.msra.mxu0 %v4096_v38  ;;  %2359 = vmatprep.subr.bf16.mxu1 %v4258_v0  ;;  %v69_v38 = vld [vmem:[%s5650_s0 + $0x1b0] sm:$0xff] }
  0x40   :  { %2937 = vmatprep.subr.bf16.mxu0 %v4258_v0  ;;  %v3413_v43 = vcombine.high %v65_v37, %v69_v38 }
  0x41   :  { %2103 = vmatmul.mubr.bf16.vlgmr.msra.gmra.mrb[0].mxu1 %v3360_v42  ;;  %v3409_v42 = vcombine.high %v63_v34, %v67_v35 }
  0x42   :  { %2681 = vmatmul.mubr.bf16.vlgmr.msra.gmra.mrb[0].mxu0 %v3364_v44  ;;  %2360 = vmatpush1.bf16.msra.mxu1 %v4097_v45  ;;  %v4117_v44 = vld [vmem:[%s5649_s1 + $0xd0] sm:$0xff]  }
  0x43   :  { %2938 = vmatpush1.bf16.msra.mxu0 %v4098_v46  ;;  %2110 = vmatprep.mubr.bf16.mxu1 %v3369_v47  ;;  %v4118_v45 = vld [vmem:[%s5649_s1 + $0x1d0] sm:$0xff]   ;;  %v71_v46 = vld [vmem:[%s5650_s0 + $0x1c0] sm:$0xff] }
  0x44   :  { %2688 = vmatprep.mubr.bf16.mxu0 %v3373_v48  ;;  %2361 = vmatprep.subr.bf16.mxu1 %v4258_v0  ;;  %v75_v47 = vld [vmem:[%s5650_s0 + $0x1e0] sm:$0xff]  ;;  %v73_v48 = vld [vmem:[%s5650_s0 + $0x1d0] sm:$0xff] }
  0x45   :  { %2939 = vmatprep.subr.bf16.mxu0 %v4258_v0  ;;  %v3421_v53 = vcombine.high %v73_v48, %v77_v49  ;;  %v3420_v61 = vcombine.low %v73_v48, %v77_v49  ;;  %v131_v48 = vld [vmem:[%s5650_s0 + $0x3a0] sm:$0xff]  ;;  %v129_v49 = vld [vmem:[%s5650_s0 + $0x390] sm:$0xff] }
  0x46   :  { %2362 = vmatpush1.bf16.msra.mxu1 %v4099_v51  ;;  %v3412_v51 = vcombine.low %v65_v37, %v69_v38  ;;  %v119_v37 = vld [vmem:[%s5650_s0 + $0x340] sm:$0xff] }
  0x47   :  { %2940 = vmatpush1.bf16.msra.mxu0 %v4100_v52  ;;  %2363 = vmatprep.subr.bf16.mxu1 %v4258_v0  ;;  %v3417_v52 = vcombine.high %v71_v46, %v75_v47  ;;  %v123_v38 = vld [vmem:[%s5650_s0 + $0x360] sm:$0xff] }
  0x48   :  { %2941 = vmatprep.subr.bf16.mxu0 %v4258_v0 }
  0x49   :  { %2111 = vmatmul.mubr.bf16.gmra.mrb[4].mxu1 %v3368_v55  ;;  %v4120_v55 = vld [vmem:[%s5649_s1 + $0x1d8] sm:$0xff]  }
  0x4a   :  { %2689 = vmatmul.mubr.bf16.gmra.mrb[4].mxu0 %v3372_v56  ;;  %2118 = vmatprep.mubr.bf16.mxu1 %v3377_v57  ;;  %v79_v56 = vld [vmem:[%s5650_s0 + $0x200] sm:$0xff] }
  0x4b   :  { %2696 = vmatprep.mubr.bf16.mxu0 %v3381_v58  ;;  %2364 = vmatpush1.bf16.msra.mxu1 %v4101_v59  ;;  %v83_v57 = vld [vmem:[%s5650_s0 + $0x220] sm:$0xff]  ;;  %v81_v58 = vld [vmem:[%s5650_s0 + $0x210] sm:$0xff] }
  0x4c   :  { %2942 = vmatpush1.bf16.msra.mxu0 %v4102_v60  ;;  %2365 = vmatprep.subr.bf16.mxu1 %v4258_v0  ;;  %v85_v59 = vld [vmem:[%s5650_s0 + $0x230] sm:$0xff]  ;;  %v3416_v60 = vcombine.low %v71_v46, %v75_v47  ;;  %v3425_v62 = vcombine.high %v79_v56, %v83_v57  ;;  %v127_v47 = vld [vmem:[%s5650_s0 + $0x380] sm:$0xff] }
  0x4d   :  { %2943 = vmatprep.subr.bf16.mxu0 %v4258_v0  ;;  %v3429_v63 = vcombine.high %v81_v58, %v85_v59  ;;  %v4126_v46 = vld [vmem:[%s5649_s1 + $0x1f0] sm:$0xff]  }
  0x4f   :  { %2366 = vmatpush1.bf16.msra.mxu1 %v4103_v2  ;;  %v91_v2 = vld [vmem:[%s5650_s0 + $0x260] sm:$0xff] }
  0x50   :  { %2944 = vmatpush1.bf16.msra.mxu0 %v4104_v3  ;;  %2367 = vmatprep.subr.bf16.mxu1 %v4258_v0  ;;  %v89_v3 = vld [vmem:[%s5650_s0 + $0x250] sm:$0xff] }
  0x51   :  { %2119 = vmatmul.mubr.bf16.gmra.mrb[8].mxu1 %v3376_v4  ;;  %2945 = vmatprep.subr.bf16.mxu0 %v4258_v0  ;;  %v93_v4 = vld [vmem:[%s5650_s0 + $0x270] sm:$0xff] }
  0x52   :  { %2697 = vmatmul.mubr.bf16.gmra.mrb[8].mxu0 %v3380_v6  ;;  %2126 = vmatprep.mubr.bf16.mxu1 %v3385_v7  ;;  %v3428_v6 = vcombine.low %v81_v58, %v85_v59  ;;  %v3433_v7 = vcombine.high %v87_v1, %v91_v2  ;;  %v3472_v58 = vcombine.low %v127_v47, %v131_v48 }
  0x53   :  { %2704 = vmatprep.mubr.bf16.mxu0 %v3389_v9  ;;  %2368 = vmatpush1.bf16.msra.mxu1 %v4105_v5  ;;  %v3424_v5 = vcombine.low %v79_v56, %v83_v57  ;;  %v4121_v9 = vld [vmem:[%s5649_s1 + $0xe0] sm:$0xff]   ;;  %v137_v57 = vld [vmem:[%s5650_s0 + $0x3d0] sm:$0xff] }
  0x54   :  { %2946 = vmatpush1.bf16.msra.mxu0 %v4106_v8  ;;  %2369 = vmatprep.subr.bf16.mxu1 %v4258_v0  ;;  %v3437_v8 = vcombine.high %v89_v3, %v93_v4  ;;  %v139_v56 = vld [vmem:[%s5650_s0 + $0x3e0] sm:$0xff] }
  0x55   :  { %2947 = vmatprep.subr.bf16.mxu0 %v4258_v0 }
  0x57   :  { %2370 = vmatpush1.bf16.msra.mxu1 %v4107_v14  ;;  %v101_v14 = vld [vmem:[%s5650_s0 + $0x2b0] sm:$0xff] }
  0x58   :  { %2948 = vmatpush1.bf16.msra.mxu0 %v4108_v15  ;;  %2371 = vmatprep.subr.bf16.mxu1 %v4258_v0  ;;  %v3432_v15 = vcombine.low %v87_v1, %v91_v2  ;;  %v143_v1 = vld [vmem:[%s5650_s0 + $0x400] sm:$0xff] }
  0x59   :  { %2127 = vmatmul.mubr.bf16.gmra.mrb[12].mxu1 %v3384_v16  ;;  %2949 = vmatprep.subr.bf16.mxu0 %v4258_v0  ;;  %v3436_v16 = vcombine.low %v89_v3, %v93_v4  ;;  %v147_v2 = vld [vmem:[%s5650_s0 + $0x420] sm:$0xff]  ;;  %v145_v3 = vld [vmem:[%s5650_s0 + $0x410] sm:$0xff] }
  0x5a   :  { %2705 = vmatmul.mubr.bf16.gmra.mrb[12].mxu0 %v3388_v17  ;;  %2134 = vmatprep.mubr.bf16.mxu1 %v3393_v18  ;;  %v3441_v17 = vcombine.high %v95_v11, %v99_v12  ;;  %v3445_v18 = vcombine.high %v97_v13, %v101_v14  ;;  %v149_v4 = vld [vmem:[%s5650_s0 + $0x430] sm:$0xff] }
  0x5b   :  { %2712 = vmatprep.mubr.bf16.mxu0 %v3397_v19  ;;  %2372 = vmatpush1.bf16.msra.mxu1 %v4109_v20  ;;  %v103_v19 = vld [vmem:[%s5650_s0 + $0x2c0] sm:$0xff]  ;;  %v153_v11 = vld [vmem:[%s5650_s0 + $0x450] sm:$0xff] }
  0x5c   :  { %2950 = vmatpush1.bf16.msra.mxu0 %v4110_v21  ;;  %2373 = vmatprep.subr.bf16.mxu1 %v4258_v0  ;;  %v107_v20 = vld [vmem:[%s5650_s0 + $0x2e0] sm:$0xff]  ;;  %v105_v21 = vld [vmem:[%s5650_s0 + $0x2d0] sm:$0xff] }
  0x5d   :  { %2951 = vmatprep.subr.bf16.mxu0 %v4258_v0  ;;  %v3449_v25 = vcombine.high %v103_v19, %v107_v20  ;;  %v3453_v26 = vcombine.high %v105_v21, %v109_v22  ;;  %v3452_v34 = vcombine.low %v105_v21, %v109_v22  ;;  %v157_v12 = vld [vmem:[%s5650_s0 + $0x470] sm:$0xff] }
  0x5e   :  { %v3500_v22 = vcombine.low %v153_v11, %v157_v12 }
  0x5f   :  { %2374 = vmatpush1.bf16.msra.mxu1 %v4111_v24  ;;  %v3444_v24 = vcombine.low %v97_v13, %v101_v14  ;;  %v3488_v13 = vcombine.low %v143_v1, %v147_v2  ;;  %v3492_v14 = vcombine.low %v145_v3, %v149_v4 }
  0x60   :  { %2952 = vmatpush1.bf16.msra.mxu0 %v4112_v27  ;;  %2375 = vmatprep.subr.bf16.mxu1 %v4258_v0  ;;  %v4123_v27 = vld [vmem:[%s5649_s1 + $0xe8] sm:$0xff]  }
  0x61   :  { %2135 = vmatmul.mubr.bf16.gmra.mrb[16].mxu1 %v3392_v28  ;;  %2953 = vmatprep.subr.bf16.mxu0 %v4258_v0  ;;  %v4124_v28 = vld [vmem:[%s5649_s1 + $0x1e8] sm:$0xff]  }
  0x62   :  { %2713 = vmatmul.mubr.bf16.gmra.mrb[16].mxu0 %v3396_v29  ;;  %2142 = vmatprep.mubr.bf16.mxu1 %v3401_v30  ;;  %v111_v29 = vld [vmem:[%s5650_s0 + $0x300] sm:$0xff] }
  0x63   :  { %2720 = vmatprep.mubr.bf16.mxu0 %v3405_v31  ;;  %2376 = vmatpush1.bf16.msra.mxu1 %v4113_v32  ;;  %v115_v30 = vld [vmem:[%s5650_s0 + $0x320] sm:$0xff]  ;;  %v113_v31 = vld [vmem:[%s5650_s0 + $0x310] sm:$0xff] }
  0x64   :  { %2954 = vmatpush1.bf16.msra.mxu0 %v4114_v33  ;;  %2377 = vmatprep.subr.bf16.mxu1 %v4258_v0  ;;  %v117_v32 = vld [vmem:[%s5650_s0 + $0x330] sm:$0xff]  ;;  %v3448_v33 = vcombine.low %v103_v19, %v107_v20  ;;  %v3457_v35 = vcombine.high %v111_v29, %v115_v30 }
  0x65   :  { %2955 = vmatprep.subr.bf16.mxu0 %v4258_v0  ;;  %v161_v19 = vld [vmem:[%s5650_s0 + $0x490] sm:$0xff] }
  0x66   :  { %v165_v20 = vld [vmem:[%s5650_s0 + $0x4b0] sm:$0xff] }
  0x67   :  { %2378 = vmatpush1.bf16.msra.mxu1 %v4115_v36  ;;  %v3461_v36 = vcombine.high %v113_v31, %v117_v32 }
  0x68   :  { %2956 = vmatpush1.bf16.msra.mxu0 %v4116_v39  ;;  %2379 = vmatprep.subr.bf16.mxu1 %v4258_v0  ;;  %v121_v39 = vld [vmem:[%s5650_s0 + $0x350] sm:$0xff] }
  0x69   :  { %2143 = vmatmul.mubr.bf16.gmra.mrb[20].mxu1 %v3400_v40  ;;  %2957 = vmatprep.subr.bf16.mxu0 %v4258_v0  ;;  %v125_v40 = vld [vmem:[%s5650_s0 + $0x370] sm:$0xff] }
  0x6a   :  { %2721 = vmatmul.mubr.bf16.gmra.mrb[20].mxu0 %v3404_v41  ;;  %2150 = vmatprep.mubr.bf16.mxu1 %v3409_v42  ;;  %v3456_v41 = vcombine.low %v111_v29, %v115_v30  ;;  %v3460_v42 = vcombine.low %v113_v31, %v117_v32  ;;  %v3508_v30 = vcombine.low %v161_v19, %v165_v20 }
  0x6b   :  { %2728 = vmatprep.mubr.bf16.mxu0 %v3413_v43  ;;  %2380 = vmatpush1.bf16.msra.mxu1 %v4117_v44  ;;  %v3465_v43 = vcombine.high %v119_v37, %v123_v38  ;;  %v3469_v44 = vcombine.high %v121_v39, %v125_v40 }
  0x6c   :  { %2958 = vmatpush1.bf16.msra.mxu0 %v4118_v45  ;;  %2381 = vmatprep.subr.bf16.mxu1 %v4258_v0  ;;  %v4125_v45 = vld [vmem:[%s5649_s1 + $0xf0] sm:$0xff]  }
  0x6d   :  { %2959 = vmatprep.subr.bf16.mxu0 %v4258_v0 }
  0x6f   :  { %2382 = vmatpush1.bf16.msra.mxu1 %v4119_v54 }
  0x70   :  { %2960 = vmatpush1.bf16.msra.mxu0 %v4120_v55  ;;  %2383 = vmatprep.subr.bf16.mxu1 %v4258_v0  ;;  %v135_v55 = vld [vmem:[%s5650_s0 + $0x3c0] sm:$0xff] }
  0x71   :  { %2151 = vmatmul.mubr.bf16.gmra.mrb[24].mxu1 %v3408_v50  ;;  %2961 = vmatprep.subr.bf16.mxu0 %v4258_v0  ;;  %v133_v50 = vld [vmem:[%s5650_s0 + $0x3b0] sm:$0xff] }
  0x72   :  { %2729 = vmatmul.mubr.bf16.gmra.mrb[24].mxu0 %v3412_v51  ;;  %2158 = vmatprep.mubr.bf16.mxu1 %v3417_v52  ;;  %v3464_v51 = vcombine.low %v119_v37, %v123_v38  ;;  %v3468_v52 = vcombine.low %v121_v39, %v125_v40  ;;  %v3477_v54 = vcombine.high %v129_v49, %v133_v50 }
  0x73   :  { %2736 = vmatprep.mubr.bf16.mxu0 %v3421_v53  ;;  %2384 = vmatpush1.bf16.msra.mxu1 %v4121_v9  ;;  %v3473_v53 = vcombine.high %v127_v47, %v131_v48  ;;  %v3476_v59 = vcombine.low %v129_v49, %v133_v50  ;;  %v151_v9 = vld [vmem:[%s5650_s0 + $0x440] sm:$0xff] }
  0x74   :  { %2962 = vmatpush1.bf16.msra.mxu0 %v4122_v10  ;;  %2385 = vmatprep.subr.bf16.mxu1 %v4258_v0  ;;  %v155_v10 = vld [vmem:[%s5650_s0 + $0x460] sm:$0xff] }
  0x75   :  { %2963 = vmatprep.subr.bf16.mxu0 %v4258_v0  ;;  %v3496_v21 = vcombine.low %v151_v9, %v155_v10  ;;  %v191_v49 = vld [vmem:[%s5650_s0 + $0x580] sm:$0xff] }
  0x76   :  { %v195_v50 = vld [vmem:[%s5650_s0 + $0x5a0] sm:$0xff] }
  0x77   :  { %2386 = vmatpush1.bf16.msra.mxu1 %v4123_v27  ;;  %v169_v27 = vld [vmem:[%s5650_s0 + $0x4d0] sm:$0xff] }
  0x78   :  { %2964 = vmatpush1.bf16.msra.mxu0 %v4124_v28  ;;  %2387 = vmatprep.subr.bf16.mxu1 %v4258_v0  ;;  %v173_v28 = vld [vmem:[%s5650_s0 + $0x4f0] sm:$0xff] }
  0x79   :  { %2159 = vmatmul.mubr.bf16.gmra.mrb[28].mxu1 %v3416_v60  ;;  %2965 = vmatprep.subr.bf16.mxu0 %v4258_v0  ;;  %v3481_v60 = vcombine.high %v135_v55, %v139_v56  ;;  %v3517_v32 = vcombine.high %v169_v27, %v173_v28  ;;  %v3516_v38 = vcombine.low %v169_v27, %v173_v28  ;;  %v233_v27 = vld [vmem:[%s5650_s0 + $0x6d0] sm:$0xff] }
  0x7a   :  { %2737 = vmatmul.mubr.bf16.gmra.mrb[28].mxu0 %v3420_v61  ;;  %2166 = vmatprep.mubr.bf16.mxu1 %v3425_v62  ;;  %v4127_v62 = vld [vmem:[%s5649_s1 + $0xf8] sm:$0xff]   ;;  %v237_v28 = vld [vmem:[%s5650_s0 + $0x6f0] sm:$0xff] }
  0x7b   :  { %2744 = vmatprep.mubr.bf16.mxu0 %v3429_v63  ;;  %2388 = vmatpush1.bf16.msra.mxu1 %v4125_v45  ;;  %v4128_v63 = vld [vmem:[%s5649_s1 + $0x1f8] sm:$0xff]  }
  0x7c   :  { %2966 = vmatpush1.bf16.msra.mxu0 %v4126_v46  ;;  %2389 = vmatprep.subr.bf16.mxu1 %v4258_v0 }
  0x7d   :  { %2967 = vmatprep.subr.bf16.mxu0 %v4258_v0  ;;  %v141_v0 = vld [vmem:[%s5650_s0 + $0x3f0] sm:$0xff] }
  0x7e   :  { %v3485_v61 = vcombine.high %v137_v57, %v141_v0 }
  0x7f   :  { %2390 = vmatpush1.bf16.msra.mxu1 %v4127_v62 }
  0x80   :  { %2968 = vmatpush1.bf16.msra.mxu0 %v4128_v63 }
  0x81   :  { %2167 = vmatmul.mubr.bf16.gmra.mrb[32].mxu1 %v3424_v5  ;;  %v3480_v5 = vcombine.low %v135_v55, %v139_v56  ;;  %v3537_v55 = vcombine.high %v191_v49, %v195_v50 }
  0x82   :  { %2745 = vmatmul.mubr.bf16.gmra.mrb[32].mxu0 %v3428_v6  ;;  %2174 = vmatprep.mubr.bf16.mxu1 %v3433_v7  ;;  %v3484_v6 = vcombine.low %v137_v57, %v141_v0  ;;  %v3489_v7 = vcombine.high %v143_v1, %v147_v2  ;;  %v199_v57 = vld [vmem:[%s5650_s0 + $0x5c0] sm:$0xff] }
  0x83   :  { %2752 = vmatprep.mubr.bf16.mxu0 %v3437_v8  ;;  %v3493_v8 = vcombine.high %v145_v3, %v149_v4  ;;  %v203_v0 = vld [vmem:[%s5650_s0 + $0x5e0] sm:$0xff]  ;;  %v209_v3 = vld [vmem:[%s5650_s0 + $0x610] sm:$0xff] }
  0x84   :  { %v3545_v62 = vcombine.high %v199_v57, %v203_v0  ;;  %v207_v1 = vld [vmem:[%s5650_s0 + $0x600] sm:$0xff]  ;;  %v213_v4 = vld [vmem:[%s5650_s0 + $0x630] sm:$0xff] }
  0x85   :  { %v211_v2 = vld [vmem:[%s5650_s0 + $0x620] sm:$0xff] }
  0x89   :  { %2175 = vmatmul.mubr.bf16.gmra.mrb[36].mxu1 %v3432_v15  ;;  %v3497_v15 = vcombine.high %v151_v9, %v155_v10  ;;  %v215_v9 = vld [vmem:[%s5650_s0 + $0x640] sm:$0xff] }
  0x8a   :  { %2753 = vmatmul.mubr.bf16.gmra.mrb[36].mxu0 %v3436_v16  ;;  %2182 = vmatprep.mubr.bf16.mxu1 %v3441_v17  ;;  %v3501_v16 = vcombine.high %v153_v11, %v157_v12  ;;  %v159_v17 = vld [vmem:[%s5650_s0 + $0x480] sm:$0xff]  ;;  %v217_v11 = vld [vmem:[%s5650_s0 + $0x650] sm:$0xff] }
  0x8b   :  { %2760 = vmatprep.mubr.bf16.mxu0 %v3445_v18  ;;  %v163_v18 = vld [vmem:[%s5650_s0 + $0x4a0] sm:$0xff]  ;;  %v221_v12 = vld [vmem:[%s5650_s0 + $0x670] sm:$0xff] }
  0x8c   :  { %v3504_v29 = vcombine.low %v159_v17, %v163_v18  ;;  %v219_v10 = vld [vmem:[%s5650_s0 + $0x660] sm:$0xff] }
  0x91   :  { %2183 = vmatmul.mubr.bf16.gmra.mrb[40].mxu1 %v3440_v23  ;;  %v3505_v23 = vcombine.high %v159_v17, %v163_v18  ;;  %v223_v17 = vld [vmem:[%s5650_s0 + $0x680] sm:$0xff] }
  0x92   :  { %2761 = vmatmul.mubr.bf16.gmra.mrb[40].mxu0 %v3444_v24  ;;  %2190 = vmatprep.mubr.bf16.mxu1 %v3449_v25  ;;  %v3509_v24 = vcombine.high %v161_v19, %v165_v20  ;;  %v167_v25 = vld [vmem:[%s5650_s0 + $0x4c0] sm:$0xff]  ;;  %v225_v19 = vld [vmem:[%s5650_s0 + $0x690] sm:$0xff] }
  0x93   :  { %2768 = vmatprep.mubr.bf16.mxu0 %v3453_v26  ;;  %v171_v26 = vld [vmem:[%s5650_s0 + $0x4e0] sm:$0xff]  ;;  %v229_v20 = vld [vmem:[%s5650_s0 + $0x6b0] sm:$0xff] }
  0x94   :  { %v3513_v31 = vcombine.high %v167_v25, %v171_v26  ;;  %v3512_v37 = vcombine.low %v167_v25, %v171_v26  ;;  %v227_v18 = vld [vmem:[%s5650_s0 + $0x6a0] sm:$0xff] }
  0x95   :  { %v231_v25 = vld [vmem:[%s5650_s0 + $0x6c0] sm:$0xff] }
  0x96   :  { %v235_v26 = vld [vmem:[%s5650_s0 + $0x6e0] sm:$0xff] }
  0x99   :  { %2191 = vmatmul.mubr.bf16.gmra.mrb[44].mxu1 %v3448_v33  ;;  %v175_v33 = vld [vmem:[%s5650_s0 + $0x500] sm:$0xff] }
  0x9a   :  { %2769 = vmatmul.mubr.bf16.gmra.mrb[44].mxu0 %v3452_v34  ;;  %2198 = vmatprep.mubr.bf16.mxu1 %v3457_v35  ;;  %v179_v34 = vld [vmem:[%s5650_s0 + $0x520] sm:$0xff]  ;;  %v177_v35 = vld [vmem:[%s5650_s0 + $0x510] sm:$0xff] }
  0x9b   :  { %2776 = vmatprep.mubr.bf16.mxu0 %v3461_v36  ;;  %v181_v36 = vld [vmem:[%s5650_s0 + $0x530] sm:$0xff]  ;;  %v3521_v39 = vcombine.high %v175_v33, %v179_v34  ;;  %v3520_v45 = vcombine.low %v175_v33, %v179_v34  ;;  %v239_v33 = vld [vmem:[%s5650_s0 + $0x700] sm:$0xff] }
  0x9c   :  { %v3525_v40 = vcombine.high %v177_v35, %v181_v36  ;;  %v3524_v46 = vcombine.low %v177_v35, %v181_v36  ;;  %v243_v34 = vld [vmem:[%s5650_s0 + $0x720] sm:$0xff]  ;;  %v241_v35 = vld [vmem:[%s5650_s0 + $0x710] sm:$0xff] }
  0x9d   :  { %v245_v36 = vld [vmem:[%s5650_s0 + $0x730] sm:$0xff] }
  0xa1   :  { %2199 = vmatmul.mubr.bf16.gmra.mrb[48].mxu1 %v3456_v41  ;;  %v183_v41 = vld [vmem:[%s5650_s0 + $0x540] sm:$0xff] }
  0xa2   :  { %2777 = vmatmul.mubr.bf16.gmra.mrb[48].mxu0 %v3460_v42  ;;  %2206 = vmatprep.mubr.bf16.mxu1 %v3465_v43  ;;  %v187_v42 = vld [vmem:[%s5650_s0 + $0x560] sm:$0xff]  ;;  %v185_v43 = vld [vmem:[%s5650_s0 + $0x550] sm:$0xff] }
  0xa3   :  { %2784 = vmatprep.mubr.bf16.mxu0 %v3469_v44  ;;  %v189_v44 = vld [vmem:[%s5650_s0 + $0x570] sm:$0xff]  ;;  %v3529_v47 = vcombine.high %v183_v41, %v187_v42 }
  0xa4   :  { %v3533_v48 = vcombine.high %v185_v43, %v189_v44 }
  0xa9   :  { %2207 = vmatmul.mubr.bf16.gmra.mrb[52].mxu1 %v3464_v51  ;;  %v193_v51 = vld [vmem:[%s5650_s0 + $0x590] sm:$0xff] }
  0xaa   :  { %2785 = vmatmul.mubr.bf16.gmra.mrb[52].mxu0 %v3468_v52  ;;  %2214 = vmatprep.mubr.bf16.mxu1 %v3473_v53  ;;  %v197_v52 = vld [vmem:[%s5650_s0 + $0x5b0] sm:$0xff]  ;;  %v3528_v53 = vcombine.low %v183_v41, %v187_v42  ;;  %v247_v41 = vld [vmem:[%s5650_s0 + $0x740] sm:$0xff] }
  0xab   :  { %2792 = vmatprep.mubr.bf16.mxu0 %v3477_v54  ;;  %v3532_v54 = vcombine.low %v185_v43, %v189_v44  ;;  %v3541_v56 = vcombine.high %v193_v51, %v197_v52  ;;  %v251_v42 = vld [vmem:[%s5650_s0 + $0x760] sm:$0xff]  ;;  %v249_v43 = vld [vmem:[%s5650_s0 + $0x750] sm:$0xff] }
  0xac   :  { %v253_v44 = vld [vmem:[%s5650_s0 + $0x770] sm:$0xff] }
  0xb1   :  { %2215 = vmatmul.mubr.bf16.gmra.mrb[56].mxu1 %v3472_v58  ;;  %v201_v58 = vld [vmem:[%s5650_s0 + $0x5d0] sm:$0xff] }
  0xb2   :  { %2793 = vmatmul.mubr.bf16.gmra.mrb[56].mxu0 %v3476_v59  ;;  %2222 = vmatprep.mubr.bf16.mxu1 %v3481_v60  ;;  %v205_v59 = vld [vmem:[%s5650_s0 + $0x5f0] sm:$0xff]  ;;  %v3536_v60 = vcombine.low %v191_v49, %v195_v50  ;;  %v255_v49 = vld [vmem:[%s5650_s0 + $0x780] sm:$0xff] }
  0xb3   :  { %2800 = vmatprep.mubr.bf16.mxu0 %v3485_v61  ;;  %v3540_v61 = vcombine.low %v193_v51, %v197_v52  ;;  %v3549_v63 = vcombine.high %v201_v58, %v205_v59  ;;  %v259_v50 = vld [vmem:[%s5650_s0 + $0x7a0] sm:$0xff]  ;;  %v257_v51 = vld [vmem:[%s5650_s0 + $0x790] sm:$0xff] }
  0xb4   :  { %v261_v52 = vld [vmem:[%s5650_s0 + $0x7b0] sm:$0xff] }
  0xb9   :  { %2223 = vmatmul.mubr.bf16.gmra.mrb[60].mxu1 %v3480_v5  ;;  %v3544_v5 = vcombine.low %v199_v57, %v203_v0  ;;  %v263_v57 = vld [vmem:[%s5650_s0 + $0x7c0] sm:$0xff] }
  0xba   :  { %2801 = vmatmul.mubr.bf16.gmra.mrb[60].mxu0 %v3484_v6  ;;  %2230 = vmatprep.mubr.bf16.mxu1 %v3489_v7  ;;  %v3548_v6 = vcombine.low %v201_v58, %v205_v59  ;;  %v3553_v7 = vcombine.high %v207_v1, %v211_v2  ;;  %v267_v0 = vld [vmem:[%s5650_s0 + $0x7e0] sm:$0xff]  ;;  %v265_v58 = vld [vmem:[%s5650_s0 + $0x7d0] sm:$0xff] }
  0xbb   :  { %2808 = vmatprep.mubr.bf16.mxu0 %v3493_v8  ;;  %v3557_v8 = vcombine.high %v209_v3, %v213_v4  ;;  %v269_v59 = vld [vmem:[%s5650_s0 + $0x7f0] sm:$0xff] }
  0xc1   :  { %2231 = vmatmul.mubr.bf16.gmra.mrb[64].mxu1 %v3488_v13  ;;  %v3552_v13 = vcombine.low %v207_v1, %v211_v2  ;;  %v16_v1 = vld [vmem:[%s5650_s0 + $0x8] sm:$0xff] }
  0xc2   :  { %2809 = vmatmul.mubr.bf16.gmra.mrb[64].mxu0 %v3492_v14  ;;  %2238 = vmatprep.mubr.bf16.mxu1 %v3497_v15  ;;  %v3556_v14 = vcombine.low %v209_v3, %v213_v4  ;;  %v3561_v15 = vcombine.high %v215_v9, %v219_v10  ;;  %v20_v2 = vld [vmem:[%s5650_s0 + $0x28] sm:$0xff]  ;;  %v18_v3 = vld [vmem:[%s5650_s0 + $0x18] sm:$0xff] }
  0xc3   :  { %2816 = vmatprep.mubr.bf16.mxu0 %v3501_v16  ;;  %v3565_v16 = vcombine.high %v217_v11, %v221_v12  ;;  %v22_v4 = vld [vmem:[%s5650_s0 + $0x38] sm:$0xff] }
  0xc9   :  { %2239 = vmatmul.mubr.bf16.gmra.mrb[68].mxu1 %v3496_v21  ;;  %v3560_v21 = vcombine.low %v215_v9, %v219_v10  ;;  %v24_v9 = vld [vmem:[%s5650_s0 + $0x48] sm:$0xff] }
  0xca   :  { %2817 = vmatmul.mubr.bf16.gmra.mrb[68].mxu0 %v3500_v22  ;;  %2246 = vmatprep.mubr.bf16.mxu1 %v3505_v23  ;;  %v3564_v22 = vcombine.low %v217_v11, %v221_v12  ;;  %v3569_v23 = vcombine.high %v223_v17, %v227_v18  ;;  %v28_v10 = vld [vmem:[%s5650_s0 + $0x68] sm:$0xff]  ;;  %v26_v11 = vld [vmem:[%s5650_s0 + $0x58] sm:$0xff] }
  0xcb   :  { %2824 = vmatprep.mubr.bf16.mxu0 %v3509_v24  ;;  %v3573_v24 = vcombine.high %v225_v19, %v229_v20  ;;  %v30_v12 = vld [vmem:[%s5650_s0 + $0x78] sm:$0xff] }
  0xd1   :  { %2247 = vmatmul.mubr.bf16.gmra.mrb[72].mxu1 %v3504_v29  ;;  %v3568_v29 = vcombine.low %v223_v17, %v227_v18  ;;  %v32_v17 = vld [vmem:[%s5650_s0 + $0x88] sm:$0xff] }
  0xd2   :  { %2825 = vmatmul.mubr.bf16.gmra.mrb[72].mxu0 %v3508_v30  ;;  %2254 = vmatprep.mubr.bf16.mxu1 %v3513_v31  ;;  %v3572_v30 = vcombine.low %v225_v19, %v229_v20  ;;  %v3577_v31 = vcombine.high %v231_v25, %v235_v26  ;;  %v36_v18 = vld [vmem:[%s5650_s0 + $0xa8] sm:$0xff]  ;;  %v34_v19 = vld [vmem:[%s5650_s0 + $0x98] sm:$0xff] }
  0xd3   :  { %2832 = vmatprep.mubr.bf16.mxu0 %v3517_v32  ;;  %v3581_v32 = vcombine.high %v233_v27, %v237_v28  ;;  %v38_v20 = vld [vmem:[%s5650_s0 + $0xb8] sm:$0xff] }
  0xd9   :  { %2255 = vmatmul.mubr.bf16.gmra.mrb[76].mxu1 %v3512_v37  ;;  %v3576_v37 = vcombine.low %v231_v25, %v235_v26  ;;  %v40_v25 = vld [vmem:[%s5650_s0 + $0xc8] sm:$0xff] }
  0xda   :  { %2833 = vmatmul.mubr.bf16.gmra.mrb[76].mxu0 %v3516_v38  ;;  %2262 = vmatprep.mubr.bf16.mxu1 %v3521_v39  ;;  %v3580_v38 = vcombine.low %v233_v27, %v237_v28  ;;  %v3585_v39 = vcombine.high %v239_v33, %v243_v34  ;;  %v44_v26 = vld [vmem:[%s5650_s0 + $0xe8] sm:$0xff]  ;;  %v42_v27 = vld [vmem:[%s5650_s0 + $0xd8] sm:$0xff] }
  0xdb   :  { %2840 = vmatprep.mubr.bf16.mxu0 %v3525_v40  ;;  %v3589_v40 = vcombine.high %v241_v35, %v245_v36  ;;  %v46_v28 = vld [vmem:[%s5650_s0 + $0xf8] sm:$0xff] }
  0xe1   :  { %2263 = vmatmul.mubr.bf16.gmra.mrb[80].mxu1 %v3520_v45  ;;  %v3584_v45 = vcombine.low %v239_v33, %v243_v34  ;;  %v48_v33 = vld [vmem:[%s5650_s0 + $0x108] sm:$0xff] }
  0xe2   :  { %2841 = vmatmul.mubr.bf16.gmra.mrb[80].mxu0 %v3524_v46  ;;  %2270 = vmatprep.mubr.bf16.mxu1 %v3529_v47  ;;  %v3588_v46 = vcombine.low %v241_v35, %v245_v36  ;;  %v3593_v47 = vcombine.high %v247_v41, %v251_v42  ;;  %v52_v34 = vld [vmem:[%s5650_s0 + $0x128] sm:$0xff]  ;;  %v50_v35 = vld [vmem:[%s5650_s0 + $0x118] sm:$0xff] }
  0xe3   :  { %2848 = vmatprep.mubr.bf16.mxu0 %v3533_v48  ;;  %v3597_v48 = vcombine.high %v249_v43, %v253_v44  ;;  %v54_v36 = vld [vmem:[%s5650_s0 + $0x138] sm:$0xff] }
  0xe9   :  { %2271 = vmatmul.mubr.bf16.gmra.mrb[84].mxu1 %v3528_v53  ;;  %v3592_v53 = vcombine.low %v247_v41, %v251_v42  ;;  %v56_v41 = vld [vmem:[%s5650_s0 + $0x148] sm:$0xff] }
  0xea   :  { %2849 = vmatmul.mubr.bf16.gmra.mrb[84].mxu0 %v3532_v54  ;;  %2278 = vmatprep.mubr.bf16.mxu1 %v3537_v55  ;;  %v3596_v54 = vcombine.low %v249_v43, %v253_v44  ;;  %v3601_v55 = vcombine.high %v255_v49, %v259_v50  ;;  %v60_v42 = vld [vmem:[%s5650_s0 + $0x168] sm:$0xff]  ;;  %v58_v43 = vld [vmem:[%s5650_s0 + $0x158] sm:$0xff] }
  0xeb   :  { %2856 = vmatprep.mubr.bf16.mxu0 %v3541_v56  ;;  %v3605_v56 = vcombine.high %v257_v51, %v261_v52  ;;  %v62_v44 = vld [vmem:[%s5650_s0 + $0x178] sm:$0xff] }
  0xf1   :  { %2279 = vmatmul.mubr.bf16.gmra.mrb[88].mxu1 %v3536_v60  ;;  %v3600_v60 = vcombine.low %v255_v49, %v259_v50  ;;  %v64_v49 = vld [vmem:[%s5650_s0 + $0x188] sm:$0xff] }
  0xf2   :  { %2857 = vmatmul.mubr.bf16.gmra.mrb[88].mxu0 %v3540_v61  ;;  %2286 = vmatprep.mubr.bf16.mxu1 %v3545_v62  ;;  %v3604_v61 = vcombine.low %v257_v51, %v261_v52  ;;  %v3609_v62 = vcombine.high %v263_v57, %v267_v0  ;;  %v68_v50 = vld [vmem:[%s5650_s0 + $0x1a8] sm:$0xff]  ;;  %v66_v51 = vld [vmem:[%s5650_s0 + $0x198] sm:$0xff] }
  0xf3   :  { %2864 = vmatprep.mubr.bf16.mxu0 %v3549_v63  ;;  %v3613_v63 = vcombine.high %v265_v58, %v269_v59  ;;  %v70_v52 = vld [vmem:[%s5650_s0 + $0x1b8] sm:$0xff] }
  0xf9   :  { %2287 = vmatmul.mubr.bf16.gmra.mrb[92].mxu1 %v3544_v5  ;;  %v3608_v5 = vcombine.low %v263_v57, %v267_v0  ;;  %v72_v57 = vld [vmem:[%s5650_s0 + $0x1c8] sm:$0xff] }
  0xfa   :  { %2865 = vmatmul.mubr.bf16.gmra.mrb[92].mxu0 %v3548_v6  ;;  %2294 = vmatprep.mubr.bf16.mxu1 %v3553_v7  ;;  %v3612_v6 = vcombine.low %v265_v58, %v269_v59  ;;  %v3363_v7 = vcombine.high %v16_v1, %v20_v2  ;;  %v76_v0 = vld [vmem:[%s5650_s0 + $0x1e8] sm:$0xff]  ;;  %v74_v58 = vld [vmem:[%s5650_s0 + $0x1d8] sm:$0xff] }
  0xfb   :  { %2872 = vmatprep.mubr.bf16.mxu0 %v3557_v8  ;;  %v3367_v8 = vcombine.high %v18_v3, %v22_v4  ;;  %v78_v59 = vld [vmem:[%s5650_s0 + $0x1f8] sm:$0xff] }
 0x101   :  { %2295 = vmatmul.mubr.bf16.gmra.mrb[96].mxu1 %v3552_v13  ;;  %v3362_v13 = vcombine.low %v16_v1, %v20_v2  ;;  %v80_v1 = vld [vmem:[%s5650_s0 + $0x208] sm:$0xff] }
 0x102   :  { %2873 = vmatmul.mubr.bf16.gmra.mrb[96].mxu0 %v3556_v14  ;;  %2302 = vmatprep.mubr.bf16.mxu1 %v3561_v15  ;;  %v3366_v14 = vcombine.low %v18_v3, %v22_v4  ;;  %v3371_v15 = vcombine.high %v24_v9, %v28_v10  ;;  %v84_v2 = vld [vmem:[%s5650_s0 + $0x228] sm:$0xff]  ;;  %v82_v3 = vld [vmem:[%s5650_s0 + $0x218] sm:$0xff] }
 0x103   :  { %2880 = vmatprep.mubr.bf16.mxu0 %v3565_v16  ;;  %v3375_v16 = vcombine.high %v26_v11, %v30_v12  ;;  %v86_v4 = vld [vmem:[%s5650_s0 + $0x238] sm:$0xff] }
 0x109   :  { %2303 = vmatmul.mubr.bf16.gmra.mrb[100].mxu1 %v3560_v21  ;;  %v3370_v21 = vcombine.low %v24_v9, %v28_v10  ;;  %v88_v9 = vld [vmem:[%s5650_s0 + $0x248] sm:$0xff] }
 0x10a   :  { %2881 = vmatmul.mubr.bf16.gmra.mrb[100].mxu0 %v3564_v22  ;;  %2310 = vmatprep.mubr.bf16.mxu1 %v3569_v23  ;;  %v3374_v22 = vcombine.low %v26_v11, %v30_v12  ;;  %v3379_v23 = vcombine.high %v32_v17, %v36_v18  ;;  %v92_v10 = vld [vmem:[%s5650_s0 + $0x268] sm:$0xff]  ;;  %v90_v11 = vld [vmem:[%s5650_s0 + $0x258] sm:$0xff] }
 0x10b   :  { %2888 = vmatprep.mubr.bf16.mxu0 %v3573_v24  ;;  %v3383_v24 = vcombine.high %v34_v19, %v38_v20  ;;  %v94_v12 = vld [vmem:[%s5650_s0 + $0x278] sm:$0xff] }
 0x111   :  { %2311 = vmatmul.mubr.bf16.gmra.mrb[104].mxu1 %v3568_v29  ;;  %v3378_v29 = vcombine.low %v32_v17, %v36_v18  ;;  %v96_v17 = vld [vmem:[%s5650_s0 + $0x288] sm:$0xff] }
 0x112   :  { %2889 = vmatmul.mubr.bf16.gmra.mrb[104].mxu0 %v3572_v30  ;;  %2318 = vmatprep.mubr.bf16.mxu1 %v3577_v31  ;;  %v3382_v30 = vcombine.low %v34_v19, %v38_v20  ;;  %v3387_v31 = vcombine.high %v40_v25, %v44_v26  ;;  %v100_v18 = vld [vmem:[%s5650_s0 + $0x2a8] sm:$0xff]  ;;  %v98_v19 = vld [vmem:[%s5650_s0 + $0x298] sm:$0xff] }
 0x113   :  { %2896 = vmatprep.mubr.bf16.mxu0 %v3581_v32  ;;  %v3391_v32 = vcombine.high %v42_v27, %v46_v28  ;;  %v102_v20 = vld [vmem:[%s5650_s0 + $0x2b8] sm:$0xff] }
 0x119   :  { %2319 = vmatmul.mubr.bf16.gmra.mrb[108].mxu1 %v3576_v37  ;;  %v3386_v37 = vcombine.low %v40_v25, %v44_v26  ;;  %v104_v25 = vld [vmem:[%s5650_s0 + $0x2c8] sm:$0xff] }
 0x11a   :  { %2897 = vmatmul.mubr.bf16.gmra.mrb[108].mxu0 %v3580_v38  ;;  %2326 = vmatprep.mubr.bf16.mxu1 %v3585_v39  ;;  %v3390_v38 = vcombine.low %v42_v27, %v46_v28  ;;  %v3395_v39 = vcombine.high %v48_v33, %v52_v34  ;;  %v108_v26 = vld [vmem:[%s5650_s0 + $0x2e8] sm:$0xff]  ;;  %v106_v27 = vld [vmem:[%s5650_s0 + $0x2d8] sm:$0xff] }
 0x11b   :  { %2904 = vmatprep.mubr.bf16.mxu0 %v3589_v40  ;;  %v3399_v40 = vcombine.high %v50_v35, %v54_v36  ;;  %v110_v28 = vld [vmem:[%s5650_s0 + $0x2f8] sm:$0xff] }
 0x121   :  { %2327 = vmatmul.mubr.bf16.gmra.mrb[112].mxu1 %v3584_v45  ;;  %v3394_v45 = vcombine.low %v48_v33, %v52_v34  ;;  %v112_v33 = vld [vmem:[%s5650_s0 + $0x308] sm:$0xff] }
 0x122   :  { %2905 = vmatmul.mubr.bf16.gmra.mrb[112].mxu0 %v3588_v46  ;;  %2334 = vmatprep.mubr.bf16.mxu1 %v3593_v47  ;;  %v3398_v46 = vcombine.low %v50_v35, %v54_v36  ;;  %v3403_v47 = vcombine.high %v56_v41, %v60_v42  ;;  %v116_v34 = vld [vmem:[%s5650_s0 + $0x328] sm:$0xff]  ;;  %v114_v35 = vld [vmem:[%s5650_s0 + $0x318] sm:$0xff] }
 0x123   :  { %2912 = vmatprep.mubr.bf16.mxu0 %v3597_v48  ;;  %v3407_v48 = vcombine.high %v58_v43, %v62_v44  ;;  %v118_v36 = vld [vmem:[%s5650_s0 + $0x338] sm:$0xff] }
 0x129   :  { %2335 = vmatmul.mubr.bf16.gmra.mrb[116].mxu1 %v3592_v53  ;;  %v3402_v53 = vcombine.low %v56_v41, %v60_v42  ;;  %v120_v41 = vld [vmem:[%s5650_s0 + $0x348] sm:$0xff] }
 0x12a   :  { %2913 = vmatmul.mubr.bf16.gmra.mrb[116].mxu0 %v3596_v54  ;;  %2342 = vmatprep.mubr.bf16.mxu1 %v3601_v55  ;;  %v3406_v54 = vcombine.low %v58_v43, %v62_v44  ;;  %v3411_v55 = vcombine.high %v64_v49, %v68_v50  ;;  %v124_v42 = vld [vmem:[%s5650_s0 + $0x368] sm:$0xff]  ;;  %v122_v43 = vld [vmem:[%s5650_s0 + $0x358] sm:$0xff] }
 0x12b   :  { %2920 = vmatprep.mubr.bf16.mxu0 %v3605_v56  ;;  %v3415_v56 = vcombine.high %v66_v51, %v70_v52  ;;  %v126_v44 = vld [vmem:[%s5650_s0 + $0x378] sm:$0xff] }
 0x131   :  { %2343 = vmatmul.mubr.bf16.gmra.mrb[120].mxu1 %v3600_v60  ;;  %v3410_v60 = vcombine.low %v64_v49, %v68_v50  ;;  %v128_v49 = vld [vmem:[%s5650_s0 + $0x388] sm:$0xff] }
 0x132   :  { %2921 = vmatmul.mubr.bf16.gmra.mrb[120].mxu0 %v3604_v61  ;;  %2350 = vmatprep.mubr.bf16.mxu1 %v3609_v62  ;;  %v3414_v61 = vcombine.low %v66_v51, %v70_v52  ;;  %v3419_v62 = vcombine.high %v72_v57, %v76_v0  ;;  %v132_v50 = vld [vmem:[%s5650_s0 + $0x3a8] sm:$0xff]  ;;  %v130_v51 = vld [vmem:[%s5650_s0 + $0x398] sm:$0xff] }
 0x133   :  { %2928 = vmatprep.mubr.bf16.mxu0 %v3613_v63  ;;  %v3423_v63 = vcombine.high %v74_v58, %v78_v59  ;;  %v134_v52 = vld [vmem:[%s5650_s0 + $0x3b8] sm:$0xff] }
 0x139   :  { %2351 = vmatmul.mubr.bf16.gmra.mrb[124].mxu1 %v3608_v5  ;;  %v3418_v5 = vcombine.low %v72_v57, %v76_v0  ;;  %v136_v57 = vld [vmem:[%s5650_s0 + $0x3c8] sm:$0xff] }
 0x13a   :  { %2929 = vmatmul.mubr.bf16.gmra.mrb[124].mxu0 %v3612_v6  ;;  %2391 = vmatprep.mubr.bf16.mxu1 %v3363_v7  ;;  %v3422_v6 = vcombine.low %v74_v58, %v78_v59  ;;  %v3427_v7 = vcombine.high %v80_v1, %v84_v2  ;;  %v140_v0 = vld [vmem:[%s5650_s0 + $0x3e8] sm:$0xff]  ;;  %v138_v58 = vld [vmem:[%s5650_s0 + $0x3d8] sm:$0xff] }
 0x13b   :  { %2969 = vmatprep.mubr.bf16.mxu0 %v3367_v8  ;;  %v3431_v8 = vcombine.high %v82_v3, %v86_v4  ;;  %v142_v59 = vld [vmem:[%s5650_s0 + $0x3f8] sm:$0xff] }
 0x141   :  { %2392 = vmatmul.mubr.bf16.vlgmr.msra.gmra.mrb[0].mxu1 %v3362_v13  ;;  %v3426_v13 = vcombine.low %v80_v1, %v84_v2  ;;  %v144_v1 = vld [vmem:[%s5650_s0 + $0x408] sm:$0xff] }
 0x142   :  { %2970 = vmatmul.mubr.bf16.vlgmr.msra.gmra.mrb[0].mxu0 %v3366_v14  ;;  %2399 = vmatprep.mubr.bf16.mxu1 %v3371_v15  ;;  %v3430_v14 = vcombine.low %v82_v3, %v86_v4  ;;  %v3435_v15 = vcombine.high %v88_v9, %v92_v10  ;;  %v148_v2 = vld [vmem:[%s5650_s0 + $0x428] sm:$0xff]  ;;  %v146_v3 = vld [vmem:[%s5650_s0 + $0x418] sm:$0xff] }
 0x143   :  { %2977 = vmatprep.mubr.bf16.mxu0 %v3375_v16  ;;  %v3439_v16 = vcombine.high %v90_v11, %v94_v12  ;;  %v150_v4 = vld [vmem:[%s5650_s0 + $0x438] sm:$0xff] }
 0x149   :  { %2400 = vmatmul.mubr.bf16.gmra.mrb[4].mxu1 %v3370_v21  ;;  %v3434_v21 = vcombine.low %v88_v9, %v92_v10  ;;  %v152_v9 = vld [vmem:[%s5650_s0 + $0x448] sm:$0xff] }
 0x14a   :  { %2978 = vmatmul.mubr.bf16.gmra.mrb[4].mxu0 %v3374_v22  ;;  %2407 = vmatprep.mubr.bf16.mxu1 %v3379_v23  ;;  %v3438_v22 = vcombine.low %v90_v11, %v94_v12  ;;  %v3443_v23 = vcombine.high %v96_v17, %v100_v18  ;;  %v156_v10 = vld [vmem:[%s5650_s0 + $0x468] sm:$0xff]  ;;  %v154_v11 = vld [vmem:[%s5650_s0 + $0x458] sm:$0xff] }
 0x14b   :  { %2985 = vmatprep.mubr.bf16.mxu0 %v3383_v24  ;;  %v3447_v24 = vcombine.high %v98_v19, %v102_v20  ;;  %v158_v12 = vld [vmem:[%s5650_s0 + $0x478] sm:$0xff] }
 0x151   :  { %2408 = vmatmul.mubr.bf16.gmra.mrb[8].mxu1 %v3378_v29  ;;  %v3442_v29 = vcombine.low %v96_v17, %v100_v18  ;;  %v160_v17 = vld [vmem:[%s5650_s0 + $0x488] sm:$0xff] }
 0x152   :  { %2986 = vmatmul.mubr.bf16.gmra.mrb[8].mxu0 %v3382_v30  ;;  %2415 = vmatprep.mubr.bf16.mxu1 %v3387_v31  ;;  %v3446_v30 = vcombine.low %v98_v19, %v102_v20  ;;  %v3451_v31 = vcombine.high %v104_v25, %v108_v26  ;;  %v164_v18 = vld [vmem:[%s5650_s0 + $0x4a8] sm:$0xff]  ;;  %v162_v19 = vld [vmem:[%s5650_s0 + $0x498] sm:$0xff] }
 0x153   :  { %2993 = vmatprep.mubr.bf16.mxu0 %v3391_v32  ;;  %v3455_v32 = vcombine.high %v106_v27, %v110_v28  ;;  %v166_v20 = vld [vmem:[%s5650_s0 + $0x4b8] sm:$0xff] }
 0x159   :  { %2416 = vmatmul.mubr.bf16.gmra.mrb[12].mxu1 %v3386_v37  ;;  %v3450_v37 = vcombine.low %v104_v25, %v108_v26  ;;  %v168_v25 = vld [vmem:[%s5650_s0 + $0x4c8] sm:$0xff] }
 0x15a   :  { %2994 = vmatmul.mubr.bf16.gmra.mrb[12].mxu0 %v3390_v38  ;;  %2423 = vmatprep.mubr.bf16.mxu1 %v3395_v39  ;;  %v3454_v38 = vcombine.low %v106_v27, %v110_v28  ;;  %v3459_v39 = vcombine.high %v112_v33, %v116_v34  ;;  %v172_v26 = vld [vmem:[%s5650_s0 + $0x4e8] sm:$0xff]  ;;  %v170_v27 = vld [vmem:[%s5650_s0 + $0x4d8] sm:$0xff] }
 0x15b   :  { %3001 = vmatprep.mubr.bf16.mxu0 %v3399_v40  ;;  %v3463_v40 = vcombine.high %v114_v35, %v118_v36  ;;  %v174_v28 = vld [vmem:[%s5650_s0 + $0x4f8] sm:$0xff] }
 0x161   :  { %2424 = vmatmul.mubr.bf16.gmra.mrb[16].mxu1 %v3394_v45  ;;  %v3458_v45 = vcombine.low %v112_v33, %v116_v34  ;;  %v176_v33 = vld [vmem:[%s5650_s0 + $0x508] sm:$0xff] }
 0x162   :  { %3002 = vmatmul.mubr.bf16.gmra.mrb[16].mxu0 %v3398_v46  ;;  %2431 = vmatprep.mubr.bf16.mxu1 %v3403_v47  ;;  %v3462_v46 = vcombine.low %v114_v35, %v118_v36  ;;  %v3467_v47 = vcombine.high %v120_v41, %v124_v42  ;;  %v180_v34 = vld [vmem:[%s5650_s0 + $0x528] sm:$0xff]  ;;  %v178_v35 = vld [vmem:[%s5650_s0 + $0x518] sm:$0xff] }
 0x163   :  { %3009 = vmatprep.mubr.bf16.mxu0 %v3407_v48  ;;  %v3471_v48 = vcombine.high %v122_v43, %v126_v44  ;;  %v182_v36 = vld [vmem:[%s5650_s0 + $0x538] sm:$0xff] }
 0x169   :  { %2432 = vmatmul.mubr.bf16.gmra.mrb[20].mxu1 %v3402_v53  ;;  %v3466_v53 = vcombine.low %v120_v41, %v124_v42  ;;  %v184_v41 = vld [vmem:[%s5650_s0 + $0x548] sm:$0xff] }
 0x16a   :  { %3010 = vmatmul.mubr.bf16.gmra.mrb[20].mxu0 %v3406_v54  ;;  %2439 = vmatprep.mubr.bf16.mxu1 %v3411_v55  ;;  %v3470_v54 = vcombine.low %v122_v43, %v126_v44  ;;  %v3475_v55 = vcombine.high %v128_v49, %v132_v50  ;;  %v188_v42 = vld [vmem:[%s5650_s0 + $0x568] sm:$0xff]  ;;  %v186_v43 = vld [vmem:[%s5650_s0 + $0x558] sm:$0xff] }
 0x16b   :  { %3017 = vmatprep.mubr.bf16.mxu0 %v3415_v56  ;;  %v3479_v56 = vcombine.high %v130_v51, %v134_v52  ;;  %v190_v44 = vld [vmem:[%s5650_s0 + $0x578] sm:$0xff] }
 0x171   :  { %2440 = vmatmul.mubr.bf16.gmra.mrb[24].mxu1 %v3410_v60  ;;  %v3474_v60 = vcombine.low %v128_v49, %v132_v50  ;;  %v192_v49 = vld [vmem:[%s5650_s0 + $0x588] sm:$0xff] }
 0x172   :  { %3018 = vmatmul.mubr.bf16.gmra.mrb[24].mxu0 %v3414_v61  ;;  %2447 = vmatprep.mubr.bf16.mxu1 %v3419_v62  ;;  %v3478_v61 = vcombine.low %v130_v51, %v134_v52  ;;  %v3483_v62 = vcombine.high %v136_v57, %v140_v0  ;;  %v196_v50 = vld [vmem:[%s5650_s0 + $0x5a8] sm:$0xff]  ;;  %v194_v51 = vld [vmem:[%s5650_s0 + $0x598] sm:$0xff] }
 0x173   :  { %3025 = vmatprep.mubr.bf16.mxu0 %v3423_v63  ;;  %v3487_v63 = vcombine.high %v138_v58, %v142_v59  ;;  %v198_v52 = vld [vmem:[%s5650_s0 + $0x5b8] sm:$0xff] }
 0x179   :  { %2448 = vmatmul.mubr.bf16.gmra.mrb[28].mxu1 %v3418_v5  ;;  %v3482_v5 = vcombine.low %v136_v57, %v140_v0  ;;  %v200_v57 = vld [vmem:[%s5650_s0 + $0x5c8] sm:$0xff] }
 0x17a   :  { %3026 = vmatmul.mubr.bf16.gmra.mrb[28].mxu0 %v3422_v6  ;;  %2455 = vmatprep.mubr.bf16.mxu1 %v3427_v7  ;;  %v3486_v6 = vcombine.low %v138_v58, %v142_v59  ;;  %v3491_v7 = vcombine.high %v144_v1, %v148_v2  ;;  %v204_v0 = vld [vmem:[%s5650_s0 + $0x5e8] sm:$0xff]  ;;  %v202_v58 = vld [vmem:[%s5650_s0 + $0x5d8] sm:$0xff] }
 0x17b   :  { %3033 = vmatprep.mubr.bf16.mxu0 %v3431_v8  ;;  %v3495_v8 = vcombine.high %v146_v3, %v150_v4  ;;  %v206_v59 = vld [vmem:[%s5650_s0 + $0x5f8] sm:$0xff] }
 0x181   :  { %2456 = vmatmul.mubr.bf16.gmra.mrb[32].mxu1 %v3426_v13  ;;  %v3490_v13 = vcombine.low %v144_v1, %v148_v2  ;;  %v208_v1 = vld [vmem:[%s5650_s0 + $0x608] sm:$0xff] }
 0x182   :  { %3034 = vmatmul.mubr.bf16.gmra.mrb[32].mxu0 %v3430_v14  ;;  %2463 = vmatprep.mubr.bf16.mxu1 %v3435_v15  ;;  %v3494_v14 = vcombine.low %v146_v3, %v150_v4  ;;  %v3499_v15 = vcombine.high %v152_v9, %v156_v10  ;;  %v212_v2 = vld [vmem:[%s5650_s0 + $0x628] sm:$0xff]  ;;  %v210_v3 = vld [vmem:[%s5650_s0 + $0x618] sm:$0xff] }
 0x183   :  { %3041 = vmatprep.mubr.bf16.mxu0 %v3439_v16  ;;  %v3503_v16 = vcombine.high %v154_v11, %v158_v12  ;;  %v214_v4 = vld [vmem:[%s5650_s0 + $0x638] sm:$0xff] }
 0x189   :  { %2464 = vmatmul.mubr.bf16.gmra.mrb[36].mxu1 %v3434_v21  ;;  %v3498_v21 = vcombine.low %v152_v9, %v156_v10  ;;  %v216_v9 = vld [vmem:[%s5650_s0 + $0x648] sm:$0xff] }
 0x18a   :  { %3042 = vmatmul.mubr.bf16.gmra.mrb[36].mxu0 %v3438_v22  ;;  %2471 = vmatprep.mubr.bf16.mxu1 %v3443_v23  ;;  %v3502_v22 = vcombine.low %v154_v11, %v158_v12  ;;  %v3507_v23 = vcombine.high %v160_v17, %v164_v18  ;;  %v220_v10 = vld [vmem:[%s5650_s0 + $0x668] sm:$0xff]  ;;  %v218_v11 = vld [vmem:[%s5650_s0 + $0x658] sm:$0xff] }
 0x18b   :  { %3049 = vmatprep.mubr.bf16.mxu0 %v3447_v24  ;;  %v3511_v24 = vcombine.high %v162_v19, %v166_v20  ;;  %v222_v12 = vld [vmem:[%s5650_s0 + $0x678] sm:$0xff] }
 0x191   :  { %2472 = vmatmul.mubr.bf16.gmra.mrb[40].mxu1 %v3442_v29  ;;  %v3506_v29 = vcombine.low %v160_v17, %v164_v18  ;;  %v224_v17 = vld [vmem:[%s5650_s0 + $0x688] sm:$0xff] }
 0x192   :  { %3050 = vmatmul.mubr.bf16.gmra.mrb[40].mxu0 %v3446_v30  ;;  %2479 = vmatprep.mubr.bf16.mxu1 %v3451_v31  ;;  %v3510_v30 = vcombine.low %v162_v19, %v166_v20  ;;  %v3515_v31 = vcombine.high %v168_v25, %v172_v26  ;;  %v228_v18 = vld [vmem:[%s5650_s0 + $0x6a8] sm:$0xff]  ;;  %v226_v19 = vld [vmem:[%s5650_s0 + $0x698] sm:$0xff] }
 0x193   :  { %3057 = vmatprep.mubr.bf16.mxu0 %v3455_v32  ;;  %v3519_v32 = vcombine.high %v170_v27, %v174_v28  ;;  %v230_v20 = vld [vmem:[%s5650_s0 + $0x6b8] sm:$0xff] }
 0x199   :  { %2480 = vmatmul.mubr.bf16.gmra.mrb[44].mxu1 %v3450_v37  ;;  %v3514_v37 = vcombine.low %v168_v25, %v172_v26  ;;  %v232_v25 = vld [vmem:[%s5650_s0 + $0x6c8] sm:$0xff] }
 0x19a   :  { %3058 = vmatmul.mubr.bf16.gmra.mrb[44].mxu0 %v3454_v38  ;;  %2487 = vmatprep.mubr.bf16.mxu1 %v3459_v39  ;;  %v3518_v38 = vcombine.low %v170_v27, %v174_v28  ;;  %v3523_v39 = vcombine.high %v176_v33, %v180_v34  ;;  %v236_v26 = vld [vmem:[%s5650_s0 + $0x6e8] sm:$0xff]  ;;  %v234_v27 = vld [vmem:[%s5650_s0 + $0x6d8] sm:$0xff] }
 0x19b   :  { %3065 = vmatprep.mubr.bf16.mxu0 %v3463_v40  ;;  %v3527_v40 = vcombine.high %v178_v35, %v182_v36  ;;  %v238_v28 = vld [vmem:[%s5650_s0 + $0x6f8] sm:$0xff] }
 0x1a1   :  { %2488 = vmatmul.mubr.bf16.gmra.mrb[48].mxu1 %v3458_v45  ;;  %v3522_v45 = vcombine.low %v176_v33, %v180_v34  ;;  %v5274_v33 = vld [vmem:[%s5651_s2] ss:$0 sm:$0xff]  ;;  %v240_v34 = vld [vmem:[%s5650_s0 + $0x708] sm:$0xff] }
 0x1a2   :  { %3066 = vmatmul.mubr.bf16.gmra.mrb[48].mxu0 %v3462_v46  ;;  %2495 = vmatprep.mubr.bf16.mxu1 %v3467_v47  ;;  %v3526_v46 = vcombine.low %v178_v35, %v182_v36  ;;  %v3531_v47 = vcombine.high %v184_v41, %v188_v42  ;;  %v244_v35 = vld [vmem:[%s5650_s0 + $0x728] sm:$0xff] }
 0x1a3   :  { %3073 = vmatprep.mubr.bf16.mxu0 %v3471_v48  ;;  %v3535_v48 = vcombine.high %v186_v43, %v190_v44 }
 0x1a9   :  { %2496 = vmatmul.mubr.bf16.gmra.mrb[52].mxu1 %v3466_v53  ;;  %v3530_v53 = vcombine.low %v184_v41, %v188_v42  ;;  %v3578_v42 = vcombine.low %v232_v25, %v236_v26 }
 0x1aa   :  { %3074 = vmatmul.mubr.bf16.gmra.mrb[52].mxu0 %v3470_v54  ;;  %2503 = vmatprep.mubr.bf16.mxu1 %v3475_v55  ;;  %v3534_v54 = vcombine.low %v186_v43, %v190_v44  ;;  %v3539_v55 = vcombine.high %v192_v49, %v196_v50 }
 0x1ab   :  { %3081 = vmatprep.mubr.bf16.mxu0 %v3479_v56  ;;  %v3543_v56 = vcombine.high %v194_v51, %v198_v52 }
 0x1b1   :  { %2504 = vmatmul.mubr.bf16.gmra.mrb[56].mxu1 %v3474_v60  ;;  %v3538_v60 = vcombine.low %v192_v49, %v196_v50 }
 0x1b2   :  { %3082 = vmatmul.mubr.bf16.gmra.mrb[56].mxu0 %v3478_v61  ;;  %2511 = vmatprep.mubr.bf16.mxu1 %v3483_v62  ;;  %v3542_v61 = vcombine.low %v194_v51, %v198_v52  ;;  %v3547_v62 = vcombine.high %v200_v57, %v204_v0 }
 0x1b3   :  { %3089 = vmatprep.mubr.bf16.mxu0 %v3487_v63  ;;  %v3551_v63 = vcombine.high %v202_v58, %v206_v59 }
 0x1b9   :  { %2512 = vmatmul.mubr.bf16.gmra.mrb[60].mxu1 %v3482_v5  ;;  %v3546_v5 = vcombine.low %v200_v57, %v204_v0  ;;  %v250_v57 = vld [vmem:[%s5650_s0 + $0x758] sm:$0xff] }
 0x1ba   :  { %3090 = vmatmul.mubr.bf16.gmra.mrb[60].mxu0 %v3486_v6  ;;  %2519 = vmatprep.mubr.bf16.mxu1 %v3491_v7  ;;  %v3550_v6 = vcombine.low %v202_v58, %v206_v59  ;;  %v3555_v7 = vcombine.high %v208_v1, %v212_v2  ;;  %v254_v0 = vld [vmem:[%s5650_s0 + $0x778] sm:$0xff] }
 0x1bb   :  { %3097 = vmatprep.mubr.bf16.mxu0 %v3495_v8  ;;  %v3559_v8 = vcombine.high %v210_v3, %v214_v4 }
 0x1c1   :  { %2520 = vmatmul.mubr.bf16.gmra.mrb[64].mxu1 %v3490_v13  ;;  %v3554_v13 = vcombine.low %v208_v1, %v212_v2 }
 0x1c2   :  { %3098 = vmatmul.mubr.bf16.gmra.mrb[64].mxu0 %v3494_v14  ;;  %2527 = vmatprep.mubr.bf16.mxu1 %v3499_v15  ;;  %v3558_v14 = vcombine.low %v210_v3, %v214_v4  ;;  %v3563_v15 = vcombine.high %v216_v9, %v220_v10 }
 0x1c3   :  { %3105 = vmatprep.mubr.bf16.mxu0 %v3503_v16  ;;  %v3567_v16 = vcombine.high %v218_v11, %v222_v12 }
 0x1c9   :  { %2528 = vmatmul.mubr.bf16.gmra.mrb[68].mxu1 %v3498_v21  ;;  %v3562_v21 = vcombine.low %v216_v9, %v220_v10 }
 0x1ca   :  { %3106 = vmatmul.mubr.bf16.gmra.mrb[68].mxu0 %v3502_v22  ;;  %2535 = vmatprep.mubr.bf16.mxu1 %v3507_v23  ;;  %v3566_v22 = vcombine.low %v218_v11, %v222_v12  ;;  %v3571_v23 = vcombine.high %v224_v17, %v228_v18  ;;  %v256_v11 = vld [vmem:[%s5650_s0 + $0x788] sm:$0xff] }
 0x1cb   :  { %3113 = vmatprep.mubr.bf16.mxu0 %v3511_v24  ;;  %v3575_v24 = vcombine.high %v226_v19, %v230_v20  ;;  %v260_v12 = vld [vmem:[%s5650_s0 + $0x7a8] sm:$0xff] }
 0x1d1   :  { %2536 = vmatmul.mubr.bf16.gmra.mrb[72].mxu1 %v3506_v29  ;;  %v3570_v29 = vcombine.low %v224_v17, %v228_v18 }
 0x1d2   :  { %3114 = vmatmul.mubr.bf16.gmra.mrb[72].mxu0 %v3510_v30  ;;  %2543 = vmatprep.mubr.bf16.mxu1 %v3515_v31  ;;  %v3574_v30 = vcombine.low %v226_v19, %v230_v20  ;;  %v3579_v31 = vcombine.high %v232_v25, %v236_v26 }
 0x1d3   :  { %3121 = vmatprep.mubr.bf16.mxu0 %v3519_v32  ;;  %v3583_v32 = vcombine.high %v234_v27, %v238_v28 }
 0x1d9   :  { %2544 = vmatmul.mubr.bf16.gmra.mrb[76].mxu1 %v3514_v37  ;;  %v242_v37 = vld [vmem:[%s5650_s0 + $0x718] sm:$0xff] }
 0x1da   :  { %3122 = vmatmul.mubr.bf16.gmra.mrb[76].mxu0 %v3518_v38  ;;  %2551 = vmatprep.mubr.bf16.mxu1 %v3523_v39  ;;  %v246_v38 = vld [vmem:[%s5650_s0 + $0x738] sm:$0xff] }
 0x1db   :  { %3129 = vmatprep.mubr.bf16.mxu0 %v3527_v40  ;;  %v3591_v51 = vcombine.high %v242_v37, %v246_v38  ;;  %v3590_v1 = vcombine.low %v242_v37, %v246_v38  ;;  %v266_v37 = vld [vmem:[%s5650_s0 + $0x7d8] sm:$0xff] }
 0x1dc   :  { %v270_v38 = vld [vmem:[%s5650_s0 + $0x7f8] sm:$0xff] }
 0x1e1   :  { %2552 = vmatmul.mubr.bf16.gmra.mrb[80].mxu1 %v3522_v45  ;;  %v3582_v45 = vcombine.low %v234_v27, %v238_v28 }
 0x1e2   :  { %3130 = vmatmul.mubr.bf16.gmra.mrb[80].mxu0 %v3526_v46  ;;  %2559 = vmatprep.mubr.bf16.mxu1 %v3531_v47  ;;  %v3587_v46 = vcombine.high %v240_v34, %v244_v35 }
 0x1e3   :  { %3137 = vmatprep.mubr.bf16.mxu0 %v3535_v48 }
 0x1e9   :  { %2560 = vmatmul.mubr.bf16.gmra.mrb[84].mxu1 %v3530_v53 }
 0x1ea   :  { %3138 = vmatmul.mubr.bf16.gmra.mrb[84].mxu0 %v3534_v54  ;;  %2567 = vmatprep.mubr.bf16.mxu1 %v3539_v55  ;;  %v248_v54 = vld [vmem:[%s5650_s0 + $0x748] sm:$0xff] }
 0x1eb   :  { %3145 = vmatprep.mubr.bf16.mxu0 %v3543_v56  ;;  %v252_v55 = vld [vmem:[%s5650_s0 + $0x768] sm:$0xff] }
 0x1ec   :  { %v3595_v2 = vcombine.high %v248_v54, %v252_v55  ;;  %v3594_v20 = vcombine.low %v248_v54, %v252_v55 }
 0x1f1   :  { %2568 = vmatmul.mubr.bf16.gmra.mrb[88].mxu1 %v3538_v60 }
 0x1f2   :  { %3146 = vmatmul.mubr.bf16.gmra.mrb[88].mxu0 %v3542_v61  ;;  %2575 = vmatprep.mubr.bf16.mxu1 %v3547_v62  ;;  %v3586_v61 = vcombine.low %v240_v34, %v244_v35  ;;  %v264_v34 = vld [vmem:[%s5650_s0 + $0x7c8] sm:$0xff] }
 0x1f3   :  { %3153 = vmatprep.mubr.bf16.mxu0 %v3551_v63  ;;  %v268_v35 = vld [vmem:[%s5650_s0 + $0x7e8] sm:$0xff] }
 0x1f9   :  { %2576 = vmatmul.mubr.bf16.gmra.mrb[92].mxu1 %v3546_v5 }
 0x1fa   :  { %3154 = vmatmul.mubr.bf16.gmra.mrb[92].mxu0 %v3550_v6  ;;  %2583 = vmatprep.mubr.bf16.mxu1 %v3555_v7  ;;  %v3599_v7 = vcombine.high %v250_v57, %v254_v0 }
 0x1fb   :  { %3161 = vmatprep.mubr.bf16.mxu0 %v3559_v8 }
 0x201   :  { %2584 = vmatmul.mubr.bf16.gmra.mrb[96].mxu1 %v3554_v13 }
 0x202   :  { %3162 = vmatmul.mubr.bf16.gmra.mrb[96].mxu0 %v3558_v14  ;;  %2591 = vmatprep.mubr.bf16.mxu1 %v3563_v15  ;;  %v258_v14 = vld [vmem:[%s5650_s0 + $0x798] sm:$0xff] }
 0x203   :  { %3169 = vmatprep.mubr.bf16.mxu0 %v3567_v16  ;;  %v262_v15 = vld [vmem:[%s5650_s0 + $0x7b8] sm:$0xff] }
 0x209   :  { %2592 = vmatmul.mubr.bf16.gmra.mrb[100].mxu1 %v3562_v21 }
 0x20a   :  { %3170 = vmatmul.mubr.bf16.gmra.mrb[100].mxu0 %v3566_v22  ;;  %2599 = vmatprep.mubr.bf16.mxu1 %v3571_v23  ;;  %v3598_v23 = vcombine.low %v250_v57, %v254_v0 }
 0x20b   :  { %3177 = vmatprep.mubr.bf16.mxu0 %v3575_v24  ;;  %v3603_v24 = vcombine.high %v256_v11, %v260_v12 }
 0x211   :  { %2600 = vmatmul.mubr.bf16.gmra.mrb[104].mxu1 %v3570_v29  ;;  %v3607_v29 = vcombine.high %v258_v14, %v262_v15 }
 0x212   :  { %3178 = vmatmul.mubr.bf16.gmra.mrb[104].mxu0 %v3574_v30  ;;  %2607 = vmatprep.mubr.bf16.mxu1 %v3579_v31 }
 0x213   :  { %3185 = vmatprep.mubr.bf16.mxu0 %v3583_v32 }
 0x214   :  { %v2393_v36 = vpop.f32.mrb[0].mxu1 }
 0x215   :  { %v3680_v39 = vadd.f32 %v5274_v33, %v2393_v36  ;;  %v2971_v40 = vpop.f32.mrb[0].mxu0  ;;  %v2395_v41 = vpop.f32.mrb[1].mxu1 }
 0x216   :  { %v2973_v43 = vpop.f32.mrb[1].mxu0  ;;  %v2396_v44 = vpop.f32.mrb[2].mxu1 }
 0x217   :  { %v3681_v47 = vadd.f32 %v3680_v39, %v2971_v40  ;;  %v3682_v48 = vadd.f32 %v5274_v33, %v2396_v44  ;;  %v2974_v49 = vpop.f32.mrb[2].mxu0  ;;  %v2398_v50 = vpop.f32.mrb[3].mxu1  ;;  %v3602_v43 = vcombine.low %v256_v11, %v260_v12 }
 0x218   :  { %v2976_v52 = vpop.f32.mrb[3].mxu0 }
 0x219   :  { %4129 = vtanh.f32 %v3681_v47  ;;  %v3683_v53 = vadd.f32 %v3682_v48, %v2974_v49  ;;  %2608 = vmatmul.mubr.bf16.gmra.mrb[108].mxu1 %v3578_v42  ;;  %v3611_v47 = vcombine.high %v264_v34, %v268_v35  ;;  %v3615_v52 = vcombine.high %v266_v37, %v270_v38 }
 0x21a   :  { %3186 = vmatmul.mubr.bf16.gmra.mrb[108].mxu0 %v3582_v45  ;;  %2615 = vmatprep.mubr.bf16.mxu1 %v3587_v46  ;;  %v3606_v46 = vcombine.low %v258_v14, %v262_v15 }
 0x21b   :  { %4131 = vtanh.f32 %v3683_v53  ;;  %3193 = vmatprep.mubr.bf16.mxu0 %v3591_v51 }
 0x21c   :  { %v2401_v56 = vpop.f32.mrb[4].mxu1 }
 0x21d   :  { %v3684_v58 = vadd.f32 %v5274_v33, %v2401_v56  ;;  %v2979_v59 = vpop.f32.mrb[4].mxu0  ;;  %v2403_v60 = vpop.f32.mrb[5].mxu1 }
 0x21e   :  { %v2981_v62 = vpop.f32.mrb[5].mxu0  ;;  %v2404_v63 = vpop.f32.mrb[6].mxu1  ;;  %v3610_v60 = vcombine.low %v264_v34, %v268_v35 }
 0x21f   :  { %v3685_v3 = vadd.f32 %v3684_v58, %v2979_v59  ;;  %v3686_v4 = vadd.f32 %v5274_v33, %v2404_v63  ;;  %v2982_v5 = vpop.f32.mrb[6].mxu0  ;;  %v2406_v6 = vpop.f32.mrb[7].mxu1  ;;  %v3614_v63 = vcombine.low %v266_v37, %v270_v38 }
 0x220   :  { %v2984_v8 = vpop.f32.mrb[7].mxu0 }
 0x221   :  { %4133 = vtanh.f32 %v3685_v3  ;;  %v3687_v9 = vadd.f32 %v3686_v4, %v2982_v5  ;;  %2616 = vmatmul.mubr.bf16.gmra.mrb[112].mxu1 %v3586_v61 }
 0x222   :  { %3194 = vmatmul.mubr.bf16.gmra.mrb[112].mxu0 %v3590_v1  ;;  %2623 = vmatprep.mubr.bf16.mxu1 %v3595_v2 }
 0x223   :  { %v4130_v10 = vpop.eup %4129  ;;  %4135 = vtanh.f32 %v3687_v9  ;;  %3201 = vmatprep.mubr.bf16.mxu0 %v3599_v7 }
 0x224   :  { %3291 = vst.msk [vmem:[%s5652_s3] sm:$0xff] %vm3290_vm0, %v4130_v10  ;;  %v2409_v13 = vpop.f32.mrb[8].mxu1 }
 0x225   :  { %v4132_v16 = vpop.eup %4131  ;;  %v3688_v17 = vadd.f32 %v5274_v33, %v2409_v13  ;;  %v2987_v18 = vpop.f32.mrb[8].mxu0 }
 0x226   :  { %v2411_v19 = vpop.f32.mrb[9].mxu1  ;;  %3292 = vst.msk [vmem:[%s5652_s3 + $0x8] sm:$0xff] %vm3290_vm0, %v4132_v16  ;;  %v2989_v21 = vpop.f32.mrb[9].mxu0 }
 0x227   :  { %v2412_v22 = vpop.f32.mrb[10].mxu1  ;;  %v3689_v25 = vadd.f32 %v3688_v17, %v2987_v18  ;;  %v2990_v27 = vpop.f32.mrb[10].mxu0 }
 0x228   :  { %v3690_v26 = vadd.f32 %v5274_v33, %v2412_v22  ;;  %v2414_v28 = vpop.f32.mrb[11].mxu1  ;;  %v2992_v30 = vpop.f32.mrb[11].mxu0 }
 0x229   :  { %4137 = vtanh.f32 %v3689_v25  ;;  %2624 = vmatmul.mubr.bf16.gmra.mrb[116].mxu1 %v3594_v20 }
 0x22a   :  { %v3691_v31 = vadd.f32 %v3690_v26, %v2990_v27  ;;  %3202 = vmatmul.mubr.bf16.gmra.mrb[116].mxu0 %v3598_v23  ;;  %2631 = vmatprep.mubr.bf16.mxu1 %v3603_v24 }
 0x22b   :  { %v4134_v32 = vpop.eup %4133  ;;  %3209 = vmatprep.mubr.bf16.mxu0 %v3607_v29 }
 0x22c   :  { %4139 = vtanh.f32 %v3691_v31  ;;  %3293 = vst.msk [vmem:[%s5652_s3 + $0x10] sm:$0xff] %vm3290_vm0, %v4134_v32  ;;  %v2417_v36 = vpop.f32.mrb[12].mxu1 }
 0x22d   :  { %v4136_v39 = vpop.eup %4135  ;;  %v3692_v40 = vadd.f32 %v5274_v33, %v2417_v36  ;;  %v2995_v41 = vpop.f32.mrb[12].mxu0 }
 0x22e   :  { %v2419_v42 = vpop.f32.mrb[13].mxu1  ;;  %3294 = vst.msk [vmem:[%s5652_s3 + $0x18] sm:$0xff] %vm3290_vm0, %v4136_v39  ;;  %v2997_v44 = vpop.f32.mrb[13].mxu0 }
 0x22f   :  { %v2420_v45 = vpop.f32.mrb[14].mxu1  ;;  %v3693_v48 = vadd.f32 %v3692_v40, %v2995_v41  ;;  %v2998_v50 = vpop.f32.mrb[14].mxu0 }
 0x230   :  { %v3694_v49 = vadd.f32 %v5274_v33, %v2420_v45  ;;  %v2422_v51 = vpop.f32.mrb[15].mxu1  ;;  %v3000_v53 = vpop.f32.mrb[15].mxu0 }
 0x231   :  { %4141 = vtanh.f32 %v3693_v48  ;;  %2632 = vmatmul.mubr.bf16.gmra.mrb[120].mxu1 %v3602_v43 }
 0x232   :  { %v3695_v54 = vadd.f32 %v3694_v49, %v2998_v50  ;;  %3210 = vmatmul.mubr.bf16.gmra.mrb[120].mxu0 %v3606_v46  ;;  %2639 = vmatprep.mubr.bf16.mxu1 %v3611_v47 }
 0x233   :  { %v4138_v55 = vpop.eup %4137  ;;  %3217 = vmatprep.mubr.bf16.mxu0 %v3615_v52 }
 0x234   :  { %4143 = vtanh.f32 %v3695_v54  ;;  %3295 = vst.msk [vmem:[%s5652_s3 + $0x20] sm:$0xff] %vm3290_vm0, %v4138_v55  ;;  %v2425_v56 = vpop.f32.mrb[16].mxu1 }
 0x235   :  { %v3696_v0 = vadd.f32 %v5274_v33, %v2425_v56  ;;  %v3003_v58 = vpop.f32.mrb[16].mxu0  ;;  %v2427_v59 = vpop.f32.mrb[17].mxu1 }
 0x236   :  { %v4140_v57 = vpop.eup %4139  ;;  %v3005_v61 = vpop.f32.mrb[17].mxu0 }
 0x237   :  { %3296 = vst.msk [vmem:[%s5652_s3 + $0x28] sm:$0xff] %vm3290_vm0, %v4140_v57  ;;  %v2428_v62 = vpop.f32.mrb[18].mxu1  ;;  %v3697_v1 = vadd.f32 %v3696_v0, %v3003_v58  ;;  %v3006_v3 = vpop.f32.mrb[18].mxu0 }
 0x238   :  { %v3698_v2 = vadd.f32 %v5274_v33, %v2428_v62  ;;  %v2430_v4 = vpop.f32.mrb[19].mxu1  ;;  %v3008_v5 = vpop.f32.mrb[19].mxu0 }
 0x239   :  { %4145 = vtanh.f32 %v3697_v1  ;;  %2640 = vmatmul.mubr.bf16.gmra.mrb[124].mxu1 %v3610_v60 }
 0x23a   :  { %v3699_v6 = vadd.f32 %v3698_v2, %v3006_v3  ;;  %3218 = vmatmul.mubr.bf16.gmra.mrb[124].mxu0 %v3614_v63 }
 0x23b   :  { %v4142_v7 = vpop.eup %4141 }
 0x23c   :  { %4147 = vtanh.f32 %v3699_v6  ;;  %3297 = vst.msk [vmem:[%s5652_s3 + $0x30] sm:$0xff] %vm3290_vm0, %v4142_v7  ;;  %v2433_v8 = vpop.f32.mrb[20].mxu1 }
 0x23d   :  { %v3700_v10 = vadd.f32 %v5274_v33, %v2433_v8  ;;  %v3011_v11 = vpop.f32.mrb[20].mxu0  ;;  %v2435_v12 = vpop.f32.mrb[21].mxu1 }
 0x23e   :  { %v4144_v9 = vpop.eup %4143  ;;  %v3013_v13 = vpop.f32.mrb[21].mxu0 }
 0x23f   :  { %3298 = vst.msk [vmem:[%s5652_s3 + $0x38] sm:$0xff] %vm3290_vm0, %v4144_v9  ;;  %v2436_v14 = vpop.f32.mrb[22].mxu1  ;;  %v3701_v15 = vadd.f32 %v3700_v10, %v3011_v11  ;;  %v3014_v17 = vpop.f32.mrb[22].mxu0 }
 0x240   :  { %v3702_v16 = vadd.f32 %v5274_v33, %v2436_v14  ;;  %v2438_v18 = vpop.f32.mrb[23].mxu1  ;;  %v3016_v19 = vpop.f32.mrb[23].mxu0 }
 0x241   :  { %4149 = vtanh.f32 %v3701_v15 }
 0x242   :  { %v3703_v20 = vadd.f32 %v3702_v16, %v3014_v17 }
 0x243   :  { %v4146_v21 = vpop.eup %4145 }
 0x244   :  { %4151 = vtanh.f32 %v3703_v20  ;;  %3299 = vst.msk [vmem:[%s5652_s3 + $0x40] sm:$0xff] %vm3290_vm0, %v4146_v21  ;;  %v2441_v22 = vpop.f32.mrb[24].mxu1 }
 0x245   :  { %v3704_v24 = vadd.f32 %v5274_v33, %v2441_v22  ;;  %v3019_v25 = vpop.f32.mrb[24].mxu0  ;;  %v2443_v26 = vpop.f32.mrb[25].mxu1 }
 0x246   :  { %v4148_v23 = vpop.eup %4147  ;;  %v3021_v27 = vpop.f32.mrb[25].mxu0 }
 0x247   :  { %3300 = vst.msk [vmem:[%s5652_s3 + $0x48] sm:$0xff] %vm3290_vm0, %v4148_v23  ;;  %v2444_v28 = vpop.f32.mrb[26].mxu1  ;;  %v3705_v29 = vadd.f32 %v3704_v24, %v3019_v25  ;;  %v3022_v31 = vpop.f32.mrb[26].mxu0 }
 0x248   :  { %v3706_v30 = vadd.f32 %v5274_v33, %v2444_v28  ;;  %v2446_v32 = vpop.f32.mrb[27].mxu1  ;;  %v3024_v34 = vpop.f32.mrb[27].mxu0 }
 0x249   :  { %4153 = vtanh.f32 %v3705_v29 }
 0x24a   :  { %v3707_v35 = vadd.f32 %v3706_v30, %v3022_v31 }
 0x24b   :  { %v4150_v36 = vpop.eup %4149 }
 0x24c   :  { %4155 = vtanh.f32 %v3707_v35  ;;  %3301 = vst.msk [vmem:[%s5652_s3 + $0x50] sm:$0xff] %vm3290_vm0, %v4150_v36  ;;  %v2449_v37 = vpop.f32.mrb[28].mxu1 }
 0x24d   :  { %v3708_v39 = vadd.f32 %v5274_v33, %v2449_v37  ;;  %v3027_v40 = vpop.f32.mrb[28].mxu0  ;;  %v2451_v41 = vpop.f32.mrb[29].mxu1 }
 0x24e   :  { %v4152_v38 = vpop.eup %4151  ;;  %v3029_v42 = vpop.f32.mrb[29].mxu0 }
 0x24f   :  { %3302 = vst.msk [vmem:[%s5652_s3 + $0x58] sm:$0xff] %vm3290_vm0, %v4152_v38  ;;  %v2452_v43 = vpop.f32.mrb[30].mxu1  ;;  %v3709_v44 = vadd.f32 %v3708_v39, %v3027_v40  ;;  %v3030_v46 = vpop.f32.mrb[30].mxu0 }
 0x250   :  { %v3710_v45 = vadd.f32 %v5274_v33, %v2452_v43  ;;  %v2454_v47 = vpop.f32.mrb[31].mxu1  ;;  %v3032_v48 = vpop.f32.mrb[31].mxu0 }
 0x251   :  { %4157 = vtanh.f32 %v3709_v44 }
 0x252   :  { %v3711_v49 = vadd.f32 %v3710_v45, %v3030_v46 }
 0x253   :  { %v4154_v50 = vpop.eup %4153 }
 0x254   :  { %4159 = vtanh.f32 %v3711_v49  ;;  %3303 = vst.msk [vmem:[%s5652_s3 + $0x60] sm:$0xff] %vm3290_vm0, %v4154_v50  ;;  %v2457_v51 = vpop.f32.mrb[32].mxu1 }
 0x255   :  { %v3712_v53 = vadd.f32 %v5274_v33, %v2457_v51  ;;  %v3035_v54 = vpop.f32.mrb[32].mxu0  ;;  %v2459_v55 = vpop.f32.mrb[33].mxu1 }
 0x256   :  { %v4156_v52 = vpop.eup %4155  ;;  %v3037_v56 = vpop.f32.mrb[33].mxu0 }
 0x257   :  { %3304 = vst.msk [vmem:[%s5652_s3 + $0x68] sm:$0xff] %vm3290_vm0, %v4156_v52  ;;  %v2460_v57 = vpop.f32.mrb[34].mxu1  ;;  %v3713_v0 = vadd.f32 %v3712_v53, %v3035_v54  ;;  %v3038_v59 = vpop.f32.mrb[34].mxu0 }
 0x258   :  { %v3714_v58 = vadd.f32 %v5274_v33, %v2460_v57  ;;  %v2462_v60 = vpop.f32.mrb[35].mxu1  ;;  %v3040_v61 = vpop.f32.mrb[35].mxu0 }
 0x259   :  { %4161 = vtanh.f32 %v3713_v0 }
 0x25a   :  { %v3715_v62 = vadd.f32 %v3714_v58, %v3038_v59 }
 0x25b   :  { %v4158_v63 = vpop.eup %4157 }
 0x25c   :  { %4163 = vtanh.f32 %v3715_v62  ;;  %3305 = vst.msk [vmem:[%s5652_s3 + $0x70] sm:$0xff] %vm3290_vm0, %v4158_v63  ;;  %v2465_v1 = vpop.f32.mrb[36].mxu1 }
 0x25d   :  { %v3716_v3 = vadd.f32 %v5274_v33, %v2465_v1  ;;  %v3043_v4 = vpop.f32.mrb[36].mxu0  ;;  %v2467_v5 = vpop.f32.mrb[37].mxu1 }
 0x25e   :  { %v4160_v2 = vpop.eup %4159  ;;  %v3045_v6 = vpop.f32.mrb[37].mxu0 }
 0x25f   :  { %3306 = vst.msk [vmem:[%s5652_s3 + $0x78] sm:$0xff] %vm3290_vm0, %v4160_v2  ;;  %v2468_v7 = vpop.f32.mrb[38].mxu1  ;;  %v3717_v8 = vadd.f32 %v3716_v3, %v3043_v4  ;;  %v3046_v10 = vpop.f32.mrb[38].mxu0 }
 0x260   :  { %v3718_v9 = vadd.f32 %v5274_v33, %v2468_v7  ;;  %v2470_v11 = vpop.f32.mrb[39].mxu1  ;;  %v3048_v12 = vpop.f32.mrb[39].mxu0 }
 0x261   :  { %4165 = vtanh.f32 %v3717_v8 }
 0x262   :  { %v3719_v13 = vadd.f32 %v3718_v9, %v3046_v10 }
 0x263   :  { %v4162_v14 = vpop.eup %4161 }
 0x264   :  { %4167 = vtanh.f32 %v3719_v13  ;;  %3307 = vst.msk [vmem:[%s5652_s3 + $0x80] sm:$0xff] %vm3290_vm0, %v4162_v14  ;;  %v2473_v15 = vpop.f32.mrb[40].mxu1 }
 0x265   :  { %v3720_v17 = vadd.f32 %v5274_v33, %v2473_v15  ;;  %v3051_v18 = vpop.f32.mrb[40].mxu0  ;;  %v2475_v19 = vpop.f32.mrb[41].mxu1 }
 0x266   :  { %v4164_v16 = vpop.eup %4163  ;;  %v3053_v20 = vpop.f32.mrb[41].mxu0 }
 0x267   :  { %3308 = vst.msk [vmem:[%s5652_s3 + $0x88] sm:$0xff] %vm3290_vm0, %v4164_v16  ;;  %v2476_v21 = vpop.f32.mrb[42].mxu1  ;;  %v3721_v22 = vadd.f32 %v3720_v17, %v3051_v18  ;;  %v3054_v24 = vpop.f32.mrb[42].mxu0 }
 0x268   :  { %v3722_v23 = vadd.f32 %v5274_v33, %v2476_v21  ;;  %v2478_v25 = vpop.f32.mrb[43].mxu1  ;;  %v3056_v26 = vpop.f32.mrb[43].mxu0 }
 0x269   :  { %4169 = vtanh.f32 %v3721_v22 }
 0x26a   :  { %v3723_v27 = vadd.f32 %v3722_v23, %v3054_v24 }
 0x26b   :  { %v4166_v28 = vpop.eup %4165 }
 0x26c   :  { %4171 = vtanh.f32 %v3723_v27  ;;  %3309 = vst.msk [vmem:[%s5652_s3 + $0x90] sm:$0xff] %vm3290_vm0, %v4166_v28  ;;  %v2481_v29 = vpop.f32.mrb[44].mxu1 }
 0x26d   :  { %v3724_v31 = vadd.f32 %v5274_v33, %v2481_v29  ;;  %v3059_v32 = vpop.f32.mrb[44].mxu0  ;;  %v2483_v34 = vpop.f32.mrb[45].mxu1 }
 0x26e   :  { %v4168_v30 = vpop.eup %4167  ;;  %v3061_v35 = vpop.f32.mrb[45].mxu0 }
 0x26f   :  { %3310 = vst.msk [vmem:[%s5652_s3 + $0x98] sm:$0xff] %vm3290_vm0, %v4168_v30  ;;  %v2484_v36 = vpop.f32.mrb[46].mxu1  ;;  %v3725_v37 = vadd.f32 %v3724_v31, %v3059_v32  ;;  %v3062_v39 = vpop.f32.mrb[46].mxu0 }
 0x270   :  { %v3726_v38 = vadd.f32 %v5274_v33, %v2484_v36  ;;  %v2486_v40 = vpop.f32.mrb[47].mxu1  ;;  %v3064_v41 = vpop.f32.mrb[47].mxu0 }
 0x271   :  { %4173 = vtanh.f32 %v3725_v37 }
 0x272   :  { %v3727_v42 = vadd.f32 %v3726_v38, %v3062_v39 }
 0x273   :  { %v4170_v43 = vpop.eup %4169 }
 0x274   :  { %4175 = vtanh.f32 %v3727_v42  ;;  %3311 = vst.msk [vmem:[%s5652_s3 + $0xa0] sm:$0xff] %vm3290_vm0, %v4170_v43  ;;  %v2489_v44 = vpop.f32.mrb[48].mxu1 }
 0x275   :  { %v3728_v46 = vadd.f32 %v5274_v33, %v2489_v44  ;;  %v3067_v47 = vpop.f32.mrb[48].mxu0  ;;  %v2491_v48 = vpop.f32.mrb[49].mxu1 }
 0x276   :  { %v4172_v45 = vpop.eup %4171  ;;  %v3069_v49 = vpop.f32.mrb[49].mxu0 }
 0x277   :  { %3312 = vst.msk [vmem:[%s5652_s3 + $0xa8] sm:$0xff] %vm3290_vm0, %v4172_v45  ;;  %v2492_v50 = vpop.f32.mrb[50].mxu1  ;;  %v3729_v51 = vadd.f32 %v3728_v46, %v3067_v47  ;;  %v3070_v53 = vpop.f32.mrb[50].mxu0 }
 0x278   :  { %v3730_v52 = vadd.f32 %v5274_v33, %v2492_v50  ;;  %v2494_v54 = vpop.f32.mrb[51].mxu1  ;;  %v3072_v55 = vpop.f32.mrb[51].mxu0 }
 0x279   :  { %4177 = vtanh.f32 %v3729_v51 }
 0x27a   :  { %v3731_v56 = vadd.f32 %v3730_v52, %v3070_v53 }
 0x27b   :  { %v4174_v57 = vpop.eup %4173 }
 0x27c   :  { %4179 = vtanh.f32 %v3731_v56  ;;  %3313 = vst.msk [vmem:[%s5652_s3 + $0xb0] sm:$0xff] %vm3290_vm0, %v4174_v57  ;;  %v2497_v0 = vpop.f32.mrb[52].mxu1 }
 0x27d   :  { %v3732_v59 = vadd.f32 %v5274_v33, %v2497_v0  ;;  %v3075_v60 = vpop.f32.mrb[52].mxu0  ;;  %v2499_v61 = vpop.f32.mrb[53].mxu1 }
 0x27e   :  { %v4176_v58 = vpop.eup %4175  ;;  %v3077_v62 = vpop.f32.mrb[53].mxu0 }
 0x27f   :  { %3314 = vst.msk [vmem:[%s5652_s3 + $0xb8] sm:$0xff] %vm3290_vm0, %v4176_v58  ;;  %v2500_v63 = vpop.f32.mrb[54].mxu1  ;;  %v3733_v1 = vadd.f32 %v3732_v59, %v3075_v60  ;;  %v3078_v3 = vpop.f32.mrb[54].mxu0 }
 0x280   :  { %v3734_v2 = vadd.f32 %v5274_v33, %v2500_v63  ;;  %v2502_v4 = vpop.f32.mrb[55].mxu1  ;;  %v3080_v5 = vpop.f32.mrb[55].mxu0 }
 0x281   :  { %4181 = vtanh.f32 %v3733_v1 }
 0x282   :  { %v3735_v6 = vadd.f32 %v3734_v2, %v3078_v3 }
 0x283   :  { %v4178_v7 = vpop.eup %4177 }
 0x284   :  { %4183 = vtanh.f32 %v3735_v6  ;;  %3315 = vst.msk [vmem:[%s5652_s3 + $0xc0] sm:$0xff] %vm3290_vm0, %v4178_v7  ;;  %v2505_v8 = vpop.f32.mrb[56].mxu1 }
 0x285   :  { %v3736_v10 = vadd.f32 %v5274_v33, %v2505_v8  ;;  %v3083_v11 = vpop.f32.mrb[56].mxu0  ;;  %v2507_v12 = vpop.f32.mrb[57].mxu1 }
 0x286   :  { %v4180_v9 = vpop.eup %4179  ;;  %v3085_v13 = vpop.f32.mrb[57].mxu0 }
 0x287   :  { %3316 = vst.msk [vmem:[%s5652_s3 + $0xc8] sm:$0xff] %vm3290_vm0, %v4180_v9  ;;  %v2508_v14 = vpop.f32.mrb[58].mxu1  ;;  %v3737_v15 = vadd.f32 %v3736_v10, %v3083_v11  ;;  %v3086_v17 = vpop.f32.mrb[58].mxu0 }
 0x288   :  { %v3738_v16 = vadd.f32 %v5274_v33, %v2508_v14  ;;  %v2510_v18 = vpop.f32.mrb[59].mxu1  ;;  %v3088_v19 = vpop.f32.mrb[59].mxu0 }
 0x289   :  { %4185 = vtanh.f32 %v3737_v15 }
 0x28a   :  { %v3739_v20 = vadd.f32 %v3738_v16, %v3086_v17 }
 0x28b   :  { %v4182_v21 = vpop.eup %4181 }
 0x28c   :  { %4187 = vtanh.f32 %v3739_v20  ;;  %3317 = vst.msk [vmem:[%s5652_s3 + $0xd0] sm:$0xff] %vm3290_vm0, %v4182_v21  ;;  %v2513_v22 = vpop.f32.mrb[60].mxu1 }
 0x28d   :  { %v3740_v24 = vadd.f32 %v5274_v33, %v2513_v22  ;;  %v3091_v25 = vpop.f32.mrb[60].mxu0  ;;  %v2515_v26 = vpop.f32.mrb[61].mxu1 }
 0x28e   :  { %v4184_v23 = vpop.eup %4183  ;;  %v3093_v27 = vpop.f32.mrb[61].mxu0 }
 0x28f   :  { %3318 = vst.msk [vmem:[%s5652_s3 + $0xd8] sm:$0xff] %vm3290_vm0, %v4184_v23  ;;  %v2516_v28 = vpop.f32.mrb[62].mxu1  ;;  %v3741_v29 = vadd.f32 %v3740_v24, %v3091_v25  ;;  %v3094_v31 = vpop.f32.mrb[62].mxu0 }
 0x290   :  { %v3742_v30 = vadd.f32 %v5274_v33, %v2516_v28  ;;  %v2518_v32 = vpop.f32.mrb[63].mxu1  ;;  %v3096_v34 = vpop.f32.mrb[63].mxu0 }
 0x291   :  { %4189 = vtanh.f32 %v3741_v29 }
 0x292   :  { %v3743_v35 = vadd.f32 %v3742_v30, %v3094_v31 }
 0x293   :  { %v4186_v36 = vpop.eup %4185 }
 0x294   :  { %4191 = vtanh.f32 %v3743_v35  ;;  %3319 = vst.msk [vmem:[%s5652_s3 + $0xe0] sm:$0xff] %vm3290_vm0, %v4186_v36  ;;  %v2521_v37 = vpop.f32.mrb[64].mxu1 }
 0x295   :  { %v3744_v39 = vadd.f32 %v5274_v33, %v2521_v37  ;;  %v3099_v40 = vpop.f32.mrb[64].mxu0  ;;  %v2523_v41 = vpop.f32.mrb[65].mxu1 }
 0x296   :  { %v4188_v38 = vpop.eup %4187  ;;  %v3101_v42 = vpop.f32.mrb[65].mxu0 }
 0x297   :  { %3320 = vst.msk [vmem:[%s5652_s3 + $0xe8] sm:$0xff] %vm3290_vm0, %v4188_v38  ;;  %v2524_v43 = vpop.f32.mrb[66].mxu1  ;;  %v3745_v44 = vadd.f32 %v3744_v39, %v3099_v40  ;;  %v3102_v46 = vpop.f32.mrb[66].mxu0 }
 0x298   :  { %v3746_v45 = vadd.f32 %v5274_v33, %v2524_v43  ;;  %v2526_v47 = vpop.f32.mrb[67].mxu1  ;;  %v3104_v48 = vpop.f32.mrb[67].mxu0 }
 0x299   :  { %4193 = vtanh.f32 %v3745_v44 }
 0x29a   :  { %v3747_v49 = vadd.f32 %v3746_v45, %v3102_v46 }
 0x29b   :  { %v4190_v50 = vpop.eup %4189 }
 0x29c   :  { %4195 = vtanh.f32 %v3747_v49  ;;  %3321 = vst.msk [vmem:[%s5652_s3 + $0xf0] sm:$0xff] %vm3290_vm0, %v4190_v50  ;;  %v2529_v51 = vpop.f32.mrb[68].mxu1 }
 0x29d   :  { %v3748_v53 = vadd.f32 %v5274_v33, %v2529_v51  ;;  %v3107_v54 = vpop.f32.mrb[68].mxu0  ;;  %v2531_v55 = vpop.f32.mrb[69].mxu1 }
 0x29e   :  { %v4192_v52 = vpop.eup %4191  ;;  %v3109_v56 = vpop.f32.mrb[69].mxu0 }
 0x29f   :  { %3322 = vst.msk [vmem:[%s5652_s3 + $0xf8] sm:$0xff] %vm3290_vm0, %v4192_v52  ;;  %v2532_v57 = vpop.f32.mrb[70].mxu1  ;;  %v3749_v0 = vadd.f32 %v3748_v53, %v3107_v54  ;;  %v3110_v59 = vpop.f32.mrb[70].mxu0 }
 0x2a0   :  { %v3750_v58 = vadd.f32 %v5274_v33, %v2532_v57  ;;  %v2534_v60 = vpop.f32.mrb[71].mxu1  ;;  %v3112_v61 = vpop.f32.mrb[71].mxu0 }
 0x2a1   :  { %4197 = vtanh.f32 %v3749_v0 }
 0x2a2   :  { %v3751_v62 = vadd.f32 %v3750_v58, %v3110_v59 }
 0x2a3   :  { %v4194_v63 = vpop.eup %4193 }
 0x2a4   :  { %4199 = vtanh.f32 %v3751_v62  ;;  %3323 = vst.msk [vmem:[%s5652_s3 + $0x100] sm:$0xff] %vm3290_vm0, %v4194_v63  ;;  %v2537_v1 = vpop.f32.mrb[72].mxu1 }
 0x2a5   :  { %v3752_v3 = vadd.f32 %v5274_v33, %v2537_v1  ;;  %v3115_v4 = vpop.f32.mrb[72].mxu0  ;;  %v2539_v5 = vpop.f32.mrb[73].mxu1 }
 0x2a6   :  { %v4196_v2 = vpop.eup %4195  ;;  %v3117_v6 = vpop.f32.mrb[73].mxu0 }
 0x2a7   :  { %3324 = vst.msk [vmem:[%s5652_s3 + $0x108] sm:$0xff] %vm3290_vm0, %v4196_v2  ;;  %v2540_v7 = vpop.f32.mrb[74].mxu1  ;;  %v3753_v8 = vadd.f32 %v3752_v3, %v3115_v4  ;;  %v3118_v10 = vpop.f32.mrb[74].mxu0 }
 0x2a8   :  { %v3754_v9 = vadd.f32 %v5274_v33, %v2540_v7  ;;  %v2542_v11 = vpop.f32.mrb[75].mxu1  ;;  %v3120_v12 = vpop.f32.mrb[75].mxu0 }
 0x2a9   :  { %4201 = vtanh.f32 %v3753_v8 }
 0x2aa   :  { %v3755_v13 = vadd.f32 %v3754_v9, %v3118_v10 }
 0x2ab   :  { %v4198_v14 = vpop.eup %4197 }
 0x2ac   :  { %4203 = vtanh.f32 %v3755_v13  ;;  %3325 = vst.msk [vmem:[%s5652_s3 + $0x110] sm:$0xff] %vm3290_vm0, %v4198_v14  ;;  %v2545_v15 = vpop.f32.mrb[76].mxu1 }
 0x2ad   :  { %v3756_v17 = vadd.f32 %v5274_v33, %v2545_v15  ;;  %v3123_v18 = vpop.f32.mrb[76].mxu0  ;;  %v2547_v19 = vpop.f32.mrb[77].mxu1 }
 0x2ae   :  { %v4200_v16 = vpop.eup %4199  ;;  %v3125_v20 = vpop.f32.mrb[77].mxu0 }
 0x2af   :  { %3326 = vst.msk [vmem:[%s5652_s3 + $0x118] sm:$0xff] %vm3290_vm0, %v4200_v16  ;;  %v2548_v21 = vpop.f32.mrb[78].mxu1  ;;  %v3757_v22 = vadd.f32 %v3756_v17, %v3123_v18  ;;  %v3126_v24 = vpop.f32.mrb[78].mxu0 }
 0x2b0   :  { %v3758_v23 = vadd.f32 %v5274_v33, %v2548_v21  ;;  %v2550_v25 = vpop.f32.mrb[79].mxu1  ;;  %v3128_v26 = vpop.f32.mrb[79].mxu0 }
 0x2b1   :  { %4205 = vtanh.f32 %v3757_v22 }
 0x2b2   :  { %v3759_v27 = vadd.f32 %v3758_v23, %v3126_v24 }
 0x2b3   :  { %v4202_v28 = vpop.eup %4201 }
 0x2b4   :  { %4207 = vtanh.f32 %v3759_v27  ;;  %3327 = vst.msk [vmem:[%s5652_s3 + $0x120] sm:$0xff] %vm3290_vm0, %v4202_v28  ;;  %v2553_v29 = vpop.f32.mrb[80].mxu1 }
 0x2b5   :  { %v3760_v31 = vadd.f32 %v5274_v33, %v2553_v29  ;;  %v3131_v32 = vpop.f32.mrb[80].mxu0  ;;  %v2555_v34 = vpop.f32.mrb[81].mxu1 }
 0x2b6   :  { %v4204_v30 = vpop.eup %4203  ;;  %v3133_v35 = vpop.f32.mrb[81].mxu0 }
 0x2b7   :  { %3328 = vst.msk [vmem:[%s5652_s3 + $0x128] sm:$0xff] %vm3290_vm0, %v4204_v30  ;;  %v2556_v36 = vpop.f32.mrb[82].mxu1  ;;  %v3761_v37 = vadd.f32 %v3760_v31, %v3131_v32  ;;  %v3134_v39 = vpop.f32.mrb[82].mxu0 }
 0x2b8   :  { %v3762_v38 = vadd.f32 %v5274_v33, %v2556_v36  ;;  %v2558_v40 = vpop.f32.mrb[83].mxu1  ;;  %v3136_v41 = vpop.f32.mrb[83].mxu0 }
 0x2b9   :  { %4209 = vtanh.f32 %v3761_v37 }
 0x2ba   :  { %v3763_v42 = vadd.f32 %v3762_v38, %v3134_v39 }
 0x2bb   :  { %v4206_v43 = vpop.eup %4205 }
 0x2bc   :  { %4211 = vtanh.f32 %v3763_v42  ;;  %3329 = vst.msk [vmem:[%s5652_s3 + $0x130] sm:$0xff] %vm3290_vm0, %v4206_v43  ;;  %v2561_v44 = vpop.f32.mrb[84].mxu1 }
 0x2bd   :  { %v3764_v46 = vadd.f32 %v5274_v33, %v2561_v44  ;;  %v3139_v47 = vpop.f32.mrb[84].mxu0  ;;  %v2563_v48 = vpop.f32.mrb[85].mxu1 }
 0x2be   :  { %v4208_v45 = vpop.eup %4207  ;;  %v3141_v49 = vpop.f32.mrb[85].mxu0 }
 0x2bf   :  { %3330 = vst.msk [vmem:[%s5652_s3 + $0x138] sm:$0xff] %vm3290_vm0, %v4208_v45  ;;  %v2564_v50 = vpop.f32.mrb[86].mxu1  ;;  %v3765_v51 = vadd.f32 %v3764_v46, %v3139_v47  ;;  %v3142_v53 = vpop.f32.mrb[86].mxu0 }
 0x2c0   :  { %v3766_v52 = vadd.f32 %v5274_v33, %v2564_v50  ;;  %v2566_v54 = vpop.f32.mrb[87].mxu1  ;;  %v3144_v55 = vpop.f32.mrb[87].mxu0 }
 0x2c1   :  { %4213 = vtanh.f32 %v3765_v51 }
 0x2c2   :  { %v3767_v56 = vadd.f32 %v3766_v52, %v3142_v53  ;;  %v5575_v53 = vld [vmem:[%s5651_s2] ss:$0 sm:$0xff] }
 0x2c3   :  { %v4210_v57 = vpop.eup %4209 }
 0x2c4   :  { %4215 = vtanh.f32 %v3767_v56  ;;  %3331 = vst.msk [vmem:[%s5652_s3 + $0x140] sm:$0xff] %vm3290_vm0, %v4210_v57  ;;  %v2569_v0 = vpop.f32.mrb[88].mxu1 }
 0x2c5   :  { %v3768_v59 = vadd.f32 %v5274_v33, %v2569_v0  ;;  %v3147_v60 = vpop.f32.mrb[88].mxu0  ;;  %v2571_v61 = vpop.f32.mrb[89].mxu1 }
 0x2c6   :  { %v4212_v58 = vpop.eup %4211  ;;  %v3149_v62 = vpop.f32.mrb[89].mxu0 }
 0x2c7   :  { %3332 = vst.msk [vmem:[%s5652_s3 + $0x148] sm:$0xff] %vm3290_vm0, %v4212_v58  ;;  %v2572_v63 = vpop.f32.mrb[90].mxu1  ;;  %v3769_v1 = vadd.f32 %v3768_v59, %v3147_v60  ;;  %v3150_v3 = vpop.f32.mrb[90].mxu0 }
 0x2c8   :  { %v3770_v2 = vadd.f32 %v5274_v33, %v2572_v63  ;;  %v2574_v4 = vpop.f32.mrb[91].mxu1  ;;  %v3152_v5 = vpop.f32.mrb[91].mxu0 }
 0x2c9   :  { %4217 = vtanh.f32 %v3769_v1 }
 0x2ca   :  { %v3771_v6 = vadd.f32 %v3770_v2, %v3150_v3 }
 0x2cb   :  { %v4214_v7 = vpop.eup %4213 }
 0x2cc   :  { %4219 = vtanh.f32 %v3771_v6  ;;  %3333 = vst.msk [vmem:[%s5652_s3 + $0x150] sm:$0xff] %vm3290_vm0, %v4214_v7  ;;  %v2577_v8 = vpop.f32.mrb[92].mxu1 }
 0x2cd   :  { %v3772_v10 = vadd.f32 %v5274_v33, %v2577_v8  ;;  %v3155_v11 = vpop.f32.mrb[92].mxu0  ;;  %v2579_v12 = vpop.f32.mrb[93].mxu1 }
 0x2ce   :  { %v4216_v9 = vpop.eup %4215  ;;  %v3157_v13 = vpop.f32.mrb[93].mxu0 }
 0x2cf   :  { %3334 = vst.msk [vmem:[%s5652_s3 + $0x158] sm:$0xff] %vm3290_vm0, %v4216_v9  ;;  %v2580_v14 = vpop.f32.mrb[94].mxu1  ;;  %v3773_v15 = vadd.f32 %v3772_v10, %v3155_v11  ;;  %v3158_v17 = vpop.f32.mrb[94].mxu0 }
 0x2d0   :  { %v3774_v16 = vadd.f32 %v5274_v33, %v2580_v14  ;;  %v2582_v18 = vpop.f32.mrb[95].mxu1  ;;  %v3160_v19 = vpop.f32.mrb[95].mxu0 }
 0x2d1   :  { %4221 = vtanh.f32 %v3773_v15 }
 0x2d2   :  { %v3775_v20 = vadd.f32 %v3774_v16, %v3158_v17 }
 0x2d3   :  { %v4218_v21 = vpop.eup %4217 }
 0x2d4   :  { %4223 = vtanh.f32 %v3775_v20  ;;  %3335 = vst.msk [vmem:[%s5652_s3 + $0x160] sm:$0xff] %vm3290_vm0, %v4218_v21  ;;  %v2585_v22 = vpop.f32.mrb[96].mxu1 }
 0x2d5   :  { %v3776_v24 = vadd.f32 %v5274_v33, %v2585_v22  ;;  %v3163_v25 = vpop.f32.mrb[96].mxu0  ;;  %v2587_v26 = vpop.f32.mrb[97].mxu1 }
 0x2d6   :  { %v4220_v23 = vpop.eup %4219  ;;  %v3165_v27 = vpop.f32.mrb[97].mxu0 }
 0x2d7   :  { %3336 = vst.msk [vmem:[%s5652_s3 + $0x168] sm:$0xff] %vm3290_vm0, %v4220_v23  ;;  %v2588_v28 = vpop.f32.mrb[98].mxu1  ;;  %v3777_v29 = vadd.f32 %v3776_v24, %v3163_v25  ;;  %v3166_v31 = vpop.f32.mrb[98].mxu0 }
 0x2d8   :  { %v3778_v30 = vadd.f32 %v5274_v33, %v2588_v28  ;;  %v2590_v32 = vpop.f32.mrb[99].mxu1  ;;  %v3168_v34 = vpop.f32.mrb[99].mxu0 }
 0x2d9   :  { %4225 = vtanh.f32 %v3777_v29 }
 0x2da   :  { %v3779_v35 = vadd.f32 %v3778_v30, %v3166_v31 }
 0x2db   :  { %v4222_v36 = vpop.eup %4221 }
 0x2dc   :  { %4227 = vtanh.f32 %v3779_v35  ;;  %3337 = vst.msk [vmem:[%s5652_s3 + $0x170] sm:$0xff] %vm3290_vm0, %v4222_v36  ;;  %v2593_v37 = vpop.f32.mrb[100].mxu1 }
 0x2dd   :  { %v3780_v39 = vadd.f32 %v5274_v33, %v2593_v37  ;;  %v3171_v40 = vpop.f32.mrb[100].mxu0  ;;  %v2595_v41 = vpop.f32.mrb[101].mxu1 }
 0x2de   :  { %v4224_v38 = vpop.eup %4223  ;;  %v3173_v42 = vpop.f32.mrb[101].mxu0 }
 0x2df   :  { %3338 = vst.msk [vmem:[%s5652_s3 + $0x178] sm:$0xff] %vm3290_vm0, %v4224_v38  ;;  %v2596_v43 = vpop.f32.mrb[102].mxu1  ;;  %v3781_v44 = vadd.f32 %v3780_v39, %v3171_v40  ;;  %v3174_v46 = vpop.f32.mrb[102].mxu0 }
 0x2e0   :  { %v3782_v45 = vadd.f32 %v5274_v33, %v2596_v43  ;;  %v2598_v47 = vpop.f32.mrb[103].mxu1  ;;  %v3176_v48 = vpop.f32.mrb[103].mxu0 }
 0x2e1   :  { %4229 = vtanh.f32 %v3781_v44 }
 0x2e2   :  { %v3783_v49 = vadd.f32 %v3782_v45, %v3174_v46 }
 0x2e3   :  { %v4226_v50 = vpop.eup %4225 }
 0x2e4   :  { %4231 = vtanh.f32 %v3783_v49  ;;  %3339 = vst.msk [vmem:[%s5652_s3 + $0x180] sm:$0xff] %vm3290_vm0, %v4226_v50  ;;  %v2601_v51 = vpop.f32.mrb[104].mxu1 }
 0x2e5   :  { %v3784_v33 = vadd.f32 %v5575_v53, %v2601_v51  ;;  %v3179_v54 = vpop.f32.mrb[104].mxu0  ;;  %v2603_v55 = vpop.f32.mrb[105].mxu1 }
 0x2e6   :  { %v4228_v52 = vpop.eup %4227  ;;  %v3181_v56 = vpop.f32.mrb[105].mxu0 }
 0x2e7   :  { %3340 = vst.msk [vmem:[%s5652_s3 + $0x188] sm:$0xff] %vm3290_vm0, %v4228_v52  ;;  %v2604_v57 = vpop.f32.mrb[106].mxu1  ;;  %v3785_v0 = vadd.f32 %v3784_v33, %v3179_v54  ;;  %v3182_v59 = vpop.f32.mrb[106].mxu0 }
 0x2e8   :  { %v3786_v58 = vadd.f32 %v5575_v53, %v2604_v57  ;;  %v2606_v60 = vpop.f32.mrb[107].mxu1  ;;  %v3184_v61 = vpop.f32.mrb[107].mxu0 }
 0x2e9   :  { %4233 = vtanh.f32 %v3785_v0 }
 0x2ea   :  { %v3787_v62 = vadd.f32 %v3786_v58, %v3182_v59 }
 0x2eb   :  { %v4230_v63 = vpop.eup %4229 }
 0x2ec   :  { %4235 = vtanh.f32 %v3787_v62  ;;  %3341 = vst.msk [vmem:[%s5652_s3 + $0x190] sm:$0xff] %vm3290_vm0, %v4230_v63  ;;  %v2609_v1 = vpop.f32.mrb[108].mxu1 }
 0x2ed   :  { %v3788_v3 = vadd.f32 %v5575_v53, %v2609_v1  ;;  %v3187_v4 = vpop.f32.mrb[108].mxu0  ;;  %v2611_v5 = vpop.f32.mrb[109].mxu1 }
 0x2ee   :  { %v4232_v2 = vpop.eup %4231  ;;  %v3189_v6 = vpop.f32.mrb[109].mxu0 }
 0x2ef   :  { %3342 = vst.msk [vmem:[%s5652_s3 + $0x198] sm:$0xff] %vm3290_vm0, %v4232_v2  ;;  %v2612_v7 = vpop.f32.mrb[110].mxu1  ;;  %v3789_v8 = vadd.f32 %v3788_v3, %v3187_v4  ;;  %v3190_v10 = vpop.f32.mrb[110].mxu0 }
 0x2f0   :  { %v3790_v9 = vadd.f32 %v5575_v53, %v2612_v7  ;;  %v2614_v11 = vpop.f32.mrb[111].mxu1  ;;  %v3192_v12 = vpop.f32.mrb[111].mxu0 }
 0x2f1   :  { %4237 = vtanh.f32 %v3789_v8 }
 0x2f2   :  { %v3791_v13 = vadd.f32 %v3790_v9, %v3190_v10 }
 0x2f3   :  { %v4234_v14 = vpop.eup %4233 }
 0x2f4   :  { %4239 = vtanh.f32 %v3791_v13  ;;  %3343 = vst.msk [vmem:[%s5652_s3 + $0x1a0] sm:$0xff] %vm3290_vm0, %v4234_v14  ;;  %v2617_v15 = vpop.f32.mrb[112].mxu1 }
 0x2f5   :  { %v3792_v17 = vadd.f32 %v5575_v53, %v2617_v15  ;;  %v3195_v18 = vpop.f32.mrb[112].mxu0  ;;  %v2619_v19 = vpop.f32.mrb[113].mxu1 }
 0x2f6   :  { %v4236_v16 = vpop.eup %4235  ;;  %v3197_v20 = vpop.f32.mrb[113].mxu0 }
 0x2f7   :  { %3344 = vst.msk [vmem:[%s5652_s3 + $0x1a8] sm:$0xff] %vm3290_vm0, %v4236_v16  ;;  %v2620_v21 = vpop.f32.mrb[114].mxu1  ;;  %v3793_v22 = vadd.f32 %v3792_v17, %v3195_v18  ;;  %v3198_v24 = vpop.f32.mrb[114].mxu0 }
 0x2f8   :  { %v3794_v23 = vadd.f32 %v5575_v53, %v2620_v21  ;;  %v2622_v25 = vpop.f32.mrb[115].mxu1  ;;  %v3200_v26 = vpop.f32.mrb[115].mxu0 }
 0x2f9   :  { %4241 = vtanh.f32 %v3793_v22 }
 0x2fa   :  { %v3795_v27 = vadd.f32 %v3794_v23, %v3198_v24 }
 0x2fb   :  { %v4238_v28 = vpop.eup %4237 }
 0x2fc   :  { %4243 = vtanh.f32 %v3795_v27  ;;  %3345 = vst.msk [vmem:[%s5652_s3 + $0x1b0] sm:$0xff] %vm3290_vm0, %v4238_v28  ;;  %v2625_v29 = vpop.f32.mrb[116].mxu1 }
 0x2fd   :  { %v3796_v31 = vadd.f32 %v5575_v53, %v2625_v29  ;;  %v3203_v32 = vpop.f32.mrb[116].mxu0  ;;  %v2627_v34 = vpop.f32.mrb[117].mxu1 }
 0x2fe   :  { %v4240_v30 = vpop.eup %4239  ;;  %v3205_v35 = vpop.f32.mrb[117].mxu0 }
 0x2ff   :  { %3346 = vst.msk [vmem:[%s5652_s3 + $0x1b8] sm:$0xff] %vm3290_vm0, %v4240_v30  ;;  %v2628_v36 = vpop.f32.mrb[118].mxu1  ;;  %v3797_v37 = vadd.f32 %v3796_v31, %v3203_v32  ;;  %v3206_v39 = vpop.f32.mrb[118].mxu0 }
 0x300   :  { %v3798_v38 = vadd.f32 %v5575_v53, %v2628_v36  ;;  %v2630_v40 = vpop.f32.mrb[119].mxu1  ;;  %v3208_v41 = vpop.f32.mrb[119].mxu0 }
 0x301   :  { %4245 = vtanh.f32 %v3797_v37 }
 0x302   :  { %v3799_v42 = vadd.f32 %v3798_v38, %v3206_v39 }
 0x303   :  { %v4242_v43 = vpop.eup %4241 }
 0x304   :  { %4247 = vtanh.f32 %v3799_v42  ;;  %3347 = vst.msk [vmem:[%s5652_s3 + $0x1c0] sm:$0xff] %vm3290_vm0, %v4242_v43  ;;  %v2633_v44 = vpop.f32.mrb[120].mxu1 }
 0x305   :  { %v3800_v46 = vadd.f32 %v5575_v53, %v2633_v44  ;;  %v3211_v47 = vpop.f32.mrb[120].mxu0  ;;  %v2635_v48 = vpop.f32.mrb[121].mxu1 }
 0x306   :  { %v4244_v45 = vpop.eup %4243  ;;  %v3213_v49 = vpop.f32.mrb[121].mxu0 }
 0x307   :  { %3348 = vst.msk [vmem:[%s5652_s3 + $0x1c8] sm:$0xff] %vm3290_vm0, %v4244_v45  ;;  %v2636_v50 = vpop.f32.mrb[122].mxu1  ;;  %v3801_v51 = vadd.f32 %v3800_v46, %v3211_v47  ;;  %v3214_v33 = vpop.f32.mrb[122].mxu0 }
 0x308   :  { %v3802_v52 = vadd.f32 %v5575_v53, %v2636_v50  ;;  %v2638_v54 = vpop.f32.mrb[123].mxu1  ;;  %v3216_v55 = vpop.f32.mrb[123].mxu0 }
 0x309   :  { %4249 = vtanh.f32 %v3801_v51 }
 0x30a   :  { %v3803_v56 = vadd.f32 %v3802_v52, %v3214_v33 }
 0x30b   :  { %v4246_v57 = vpop.eup %4245 }
 0x30c   :  { %4251 = vtanh.f32 %v3803_v56  ;;  %3349 = vst.msk [vmem:[%s5652_s3 + $0x1d0] sm:$0xff] %vm3290_vm0, %v4246_v57  ;;  %v2641_v0 = vpop.f32.mrb[124].mxu1 }
 0x30d   :  { %v3804_v59 = vadd.f32 %v5575_v53, %v2641_v0  ;;  %v3219_v60 = vpop.f32.mrb[124].mxu0  ;;  %v2643_v61 = vpop.f32.mrb[125].mxu1 }
 0x30e   :  { %v4248_v58 = vpop.eup %4247  ;;  %v3221_v62 = vpop.f32.mrb[125].mxu0 }
 0x30f   :  { %3350 = vst.msk [vmem:[%s5652_s3 + $0x1d8] sm:$0xff] %vm3290_vm0, %v4248_v58  ;;  %v2644_v63 = vpop.f32.mrb[126].mxu1  ;;  %v3805_v1 = vadd.f32 %v3804_v59, %v3219_v60  ;;  %v3222_v3 = vpop.f32.mrb[126].mxu0 }
 0x310   :  { %v3806_v2 = vadd.f32 %v5575_v53, %v2644_v63  ;;  %v2646_v4 = vpop.f32.mrb[127].mxu1  ;;  %v3224_v5 = vpop.f32.mrb[127].mxu0 }
 0x311   :  { %4253 = vtanh.f32 %v3805_v1 }
 0x312   :  { %v3807_v6 = vadd.f32 %v3806_v2, %v3222_v3 }
 0x313   :  { %v4250_v7 = vpop.eup %4249 }
 0x314   :  { %4255 = vtanh.f32 %v3807_v6  ;;  %3351 = vst.msk [vmem:[%s5652_s3 + $0x1e0] sm:$0xff] %vm3290_vm0, %v4250_v7 }
 0x316   :  { %v4252_v8 = vpop.eup %4251 }
 0x317   :  { %3352 = vst.msk [vmem:[%s5652_s3 + $0x1e8] sm:$0xff] %vm3290_vm0, %v4252_v8 }
 0x31b   :  { %v4254_v9 = vpop.eup %4253 }
 0x31c   :  { %3353 = vst.msk [vmem:[%s5652_s3 + $0x1f0] sm:$0xff] %vm3290_vm0, %v4254_v9 }
 0x31e   :  { %v4256_v53 = vpop.eup %4255 }
 0x31f   :  { %3354 = vst.msk [vmem:[%s5652_s3 + $0x1f8] sm:$0xff] %vm3290_vm0, %v4256_v53 }

</bundles_post_ra>
